<compile_context>
chip_gen: v5e
topology: v5e:2x2
jax: 0.10.0
libtpu: 0.0.40
codegen_flags: <defaults>
</compile_context>

<pallas_src>
import functools

import jax
import jax.numpy as jnp
from jax.experimental import pallas as pl
from jax.experimental.pallas import tpu as pltpu

LRELU_SLOPE = 0.1


def _round_up(v, m):
    return ((v + m - 1) // m) * m


def _cdiv(a, b):
    return -(-a // b)


def _get_padding(k, d=1):
    return (k * d - d) // 2


# --------------------------------------------------------------------------------------
# Pallas kernel: one (batch, time-tile) block of a dilated stride-1 Conv1d with fused
# pre-LeakyReLU, bias, residual adds, output scaling and tanh epilogue.
# --------------------------------------------------------------------------------------
def _conv1d_kernel(*refs, K, dilation, halo, n_add, pre_slope, post_tanh,
                   out_scale, cout_is_one):
    x_ref, h_ref, w_ref, b_ref = refs[:4]
    add_refs = refs[4:4 + n_add]
    o_ref = refs[4 + n_add]

    t_tile = x_ref.shape[-1]

    x = x_ref[0].astype(jnp.float32)                       # (Cin, Ttile)
    if halo > 0:
        h = h_ref[0].astype(jnp.float32)                   # (Cin, Thalo)
        window = jnp.concatenate([x, h], axis=-1)          # (Cin, Ttile + Thalo)
    else:
        window = x

    if pre_slope is not None:                              # fused LeakyReLU prologue (f32 VPU)
        window = jnp.where(window >= 0, window, pre_slope * window)

    # Fold the K taps into one contraction of size K*Cin (tap-major row order).
    taps = [window[:, k * dilation:k * dilation + t_tile] for k in range(K)]
    stacked = taps[0] if K == 1 else jnp.concatenate(taps, axis=0)   # (K*Cin, Ttile)

    if cout_is_one:
        # conv_post: Cout == 1 -> VPU multiply + sublane reduce, not a 1-row MXU matmul.
        w = w_ref[...].astype(jnp.float32)                 # (K*Cin, 1)
        acc = jnp.sum(w * stacked, axis=0, keepdims=True)  # (1, Ttile)
    else:
        acc = jnp.dot(w_ref[...], stacked.astype(jnp.bfloat16),
                      preferred_element_type=jnp.float32)  # MXU bf16 x bf16 -> f32 (Cout, Ttile)

    acc = acc + b_ref[...].astype(jnp.float32)             # (Cout, 1) broadcast over lanes
    for a_ref in add_refs:                                 # fused residual / resblock-sum adds
        acc = acc + a_ref[0].astype(jnp.float32)
    if out_scale is not None:                              # fused /num_kernels
        acc = acc * out_scale
    if post_tanh:
        acc = jnp.tanh(acc)
    o_ref[0] = acc.astype(o_ref.dtype)


def conv1d_pallas(x, w, b, *, padding, dilation=1, in_len=None,
                  pre_lrelu_slope=None, post_tanh=False, adds=(),
                  out_scale=None, max_tile=512):
    """Conv1d (stride 1) on (B, Cin, T) activations.

    `x` may be physically longer than its logical length `in_len` (128-padded pipeline
    layout); only the first `in_len` samples are used.  Returns (y, out_len) where y is
    physically padded to a multiple of the time tile and only y[..., :out_len] is valid.
    """
    adds = tuple(adds)
    B, Cin, t_phys = x.shape
    if in_len is None:
        in_len = t_phys
    Cout, _, K = w.shape
    halo = dilation * (K - 1)
    out_len = in_len + 2 * padding - halo
    assert out_len > 0

    # Lane-dense time tiling; halo fetched as an extra 128-lane window of the same array.
    t_halo = max(128, _round_up(halo, 128))
    t_tile = min(max_tile, _round_up(out_len, 128))
    t_tile = max(_round_up(t_tile, t_halo), t_halo)
    nt = _cdiv(out_len, t_tile)
    ratio = t_tile // t_halo
    out_phys = nt * t_tile

    # One fused slice+pad pass builds the zero-padded input layout:
    #   [ `padding` zeros | x[:in_len] | zeros up to (nt+1)*t_tile ]
    pad_len = (nt + 1) * t_tile
    right = pad_len - in_len - padding
    assert right >= 0
    x_pad = jnp.pad(x[:, :, :in_len], ((0, 0), (0, 0), (padding, right)))

    # Weights: (Cout, Cin, K) -> (Cout, K*Cin), tap-major, bf16 for the MXU.
    w2d = jnp.transpose(w, (0, 2, 1)).reshape(Cout, K * Cin).astype(jnp.bfloat16)
    cout_is_one = (Cout == 1)
    if cout_is_one:
        w2d = w2d.reshape(K * Cin, 1)
    b2 = b.reshape(Cout, 1).astype(jnp.float32)

    # Fused-epilogue addends, normalized to the physical output length (exact blocks).
    def _fit(a):
        ap = a.shape[-1]
        if ap < out_phys:
            return jnp.pad(a, ((0, 0), (0, 0), (0, out_phys - ap)))
        if ap > out_phys:
            return a[:, :, :out_phys]
        return a
    adds = tuple(_fit(a) for a in adds)

    kern = functools.partial(
        _conv1d_kernel, K=K, dilation=dilation, halo=halo, n_add=len(adds),
        pre_slope=pre_lrelu_slope, post_tanh=post_tanh, out_scale=out_scale,
        cout_is_one=cout_is_one)

    in_specs = [
        pl.BlockSpec((1, Cin, t_tile), lambda bb, ii: (bb, 0, ii)),
        pl.BlockSpec((1, Cin, t_halo), lambda bb, ii: (bb, 0, (ii + 1) * ratio)),
        pl.BlockSpec(w2d.shape, lambda bb, ii: (0, 0)),
        pl.BlockSpec((Cout, 1), lambda bb, ii: (0, 0)),
    ]
    for _ in adds:
        in_specs.append(pl.BlockSpec((1, Cout, t_tile), lambda bb, ii: (bb, 0, ii)))

    y = pl.pallas_call(
        kern,
        grid=(B, nt),
        in_specs=in_specs,
        out_specs=pl.BlockSpec((1, Cout, t_tile), lambda bb, ii: (bb, 0, ii)),
        out_shape=jax.ShapeDtypeStruct((B, Cout, out_phys), jnp.float32),
        compiler_params=pltpu.CompilerParams(
            dimension_semantics=("parallel", "parallel"),
            vmem_limit_bytes=32 * 1024 * 1024),
    )(x_pad, x_pad, w2d, b2, *adds)
    return y, out_len


def conv_transpose1d_pallas(x, w, b, *, stride, padding, in_len=None,
                            pre_lrelu_slope=None):
    """ConvTranspose1d on (B, Cin, T); weight layout (Cin, Cout, K) like PyTorch."""
    B, Cin, t_phys = x.shape
    if in_len is None:
        in_len = t_phys
    _, Cout, K = w.shape
    s, p = stride, padding

    if s > 1 and K == 2 * s and K - s == 2 * p:
        # Polyphase: each output sub-position j in [0, s) is a 3-tap conv over raw x.
        #   y[m*s + j] = x[m-1]*W[j+p+s] (if j < s-p) + x[m]*W[j+p] + x[m+1]*W[j+p-s] (if j >= s-p)
        wt = jnp.transpose(w, (1, 0, 2))                       # (Cout, Cin, K)
        zero = jnp.zeros((Cout, Cin), w.dtype)
        phases = []
        for j in range(s):
            left = wt[:, :, j + p + s] if j < s - p else zero   # multiplies x[m-1]
            mid = wt[:, :, j + p]                                # multiplies x[m]
            right = wt[:, :, j + p - s] if j >= s - p else zero  # multiplies x[m+1]
            phases.append(jnp.stack([left, mid, right], axis=-1))  # (Cout, Cin, 3)
        w_poly = jnp.concatenate(phases, axis=0)                # (s*Cout, Cin, 3)
        b_poly = jnp.tile(b, s)                                  # (s*Cout,)
        z, z_len = conv1d_pallas(x, w_poly, b_poly, padding=1, dilation=1,
                                 in_len=in_len, pre_lrelu_slope=pre_lrelu_slope)
        z_phys = z.shape[-1]
        y = z.reshape(B, s, Cout, z_phys).transpose(0, 2, 3, 1).reshape(B, Cout, z_phys * s)
        return y, z_len * s

    # TODO(synk): general polyphase for other (K, stride, padding) combos; fall back to
    # zero-stuffing + flipped-weight Conv1d (equivalent, but wastes MXU work on zeros).
    x_sl = x[:, :, :in_len]
    t_dil = (in_len - 1) * s + 1
    x_dil = jnp.zeros((B, Cin, t_dil), x.dtype).at[:, :, ::s].set(x_sl)
    w_eq = jnp.flip(jnp.transpose(w, (1, 0, 2)), axis=2)        # (Cout, Cin, K)
    return conv1d_pallas(x_dil, w_eq, b, padding=K - 1 - p, dilation=1,
                         pre_lrelu_slope=pre_lrelu_slope)


# --------------------------------------------------------------------------------------
# Generator (parameters + forward)
# --------------------------------------------------------------------------------------
def _init_conv(key, cout, cin, k, bias=True, scale=0.01):
    kw, kb = jax.random.split(key)
    w = scale * jax.random.normal(kw, (cout, cin, k), jnp.float32)
    b = (scale * jax.random.normal(kb, (cout,), jnp.float32)
         if bias else jnp.zeros((cout,), jnp.float32))
    return {"w": w, "b": b}


def build_generator_params(key, cfg):
    # weight_norm reparameterization is folded: effective weights are drawn directly.
    counter = [0]

    def nk():
        counter[0] += 1
        return jax.random.fold_in(key, counter[0])

    uic = cfg["upsample_initial_channel"]
    params = {}
    params["conv_pre"] = _init_conv(nk(), uic, cfg["initial_channel"], 7)

    params["ups"] = []
    for i, (u, k) in enumerate(zip(cfg["upsample_rates"], cfg["upsample_kernel_sizes"])):
        cin = uic // (2 ** i)
        cout = uic // (2 ** (i + 1))
        kw, kb = jax.random.split(nk())
        params["ups"].append({
            "w": 0.01 * jax.random.normal(kw, (cin, cout, k), jnp.float32),  # ConvT layout
            "b": 0.01 * jax.random.normal(kb, (cout,), jnp.float32),
        })

    params["resblocks"] = []
    for i in range(len(cfg["upsample_rates"])):
        ch = uic // (2 ** (i + 1))
        for k, ds in zip(cfg["resblock_kernel_sizes"], cfg["resblock_dilation_sizes"]):
            convs1 = [_init_conv(nk(), ch, ch, k) for _ in ds]
            convs2 = [_init_conv(nk(), ch, ch, k) for _ in ds]
            params["resblocks"].append({"convs1": convs1, "convs2": convs2})

    ch = uic // (2 ** len(cfg["upsample_rates"]))
    params["conv_post"] = _init_conv(nk(), 1, ch, 7, bias=False)

    if cfg.get("gin_channels", 0) != 0:
        params["cond"] = _init_conv(nk(), uic, cfg["gin_channels"], 1)
    return params


def _resblock1_fused(p, x, t, k, dilations, xs_prev, final_scale):
    """ResBlock1 with the residual add, the resblock accumulation (xs += y) and the final
    /num_kernels scaling fused into the second conv of each (dilated, 1-dilated) pair."""
    # TODO(synk): fuse each (dilated conv, dilation-1 conv) pair into a single pallas_call
    # (halo recompute) to drop the intermediate xt HBM round trip.
    cur = x
    n = len(dilations)
    for m, d in enumerate(dilations):
        c1 = p["convs1"][m]
        c2 = p["convs2"][m]
        xt, _ = conv1d_pallas(cur, c1["w"], c1["b"], padding=_get_padding(k, d),
                              dilation=d, in_len=t, pre_lrelu_slope=LRELU_SLOPE)
        adds = [cur]                       # fused residual: xt + x
        scale = None
        if m == n - 1:                     # this pair produces the resblock output y_j
            if xs_prev is not None:
                adds.append(xs_prev)       # fused xs accumulation
            scale = final_scale            # fused /num_kernels on the last resblock
        cur, _ = conv1d_pallas(xt, c2["w"], c2["b"], padding=_get_padding(k, 1),
                               dilation=1, in_len=t, pre_lrelu_slope=LRELU_SLOPE,
                               adds=adds, out_scale=scale)
    return cur


def generator_forward(params, x, cfg, g=None):
    num_kernels = len(cfg["resblock_kernel_sizes"])
    num_upsamples = len(cfg["upsample_rates"])

    x, t = conv1d_pallas(x, params["conv_pre"]["w"], params["conv_pre"]["b"], padding=3)
    if g is not None:
        c, c_len = conv1d_pallas(g, params["cond"]["w"], params["cond"]["b"], padding=0)
        c = c[:, :, :c_len]
        if c_len == 1:
            x = x + c
        else:
            x = x + jnp.pad(c, ((0, 0), (0, 0), (0, x.shape[-1] - c_len)))

    for i in range(num_upsamples):
        u = cfg["upsample_rates"][i]
        k = cfg["upsample_kernel_sizes"][i]
        up = params["ups"][i]
        # leaky_relu(x, LRELU_SLOPE) is fused into the (polyphase) transposed-conv kernel.
        x, t = conv_transpose1d_pallas(x, up["w"], up["b"], stride=u,
                                       padding=(k - u) // 2, in_len=t,
                                       pre_lrelu_slope=LRELU_SLOPE)
        xs = None
        for j in range(num_kernels):
            rb = params["resblocks"][i * num_kernels + j]
            xs = _resblock1_fused(
                rb, x, t, cfg["resblock_kernel_sizes"][j],
                cfg["resblock_dilation_sizes"][j], xs,
                final_scale=(1.0 / num_kernels) if j == num_kernels - 1 else None)
        x = xs

    # TODO(synk): ResBlock2 variant not implemented (this config uses resblock='1').
    # final leaky_relu (PyTorch default slope 0.01) + conv_post + tanh, fused in-kernel.
    x, t = conv1d_pallas(x, params["conv_post"]["w"], params["conv_post"]["b"],
                         padding=3, in_len=t, pre_lrelu_slope=0.01, post_tanh=True)
    return x[:, :, :t]


# --------------------------------------------------------------------------------------
# Pure-JAX reference (mirrors the PyTorch module exactly) for correctness checking.
# --------------------------------------------------------------------------------------
def _ref_lrelu(x, slope):
    return jnp.where(x >= 0, x, slope * x)


def _ref_conv1d(x, w, b, padding, dilation=1):
    out = jax.lax.conv_general_dilated(
        x, w, window_strides=(1,), padding=[(padding, padding)],
        rhs_dilation=(dilation,), dimension_numbers=("NCH", "OIH", "NCH"))
    return out + b[None, :, None]


def _ref_conv_transpose1d(x, w, b, stride, padding):
    K = w.shape[2]
    w_eq = jnp.flip(jnp.transpose(w, (1, 0, 2)), axis=2)
    out = jax.lax.conv_general_dilated(
        x, w_eq, window_strides=(1,), padding=[(K - 1 - padding, K - 1 - padding)],
        lhs_dilation=(stride,), dimension_numbers=("NCH", "OIH", "NCH"))
    return out + b[None, :, None]


def _ref_generator(params, x, cfg, g=None):
    nk = len(cfg["resblock_kernel_sizes"])
    nu = len(cfg["upsample_rates"])
    x = _ref_conv1d(x, params["conv_pre"]["w"], params["conv_pre"]["b"], 3)
    if g is not None:
        x = x + _ref_conv1d(g, params["cond"]["w"], params["cond"]["b"], 0)
    for i in range(nu):
        u = cfg["upsample_rates"][i]
        k = cfg["upsample_kernel_sizes"][i]
        x = _ref_lrelu(x, LRELU_SLOPE)
        x = _ref_conv_transpose1d(x, params["ups"][i]["w"], params["ups"][i]["b"],
                                  u, (k - u) // 2)
        xs = None
        for j in range(nk):
            rb = params["resblocks"][i * nk + j]
            kk = cfg["resblock_kernel_sizes"][j]
            ds = cfg["resblock_dilation_sizes"][j]
            cur = x
            for m, d in enumerate(ds):
                tt = _ref_lrelu(cur, LRELU_SLOPE)
                tt = _ref_conv1d(tt, rb["convs1"][m]["w"], rb["convs1"][m]["b"],
                                 _get_padding(kk, d), d)
                tt = _ref_lrelu(tt, LRELU_SLOPE)
                tt = _ref_conv1d(tt, rb["convs2"][m]["w"], rb["convs2"][m]["b"],
                                 _get_padding(kk, 1), 1)
                cur = tt + cur
            xs = cur if xs is None else xs + cur
        x = xs / nk
    x = _ref_lrelu(x, 0.01)
    x = _ref_conv1d(x, params["conv_post"]["w"], params["conv_post"]["b"], 3)
    return jnp.tanh(x)


if __name__ == "__main__":
    cfg = dict(
        initial_channel=8,
        resblock="1",
        resblock_kernel_sizes=[3, 5],
        resblock_dilation_sizes=[[1, 3, 5], [1, 3, 5]],
        upsample_rates=[2, 2],
        upsample_initial_channel=32,
        upsample_kernel_sizes=[4, 4],
        gin_channels=0,
    )

    key = jax.random.PRNGKey(0)
    pkey, xkey = jax.random.split(key)
    params = build_generator_params(pkey, cfg)

    B, C, T = 2, cfg["initial_channel"], 16
    x = jax.random.normal(xkey, (B, C, T), jnp.float32)

    fwd = jax.jit(functools.partial(generator_forward, cfg=cfg))
    out = jax.block_until_ready(fwd(params, x))

    expected_T = T
    for u in cfg["upsample_rates"]:
        expected_T *= u
    assert out.shape == (B, 1, expected_T), out.shape
    assert bool(jnp.all(jnp.isfinite(out)))
    assert bool(jnp.all(jnp.abs(out) <= 1.0))  # tanh range

    # Cross-check against a pure-JAX reference of the PyTorch forward (f32 lax convs).
    ref = _ref_generator(params, x, cfg)
    err = float(jnp.max(jnp.abs(out - ref)))
    scale = float(jnp.max(jnp.abs(ref)))
    assert err <= 0.1 * scale + 1e-6, (err, scale)

    print("KERNEL_OK")
</pallas_src>

<mosaic_0001>
module attributes {stable_mosaic.version = 11 : i64} {
  func.func @_conv1d_kernel(%arg0: i32, %arg1: i32, %arg2: memref<1x8x128xf32, #tpu.memory_space<vmem>>, %arg3: memref<1x8x128xf32, #tpu.memory_space<vmem>>, %arg4: memref<32x56xbf16, #tpu.memory_space<vmem>>, %arg5: memref<32x1xf32, #tpu.memory_space<vmem>>, %arg6: memref<1x32x128xf32, #tpu.memory_space<vmem>>) attributes {dimension_semantics = [#tpu.dimension_semantics<parallel>, #tpu.dimension_semantics<parallel>], iteration_bounds = array<i64: 2, 1>, scalar_prefetch = 0 : i64, scratch_operands = 0 : i64, tpu.core_type = #tpu.core_type<tc>, window_params = [{transform_indices = @transform_0, window_bounds = array<i64: 1, 8, 128>}, {transform_indices = @transform_1, window_bounds = array<i64: 1, 8, 128>}, {pipeline_mode = #tpu.pipeline_mode<synchronous>, transform_indices = @transform_2, window_bounds = array<i64: 32, 56>}, {pipeline_mode = #tpu.pipeline_mode<synchronous>, transform_indices = @transform_3, window_bounds = array<i64: 32, 1>}, {transform_indices = @transform_4, window_bounds = array<i64: 1, 32, 128>}]} {
    %c0 = arith.constant 0 : index
    %c0_0 = arith.constant 0 : index
    %c0_1 = arith.constant 0 : index
    %0 = vector.load %arg2[%c0, %c0_0, %c0_1] : memref<1x8x128xf32, #tpu.memory_space<vmem>>, vector<1x8x128xf32>
    %1 = vector.shape_cast %0 : vector<1x8x128xf32> to vector<8x128xf32>
    %c0_2 = arith.constant 0 : index
    %c0_3 = arith.constant 0 : index
    %c0_4 = arith.constant 0 : index
    %2 = vector.load %arg3[%c0_2, %c0_3, %c0_4] : memref<1x8x128xf32, #tpu.memory_space<vmem>>, vector<1x8x128xf32>
    %3 = vector.shape_cast %2 : vector<1x8x128xf32> to vector<8x128xf32>
    %4 = tpu.concatenate %1, %3 in 1 : vector<8x128xf32>, vector<8x128xf32> -> vector<8x256xf32>
    %5 = vector.extract_strided_slice %4 {offsets = [0, 0], sizes = [8, 128], strides = [1, 1]} : vector<8x256xf32> to vector<8x128xf32>
    %6 = vector.extract_strided_slice %4 {offsets = [0, 1], sizes = [8, 128], strides = [1, 1]} : vector<8x256xf32> to vector<8x128xf32>
    %7 = vector.extract_strided_slice %4 {offsets = [0, 2], sizes = [8, 128], strides = [1, 1]} : vector<8x256xf32> to vector<8x128xf32>
    %8 = vector.extract_strided_slice %4 {offsets = [0, 3], sizes = [8, 128], strides = [1, 1]} : vector<8x256xf32> to vector<8x128xf32>
    %9 = vector.extract_strided_slice %4 {offsets = [0, 4], sizes = [8, 128], strides = [1, 1]} : vector<8x256xf32> to vector<8x128xf32>
    %10 = vector.extract_strided_slice %4 {offsets = [0, 5], sizes = [8, 128], strides = [1, 1]} : vector<8x256xf32> to vector<8x128xf32>
    %11 = vector.extract_strided_slice %4 {offsets = [0, 6], sizes = [8, 128], strides = [1, 1]} : vector<8x256xf32> to vector<8x128xf32>
    %12 = tpu.concatenate %5, %6, %7, %8, %9, %10, %11 in 0 : vector<8x128xf32>, vector<8x128xf32>, vector<8x128xf32>, vector<8x128xf32>, vector<8x128xf32>, vector<8x128xf32>, vector<8x128xf32> -> vector<56x128xf32>
    %c0_5 = arith.constant 0 : index
    %c0_6 = arith.constant 0 : index
    %13 = vector.load %arg4[%c0_5, %c0_6] : memref<32x56xbf16, #tpu.memory_space<vmem>>, vector<32x56xbf16>
    %14 = arith.truncf %12 : vector<56x128xf32> to vector<56x128xbf16>
    %cst = arith.constant dense<0.000000e+00> : vector<32x128xf32>
    %15 = tpu.matmul %13, %14, %cst {dimension_numbers = #tpu.dot_dimension_numbers<[1], [0], [0], [1], [0, 0, 1, 1], [], []>} : vector<32x56xbf16>, vector<56x128xbf16>, vector<32x128xf32> -> vector<32x128xf32>
    %c0_7 = arith.constant 0 : index
    %c0_8 = arith.constant 0 : index
    %16 = vector.load %arg5[%c0_7, %c0_8] : memref<32x1xf32, #tpu.memory_space<vmem>>, vector<32x1xf32>
    %17 = vector.broadcast %16 : vector<32x1xf32> to vector<32x128xf32>
    %18 = arith.addf %15, %17 : vector<32x128xf32>
    %c0_9 = arith.constant 0 : index
    %c0_10 = arith.constant 0 : index
    %c0_11 = arith.constant 0 : index
    %19 = vector.load %arg6[%c0_9, %c0_10, %c0_11] : memref<1x32x128xf32, #tpu.memory_space<vmem>>, vector<1x32x128xf32>
    %20 = vector.shape_cast %19 : vector<1x32x128xf32> to vector<32x128xf32>
    %21 = vector.shape_cast %18 : vector<32x128xf32> to vector<1x32x128xf32>
    tpu.vector_store %arg6[%c0_9, %c0_10, %c0_11], %21 {strides = array<i32>} : memref<1x32x128xf32, #tpu.memory_space<vmem>>, vector<1x32x128xf32>,
    return
  }
  func.func @transform_0(%arg0: i32, %arg1: i32) -> (i32, i32, i32) {
    %c0_i32 = arith.constant 0 : i32
    %c0_i32_0 = arith.constant 0 : i32
    return %arg0, %c0_i32, %arg1 : i32, i32, i32
  }
  func.func @transform_1(%arg0: i32, %arg1: i32) -> (i32, i32, i32) {
    %c1_i32 = arith.constant 1 : i32
    %0 = arith.addi %arg1, %c1_i32 : i32
    %c1_i32_0 = arith.constant 1 : i32
    %1 = arith.muli %0, %c1_i32_0 : i32
    %c0_i32 = arith.constant 0 : i32
    %c0_i32_1 = arith.constant 0 : i32
    return %arg0, %c0_i32, %1 : i32, i32, i32
  }
  func.func @transform_2(%arg0: i32, %arg1: i32) -> (i32, i32) {
    %c0_i32 = arith.constant 0 : i32
    %c0_i32_0 = arith.constant 0 : i32
    %c0_i32_1 = arith.constant 0 : i32
    return %c0_i32, %c0_i32_0 : i32, i32
  }
  func.func @transform_3(%arg0: i32, %arg1: i32) -> (i32, i32) {
    %c0_i32 = arith.constant 0 : i32
    %c0_i32_0 = arith.constant 0 : i32
    %c0_i32_1 = arith.constant 0 : i32
    return %c0_i32, %c0_i32_0 : i32, i32
  }
  func.func @transform_4(%arg0: i32, %arg1: i32) -> (i32, i32, i32) {
    %c0_i32 = arith.constant 0 : i32
    %c0_i32_0 = arith.constant 0 : i32
    return %arg0, %c0_i32, %arg1 : i32, i32, i32
  }
}

module attributes {stable_mosaic.version = 11 : i64} {
  func.func @_conv1d_kernel(%arg0: i32, %arg1: i32, %arg2: memref<1x32x128xf32, #tpu.memory_space<vmem>>, %arg3: memref<1x32x128xf32, #tpu.memory_space<vmem>>, %arg4: memref<32x96xbf16, #tpu.memory_space<vmem>>, %arg5: memref<32x1xf32, #tpu.memory_space<vmem>>, %arg6: memref<1x32x128xf32, #tpu.memory_space<vmem>>) attributes {dimension_semantics = [#tpu.dimension_semantics<parallel>, #tpu.dimension_semantics<parallel>], iteration_bounds = array<i64: 2, 1>, scalar_prefetch = 0 : i64, scratch_operands = 0 : i64, tpu.core_type = #tpu.core_type<tc>, window_params = [{transform_indices = @transform_0, window_bounds = array<i64: 1, 32, 128>}, {transform_indices = @transform_1, window_bounds = array<i64: 1, 32, 128>}, {pipeline_mode = #tpu.pipeline_mode<synchronous>, transform_indices = @transform_2, window_bounds = array<i64: 32, 96>}, {pipeline_mode = #tpu.pipeline_mode<synchronous>, transform_indices = @transform_3, window_bounds = array<i64: 32, 1>}, {transform_indices = @transform_4, window_bounds = array<i64: 1, 32, 128>}]} {
    %c0 = arith.constant 0 : index
    %c0_0 = arith.constant 0 : index
    %c0_1 = arith.constant 0 : index
    %0 = vector.load %arg2[%c0, %c0_0, %c0_1] : memref<1x32x128xf32, #tpu.memory_space<vmem>>, vector<1x32x128xf32>
    %1 = vector.shape_cast %0 : vector<1x32x128xf32> to vector<32x128xf32>
    %c0_2 = arith.constant 0 : index
    %c0_3 = arith.constant 0 : index
    %c0_4 = arith.constant 0 : index
    %2 = vector.load %arg3[%c0_2, %c0_3, %c0_4] : memref<1x32x128xf32, #tpu.memory_space<vmem>>, vector<1x32x128xf32>
    %3 = vector.shape_cast %2 : vector<1x32x128xf32> to vector<32x128xf32>
    %4 = tpu.concatenate %1, %3 in 1 : vector<32x128xf32>, vector<32x128xf32> -> vector<32x256xf32>
    %cst = arith.constant 0.000000e+00 : f32
    %5 = vector.broadcast %cst : f32 to vector<32x256xf32>
    %6 = arith.cmpf oge, %4, %5 : vector<32x256xf32>
    %cst_5 = arith.constant 1.000000e-01 : f32
    %7 = vector.broadcast %cst_5 : f32 to vector<32x256xf32>
    %8 = arith.mulf %7, %4 : vector<32x256xf32>
    %9 = arith.select %6, %4, %8 : vector<32x256xi1>, vector<32x256xf32>
    %10 = vector.extract_strided_slice %9 {offsets = [0, 0], sizes = [32, 128], strides = [1, 1]} : vector<32x256xf32> to vector<32x128xf32>
    %11 = vector.extract_strided_slice %9 {offsets = [0, 1], sizes = [32, 128], strides = [1, 1]} : vector<32x256xf32> to vector<32x128xf32>
    %12 = vector.extract_strided_slice %9 {offsets = [0, 2], sizes = [32, 128], strides = [1, 1]} : vector<32x256xf32> to vector<32x128xf32>
    %13 = tpu.concatenate %10, %11, %12 in 0 : vector<32x128xf32>, vector<32x128xf32>, vector<32x128xf32> -> vector<96x128xf32>
    %c0_6 = arith.constant 0 : index
    %c0_7 = arith.constant 0 : index
    %14 = vector.load %arg4[%c0_6, %c0_7] : memref<32x96xbf16, #tpu.memory_space<vmem>>, vector<32x96xbf16>
    %15 = arith.truncf %13 : vector<96x128xf32> to vector<96x128xbf16>
    %cst_8 = arith.constant dense<0.000000e+00> : vector<32x128xf32>
    %16 = tpu.matmul %14, %15, %cst_8 {dimension_numbers = #tpu.dot_dimension_numbers<[1], [0], [0], [1], [0, 0, 1, 1], [], []>} : vector<32x96xbf16>, vector<96x128xbf16>, vector<32x128xf32> -> vector<32x128xf32>
    %c0_9 = arith.constant 0 : index
    %c0_10 = arith.constant 0 : index
    %17 = vector.load %arg5[%c0_9, %c0_10] : memref<32x1xf32, #tpu.memory_space<vmem>>, vector<32x1xf32>
    %18 = vector.broadcast %17 : vector<32x1xf32> to vector<32x128xf32>
    %19 = arith.addf %16, %18 : vector<32x128xf32>
    %c0_11 = arith.constant 0 : index
    %c0_12 = arith.constant 0 : index
    %c0_13 = arith.constant 0 : index
    %20 = vector.load %arg6[%c0_11, %c0_12, %c0_13] : memref<1x32x128xf32, #tpu.memory_space<vmem>>, vector<1x32x128xf32>
    %21 = vector.shape_cast %20 : vector<1x32x128xf32> to vector<32x128xf32>
    %22 = vector.shape_cast %19 : vector<32x128xf32> to vector<1x32x128xf32>
    tpu.vector_store %arg6[%c0_11, %c0_12, %c0_13], %22 {strides = array<i32>} : memref<1x32x128xf32, #tpu.memory_space<vmem>>, vector<1x32x128xf32>,
    return
  }
  func.func @transform_0(%arg0: i32, %arg1: i32) -> (i32, i32, i32) {
    %c0_i32 = arith.constant 0 : i32
    %c0_i32_0 = arith.constant 0 : i32
    return %arg0, %c0_i32, %arg1 : i32, i32, i32
  }
  func.func @transform_1(%arg0: i32, %arg1: i32) -> (i32, i32, i32) {
    %c1_i32 = arith.constant 1 : i32
    %0 = arith.addi %arg1, %c1_i32 : i32
    %c1_i32_0 = arith.constant 1 : i32
    %1 = arith.muli %0, %c1_i32_0 : i32
    %c0_i32 = arith.constant 0 : i32
    %c0_i32_1 = arith.constant 0 : i32
    return %arg0, %c0_i32, %1 : i32, i32, i32
  }
  func.func @transform_2(%arg0: i32, %arg1: i32) -> (i32, i32) {
    %c0_i32 = arith.constant 0 : i32
    %c0_i32_0 = arith.constant 0 : i32
    %c0_i32_1 = arith.constant 0 : i32
    return %c0_i32, %c0_i32_0 : i32, i32
  }
  func.func @transform_3(%arg0: i32, %arg1: i32) -> (i32, i32) {
    %c0_i32 = arith.constant 0 : i32
    %c0_i32_0 = arith.constant 0 : i32
    %c0_i32_1 = arith.constant 0 : i32
    return %c0_i32, %c0_i32_0 : i32, i32
  }
  func.func @transform_4(%arg0: i32, %arg1: i32) -> (i32, i32, i32) {
    %c0_i32 = arith.constant 0 : i32
    %c0_i32_0 = arith.constant 0 : i32
    return %arg0, %c0_i32, %arg1 : i32, i32, i32
  }
}

module attributes {stable_mosaic.version = 11 : i64} {
  func.func @_conv1d_kernel(%arg0: i32, %arg1: i32, %arg2: memref<1x16x128xf32, #tpu.memory_space<vmem>>, %arg3: memref<1x16x128xf32, #tpu.memory_space<vmem>>, %arg4: memref<16x48xbf16, #tpu.memory_space<vmem>>, %arg5: memref<16x1xf32, #tpu.memory_space<vmem>>, %arg6: memref<1x16x128xf32, #tpu.memory_space<vmem>>) attributes {dimension_semantics = [#tpu.dimension_semantics<parallel>, #tpu.dimension_semantics<parallel>], iteration_bounds = array<i64: 2, 1>, scalar_prefetch = 0 : i64, scratch_operands = 0 : i64, tpu.core_type = #tpu.core_type<tc>, window_params = [{transform_indices = @transform_0, window_bounds = array<i64: 1, 16, 128>}, {transform_indices = @transform_1, window_bounds = array<i64: 1, 16, 128>}, {pipeline_mode = #tpu.pipeline_mode<synchronous>, transform_indices = @transform_2, window_bounds = array<i64: 16, 48>}, {pipeline_mode = #tpu.pipeline_mode<synchronous>, transform_indices = @transform_3, window_bounds = array<i64: 16, 1>}, {transform_indices = @transform_4, window_bounds = array<i64: 1, 16, 128>}]} {
    %c0 = arith.constant 0 : index
    %c0_0 = arith.constant 0 : index
    %c0_1 = arith.constant 0 : index
    %0 = vector.load %arg2[%c0, %c0_0, %c0_1] : memref<1x16x128xf32, #tpu.memory_space<vmem>>, vector<1x16x128xf32>
    %1 = vector.shape_cast %0 : vector<1x16x128xf32> to vector<16x128xf32>
    %c0_2 = arith.constant 0 : index
    %c0_3 = arith.constant 0 : index
    %c0_4 = arith.constant 0 : index
    %2 = vector.load %arg3[%c0_2, %c0_3, %c0_4] : memref<1x16x128xf32, #tpu.memory_space<vmem>>, vector<1x16x128xf32>
    %3 = vector.shape_cast %2 : vector<1x16x128xf32> to vector<16x128xf32>
    %4 = tpu.concatenate %1, %3 in 1 : vector<16x128xf32>, vector<16x128xf32> -> vector<16x256xf32>
    %cst = arith.constant 0.000000e+00 : f32
    %5 = vector.broadcast %cst : f32 to vector<16x256xf32>
    %6 = arith.cmpf oge, %4, %5 : vector<16x256xf32>
    %cst_5 = arith.constant 1.000000e-01 : f32
    %7 = vector.broadcast %cst_5 : f32 to vector<16x256xf32>
    %8 = arith.mulf %7, %4 : vector<16x256xf32>
    %9 = arith.select %6, %4, %8 : vector<16x256xi1>, vector<16x256xf32>
    %10 = vector.extract_strided_slice %9 {offsets = [0, 0], sizes = [16, 128], strides = [1, 1]} : vector<16x256xf32> to vector<16x128xf32>
    %11 = vector.extract_strided_slice %9 {offsets = [0, 1], sizes = [16, 128], strides = [1, 1]} : vector<16x256xf32> to vector<16x128xf32>
    %12 = vector.extract_strided_slice %9 {offsets = [0, 2], sizes = [16, 128], strides = [1, 1]} : vector<16x256xf32> to vector<16x128xf32>
    %13 = tpu.concatenate %10, %11, %12 in 0 : vector<16x128xf32>, vector<16x128xf32>, vector<16x128xf32> -> vector<48x128xf32>
    %c0_6 = arith.constant 0 : index
    %c0_7 = arith.constant 0 : index
    %14 = vector.load %arg4[%c0_6, %c0_7] : memref<16x48xbf16, #tpu.memory_space<vmem>>, vector<16x48xbf16>
    %15 = arith.truncf %13 : vector<48x128xf32> to vector<48x128xbf16>
    %cst_8 = arith.constant dense<0.000000e+00> : vector<16x128xf32>
    %16 = tpu.matmul %14, %15, %cst_8 {dimension_numbers = #tpu.dot_dimension_numbers<[1], [0], [0], [1], [0, 0, 1, 1], [], []>} : vector<16x48xbf16>, vector<48x128xbf16>, vector<16x128xf32> -> vector<16x128xf32>
    %c0_9 = arith.constant 0 : index
    %c0_10 = arith.constant 0 : index
    %17 = vector.load %arg5[%c0_9, %c0_10] : memref<16x1xf32, #tpu.memory_space<vmem>>, vector<16x1xf32>
    %18 = vector.broadcast %17 : vector<16x1xf32> to vector<16x128xf32>
    %19 = arith.addf %16, %18 : vector<16x128xf32>
    %c0_11 = arith.constant 0 : index
    %c0_12 = arith.constant 0 : index
    %c0_13 = arith.constant 0 : index
    %20 = vector.load %arg6[%c0_11, %c0_12, %c0_13] : memref<1x16x128xf32, #tpu.memory_space<vmem>>, vector<1x16x128xf32>
    %21 = vector.shape_cast %20 : vector<1x16x128xf32> to vector<16x128xf32>
    %22 = vector.shape_cast %19 : vector<16x128xf32> to vector<1x16x128xf32>
    tpu.vector_store %arg6[%c0_11, %c0_12, %c0_13], %22 {strides = array<i32>} : memref<1x16x128xf32, #tpu.memory_space<vmem>>, vector<1x16x128xf32>,
    return
  }
  func.func @transform_0(%arg0: i32, %arg1: i32) -> (i32, i32, i32) {
    %c0_i32 = arith.constant 0 : i32
    %c0_i32_0 = arith.constant 0 : i32
    return %arg0, %c0_i32, %arg1 : i32, i32, i32
  }
  func.func @transform_1(%arg0: i32, %arg1: i32) -> (i32, i32, i32) {
    %c1_i32 = arith.constant 1 : i32
    %0 = arith.addi %arg1, %c1_i32 : i32
    %c1_i32_0 = arith.constant 1 : i32
    %1 = arith.muli %0, %c1_i32_0 : i32
    %c0_i32 = arith.constant 0 : i32
    %c0_i32_1 = arith.constant 0 : i32
    return %arg0, %c0_i32, %1 : i32, i32, i32
  }
  func.func @transform_2(%arg0: i32, %arg1: i32) -> (i32, i32) {
    %c0_i32 = arith.constant 0 : i32
    %c0_i32_0 = arith.constant 0 : i32
    %c0_i32_1 = arith.constant 0 : i32
    return %c0_i32, %c0_i32_0 : i32, i32
  }
  func.func @transform_3(%arg0: i32, %arg1: i32) -> (i32, i32) {
    %c0_i32 = arith.constant 0 : i32
    %c0_i32_0 = arith.constant 0 : i32
    %c0_i32_1 = arith.constant 0 : i32
    return %c0_i32, %c0_i32_0 : i32, i32
  }
  func.func @transform_4(%arg0: i32, %arg1: i32) -> (i32, i32, i32) {
    %c0_i32 = arith.constant 0 : i32
    %c0_i32_0 = arith.constant 0 : i32
    return %arg0, %c0_i32, %arg1 : i32, i32, i32
  }
}

module attributes {stable_mosaic.version = 11 : i64} {
  func.func @_conv1d_kernel(%arg0: i32, %arg1: i32, %arg2: memref<1x16x128xf32, #tpu.memory_space<vmem>>, %arg3: memref<1x16x128xf32, #tpu.memory_space<vmem>>, %arg4: memref<16x48xbf16, #tpu.memory_space<vmem>>, %arg5: memref<16x1xf32, #tpu.memory_space<vmem>>, %arg6: memref<1x16x128xf32, #tpu.memory_space<vmem>>, %arg7: memref<1x16x128xf32, #tpu.memory_space<vmem>>) attributes {dimension_semantics = [#tpu.dimension_semantics<parallel>, #tpu.dimension_semantics<parallel>], iteration_bounds = array<i64: 2, 1>, scalar_prefetch = 0 : i64, scratch_operands = 0 : i64, tpu.core_type = #tpu.core_type<tc>, window_params = [{transform_indices = @transform_0, window_bounds = array<i64: 1, 16, 128>}, {transform_indices = @transform_1, window_bounds = array<i64: 1, 16, 128>}, {pipeline_mode = #tpu.pipeline_mode<synchronous>, transform_indices = @transform_2, window_bounds = array<i64: 16, 48>}, {pipeline_mode = #tpu.pipeline_mode<synchronous>, transform_indices = @transform_3, window_bounds = array<i64: 16, 1>}, {transform_indices = @transform_4, window_bounds = array<i64: 1, 16, 128>}, {transform_indices = @transform_5, window_bounds = array<i64: 1, 16, 128>}]} {
    %c0 = arith.constant 0 : index
    %c0_0 = arith.constant 0 : index
    %c0_1 = arith.constant 0 : index
    %0 = vector.load %arg2[%c0, %c0_0, %c0_1] : memref<1x16x128xf32, #tpu.memory_space<vmem>>, vector<1x16x128xf32>
    %1 = vector.shape_cast %0 : vector<1x16x128xf32> to vector<16x128xf32>
    %c0_2 = arith.constant 0 : index
    %c0_3 = arith.constant 0 : index
    %c0_4 = arith.constant 0 : index
    %2 = vector.load %arg3[%c0_2, %c0_3, %c0_4] : memref<1x16x128xf32, #tpu.memory_space<vmem>>, vector<1x16x128xf32>
    %3 = vector.shape_cast %2 : vector<1x16x128xf32> to vector<16x128xf32>
    %4 = tpu.concatenate %1, %3 in 1 : vector<16x128xf32>, vector<16x128xf32> -> vector<16x256xf32>
    %cst = arith.constant 0.000000e+00 : f32
    %5 = vector.broadcast %cst : f32 to vector<16x256xf32>
    %6 = arith.cmpf oge, %4, %5 : vector<16x256xf32>
    %cst_5 = arith.constant 1.000000e-01 : f32
    %7 = vector.broadcast %cst_5 : f32 to vector<16x256xf32>
    %8 = arith.mulf %7, %4 : vector<16x256xf32>
    %9 = arith.select %6, %4, %8 : vector<16x256xi1>, vector<16x256xf32>
    %10 = vector.extract_strided_slice %9 {offsets = [0, 0], sizes = [16, 128], strides = [1, 1]} : vector<16x256xf32> to vector<16x128xf32>
    %11 = vector.extract_strided_slice %9 {offsets = [0, 1], sizes = [16, 128], strides = [1, 1]} : vector<16x256xf32> to vector<16x128xf32>
    %12 = vector.extract_strided_slice %9 {offsets = [0, 2], sizes = [16, 128], strides = [1, 1]} : vector<16x256xf32> to vector<16x128xf32>
    %13 = tpu.concatenate %10, %11, %12 in 0 : vector<16x128xf32>, vector<16x128xf32>, vector<16x128xf32> -> vector<48x128xf32>
    %c0_6 = arith.constant 0 : index
    %c0_7 = arith.constant 0 : index
    %14 = vector.load %arg4[%c0_6, %c0_7] : memref<16x48xbf16, #tpu.memory_space<vmem>>, vector<16x48xbf16>
    %15 = arith.truncf %13 : vector<48x128xf32> to vector<48x128xbf16>
    %cst_8 = arith.constant dense<0.000000e+00> : vector<16x128xf32>
    %16 = tpu.matmul %14, %15, %cst_8 {dimension_numbers = #tpu.dot_dimension_numbers<[1], [0], [0], [1], [0, 0, 1, 1], [], []>} : vector<16x48xbf16>, vector<48x128xbf16>, vector<16x128xf32> -> vector<16x128xf32>
    %c0_9 = arith.constant 0 : index
    %c0_10 = arith.constant 0 : index
    %17 = vector.load %arg5[%c0_9, %c0_10] : memref<16x1xf32, #tpu.memory_space<vmem>>, vector<16x1xf32>
    %18 = vector.broadcast %17 : vector<16x1xf32> to vector<16x128xf32>
    %19 = arith.addf %16, %18 : vector<16x128xf32>
    %c0_11 = arith.constant 0 : index
    %c0_12 = arith.constant 0 : index
    %c0_13 = arith.constant 0 : index
    %20 = vector.load %arg6[%c0_11, %c0_12, %c0_13] : memref<1x16x128xf32, #tpu.memory_space<vmem>>, vector<1x16x128xf32>
    %21 = vector.shape_cast %20 : vector<1x16x128xf32> to vector<16x128xf32>
    %22 = arith.addf %19, %21 : vector<16x128xf32>
    %c0_14 = arith.constant 0 : index
    %c0_15 = arith.constant 0 : index
    %c0_16 = arith.constant 0 : index
    %23 = vector.load %arg7[%c0_14, %c0_15, %c0_16] : memref<1x16x128xf32, #tpu.memory_space<vmem>>, vector<1x16x128xf32>
    %24 = vector.shape_cast %23 : vector<1x16x128xf32> to vector<16x128xf32>
    %25 = vector.shape_cast %22 : vector<16x128xf32> to vector<1x16x128xf32>
    tpu.vector_store %arg7[%c0_14, %c0_15, %c0_16], %25 {strides = array<i32>} : memref<1x16x128xf32, #tpu.memory_space<vmem>>, vector<1x16x128xf32>,
    return
  }
  func.func @transform_0(%arg0: i32, %arg1: i32) -> (i32, i32, i32) {
    %c0_i32 = arith.constant 0 : i32
    %c0_i32_0 = arith.constant 0 : i32
    return %arg0, %c0_i32, %arg1 : i32, i32, i32
  }
  func.func @transform_1(%arg0: i32, %arg1: i32) -> (i32, i32, i32) {
    %c1_i32 = arith.constant 1 : i32
    %0 = arith.addi %arg1, %c1_i32 : i32
    %c1_i32_0 = arith.constant 1 : i32
    %1 = arith.muli %0, %c1_i32_0 : i32
    %c0_i32 = arith.constant 0 : i32
    %c0_i32_1 = arith.constant 0 : i32
    return %arg0, %c0_i32, %1 : i32, i32, i32
  }
  func.func @transform_2(%arg0: i32, %arg1: i32) -> (i32, i32) {
    %c0_i32 = arith.constant 0 : i32
    %c0_i32_0 = arith.constant 0 : i32
    %c0_i32_1 = arith.constant 0 : i32
    return %c0_i32, %c0_i32_0 : i32, i32
  }
  func.func @transform_3(%arg0: i32, %arg1: i32) -> (i32, i32) {
    %c0_i32 = arith.constant 0 : i32
    %c0_i32_0 = arith.constant 0 : i32
    %c0_i32_1 = arith.constant 0 : i32
    return %c0_i32, %c0_i32_0 : i32, i32
  }
  func.func @transform_4(%arg0: i32, %arg1: i32) -> (i32, i32, i32) {
    %c0_i32 = arith.constant 0 : i32
    %c0_i32_0 = arith.constant 0 : i32
    return %arg0, %c0_i32, %arg1 : i32, i32, i32
  }
  func.func @transform_5(%arg0: i32, %arg1: i32) -> (i32, i32, i32) {
    %c0_i32 = arith.constant 0 : i32
    %c0_i32_0 = arith.constant 0 : i32
    return %arg0, %c0_i32, %arg1 : i32, i32, i32
  }
}

module attributes {stable_mosaic.version = 11 : i64} {
  func.func @_conv1d_kernel(%arg0: i32, %arg1: i32, %arg2: memref<1x16x128xf32, #tpu.memory_space<vmem>>, %arg3: memref<1x16x128xf32, #tpu.memory_space<vmem>>, %arg4: memref<16x48xbf16, #tpu.memory_space<vmem>>, %arg5: memref<16x1xf32, #tpu.memory_space<vmem>>, %arg6: memref<1x16x128xf32, #tpu.memory_space<vmem>>) attributes {dimension_semantics = [#tpu.dimension_semantics<parallel>, #tpu.dimension_semantics<parallel>], iteration_bounds = array<i64: 2, 1>, scalar_prefetch = 0 : i64, scratch_operands = 0 : i64, tpu.core_type = #tpu.core_type<tc>, window_params = [{transform_indices = @transform_0, window_bounds = array<i64: 1, 16, 128>}, {transform_indices = @transform_1, window_bounds = array<i64: 1, 16, 128>}, {pipeline_mode = #tpu.pipeline_mode<synchronous>, transform_indices = @transform_2, window_bounds = array<i64: 16, 48>}, {pipeline_mode = #tpu.pipeline_mode<synchronous>, transform_indices = @transform_3, window_bounds = array<i64: 16, 1>}, {transform_indices = @transform_4, window_bounds = array<i64: 1, 16, 128>}]} {
    %c0 = arith.constant 0 : index
    %c0_0 = arith.constant 0 : index
    %c0_1 = arith.constant 0 : index
    %0 = vector.load %arg2[%c0, %c0_0, %c0_1] : memref<1x16x128xf32, #tpu.memory_space<vmem>>, vector<1x16x128xf32>
    %1 = vector.shape_cast %0 : vector<1x16x128xf32> to vector<16x128xf32>
    %c0_2 = arith.constant 0 : index
    %c0_3 = arith.constant 0 : index
    %c0_4 = arith.constant 0 : index
    %2 = vector.load %arg3[%c0_2, %c0_3, %c0_4] : memref<1x16x128xf32, #tpu.memory_space<vmem>>, vector<1x16x128xf32>
    %3 = vector.shape_cast %2 : vector<1x16x128xf32> to vector<16x128xf32>
    %4 = tpu.concatenate %1, %3 in 1 : vector<16x128xf32>, vector<16x128xf32> -> vector<16x256xf32>
    %cst = arith.constant 0.000000e+00 : f32
    %5 = vector.broadcast %cst : f32 to vector<16x256xf32>
    %6 = arith.cmpf oge, %4, %5 : vector<16x256xf32>
    %cst_5 = arith.constant 1.000000e-01 : f32
    %7 = vector.broadcast %cst_5 : f32 to vector<16x256xf32>
    %8 = arith.mulf %7, %4 : vector<16x256xf32>
    %9 = arith.select %6, %4, %8 : vector<16x256xi1>, vector<16x256xf32>
    %10 = vector.extract_strided_slice %9 {offsets = [0, 0], sizes = [16, 128], strides = [1, 1]} : vector<16x256xf32> to vector<16x128xf32>
    %11 = vector.extract_strided_slice %9 {offsets = [0, 5], sizes = [16, 128], strides = [1, 1]} : vector<16x256xf32> to vector<16x128xf32>
    %12 = vector.extract_strided_slice %9 {offsets = [0, 10], sizes = [16, 128], strides = [1, 1]} : vector<16x256xf32> to vector<16x128xf32>
    %13 = tpu.concatenate %10, %11, %12 in 0 : vector<16x128xf32>, vector<16x128xf32>, vector<16x128xf32> -> vector<48x128xf32>
    %c0_6 = arith.constant 0 : index
    %c0_7 = arith.constant 0 : index
    %14 = vector.load %arg4[%c0_6, %c0_7] : memref<16x48xbf16, #tpu.memory_space<vmem>>, vector<16x48xbf16>
    %15 = arith.truncf %13 : vector<48x128xf32> to vector<48x128xbf16>
    %cst_8 = arith.constant dense<0.000000e+00> : vector<16x128xf32>
    %16 = tpu.matmul %14, %15, %cst_8 {dimension_numbers = #tpu.dot_dimension_numbers<[1], [0], [0], [1], [0, 0, 1, 1], [], []>} : vector<16x48xbf16>, vector<48x128xbf16>, vector<16x128xf32> -> vector<16x128xf32>
    %c0_9 = arith.constant 0 : index
    %c0_10 = arith.constant 0 : index
    %17 = vector.load %arg5[%c0_9, %c0_10] : memref<16x1xf32, #tpu.memory_space<vmem>>, vector<16x1xf32>
    %18 = vector.broadcast %17 : vector<16x1xf32> to vector<16x128xf32>
    %19 = arith.addf %16, %18 : vector<16x128xf32>
    %c0_11 = arith.constant 0 : index
    %c0_12 = arith.constant 0 : index
    %c0_13 = arith.constant 0 : index
    %20 = vector.load %arg6[%c0_11, %c0_12, %c0_13] : memref<1x16x128xf32, #tpu.memory_space<vmem>>, vector<1x16x128xf32>
    %21 = vector.shape_cast %20 : vector<1x16x128xf32> to vector<16x128xf32>
    %22 = vector.shape_cast %19 : vector<16x128xf32> to vector<1x16x128xf32>
    tpu.vector_store %arg6[%c0_11, %c0_12, %c0_13], %22 {strides = array<i32>} : memref<1x16x128xf32, #tpu.memory_space<vmem>>, vector<1x16x128xf32>,
    return
  }
  func.func @transform_0(%arg0: i32, %arg1: i32) -> (i32, i32, i32) {
    %c0_i32 = arith.constant 0 : i32
    %c0_i32_0 = arith.constant 0 : i32
    return %arg0, %c0_i32, %arg1 : i32, i32, i32
  }
  func.func @transform_1(%arg0: i32, %arg1: i32) -> (i32, i32, i32) {
    %c1_i32 = arith.constant 1 : i32
    %0 = arith.addi %arg1, %c1_i32 : i32
    %c1_i32_0 = arith.constant 1 : i32
    %1 = arith.muli %0, %c1_i32_0 : i32
    %c0_i32 = arith.constant 0 : i32
    %c0_i32_1 = arith.constant 0 : i32
    return %arg0, %c0_i32, %1 : i32, i32, i32
  }
  func.func @transform_2(%arg0: i32, %arg1: i32) -> (i32, i32) {
    %c0_i32 = arith.constant 0 : i32
    %c0_i32_0 = arith.constant 0 : i32
    %c0_i32_1 = arith.constant 0 : i32
    return %c0_i32, %c0_i32_0 : i32, i32
  }
  func.func @transform_3(%arg0: i32, %arg1: i32) -> (i32, i32) {
    %c0_i32 = arith.constant 0 : i32
    %c0_i32_0 = arith.constant 0 : i32
    %c0_i32_1 = arith.constant 0 : i32
    return %c0_i32, %c0_i32_0 : i32, i32
  }
  func.func @transform_4(%arg0: i32, %arg1: i32) -> (i32, i32, i32) {
    %c0_i32 = arith.constant 0 : i32
    %c0_i32_0 = arith.constant 0 : i32
    return %arg0, %c0_i32, %arg1 : i32, i32, i32
  }
}

module attributes {stable_mosaic.version = 11 : i64} {
  func.func @_conv1d_kernel(%arg0: i32, %arg1: i32, %arg2: memref<1x16x128xf32, #tpu.memory_space<vmem>>, %arg3: memref<1x16x128xf32, #tpu.memory_space<vmem>>, %arg4: memref<16x48xbf16, #tpu.memory_space<vmem>>, %arg5: memref<16x1xf32, #tpu.memory_space<vmem>>, %arg6: memref<1x16x128xf32, #tpu.memory_space<vmem>>) attributes {dimension_semantics = [#tpu.dimension_semantics<parallel>, #tpu.dimension_semantics<parallel>], iteration_bounds = array<i64: 2, 1>, scalar_prefetch = 0 : i64, scratch_operands = 0 : i64, tpu.core_type = #tpu.core_type<tc>, window_params = [{transform_indices = @transform_0, window_bounds = array<i64: 1, 16, 128>}, {transform_indices = @transform_1, window_bounds = array<i64: 1, 16, 128>}, {pipeline_mode = #tpu.pipeline_mode<synchronous>, transform_indices = @transform_2, window_bounds = array<i64: 16, 48>}, {pipeline_mode = #tpu.pipeline_mode<synchronous>, transform_indices = @transform_3, window_bounds = array<i64: 16, 1>}, {transform_indices = @transform_4, window_bounds = array<i64: 1, 16, 128>}]} {
    %c0 = arith.constant 0 : index
    %c0_0 = arith.constant 0 : index
    %c0_1 = arith.constant 0 : index
    %0 = vector.load %arg2[%c0, %c0_0, %c0_1] : memref<1x16x128xf32, #tpu.memory_space<vmem>>, vector<1x16x128xf32>
    %1 = vector.shape_cast %0 : vector<1x16x128xf32> to vector<16x128xf32>
    %c0_2 = arith.constant 0 : index
    %c0_3 = arith.constant 0 : index
    %c0_4 = arith.constant 0 : index
    %2 = vector.load %arg3[%c0_2, %c0_3, %c0_4] : memref<1x16x128xf32, #tpu.memory_space<vmem>>, vector<1x16x128xf32>
    %3 = vector.shape_cast %2 : vector<1x16x128xf32> to vector<16x128xf32>
    %4 = tpu.concatenate %1, %3 in 1 : vector<16x128xf32>, vector<16x128xf32> -> vector<16x256xf32>
    %cst = arith.constant 0.000000e+00 : f32
    %5 = vector.broadcast %cst : f32 to vector<16x256xf32>
    %6 = arith.cmpf oge, %4, %5 : vector<16x256xf32>
    %cst_5 = arith.constant 1.000000e-01 : f32
    %7 = vector.broadcast %cst_5 : f32 to vector<16x256xf32>
    %8 = arith.mulf %7, %4 : vector<16x256xf32>
    %9 = arith.select %6, %4, %8 : vector<16x256xi1>, vector<16x256xf32>
    %10 = vector.extract_strided_slice %9 {offsets = [0, 0], sizes = [16, 128], strides = [1, 1]} : vector<16x256xf32> to vector<16x128xf32>
    %11 = vector.extract_strided_slice %9 {offsets = [0, 3], sizes = [16, 128], strides = [1, 1]} : vector<16x256xf32> to vector<16x128xf32>
    %12 = vector.extract_strided_slice %9 {offsets = [0, 6], sizes = [16, 128], strides = [1, 1]} : vector<16x256xf32> to vector<16x128xf32>
    %13 = tpu.concatenate %10, %11, %12 in 0 : vector<16x128xf32>, vector<16x128xf32>, vector<16x128xf32> -> vector<48x128xf32>
    %c0_6 = arith.constant 0 : index
    %c0_7 = arith.constant 0 : index
    %14 = vector.load %arg4[%c0_6, %c0_7] : memref<16x48xbf16, #tpu.memory_space<vmem>>, vector<16x48xbf16>
    %15 = arith.truncf %13 : vector<48x128xf32> to vector<48x128xbf16>
    %cst_8 = arith.constant dense<0.000000e+00> : vector<16x128xf32>
    %16 = tpu.matmul %14, %15, %cst_8 {dimension_numbers = #tpu.dot_dimension_numbers<[1], [0], [0], [1], [0, 0, 1, 1], [], []>} : vector<16x48xbf16>, vector<48x128xbf16>, vector<16x128xf32> -> vector<16x128xf32>
    %c0_9 = arith.constant 0 : index
    %c0_10 = arith.constant 0 : index
    %17 = vector.load %arg5[%c0_9, %c0_10] : memref<16x1xf32, #tpu.memory_space<vmem>>, vector<16x1xf32>
    %18 = vector.broadcast %17 : vector<16x1xf32> to vector<16x128xf32>
    %19 = arith.addf %16, %18 : vector<16x128xf32>
    %c0_11 = arith.constant 0 : index
    %c0_12 = arith.constant 0 : index
    %c0_13 = arith.constant 0 : index
    %20 = vector.load %arg6[%c0_11, %c0_12, %c0_13] : memref<1x16x128xf32, #tpu.memory_space<vmem>>, vector<1x16x128xf32>
    %21 = vector.shape_cast %20 : vector<1x16x128xf32> to vector<16x128xf32>
    %22 = vector.shape_cast %19 : vector<16x128xf32> to vector<1x16x128xf32>
    tpu.vector_store %arg6[%c0_11, %c0_12, %c0_13], %22 {strides = array<i32>} : memref<1x16x128xf32, #tpu.memory_space<vmem>>, vector<1x16x128xf32>,
    return
  }
  func.func @transform_0(%arg0: i32, %arg1: i32) -> (i32, i32, i32) {
    %c0_i32 = arith.constant 0 : i32
    %c0_i32_0 = arith.constant 0 : i32
    return %arg0, %c0_i32, %arg1 : i32, i32, i32
  }
  func.func @transform_1(%arg0: i32, %arg1: i32) -> (i32, i32, i32) {
    %c1_i32 = arith.constant 1 : i32
    %0 = arith.addi %arg1, %c1_i32 : i32
    %c1_i32_0 = arith.constant 1 : i32
    %1 = arith.muli %0, %c1_i32_0 : i32
    %c0_i32 = arith.constant 0 : i32
    %c0_i32_1 = arith.constant 0 : i32
    return %arg0, %c0_i32, %1 : i32, i32, i32
  }
  func.func @transform_2(%arg0: i32, %arg1: i32) -> (i32, i32) {
    %c0_i32 = arith.constant 0 : i32
    %c0_i32_0 = arith.constant 0 : i32
    %c0_i32_1 = arith.constant 0 : i32
    return %c0_i32, %c0_i32_0 : i32, i32
  }
  func.func @transform_3(%arg0: i32, %arg1: i32) -> (i32, i32) {
    %c0_i32 = arith.constant 0 : i32
    %c0_i32_0 = arith.constant 0 : i32
    %c0_i32_1 = arith.constant 0 : i32
    return %c0_i32, %c0_i32_0 : i32, i32
  }
  func.func @transform_4(%arg0: i32, %arg1: i32) -> (i32, i32, i32) {
    %c0_i32 = arith.constant 0 : i32
    %c0_i32_0 = arith.constant 0 : i32
    return %arg0, %c0_i32, %arg1 : i32, i32, i32
  }
}

module attributes {stable_mosaic.version = 11 : i64} {
  func.func @_conv1d_kernel(%arg0: i32, %arg1: i32, %arg2: memref<1x16x128xf32, #tpu.memory_space<vmem>>, %arg3: memref<1x16x128xf32, #tpu.memory_space<vmem>>, %arg4: memref<16x80xbf16, #tpu.memory_space<vmem>>, %arg5: memref<16x1xf32, #tpu.memory_space<vmem>>, %arg6: memref<1x16x128xf32, #tpu.memory_space<vmem>>) attributes {dimension_semantics = [#tpu.dimension_semantics<parallel>, #tpu.dimension_semantics<parallel>], iteration_bounds = array<i64: 2, 1>, scalar_prefetch = 0 : i64, scratch_operands = 0 : i64, tpu.core_type = #tpu.core_type<tc>, window_params = [{transform_indices = @transform_0, window_bounds = array<i64: 1, 16, 128>}, {transform_indices = @transform_1, window_bounds = array<i64: 1, 16, 128>}, {pipeline_mode = #tpu.pipeline_mode<synchronous>, transform_indices = @transform_2, window_bounds = array<i64: 16, 80>}, {pipeline_mode = #tpu.pipeline_mode<synchronous>, transform_indices = @transform_3, window_bounds = array<i64: 16, 1>}, {transform_indices = @transform_4, window_bounds = array<i64: 1, 16, 128>}]} {
    %c0 = arith.constant 0 : index
    %c0_0 = arith.constant 0 : index
    %c0_1 = arith.constant 0 : index
    %0 = vector.load %arg2[%c0, %c0_0, %c0_1] : memref<1x16x128xf32, #tpu.memory_space<vmem>>, vector<1x16x128xf32>
    %1 = vector.shape_cast %0 : vector<1x16x128xf32> to vector<16x128xf32>
    %c0_2 = arith.constant 0 : index
    %c0_3 = arith.constant 0 : index
    %c0_4 = arith.constant 0 : index
    %2 = vector.load %arg3[%c0_2, %c0_3, %c0_4] : memref<1x16x128xf32, #tpu.memory_space<vmem>>, vector<1x16x128xf32>
    %3 = vector.shape_cast %2 : vector<1x16x128xf32> to vector<16x128xf32>
    %4 = tpu.concatenate %1, %3 in 1 : vector<16x128xf32>, vector<16x128xf32> -> vector<16x256xf32>
    %cst = arith.constant 0.000000e+00 : f32
    %5 = vector.broadcast %cst : f32 to vector<16x256xf32>
    %6 = arith.cmpf oge, %4, %5 : vector<16x256xf32>
    %cst_5 = arith.constant 1.000000e-01 : f32
    %7 = vector.broadcast %cst_5 : f32 to vector<16x256xf32>
    %8 = arith.mulf %7, %4 : vector<16x256xf32>
    %9 = arith.select %6, %4, %8 : vector<16x256xi1>, vector<16x256xf32>
    %10 = vector.extract_strided_slice %9 {offsets = [0, 0], sizes = [16, 128], strides = [1, 1]} : vector<16x256xf32> to vector<16x128xf32>
    %11 = vector.extract_strided_slice %9 {offsets = [0, 1], sizes = [16, 128], strides = [1, 1]} : vector<16x256xf32> to vector<16x128xf32>
    %12 = vector.extract_strided_slice %9 {offsets = [0, 2], sizes = [16, 128], strides = [1, 1]} : vector<16x256xf32> to vector<16x128xf32>
    %13 = vector.extract_strided_slice %9 {offsets = [0, 3], sizes = [16, 128], strides = [1, 1]} : vector<16x256xf32> to vector<16x128xf32>
    %14 = vector.extract_strided_slice %9 {offsets = [0, 4], sizes = [16, 128], strides = [1, 1]} : vector<16x256xf32> to vector<16x128xf32>
    %15 = tpu.concatenate %10, %11, %12, %13, %14 in 0 : vector<16x128xf32>, vector<16x128xf32>, vector<16x128xf32>, vector<16x128xf32>, vector<16x128xf32> -> vector<80x128xf32>
    %c0_6 = arith.constant 0 : index
    %c0_7 = arith.constant 0 : index
    %16 = vector.load %arg4[%c0_6, %c0_7] : memref<16x80xbf16, #tpu.memory_space<vmem>>, vector<16x80xbf16>
    %17 = arith.truncf %15 : vector<80x128xf32> to vector<80x128xbf16>
    %cst_8 = arith.constant dense<0.000000e+00> : vector<16x128xf32>
    %18 = tpu.matmul %16, %17, %cst_8 {dimension_numbers = #tpu.dot_dimension_numbers<[1], [0], [0], [1], [0, 0, 1, 1], [], []>} : vector<16x80xbf16>, vector<80x128xbf16>, vector<16x128xf32> -> vector<16x128xf32>
    %c0_9 = arith.constant 0 : index
    %c0_10 = arith.constant 0 : index
    %19 = vector.load %arg5[%c0_9, %c0_10] : memref<16x1xf32, #tpu.memory_space<vmem>>, vector<16x1xf32>
    %20 = vector.broadcast %19 : vector<16x1xf32> to vector<16x128xf32>
    %21 = arith.addf %18, %20 : vector<16x128xf32>
    %c0_11 = arith.constant 0 : index
    %c0_12 = arith.constant 0 : index
    %c0_13 = arith.constant 0 : index
    %22 = vector.load %arg6[%c0_11, %c0_12, %c0_13] : memref<1x16x128xf32, #tpu.memory_space<vmem>>, vector<1x16x128xf32>
    %23 = vector.shape_cast %22 : vector<1x16x128xf32> to vector<16x128xf32>
    %24 = vector.shape_cast %21 : vector<16x128xf32> to vector<1x16x128xf32>
    tpu.vector_store %arg6[%c0_11, %c0_12, %c0_13], %24 {strides = array<i32>} : memref<1x16x128xf32, #tpu.memory_space<vmem>>, vector<1x16x128xf32>,
    return
  }
  func.func @transform_0(%arg0: i32, %arg1: i32) -> (i32, i32, i32) {
    %c0_i32 = arith.constant 0 : i32
    %c0_i32_0 = arith.constant 0 : i32
    return %arg0, %c0_i32, %arg1 : i32, i32, i32
  }
  func.func @transform_1(%arg0: i32, %arg1: i32) -> (i32, i32, i32) {
    %c1_i32 = arith.constant 1 : i32
    %0 = arith.addi %arg1, %c1_i32 : i32
    %c1_i32_0 = arith.constant 1 : i32
    %1 = arith.muli %0, %c1_i32_0 : i32
    %c0_i32 = arith.constant 0 : i32
    %c0_i32_1 = arith.constant 0 : i32
    return %arg0, %c0_i32, %1 : i32, i32, i32
  }
  func.func @transform_2(%arg0: i32, %arg1: i32) -> (i32, i32) {
    %c0_i32 = arith.constant 0 : i32
    %c0_i32_0 = arith.constant 0 : i32
    %c0_i32_1 = arith.constant 0 : i32
    return %c0_i32, %c0_i32_0 : i32, i32
  }
  func.func @transform_3(%arg0: i32, %arg1: i32) -> (i32, i32) {
    %c0_i32 = arith.constant 0 : i32
    %c0_i32_0 = arith.constant 0 : i32
    %c0_i32_1 = arith.constant 0 : i32
    return %c0_i32, %c0_i32_0 : i32, i32
  }
  func.func @transform_4(%arg0: i32, %arg1: i32) -> (i32, i32, i32) {
    %c0_i32 = arith.constant 0 : i32
    %c0_i32_0 = arith.constant 0 : i32
    return %arg0, %c0_i32, %arg1 : i32, i32, i32
  }
}

module attributes {stable_mosaic.version = 11 : i64} {
  func.func @_conv1d_kernel(%arg0: i32, %arg1: i32, %arg2: memref<1x16x128xf32, #tpu.memory_space<vmem>>, %arg3: memref<1x16x128xf32, #tpu.memory_space<vmem>>, %arg4: memref<16x80xbf16, #tpu.memory_space<vmem>>, %arg5: memref<16x1xf32, #tpu.memory_space<vmem>>, %arg6: memref<1x16x128xf32, #tpu.memory_space<vmem>>) attributes {dimension_semantics = [#tpu.dimension_semantics<parallel>, #tpu.dimension_semantics<parallel>], iteration_bounds = array<i64: 2, 1>, scalar_prefetch = 0 : i64, scratch_operands = 0 : i64, tpu.core_type = #tpu.core_type<tc>, window_params = [{transform_indices = @transform_0, window_bounds = array<i64: 1, 16, 128>}, {transform_indices = @transform_1, window_bounds = array<i64: 1, 16, 128>}, {pipeline_mode = #tpu.pipeline_mode<synchronous>, transform_indices = @transform_2, window_bounds = array<i64: 16, 80>}, {pipeline_mode = #tpu.pipeline_mode<synchronous>, transform_indices = @transform_3, window_bounds = array<i64: 16, 1>}, {transform_indices = @transform_4, window_bounds = array<i64: 1, 16, 128>}]} {
    %c0 = arith.constant 0 : index
    %c0_0 = arith.constant 0 : index
    %c0_1 = arith.constant 0 : index
    %0 = vector.load %arg2[%c0, %c0_0, %c0_1] : memref<1x16x128xf32, #tpu.memory_space<vmem>>, vector<1x16x128xf32>
    %1 = vector.shape_cast %0 : vector<1x16x128xf32> to vector<16x128xf32>
    %c0_2 = arith.constant 0 : index
    %c0_3 = arith.constant 0 : index
    %c0_4 = arith.constant 0 : index
    %2 = vector.load %arg3[%c0_2, %c0_3, %c0_4] : memref<1x16x128xf32, #tpu.memory_space<vmem>>, vector<1x16x128xf32>
    %3 = vector.shape_cast %2 : vector<1x16x128xf32> to vector<16x128xf32>
    %4 = tpu.concatenate %1, %3 in 1 : vector<16x128xf32>, vector<16x128xf32> -> vector<16x256xf32>
    %cst = arith.constant 0.000000e+00 : f32
    %5 = vector.broadcast %cst : f32 to vector<16x256xf32>
    %6 = arith.cmpf oge, %4, %5 : vector<16x256xf32>
    %cst_5 = arith.constant 1.000000e-01 : f32
    %7 = vector.broadcast %cst_5 : f32 to vector<16x256xf32>
    %8 = arith.mulf %7, %4 : vector<16x256xf32>
    %9 = arith.select %6, %4, %8 : vector<16x256xi1>, vector<16x256xf32>
    %10 = vector.extract_strided_slice %9 {offsets = [0, 0], sizes = [16, 128], strides = [1, 1]} : vector<16x256xf32> to vector<16x128xf32>
    %11 = vector.extract_strided_slice %9 {offsets = [0, 3], sizes = [16, 128], strides = [1, 1]} : vector<16x256xf32> to vector<16x128xf32>
    %12 = vector.extract_strided_slice %9 {offsets = [0, 6], sizes = [16, 128], strides = [1, 1]} : vector<16x256xf32> to vector<16x128xf32>
    %13 = vector.extract_strided_slice %9 {offsets = [0, 9], sizes = [16, 128], strides = [1, 1]} : vector<16x256xf32> to vector<16x128xf32>
    %14 = vector.extract_strided_slice %9 {offsets = [0, 12], sizes = [16, 128], strides = [1, 1]} : vector<16x256xf32> to vector<16x128xf32>
    %15 = tpu.concatenate %10, %11, %12, %13, %14 in 0 : vector<16x128xf32>, vector<16x128xf32>, vector<16x128xf32>, vector<16x128xf32>, vector<16x128xf32> -> vector<80x128xf32>
    %c0_6 = arith.constant 0 : index
    %c0_7 = arith.constant 0 : index
    %16 = vector.load %arg4[%c0_6, %c0_7] : memref<16x80xbf16, #tpu.memory_space<vmem>>, vector<16x80xbf16>
    %17 = arith.truncf %15 : vector<80x128xf32> to vector<80x128xbf16>
    %cst_8 = arith.constant dense<0.000000e+00> : vector<16x128xf32>
    %18 = tpu.matmul %16, %17, %cst_8 {dimension_numbers = #tpu.dot_dimension_numbers<[1], [0], [0], [1], [0, 0, 1, 1], [], []>} : vector<16x80xbf16>, vector<80x128xbf16>, vector<16x128xf32> -> vector<16x128xf32>
    %c0_9 = arith.constant 0 : index
    %c0_10 = arith.constant 0 : index
    %19 = vector.load %arg5[%c0_9, %c0_10] : memref<16x1xf32, #tpu.memory_space<vmem>>, vector<16x1xf32>
    %20 = vector.broadcast %19 : vector<16x1xf32> to vector<16x128xf32>
    %21 = arith.addf %18, %20 : vector<16x128xf32>
    %c0_11 = arith.constant 0 : index
    %c0_12 = arith.constant 0 : index
    %c0_13 = arith.constant 0 : index
    %22 = vector.load %arg6[%c0_11, %c0_12, %c0_13] : memref<1x16x128xf32, #tpu.memory_space<vmem>>, vector<1x16x128xf32>
    %23 = vector.shape_cast %22 : vector<1x16x128xf32> to vector<16x128xf32>
    %24 = vector.shape_cast %21 : vector<16x128xf32> to vector<1x16x128xf32>
    tpu.vector_store %arg6[%c0_11, %c0_12, %c0_13], %24 {strides = array<i32>} : memref<1x16x128xf32, #tpu.memory_space<vmem>>, vector<1x16x128xf32>,
    return
  }
  func.func @transform_0(%arg0: i32, %arg1: i32) -> (i32, i32, i32) {
    %c0_i32 = arith.constant 0 : i32
    %c0_i32_0 = arith.constant 0 : i32
    return %arg0, %c0_i32, %arg1 : i32, i32, i32
  }
  func.func @transform_1(%arg0: i32, %arg1: i32) -> (i32, i32, i32) {
    %c1_i32 = arith.constant 1 : i32
    %0 = arith.addi %arg1, %c1_i32 : i32
    %c1_i32_0 = arith.constant 1 : i32
    %1 = arith.muli %0, %c1_i32_0 : i32
    %c0_i32 = arith.constant 0 : i32
    %c0_i32_1 = arith.constant 0 : i32
    return %arg0, %c0_i32, %1 : i32, i32, i32
  }
  func.func @transform_2(%arg0: i32, %arg1: i32) -> (i32, i32) {
    %c0_i32 = arith.constant 0 : i32
    %c0_i32_0 = arith.constant 0 : i32
    %c0_i32_1 = arith.constant 0 : i32
    return %c0_i32, %c0_i32_0 : i32, i32
  }
  func.func @transform_3(%arg0: i32, %arg1: i32) -> (i32, i32) {
    %c0_i32 = arith.constant 0 : i32
    %c0_i32_0 = arith.constant 0 : i32
    %c0_i32_1 = arith.constant 0 : i32
    return %c0_i32, %c0_i32_0 : i32, i32
  }
  func.func @transform_4(%arg0: i32, %arg1: i32) -> (i32, i32, i32) {
    %c0_i32 = arith.constant 0 : i32
    %c0_i32_0 = arith.constant 0 : i32
    return %arg0, %c0_i32, %arg1 : i32, i32, i32
  }
}

module attributes {stable_mosaic.version = 11 : i64} {
  func.func @_conv1d_kernel(%arg0: i32, %arg1: i32, %arg2: memref<1x16x128xf32, #tpu.memory_space<vmem>>, %arg3: memref<1x16x128xf32, #tpu.memory_space<vmem>>, %arg4: memref<16x80xbf16, #tpu.memory_space<vmem>>, %arg5: memref<16x1xf32, #tpu.memory_space<vmem>>, %arg6: memref<1x16x128xf32, #tpu.memory_space<vmem>>, %arg7: memref<1x16x128xf32, #tpu.memory_space<vmem>>) attributes {dimension_semantics = [#tpu.dimension_semantics<parallel>, #tpu.dimension_semantics<parallel>], iteration_bounds = array<i64: 2, 1>, scalar_prefetch = 0 : i64, scratch_operands = 0 : i64, tpu.core_type = #tpu.core_type<tc>, window_params = [{transform_indices = @transform_0, window_bounds = array<i64: 1, 16, 128>}, {transform_indices = @transform_1, window_bounds = array<i64: 1, 16, 128>}, {pipeline_mode = #tpu.pipeline_mode<synchronous>, transform_indices = @transform_2, window_bounds = array<i64: 16, 80>}, {pipeline_mode = #tpu.pipeline_mode<synchronous>, transform_indices = @transform_3, window_bounds = array<i64: 16, 1>}, {transform_indices = @transform_4, window_bounds = array<i64: 1, 16, 128>}, {transform_indices = @transform_5, window_bounds = array<i64: 1, 16, 128>}]} {
    %c0 = arith.constant 0 : index
    %c0_0 = arith.constant 0 : index
    %c0_1 = arith.constant 0 : index
    %0 = vector.load %arg2[%c0, %c0_0, %c0_1] : memref<1x16x128xf32, #tpu.memory_space<vmem>>, vector<1x16x128xf32>
    %1 = vector.shape_cast %0 : vector<1x16x128xf32> to vector<16x128xf32>
    %c0_2 = arith.constant 0 : index
    %c0_3 = arith.constant 0 : index
    %c0_4 = arith.constant 0 : index
    %2 = vector.load %arg3[%c0_2, %c0_3, %c0_4] : memref<1x16x128xf32, #tpu.memory_space<vmem>>, vector<1x16x128xf32>
    %3 = vector.shape_cast %2 : vector<1x16x128xf32> to vector<16x128xf32>
    %4 = tpu.concatenate %1, %3 in 1 : vector<16x128xf32>, vector<16x128xf32> -> vector<16x256xf32>
    %cst = arith.constant 0.000000e+00 : f32
    %5 = vector.broadcast %cst : f32 to vector<16x256xf32>
    %6 = arith.cmpf oge, %4, %5 : vector<16x256xf32>
    %cst_5 = arith.constant 1.000000e-01 : f32
    %7 = vector.broadcast %cst_5 : f32 to vector<16x256xf32>
    %8 = arith.mulf %7, %4 : vector<16x256xf32>
    %9 = arith.select %6, %4, %8 : vector<16x256xi1>, vector<16x256xf32>
    %10 = vector.extract_strided_slice %9 {offsets = [0, 0], sizes = [16, 128], strides = [1, 1]} : vector<16x256xf32> to vector<16x128xf32>
    %11 = vector.extract_strided_slice %9 {offsets = [0, 1], sizes = [16, 128], strides = [1, 1]} : vector<16x256xf32> to vector<16x128xf32>
    %12 = vector.extract_strided_slice %9 {offsets = [0, 2], sizes = [16, 128], strides = [1, 1]} : vector<16x256xf32> to vector<16x128xf32>
    %13 = vector.extract_strided_slice %9 {offsets = [0, 3], sizes = [16, 128], strides = [1, 1]} : vector<16x256xf32> to vector<16x128xf32>
    %14 = vector.extract_strided_slice %9 {offsets = [0, 4], sizes = [16, 128], strides = [1, 1]} : vector<16x256xf32> to vector<16x128xf32>
    %15 = tpu.concatenate %10, %11, %12, %13, %14 in 0 : vector<16x128xf32>, vector<16x128xf32>, vector<16x128xf32>, vector<16x128xf32>, vector<16x128xf32> -> vector<80x128xf32>
    %c0_6 = arith.constant 0 : index
    %c0_7 = arith.constant 0 : index
    %16 = vector.load %arg4[%c0_6, %c0_7] : memref<16x80xbf16, #tpu.memory_space<vmem>>, vector<16x80xbf16>
    %17 = arith.truncf %15 : vector<80x128xf32> to vector<80x128xbf16>
    %cst_8 = arith.constant dense<0.000000e+00> : vector<16x128xf32>
    %18 = tpu.matmul %16, %17, %cst_8 {dimension_numbers = #tpu.dot_dimension_numbers<[1], [0], [0], [1], [0, 0, 1, 1], [], []>} : vector<16x80xbf16>, vector<80x128xbf16>, vector<16x128xf32> -> vector<16x128xf32>
    %c0_9 = arith.constant 0 : index
    %c0_10 = arith.constant 0 : index
    %19 = vector.load %arg5[%c0_9, %c0_10] : memref<16x1xf32, #tpu.memory_space<vmem>>, vector<16x1xf32>
    %20 = vector.broadcast %19 : vector<16x1xf32> to vector<16x128xf32>
    %21 = arith.addf %18, %20 : vector<16x128xf32>
    %c0_11 = arith.constant 0 : index
    %c0_12 = arith.constant 0 : index
    %c0_13 = arith.constant 0 : index
    %22 = vector.load %arg6[%c0_11, %c0_12, %c0_13] : memref<1x16x128xf32, #tpu.memory_space<vmem>>, vector<1x16x128xf32>
    %23 = vector.shape_cast %22 : vector<1x16x128xf32> to vector<16x128xf32>
    %24 = arith.addf %21, %23 : vector<16x128xf32>
    %c0_14 = arith.constant 0 : index
    %c0_15 = arith.constant 0 : index
    %c0_16 = arith.constant 0 : index
    %25 = vector.load %arg7[%c0_14, %c0_15, %c0_16] : memref<1x16x128xf32, #tpu.memory_space<vmem>>, vector<1x16x128xf32>
    %26 = vector.shape_cast %25 : vector<1x16x128xf32> to vector<16x128xf32>
    %27 = vector.shape_cast %24 : vector<16x128xf32> to vector<1x16x128xf32>
    tpu.vector_store %arg7[%c0_14, %c0_15, %c0_16], %27 {strides = array<i32>} : memref<1x16x128xf32, #tpu.memory_space<vmem>>, vector<1x16x128xf32>,
    return
  }
  func.func @transform_0(%arg0: i32, %arg1: i32) -> (i32, i32, i32) {
    %c0_i32 = arith.constant 0 : i32
    %c0_i32_0 = arith.constant 0 : i32
    return %arg0, %c0_i32, %arg1 : i32, i32, i32
  }
  func.func @transform_1(%arg0: i32, %arg1: i32) -> (i32, i32, i32) {
    %c1_i32 = arith.constant 1 : i32
    %0 = arith.addi %arg1, %c1_i32 : i32
    %c1_i32_0 = arith.constant 1 : i32
    %1 = arith.muli %0, %c1_i32_0 : i32
    %c0_i32 = arith.constant 0 : i32
    %c0_i32_1 = arith.constant 0 : i32
    return %arg0, %c0_i32, %1 : i32, i32, i32
  }
  func.func @transform_2(%arg0: i32, %arg1: i32) -> (i32, i32) {
    %c0_i32 = arith.constant 0 : i32
    %c0_i32_0 = arith.constant 0 : i32
    %c0_i32_1 = arith.constant 0 : i32
    return %c0_i32, %c0_i32_0 : i32, i32
  }
  func.func @transform_3(%arg0: i32, %arg1: i32) -> (i32, i32) {
    %c0_i32 = arith.constant 0 : i32
    %c0_i32_0 = arith.constant 0 : i32
    %c0_i32_1 = arith.constant 0 : i32
    return %c0_i32, %c0_i32_0 : i32, i32
  }
  func.func @transform_4(%arg0: i32, %arg1: i32) -> (i32, i32, i32) {
    %c0_i32 = arith.constant 0 : i32
    %c0_i32_0 = arith.constant 0 : i32
    return %arg0, %c0_i32, %arg1 : i32, i32, i32
  }
  func.func @transform_5(%arg0: i32, %arg1: i32) -> (i32, i32, i32) {
    %c0_i32 = arith.constant 0 : i32
    %c0_i32_0 = arith.constant 0 : i32
    return %arg0, %c0_i32, %arg1 : i32, i32, i32
  }
}

module attributes {stable_mosaic.version = 11 : i64} {
  func.func @_conv1d_kernel(%arg0: i32, %arg1: i32, %arg2: memref<1x16x128xf32, #tpu.memory_space<vmem>>, %arg3: memref<1x16x128xf32, #tpu.memory_space<vmem>>, %arg4: memref<16x80xbf16, #tpu.memory_space<vmem>>, %arg5: memref<16x1xf32, #tpu.memory_space<vmem>>, %arg6: memref<1x16x128xf32, #tpu.memory_space<vmem>>) attributes {dimension_semantics = [#tpu.dimension_semantics<parallel>, #tpu.dimension_semantics<parallel>], iteration_bounds = array<i64: 2, 1>, scalar_prefetch = 0 : i64, scratch_operands = 0 : i64, tpu.core_type = #tpu.core_type<tc>, window_params = [{transform_indices = @transform_0, window_bounds = array<i64: 1, 16, 128>}, {transform_indices = @transform_1, window_bounds = array<i64: 1, 16, 128>}, {pipeline_mode = #tpu.pipeline_mode<synchronous>, transform_indices = @transform_2, window_bounds = array<i64: 16, 80>}, {pipeline_mode = #tpu.pipeline_mode<synchronous>, transform_indices = @transform_3, window_bounds = array<i64: 16, 1>}, {transform_indices = @transform_4, window_bounds = array<i64: 1, 16, 128>}]} {
    %c0 = arith.constant 0 : index
    %c0_0 = arith.constant 0 : index
    %c0_1 = arith.constant 0 : index
    %0 = vector.load %arg2[%c0, %c0_0, %c0_1] : memref<1x16x128xf32, #tpu.memory_space<vmem>>, vector<1x16x128xf32>
    %1 = vector.shape_cast %0 : vector<1x16x128xf32> to vector<16x128xf32>
    %c0_2 = arith.constant 0 : index
    %c0_3 = arith.constant 0 : index
    %c0_4 = arith.constant 0 : index
    %2 = vector.load %arg3[%c0_2, %c0_3, %c0_4] : memref<1x16x128xf32, #tpu.memory_space<vmem>>, vector<1x16x128xf32>
    %3 = vector.shape_cast %2 : vector<1x16x128xf32> to vector<16x128xf32>
    %4 = tpu.concatenate %1, %3 in 1 : vector<16x128xf32>, vector<16x128xf32> -> vector<16x256xf32>
    %cst = arith.constant 0.000000e+00 : f32
    %5 = vector.broadcast %cst : f32 to vector<16x256xf32>
    %6 = arith.cmpf oge, %4, %5 : vector<16x256xf32>
    %cst_5 = arith.constant 1.000000e-01 : f32
    %7 = vector.broadcast %cst_5 : f32 to vector<16x256xf32>
    %8 = arith.mulf %7, %4 : vector<16x256xf32>
    %9 = arith.select %6, %4, %8 : vector<16x256xi1>, vector<16x256xf32>
    %10 = vector.extract_strided_slice %9 {offsets = [0, 0], sizes = [16, 128], strides = [1, 1]} : vector<16x256xf32> to vector<16x128xf32>
    %11 = vector.extract_strided_slice %9 {offsets = [0, 5], sizes = [16, 128], strides = [1, 1]} : vector<16x256xf32> to vector<16x128xf32>
    %12 = vector.extract_strided_slice %9 {offsets = [0, 10], sizes = [16, 128], strides = [1, 1]} : vector<16x256xf32> to vector<16x128xf32>
    %13 = vector.extract_strided_slice %9 {offsets = [0, 15], sizes = [16, 128], strides = [1, 1]} : vector<16x256xf32> to vector<16x128xf32>
    %14 = vector.extract_strided_slice %9 {offsets = [0, 20], sizes = [16, 128], strides = [1, 1]} : vector<16x256xf32> to vector<16x128xf32>
    %15 = tpu.concatenate %10, %11, %12, %13, %14 in 0 : vector<16x128xf32>, vector<16x128xf32>, vector<16x128xf32>, vector<16x128xf32>, vector<16x128xf32> -> vector<80x128xf32>
    %c0_6 = arith.constant 0 : index
    %c0_7 = arith.constant 0 : index
    %16 = vector.load %arg4[%c0_6, %c0_7] : memref<16x80xbf16, #tpu.memory_space<vmem>>, vector<16x80xbf16>
    %17 = arith.truncf %15 : vector<80x128xf32> to vector<80x128xbf16>
    %cst_8 = arith.constant dense<0.000000e+00> : vector<16x128xf32>
    %18 = tpu.matmul %16, %17, %cst_8 {dimension_numbers = #tpu.dot_dimension_numbers<[1], [0], [0], [1], [0, 0, 1, 1], [], []>} : vector<16x80xbf16>, vector<80x128xbf16>, vector<16x128xf32> -> vector<16x128xf32>
    %c0_9 = arith.constant 0 : index
    %c0_10 = arith.constant 0 : index
    %19 = vector.load %arg5[%c0_9, %c0_10] : memref<16x1xf32, #tpu.memory_space<vmem>>, vector<16x1xf32>
    %20 = vector.broadcast %19 : vector<16x1xf32> to vector<16x128xf32>
    %21 = arith.addf %18, %20 : vector<16x128xf32>
    %c0_11 = arith.constant 0 : index
    %c0_12 = arith.constant 0 : index
    %c0_13 = arith.constant 0 : index
    %22 = vector.load %arg6[%c0_11, %c0_12, %c0_13] : memref<1x16x128xf32, #tpu.memory_space<vmem>>, vector<1x16x128xf32>
    %23 = vector.shape_cast %22 : vector<1x16x128xf32> to vector<16x128xf32>
    %24 = vector.shape_cast %21 : vector<16x128xf32> to vector<1x16x128xf32>
    tpu.vector_store %arg6[%c0_11, %c0_12, %c0_13], %24 {strides = array<i32>} : memref<1x16x128xf32, #tpu.memory_space<vmem>>, vector<1x16x128xf32>,
    return
  }
  func.func @transform_0(%arg0: i32, %arg1: i32) -> (i32, i32, i32) {
    %c0_i32 = arith.constant 0 : i32
    %c0_i32_0 = arith.constant 0 : i32
    return %arg0, %c0_i32, %arg1 : i32, i32, i32
  }
  func.func @transform_1(%arg0: i32, %arg1: i32) -> (i32, i32, i32) {
    %c1_i32 = arith.constant 1 : i32
    %0 = arith.addi %arg1, %c1_i32 : i32
    %c1_i32_0 = arith.constant 1 : i32
    %1 = arith.muli %0, %c1_i32_0 : i32
    %c0_i32 = arith.constant 0 : i32
    %c0_i32_1 = arith.constant 0 : i32
    return %arg0, %c0_i32, %1 : i32, i32, i32
  }
  func.func @transform_2(%arg0: i32, %arg1: i32) -> (i32, i32) {
    %c0_i32 = arith.constant 0 : i32
    %c0_i32_0 = arith.constant 0 : i32
    %c0_i32_1 = arith.constant 0 : i32
    return %c0_i32, %c0_i32_0 : i32, i32
  }
  func.func @transform_3(%arg0: i32, %arg1: i32) -> (i32, i32) {
    %c0_i32 = arith.constant 0 : i32
    %c0_i32_0 = arith.constant 0 : i32
    %c0_i32_1 = arith.constant 0 : i32
    return %c0_i32, %c0_i32_0 : i32, i32
  }
  func.func @transform_4(%arg0: i32, %arg1: i32) -> (i32, i32, i32) {
    %c0_i32 = arith.constant 0 : i32
    %c0_i32_0 = arith.constant 0 : i32
    return %arg0, %c0_i32, %arg1 : i32, i32, i32
  }
}

module attributes {stable_mosaic.version = 11 : i64} {
  func.func @_conv1d_kernel(%arg0: i32, %arg1: i32, %arg2: memref<1x16x128xf32, #tpu.memory_space<vmem>>, %arg3: memref<1x16x128xf32, #tpu.memory_space<vmem>>, %arg4: memref<16x80xbf16, #tpu.memory_space<vmem>>, %arg5: memref<16x1xf32, #tpu.memory_space<vmem>>, %arg6: memref<1x16x128xf32, #tpu.memory_space<vmem>>, %arg7: memref<1x16x128xf32, #tpu.memory_space<vmem>>, %arg8: memref<1x16x128xf32, #tpu.memory_space<vmem>>) attributes {dimension_semantics = [#tpu.dimension_semantics<parallel>, #tpu.dimension_semantics<parallel>], iteration_bounds = array<i64: 2, 1>, scalar_prefetch = 0 : i64, scratch_operands = 0 : i64, tpu.core_type = #tpu.core_type<tc>, window_params = [{transform_indices = @transform_0, window_bounds = array<i64: 1, 16, 128>}, {transform_indices = @transform_1, window_bounds = array<i64: 1, 16, 128>}, {pipeline_mode = #tpu.pipeline_mode<synchronous>, transform_indices = @transform_2, window_bounds = array<i64: 16, 80>}, {pipeline_mode = #tpu.pipeline_mode<synchronous>, transform_indices = @transform_3, window_bounds = array<i64: 16, 1>}, {transform_indices = @transform_4, window_bounds = array<i64: 1, 16, 128>}, {transform_indices = @transform_5, window_bounds = array<i64: 1, 16, 128>}, {transform_indices = @transform_6, window_bounds = array<i64: 1, 16, 128>}]} {
    %c0 = arith.constant 0 : index
    %c0_0 = arith.constant 0 : index
    %c0_1 = arith.constant 0 : index
    %0 = vector.load %arg2[%c0, %c0_0, %c0_1] : memref<1x16x128xf32, #tpu.memory_space<vmem>>, vector<1x16x128xf32>
    %1 = vector.shape_cast %0 : vector<1x16x128xf32> to vector<16x128xf32>
    %c0_2 = arith.constant 0 : index
    %c0_3 = arith.constant 0 : index
    %c0_4 = arith.constant 0 : index
    %2 = vector.load %arg3[%c0_2, %c0_3, %c0_4] : memref<1x16x128xf32, #tpu.memory_space<vmem>>, vector<1x16x128xf32>
    %3 = vector.shape_cast %2 : vector<1x16x128xf32> to vector<16x128xf32>
    %4 = tpu.concatenate %1, %3 in 1 : vector<16x128xf32>, vector<16x128xf32> -> vector<16x256xf32>
    %cst = arith.constant 0.000000e+00 : f32
    %5 = vector.broadcast %cst : f32 to vector<16x256xf32>
    %6 = arith.cmpf oge, %4, %5 : vector<16x256xf32>
    %cst_5 = arith.constant 1.000000e-01 : f32
    %7 = vector.broadcast %cst_5 : f32 to vector<16x256xf32>
    %8 = arith.mulf %7, %4 : vector<16x256xf32>
    %9 = arith.select %6, %4, %8 : vector<16x256xi1>, vector<16x256xf32>
    %10 = vector.extract_strided_slice %9 {offsets = [0, 0], sizes = [16, 128], strides = [1, 1]} : vector<16x256xf32> to vector<16x128xf32>
    %11 = vector.extract_strided_slice %9 {offsets = [0, 1], sizes = [16, 128], strides = [1, 1]} : vector<16x256xf32> to vector<16x128xf32>
    %12 = vector.extract_strided_slice %9 {offsets = [0, 2], sizes = [16, 128], strides = [1, 1]} : vector<16x256xf32> to vector<16x128xf32>
    %13 = vector.extract_strided_slice %9 {offsets = [0, 3], sizes = [16, 128], strides = [1, 1]} : vector<16x256xf32> to vector<16x128xf32>
    %14 = vector.extract_strided_slice %9 {offsets = [0, 4], sizes = [16, 128], strides = [1, 1]} : vector<16x256xf32> to vector<16x128xf32>
    %15 = tpu.concatenate %10, %11, %12, %13, %14 in 0 : vector<16x128xf32>, vector<16x128xf32>, vector<16x128xf32>, vector<16x128xf32>, vector<16x128xf32> -> vector<80x128xf32>
    %c0_6 = arith.constant 0 : index
    %c0_7 = arith.constant 0 : index
    %16 = vector.load %arg4[%c0_6, %c0_7] : memref<16x80xbf16, #tpu.memory_space<vmem>>, vector<16x80xbf16>
    %17 = arith.truncf %15 : vector<80x128xf32> to vector<80x128xbf16>
    %cst_8 = arith.constant dense<0.000000e+00> : vector<16x128xf32>
    %18 = tpu.matmul %16, %17, %cst_8 {dimension_numbers = #tpu.dot_dimension_numbers<[1], [0], [0], [1], [0, 0, 1, 1], [], []>} : vector<16x80xbf16>, vector<80x128xbf16>, vector<16x128xf32> -> vector<16x128xf32>
    %c0_9 = arith.constant 0 : index
    %c0_10 = arith.constant 0 : index
    %19 = vector.load %arg5[%c0_9, %c0_10] : memref<16x1xf32, #tpu.memory_space<vmem>>, vector<16x1xf32>
    %20 = vector.broadcast %19 : vector<16x1xf32> to vector<16x128xf32>
    %21 = arith.addf %18, %20 : vector<16x128xf32>
    %c0_11 = arith.constant 0 : index
    %c0_12 = arith.constant 0 : index
    %c0_13 = arith.constant 0 : index
    %22 = vector.load %arg6[%c0_11, %c0_12, %c0_13] : memref<1x16x128xf32, #tpu.memory_space<vmem>>, vector<1x16x128xf32>
    %23 = vector.shape_cast %22 : vector<1x16x128xf32> to vector<16x128xf32>
    %24 = arith.addf %21, %23 : vector<16x128xf32>
    %c0_14 = arith.constant 0 : index
    %c0_15 = arith.constant 0 : index
    %c0_16 = arith.constant 0 : index
    %25 = vector.load %arg7[%c0_14, %c0_15, %c0_16] : memref<1x16x128xf32, #tpu.memory_space<vmem>>, vector<1x16x128xf32>
    %26 = vector.shape_cast %25 : vector<1x16x128xf32> to vector<16x128xf32>
    %27 = arith.addf %24, %26 : vector<16x128xf32>
    %cst_17 = arith.constant 5.000000e-01 : f32
    %28 = vector.broadcast %cst_17 : f32 to vector<16x128xf32>
    %29 = arith.mulf %27, %28 : vector<16x128xf32>
    %c0_18 = arith.constant 0 : index
    %c0_19 = arith.constant 0 : index
    %c0_20 = arith.constant 0 : index
    %30 = vector.load %arg8[%c0_18, %c0_19, %c0_20] : memref<1x16x128xf32, #tpu.memory_space<vmem>>, vector<1x16x128xf32>
    %31 = vector.shape_cast %30 : vector<1x16x128xf32> to vector<16x128xf32>
    %32 = vector.shape_cast %29 : vector<16x128xf32> to vector<1x16x128xf32>
    tpu.vector_store %arg8[%c0_18, %c0_19, %c0_20], %32 {strides = array<i32>} : memref<1x16x128xf32, #tpu.memory_space<vmem>>, vector<1x16x128xf32>,
    return
  }
  func.func @transform_0(%arg0: i32, %arg1: i32) -> (i32, i32, i32) {
    %c0_i32 = arith.constant 0 : i32
    %c0_i32_0 = arith.constant 0 : i32
    return %arg0, %c0_i32, %arg1 : i32, i32, i32
  }
  func.func @transform_1(%arg0: i32, %arg1: i32) -> (i32, i32, i32) {
    %c1_i32 = arith.constant 1 : i32
    %0 = arith.addi %arg1, %c1_i32 : i32
    %c1_i32_0 = arith.constant 1 : i32
    %1 = arith.muli %0, %c1_i32_0 : i32
    %c0_i32 = arith.constant 0 : i32
    %c0_i32_1 = arith.constant 0 : i32
    return %arg0, %c0_i32, %1 : i32, i32, i32
  }
  func.func @transform_2(%arg0: i32, %arg1: i32) -> (i32, i32) {
    %c0_i32 = arith.constant 0 : i32
    %c0_i32_0 = arith.constant 0 : i32
    %c0_i32_1 = arith.constant 0 : i32
    return %c0_i32, %c0_i32_0 : i32, i32
  }
  func.func @transform_3(%arg0: i32, %arg1: i32) -> (i32, i32) {
    %c0_i32 = arith.constant 0 : i32
    %c0_i32_0 = arith.constant 0 : i32
    %c0_i32_1 = arith.constant 0 : i32
    return %c0_i32, %c0_i32_0 : i32, i32
  }
  func.func @transform_4(%arg0: i32, %arg1: i32) -> (i32, i32, i32) {
    %c0_i32 = arith.constant 0 : i32
    %c0_i32_0 = arith.constant 0 : i32
    return %arg0, %c0_i32, %arg1 : i32, i32, i32
  }
  func.func @transform_5(%arg0: i32, %arg1: i32) -> (i32, i32, i32) {
    %c0_i32 = arith.constant 0 : i32
    %c0_i32_0 = arith.constant 0 : i32
    return %arg0, %c0_i32, %arg1 : i32, i32, i32
  }
  func.func @transform_6(%arg0: i32, %arg1: i32) -> (i32, i32, i32) {
    %c0_i32 = arith.constant 0 : i32
    %c0_i32_0 = arith.constant 0 : i32
    return %arg0, %c0_i32, %arg1 : i32, i32, i32
  }
}

module attributes {stable_mosaic.version = 11 : i64} {
  func.func @_conv1d_kernel(%arg0: i32, %arg1: i32, %arg2: memref<1x8x128xf32, #tpu.memory_space<vmem>>, %arg3: memref<1x8x128xf32, #tpu.memory_space<vmem>>, %arg4: memref<8x24xbf16, #tpu.memory_space<vmem>>, %arg5: memref<8x1xf32, #tpu.memory_space<vmem>>, %arg6: memref<1x8x128xf32, #tpu.memory_space<vmem>>) attributes {dimension_semantics = [#tpu.dimension_semantics<parallel>, #tpu.dimension_semantics<parallel>], iteration_bounds = array<i64: 2, 1>, scalar_prefetch = 0 : i64, scratch_operands = 0 : i64, tpu.core_type = #tpu.core_type<tc>, window_params = [{transform_indices = @transform_0, window_bounds = array<i64: 1, 8, 128>}, {transform_indices = @transform_1, window_bounds = array<i64: 1, 8, 128>}, {pipeline_mode = #tpu.pipeline_mode<synchronous>, transform_indices = @transform_2, window_bounds = array<i64: 8, 24>}, {pipeline_mode = #tpu.pipeline_mode<synchronous>, transform_indices = @transform_3, window_bounds = array<i64: 8, 1>}, {transform_indices = @transform_4, window_bounds = array<i64: 1, 8, 128>}]} {
    %c0 = arith.constant 0 : index
    %c0_0 = arith.constant 0 : index
    %c0_1 = arith.constant 0 : index
    %0 = vector.load %arg2[%c0, %c0_0, %c0_1] : memref<1x8x128xf32, #tpu.memory_space<vmem>>, vector<1x8x128xf32>
    %1 = vector.shape_cast %0 : vector<1x8x128xf32> to vector<8x128xf32>
    %c0_2 = arith.constant 0 : index
    %c0_3 = arith.constant 0 : index
    %c0_4 = arith.constant 0 : index
    %2 = vector.load %arg3[%c0_2, %c0_3, %c0_4] : memref<1x8x128xf32, #tpu.memory_space<vmem>>, vector<1x8x128xf32>
    %3 = vector.shape_cast %2 : vector<1x8x128xf32> to vector<8x128xf32>
    %4 = tpu.concatenate %1, %3 in 1 : vector<8x128xf32>, vector<8x128xf32> -> vector<8x256xf32>
    %cst = arith.constant 0.000000e+00 : f32
    %5 = vector.broadcast %cst : f32 to vector<8x256xf32>
    %6 = arith.cmpf oge, %4, %5 : vector<8x256xf32>
    %cst_5 = arith.constant 1.000000e-01 : f32
    %7 = vector.broadcast %cst_5 : f32 to vector<8x256xf32>
    %8 = arith.mulf %7, %4 : vector<8x256xf32>
    %9 = arith.select %6, %4, %8 : vector<8x256xi1>, vector<8x256xf32>
    %10 = vector.extract_strided_slice %9 {offsets = [0, 0], sizes = [8, 128], strides = [1, 1]} : vector<8x256xf32> to vector<8x128xf32>
    %11 = vector.extract_strided_slice %9 {offsets = [0, 3], sizes = [8, 128], strides = [1, 1]} : vector<8x256xf32> to vector<8x128xf32>
    %12 = vector.extract_strided_slice %9 {offsets = [0, 6], sizes = [8, 128], strides = [1, 1]} : vector<8x256xf32> to vector<8x128xf32>
    %13 = tpu.concatenate %10, %11, %12 in 0 : vector<8x128xf32>, vector<8x128xf32>, vector<8x128xf32> -> vector<24x128xf32>
    %c0_6 = arith.constant 0 : index
    %c0_7 = arith.constant 0 : index
    %14 = vector.load %arg4[%c0_6, %c0_7] : memref<8x24xbf16, #tpu.memory_space<vmem>>, vector<8x24xbf16>
    %15 = arith.truncf %13 : vector<24x128xf32> to vector<24x128xbf16>
    %cst_8 = arith.constant dense<0.000000e+00> : vector<8x128xf32>
    %16 = tpu.matmul %14, %15, %cst_8 {dimension_numbers = #tpu.dot_dimension_numbers<[1], [0], [0], [1], [0, 0, 1, 1], [], []>} : vector<8x24xbf16>, vector<24x128xbf16>, vector<8x128xf32> -> vector<8x128xf32>
    %c0_9 = arith.constant 0 : index
    %c0_10 = arith.constant 0 : index
    %17 = vector.load %arg5[%c0_9, %c0_10] : memref<8x1xf32, #tpu.memory_space<vmem>>, vector<8x1xf32>
    %18 = vector.broadcast %17 : vector<8x1xf32> to vector<8x128xf32>
    %19 = arith.addf %16, %18 : vector<8x128xf32>
    %c0_11 = arith.constant 0 : index
    %c0_12 = arith.constant 0 : index
    %c0_13 = arith.constant 0 : index
    %20 = vector.load %arg6[%c0_11, %c0_12, %c0_13] : memref<1x8x128xf32, #tpu.memory_space<vmem>>, vector<1x8x128xf32>
    %21 = vector.shape_cast %20 : vector<1x8x128xf32> to vector<8x128xf32>
    %22 = vector.shape_cast %19 : vector<8x128xf32> to vector<1x8x128xf32>
    tpu.vector_store %arg6[%c0_11, %c0_12, %c0_13], %22 {strides = array<i32>} : memref<1x8x128xf32, #tpu.memory_space<vmem>>, vector<1x8x128xf32>,
    return
  }
  func.func @transform_0(%arg0: i32, %arg1: i32) -> (i32, i32, i32) {
    %c0_i32 = arith.constant 0 : i32
    %c0_i32_0 = arith.constant 0 : i32
    return %arg0, %c0_i32, %arg1 : i32, i32, i32
  }
  func.func @transform_1(%arg0: i32, %arg1: i32) -> (i32, i32, i32) {
    %c1_i32 = arith.constant 1 : i32
    %0 = arith.addi %arg1, %c1_i32 : i32
    %c1_i32_0 = arith.constant 1 : i32
    %1 = arith.muli %0, %c1_i32_0 : i32
    %c0_i32 = arith.constant 0 : i32
    %c0_i32_1 = arith.constant 0 : i32
    return %arg0, %c0_i32, %1 : i32, i32, i32
  }
  func.func @transform_2(%arg0: i32, %arg1: i32) -> (i32, i32) {
    %c0_i32 = arith.constant 0 : i32
    %c0_i32_0 = arith.constant 0 : i32
    %c0_i32_1 = arith.constant 0 : i32
    return %c0_i32, %c0_i32_0 : i32, i32
  }
  func.func @transform_3(%arg0: i32, %arg1: i32) -> (i32, i32) {
    %c0_i32 = arith.constant 0 : i32
    %c0_i32_0 = arith.constant 0 : i32
    %c0_i32_1 = arith.constant 0 : i32
    return %c0_i32, %c0_i32_0 : i32, i32
  }
  func.func @transform_4(%arg0: i32, %arg1: i32) -> (i32, i32, i32) {
    %c0_i32 = arith.constant 0 : i32
    %c0_i32_0 = arith.constant 0 : i32
    return %arg0, %c0_i32, %arg1 : i32, i32, i32
  }
}

module attributes {stable_mosaic.version = 11 : i64} {
  func.func @_conv1d_kernel(%arg0: i32, %arg1: i32, %arg2: memref<1x8x128xf32, #tpu.memory_space<vmem>>, %arg3: memref<1x8x128xf32, #tpu.memory_space<vmem>>, %arg4: memref<8x24xbf16, #tpu.memory_space<vmem>>, %arg5: memref<8x1xf32, #tpu.memory_space<vmem>>, %arg6: memref<1x8x128xf32, #tpu.memory_space<vmem>>) attributes {dimension_semantics = [#tpu.dimension_semantics<parallel>, #tpu.dimension_semantics<parallel>], iteration_bounds = array<i64: 2, 1>, scalar_prefetch = 0 : i64, scratch_operands = 0 : i64, tpu.core_type = #tpu.core_type<tc>, window_params = [{transform_indices = @transform_0, window_bounds = array<i64: 1, 8, 128>}, {transform_indices = @transform_1, window_bounds = array<i64: 1, 8, 128>}, {pipeline_mode = #tpu.pipeline_mode<synchronous>, transform_indices = @transform_2, window_bounds = array<i64: 8, 24>}, {pipeline_mode = #tpu.pipeline_mode<synchronous>, transform_indices = @transform_3, window_bounds = array<i64: 8, 1>}, {transform_indices = @transform_4, window_bounds = array<i64: 1, 8, 128>}]} {
    %c0 = arith.constant 0 : index
    %c0_0 = arith.constant 0 : index
    %c0_1 = arith.constant 0 : index
    %0 = vector.load %arg2[%c0, %c0_0, %c0_1] : memref<1x8x128xf32, #tpu.memory_space<vmem>>, vector<1x8x128xf32>
    %1 = vector.shape_cast %0 : vector<1x8x128xf32> to vector<8x128xf32>
    %c0_2 = arith.constant 0 : index
    %c0_3 = arith.constant 0 : index
    %c0_4 = arith.constant 0 : index
    %2 = vector.load %arg3[%c0_2, %c0_3, %c0_4] : memref<1x8x128xf32, #tpu.memory_space<vmem>>, vector<1x8x128xf32>
    %3 = vector.shape_cast %2 : vector<1x8x128xf32> to vector<8x128xf32>
    %4 = tpu.concatenate %1, %3 in 1 : vector<8x128xf32>, vector<8x128xf32> -> vector<8x256xf32>
    %cst = arith.constant 0.000000e+00 : f32
    %5 = vector.broadcast %cst : f32 to vector<8x256xf32>
    %6 = arith.cmpf oge, %4, %5 : vector<8x256xf32>
    %cst_5 = arith.constant 1.000000e-01 : f32
    %7 = vector.broadcast %cst_5 : f32 to vector<8x256xf32>
    %8 = arith.mulf %7, %4 : vector<8x256xf32>
    %9 = arith.select %6, %4, %8 : vector<8x256xi1>, vector<8x256xf32>
    %10 = vector.extract_strided_slice %9 {offsets = [0, 0], sizes = [8, 128], strides = [1, 1]} : vector<8x256xf32> to vector<8x128xf32>
    %11 = vector.extract_strided_slice %9 {offsets = [0, 1], sizes = [8, 128], strides = [1, 1]} : vector<8x256xf32> to vector<8x128xf32>
    %12 = vector.extract_strided_slice %9 {offsets = [0, 2], sizes = [8, 128], strides = [1, 1]} : vector<8x256xf32> to vector<8x128xf32>
    %13 = tpu.concatenate %10, %11, %12 in 0 : vector<8x128xf32>, vector<8x128xf32>, vector<8x128xf32> -> vector<24x128xf32>
    %c0_6 = arith.constant 0 : index
    %c0_7 = arith.constant 0 : index
    %14 = vector.load %arg4[%c0_6, %c0_7] : memref<8x24xbf16, #tpu.memory_space<vmem>>, vector<8x24xbf16>
    %15 = arith.truncf %13 : vector<24x128xf32> to vector<24x128xbf16>
    %cst_8 = arith.constant dense<0.000000e+00> : vector<8x128xf32>
    %16 = tpu.matmul %14, %15, %cst_8 {dimension_numbers = #tpu.dot_dimension_numbers<[1], [0], [0], [1], [0, 0, 1, 1], [], []>} : vector<8x24xbf16>, vector<24x128xbf16>, vector<8x128xf32> -> vector<8x128xf32>
    %c0_9 = arith.constant 0 : index
    %c0_10 = arith.constant 0 : index
    %17 = vector.load %arg5[%c0_9, %c0_10] : memref<8x1xf32, #tpu.memory_space<vmem>>, vector<8x1xf32>
    %18 = vector.broadcast %17 : vector<8x1xf32> to vector<8x128xf32>
    %19 = arith.addf %16, %18 : vector<8x128xf32>
    %c0_11 = arith.constant 0 : index
    %c0_12 = arith.constant 0 : index
    %c0_13 = arith.constant 0 : index
    %20 = vector.load %arg6[%c0_11, %c0_12, %c0_13] : memref<1x8x128xf32, #tpu.memory_space<vmem>>, vector<1x8x128xf32>
    %21 = vector.shape_cast %20 : vector<1x8x128xf32> to vector<8x128xf32>
    %22 = vector.shape_cast %19 : vector<8x128xf32> to vector<1x8x128xf32>
    tpu.vector_store %arg6[%c0_11, %c0_12, %c0_13], %22 {strides = array<i32>} : memref<1x8x128xf32, #tpu.memory_space<vmem>>, vector<1x8x128xf32>,
    return
  }
  func.func @transform_0(%arg0: i32, %arg1: i32) -> (i32, i32, i32) {
    %c0_i32 = arith.constant 0 : i32
    %c0_i32_0 = arith.constant 0 : i32
    return %arg0, %c0_i32, %arg1 : i32, i32, i32
  }
  func.func @transform_1(%arg0: i32, %arg1: i32) -> (i32, i32, i32) {
    %c1_i32 = arith.constant 1 : i32
    %0 = arith.addi %arg1, %c1_i32 : i32
    %c1_i32_0 = arith.constant 1 : i32
    %1 = arith.muli %0, %c1_i32_0 : i32
    %c0_i32 = arith.constant 0 : i32
    %c0_i32_1 = arith.constant 0 : i32
    return %arg0, %c0_i32, %1 : i32, i32, i32
  }
  func.func @transform_2(%arg0: i32, %arg1: i32) -> (i32, i32) {
    %c0_i32 = arith.constant 0 : i32
    %c0_i32_0 = arith.constant 0 : i32
    %c0_i32_1 = arith.constant 0 : i32
    return %c0_i32, %c0_i32_0 : i32, i32
  }
  func.func @transform_3(%arg0: i32, %arg1: i32) -> (i32, i32) {
    %c0_i32 = arith.constant 0 : i32
    %c0_i32_0 = arith.constant 0 : i32
    %c0_i32_1 = arith.constant 0 : i32
    return %c0_i32, %c0_i32_0 : i32, i32
  }
  func.func @transform_4(%arg0: i32, %arg1: i32) -> (i32, i32, i32) {
    %c0_i32 = arith.constant 0 : i32
    %c0_i32_0 = arith.constant 0 : i32
    return %arg0, %c0_i32, %arg1 : i32, i32, i32
  }
}

module attributes {stable_mosaic.version = 11 : i64} {
  func.func @_conv1d_kernel(%arg0: i32, %arg1: i32, %arg2: memref<1x8x128xf32, #tpu.memory_space<vmem>>, %arg3: memref<1x8x128xf32, #tpu.memory_space<vmem>>, %arg4: memref<8x24xbf16, #tpu.memory_space<vmem>>, %arg5: memref<8x1xf32, #tpu.memory_space<vmem>>, %arg6: memref<1x8x128xf32, #tpu.memory_space<vmem>>, %arg7: memref<1x8x128xf32, #tpu.memory_space<vmem>>) attributes {dimension_semantics = [#tpu.dimension_semantics<parallel>, #tpu.dimension_semantics<parallel>], iteration_bounds = array<i64: 2, 1>, scalar_prefetch = 0 : i64, scratch_operands = 0 : i64, tpu.core_type = #tpu.core_type<tc>, window_params = [{transform_indices = @transform_0, window_bounds = array<i64: 1, 8, 128>}, {transform_indices = @transform_1, window_bounds = array<i64: 1, 8, 128>}, {pipeline_mode = #tpu.pipeline_mode<synchronous>, transform_indices = @transform_2, window_bounds = array<i64: 8, 24>}, {pipeline_mode = #tpu.pipeline_mode<synchronous>, transform_indices = @transform_3, window_bounds = array<i64: 8, 1>}, {transform_indices = @transform_4, window_bounds = array<i64: 1, 8, 128>}, {transform_indices = @transform_5, window_bounds = array<i64: 1, 8, 128>}]} {
    %c0 = arith.constant 0 : index
    %c0_0 = arith.constant 0 : index
    %c0_1 = arith.constant 0 : index
    %0 = vector.load %arg2[%c0, %c0_0, %c0_1] : memref<1x8x128xf32, #tpu.memory_space<vmem>>, vector<1x8x128xf32>
    %1 = vector.shape_cast %0 : vector<1x8x128xf32> to vector<8x128xf32>
    %c0_2 = arith.constant 0 : index
    %c0_3 = arith.constant 0 : index
    %c0_4 = arith.constant 0 : index
    %2 = vector.load %arg3[%c0_2, %c0_3, %c0_4] : memref<1x8x128xf32, #tpu.memory_space<vmem>>, vector<1x8x128xf32>
    %3 = vector.shape_cast %2 : vector<1x8x128xf32> to vector<8x128xf32>
    %4 = tpu.concatenate %1, %3 in 1 : vector<8x128xf32>, vector<8x128xf32> -> vector<8x256xf32>
    %cst = arith.constant 0.000000e+00 : f32
    %5 = vector.broadcast %cst : f32 to vector<8x256xf32>
    %6 = arith.cmpf oge, %4, %5 : vector<8x256xf32>
    %cst_5 = arith.constant 1.000000e-01 : f32
    %7 = vector.broadcast %cst_5 : f32 to vector<8x256xf32>
    %8 = arith.mulf %7, %4 : vector<8x256xf32>
    %9 = arith.select %6, %4, %8 : vector<8x256xi1>, vector<8x256xf32>
    %10 = vector.extract_strided_slice %9 {offsets = [0, 0], sizes = [8, 128], strides = [1, 1]} : vector<8x256xf32> to vector<8x128xf32>
    %11 = vector.extract_strided_slice %9 {offsets = [0, 1], sizes = [8, 128], strides = [1, 1]} : vector<8x256xf32> to vector<8x128xf32>
    %12 = vector.extract_strided_slice %9 {offsets = [0, 2], sizes = [8, 128], strides = [1, 1]} : vector<8x256xf32> to vector<8x128xf32>
    %13 = tpu.concatenate %10, %11, %12 in 0 : vector<8x128xf32>, vector<8x128xf32>, vector<8x128xf32> -> vector<24x128xf32>
    %c0_6 = arith.constant 0 : index
    %c0_7 = arith.constant 0 : index
    %14 = vector.load %arg4[%c0_6, %c0_7] : memref<8x24xbf16, #tpu.memory_space<vmem>>, vector<8x24xbf16>
    %15 = arith.truncf %13 : vector<24x128xf32> to vector<24x128xbf16>
    %cst_8 = arith.constant dense<0.000000e+00> : vector<8x128xf32>
    %16 = tpu.matmul %14, %15, %cst_8 {dimension_numbers = #tpu.dot_dimension_numbers<[1], [0], [0], [1], [0, 0, 1, 1], [], []>} : vector<8x24xbf16>, vector<24x128xbf16>, vector<8x128xf32> -> vector<8x128xf32>
    %c0_9 = arith.constant 0 : index
    %c0_10 = arith.constant 0 : index
    %17 = vector.load %arg5[%c0_9, %c0_10] : memref<8x1xf32, #tpu.memory_space<vmem>>, vector<8x1xf32>
    %18 = vector.broadcast %17 : vector<8x1xf32> to vector<8x128xf32>
    %19 = arith.addf %16, %18 : vector<8x128xf32>
    %c0_11 = arith.constant 0 : index
    %c0_12 = arith.constant 0 : index
    %c0_13 = arith.constant 0 : index
    %20 = vector.load %arg6[%c0_11, %c0_12, %c0_13] : memref<1x8x128xf32, #tpu.memory_space<vmem>>, vector<1x8x128xf32>
    %21 = vector.shape_cast %20 : vector<1x8x128xf32> to vector<8x128xf32>
    %22 = arith.addf %19, %21 : vector<8x128xf32>
    %c0_14 = arith.constant 0 : index
    %c0_15 = arith.constant 0 : index
    %c0_16 = arith.constant 0 : index
    %23 = vector.load %arg7[%c0_14, %c0_15, %c0_16] : memref<1x8x128xf32, #tpu.memory_space<vmem>>, vector<1x8x128xf32>
    %24 = vector.shape_cast %23 : vector<1x8x128xf32> to vector<8x128xf32>
    %25 = vector.shape_cast %22 : vector<8x128xf32> to vector<1x8x128xf32>
    tpu.vector_store %arg7[%c0_14, %c0_15, %c0_16], %25 {strides = array<i32>} : memref<1x8x128xf32, #tpu.memory_space<vmem>>, vector<1x8x128xf32>,
    return
  }
  func.func @transform_0(%arg0: i32, %arg1: i32) -> (i32, i32, i32) {
    %c0_i32 = arith.constant 0 : i32
    %c0_i32_0 = arith.constant 0 : i32
    return %arg0, %c0_i32, %arg1 : i32, i32, i32
  }
  func.func @transform_1(%arg0: i32, %arg1: i32) -> (i32, i32, i32) {
    %c1_i32 = arith.constant 1 : i32
    %0 = arith.addi %arg1, %c1_i32 : i32
    %c1_i32_0 = arith.constant 1 : i32
    %1 = arith.muli %0, %c1_i32_0 : i32
    %c0_i32 = arith.constant 0 : i32
    %c0_i32_1 = arith.constant 0 : i32
    return %arg0, %c0_i32, %1 : i32, i32, i32
  }
  func.func @transform_2(%arg0: i32, %arg1: i32) -> (i32, i32) {
    %c0_i32 = arith.constant 0 : i32
    %c0_i32_0 = arith.constant 0 : i32
    %c0_i32_1 = arith.constant 0 : i32
    return %c0_i32, %c0_i32_0 : i32, i32
  }
  func.func @transform_3(%arg0: i32, %arg1: i32) -> (i32, i32) {
    %c0_i32 = arith.constant 0 : i32
    %c0_i32_0 = arith.constant 0 : i32
    %c0_i32_1 = arith.constant 0 : i32
    return %c0_i32, %c0_i32_0 : i32, i32
  }
  func.func @transform_4(%arg0: i32, %arg1: i32) -> (i32, i32, i32) {
    %c0_i32 = arith.constant 0 : i32
    %c0_i32_0 = arith.constant 0 : i32
    return %arg0, %c0_i32, %arg1 : i32, i32, i32
  }
  func.func @transform_5(%arg0: i32, %arg1: i32) -> (i32, i32, i32) {
    %c0_i32 = arith.constant 0 : i32
    %c0_i32_0 = arith.constant 0 : i32
    return %arg0, %c0_i32, %arg1 : i32, i32, i32
  }
}

module attributes {stable_mosaic.version = 11 : i64} {
  func.func @_conv1d_kernel(%arg0: i32, %arg1: i32, %arg2: memref<1x8x128xf32, #tpu.memory_space<vmem>>, %arg3: memref<1x8x128xf32, #tpu.memory_space<vmem>>, %arg4: memref<8x24xbf16, #tpu.memory_space<vmem>>, %arg5: memref<8x1xf32, #tpu.memory_space<vmem>>, %arg6: memref<1x8x128xf32, #tpu.memory_space<vmem>>) attributes {dimension_semantics = [#tpu.dimension_semantics<parallel>, #tpu.dimension_semantics<parallel>], iteration_bounds = array<i64: 2, 1>, scalar_prefetch = 0 : i64, scratch_operands = 0 : i64, tpu.core_type = #tpu.core_type<tc>, window_params = [{transform_indices = @transform_0, window_bounds = array<i64: 1, 8, 128>}, {transform_indices = @transform_1, window_bounds = array<i64: 1, 8, 128>}, {pipeline_mode = #tpu.pipeline_mode<synchronous>, transform_indices = @transform_2, window_bounds = array<i64: 8, 24>}, {pipeline_mode = #tpu.pipeline_mode<synchronous>, transform_indices = @transform_3, window_bounds = array<i64: 8, 1>}, {transform_indices = @transform_4, window_bounds = array<i64: 1, 8, 128>}]} {
    %c0 = arith.constant 0 : index
    %c0_0 = arith.constant 0 : index
    %c0_1 = arith.constant 0 : index
    %0 = vector.load %arg2[%c0, %c0_0, %c0_1] : memref<1x8x128xf32, #tpu.memory_space<vmem>>, vector<1x8x128xf32>
    %1 = vector.shape_cast %0 : vector<1x8x128xf32> to vector<8x128xf32>
    %c0_2 = arith.constant 0 : index
    %c0_3 = arith.constant 0 : index
    %c0_4 = arith.constant 0 : index
    %2 = vector.load %arg3[%c0_2, %c0_3, %c0_4] : memref<1x8x128xf32, #tpu.memory_space<vmem>>, vector<1x8x128xf32>
    %3 = vector.shape_cast %2 : vector<1x8x128xf32> to vector<8x128xf32>
    %4 = tpu.concatenate %1, %3 in 1 : vector<8x128xf32>, vector<8x128xf32> -> vector<8x256xf32>
    %cst = arith.constant 0.000000e+00 : f32
    %5 = vector.broadcast %cst : f32 to vector<8x256xf32>
    %6 = arith.cmpf oge, %4, %5 : vector<8x256xf32>
    %cst_5 = arith.constant 1.000000e-01 : f32
    %7 = vector.broadcast %cst_5 : f32 to vector<8x256xf32>
    %8 = arith.mulf %7, %4 : vector<8x256xf32>
    %9 = arith.select %6, %4, %8 : vector<8x256xi1>, vector<8x256xf32>
    %10 = vector.extract_strided_slice %9 {offsets = [0, 0], sizes = [8, 128], strides = [1, 1]} : vector<8x256xf32> to vector<8x128xf32>
    %11 = vector.extract_strided_slice %9 {offsets = [0, 5], sizes = [8, 128], strides = [1, 1]} : vector<8x256xf32> to vector<8x128xf32>
    %12 = vector.extract_strided_slice %9 {offsets = [0, 10], sizes = [8, 128], strides = [1, 1]} : vector<8x256xf32> to vector<8x128xf32>
    %13 = tpu.concatenate %10, %11, %12 in 0 : vector<8x128xf32>, vector<8x128xf32>, vector<8x128xf32> -> vector<24x128xf32>
    %c0_6 = arith.constant 0 : index
    %c0_7 = arith.constant 0 : index
    %14 = vector.load %arg4[%c0_6, %c0_7] : memref<8x24xbf16, #tpu.memory_space<vmem>>, vector<8x24xbf16>
    %15 = arith.truncf %13 : vector<24x128xf32> to vector<24x128xbf16>
    %cst_8 = arith.constant dense<0.000000e+00> : vector<8x128xf32>
    %16 = tpu.matmul %14, %15, %cst_8 {dimension_numbers = #tpu.dot_dimension_numbers<[1], [0], [0], [1], [0, 0, 1, 1], [], []>} : vector<8x24xbf16>, vector<24x128xbf16>, vector<8x128xf32> -> vector<8x128xf32>
    %c0_9 = arith.constant 0 : index
    %c0_10 = arith.constant 0 : index
    %17 = vector.load %arg5[%c0_9, %c0_10] : memref<8x1xf32, #tpu.memory_space<vmem>>, vector<8x1xf32>
    %18 = vector.broadcast %17 : vector<8x1xf32> to vector<8x128xf32>
    %19 = arith.addf %16, %18 : vector<8x128xf32>
    %c0_11 = arith.constant 0 : index
    %c0_12 = arith.constant 0 : index
    %c0_13 = arith.constant 0 : index
    %20 = vector.load %arg6[%c0_11, %c0_12, %c0_13] : memref<1x8x128xf32, #tpu.memory_space<vmem>>, vector<1x8x128xf32>
    %21 = vector.shape_cast %20 : vector<1x8x128xf32> to vector<8x128xf32>
    %22 = vector.shape_cast %19 : vector<8x128xf32> to vector<1x8x128xf32>
    tpu.vector_store %arg6[%c0_11, %c0_12, %c0_13], %22 {strides = array<i32>} : memref<1x8x128xf32, #tpu.memory_space<vmem>>, vector<1x8x128xf32>,
    return
  }
  func.func @transform_0(%arg0: i32, %arg1: i32) -> (i32, i32, i32) {
    %c0_i32 = arith.constant 0 : i32
    %c0_i32_0 = arith.constant 0 : i32
    return %arg0, %c0_i32, %arg1 : i32, i32, i32
  }
  func.func @transform_1(%arg0: i32, %arg1: i32) -> (i32, i32, i32) {
    %c1_i32 = arith.constant 1 : i32
    %0 = arith.addi %arg1, %c1_i32 : i32
    %c1_i32_0 = arith.constant 1 : i32
    %1 = arith.muli %0, %c1_i32_0 : i32
    %c0_i32 = arith.constant 0 : i32
    %c0_i32_1 = arith.constant 0 : i32
    return %arg0, %c0_i32, %1 : i32, i32, i32
  }
  func.func @transform_2(%arg0: i32, %arg1: i32) -> (i32, i32) {
    %c0_i32 = arith.constant 0 : i32
    %c0_i32_0 = arith.constant 0 : i32
    %c0_i32_1 = arith.constant 0 : i32
    return %c0_i32, %c0_i32_0 : i32, i32
  }
  func.func @transform_3(%arg0: i32, %arg1: i32) -> (i32, i32) {
    %c0_i32 = arith.constant 0 : i32
    %c0_i32_0 = arith.constant 0 : i32
    %c0_i32_1 = arith.constant 0 : i32
    return %c0_i32, %c0_i32_0 : i32, i32
  }
  func.func @transform_4(%arg0: i32, %arg1: i32) -> (i32, i32, i32) {
    %c0_i32 = arith.constant 0 : i32
    %c0_i32_0 = arith.constant 0 : i32
    return %arg0, %c0_i32, %arg1 : i32, i32, i32
  }
}

module attributes {stable_mosaic.version = 11 : i64} {
  func.func @_conv1d_kernel(%arg0: i32, %arg1: i32, %arg2: memref<1x8x128xf32, #tpu.memory_space<vmem>>, %arg3: memref<1x8x128xf32, #tpu.memory_space<vmem>>, %arg4: memref<8x40xbf16, #tpu.memory_space<vmem>>, %arg5: memref<8x1xf32, #tpu.memory_space<vmem>>, %arg6: memref<1x8x128xf32, #tpu.memory_space<vmem>>) attributes {dimension_semantics = [#tpu.dimension_semantics<parallel>, #tpu.dimension_semantics<parallel>], iteration_bounds = array<i64: 2, 1>, scalar_prefetch = 0 : i64, scratch_operands = 0 : i64, tpu.core_type = #tpu.core_type<tc>, window_params = [{transform_indices = @transform_0, window_bounds = array<i64: 1, 8, 128>}, {transform_indices = @transform_1, window_bounds = array<i64: 1, 8, 128>}, {pipeline_mode = #tpu.pipeline_mode<synchronous>, transform_indices = @transform_2, window_bounds = array<i64: 8, 40>}, {pipeline_mode = #tpu.pipeline_mode<synchronous>, transform_indices = @transform_3, window_bounds = array<i64: 8, 1>}, {transform_indices = @transform_4, window_bounds = array<i64: 1, 8, 128>}]} {
    %c0 = arith.constant 0 : index
    %c0_0 = arith.constant 0 : index
    %c0_1 = arith.constant 0 : index
    %0 = vector.load %arg2[%c0, %c0_0, %c0_1] : memref<1x8x128xf32, #tpu.memory_space<vmem>>, vector<1x8x128xf32>
    %1 = vector.shape_cast %0 : vector<1x8x128xf32> to vector<8x128xf32>
    %c0_2 = arith.constant 0 : index
    %c0_3 = arith.constant 0 : index
    %c0_4 = arith.constant 0 : index
    %2 = vector.load %arg3[%c0_2, %c0_3, %c0_4] : memref<1x8x128xf32, #tpu.memory_space<vmem>>, vector<1x8x128xf32>
    %3 = vector.shape_cast %2 : vector<1x8x128xf32> to vector<8x128xf32>
    %4 = tpu.concatenate %1, %3 in 1 : vector<8x128xf32>, vector<8x128xf32> -> vector<8x256xf32>
    %cst = arith.constant 0.000000e+00 : f32
    %5 = vector.broadcast %cst : f32 to vector<8x256xf32>
    %6 = arith.cmpf oge, %4, %5 : vector<8x256xf32>
    %cst_5 = arith.constant 1.000000e-01 : f32
    %7 = vector.broadcast %cst_5 : f32 to vector<8x256xf32>
    %8 = arith.mulf %7, %4 : vector<8x256xf32>
    %9 = arith.select %6, %4, %8 : vector<8x256xi1>, vector<8x256xf32>
    %10 = vector.extract_strided_slice %9 {offsets = [0, 0], sizes = [8, 128], strides = [1, 1]} : vector<8x256xf32> to vector<8x128xf32>
    %11 = vector.extract_strided_slice %9 {offsets = [0, 1], sizes = [8, 128], strides = [1, 1]} : vector<8x256xf32> to vector<8x128xf32>
    %12 = vector.extract_strided_slice %9 {offsets = [0, 2], sizes = [8, 128], strides = [1, 1]} : vector<8x256xf32> to vector<8x128xf32>
    %13 = vector.extract_strided_slice %9 {offsets = [0, 3], sizes = [8, 128], strides = [1, 1]} : vector<8x256xf32> to vector<8x128xf32>
    %14 = vector.extract_strided_slice %9 {offsets = [0, 4], sizes = [8, 128], strides = [1, 1]} : vector<8x256xf32> to vector<8x128xf32>
    %15 = tpu.concatenate %10, %11, %12, %13, %14 in 0 : vector<8x128xf32>, vector<8x128xf32>, vector<8x128xf32>, vector<8x128xf32>, vector<8x128xf32> -> vector<40x128xf32>
    %c0_6 = arith.constant 0 : index
    %c0_7 = arith.constant 0 : index
    %16 = vector.load %arg4[%c0_6, %c0_7] : memref<8x40xbf16, #tpu.memory_space<vmem>>, vector<8x40xbf16>
    %17 = arith.truncf %15 : vector<40x128xf32> to vector<40x128xbf16>
    %cst_8 = arith.constant dense<0.000000e+00> : vector<8x128xf32>
    %18 = tpu.matmul %16, %17, %cst_8 {dimension_numbers = #tpu.dot_dimension_numbers<[1], [0], [0], [1], [0, 0, 1, 1], [], []>} : vector<8x40xbf16>, vector<40x128xbf16>, vector<8x128xf32> -> vector<8x128xf32>
    %c0_9 = arith.constant 0 : index
    %c0_10 = arith.constant 0 : index
    %19 = vector.load %arg5[%c0_9, %c0_10] : memref<8x1xf32, #tpu.memory_space<vmem>>, vector<8x1xf32>
    %20 = vector.broadcast %19 : vector<8x1xf32> to vector<8x128xf32>
    %21 = arith.addf %18, %20 : vector<8x128xf32>
    %c0_11 = arith.constant 0 : index
    %c0_12 = arith.constant 0 : index
    %c0_13 = arith.constant 0 : index
    %22 = vector.load %arg6[%c0_11, %c0_12, %c0_13] : memref<1x8x128xf32, #tpu.memory_space<vmem>>, vector<1x8x128xf32>
    %23 = vector.shape_cast %22 : vector<1x8x128xf32> to vector<8x128xf32>
    %24 = vector.shape_cast %21 : vector<8x128xf32> to vector<1x8x128xf32>
    tpu.vector_store %arg6[%c0_11, %c0_12, %c0_13], %24 {strides = array<i32>} : memref<1x8x128xf32, #tpu.memory_space<vmem>>, vector<1x8x128xf32>,
    return
  }
  func.func @transform_0(%arg0: i32, %arg1: i32) -> (i32, i32, i32) {
    %c0_i32 = arith.constant 0 : i32
    %c0_i32_0 = arith.constant 0 : i32
    return %arg0, %c0_i32, %arg1 : i32, i32, i32
  }
  func.func @transform_1(%arg0: i32, %arg1: i32) -> (i32, i32, i32) {
    %c1_i32 = arith.constant 1 : i32
    %0 = arith.addi %arg1, %c1_i32 : i32
    %c1_i32_0 = arith.constant 1 : i32
    %1 = arith.muli %0, %c1_i32_0 : i32
    %c0_i32 = arith.constant 0 : i32
    %c0_i32_1 = arith.constant 0 : i32
    return %arg0, %c0_i32, %1 : i32, i32, i32
  }
  func.func @transform_2(%arg0: i32, %arg1: i32) -> (i32, i32) {
    %c0_i32 = arith.constant 0 : i32
    %c0_i32_0 = arith.constant 0 : i32
    %c0_i32_1 = arith.constant 0 : i32
    return %c0_i32, %c0_i32_0 : i32, i32
  }
  func.func @transform_3(%arg0: i32, %arg1: i32) -> (i32, i32) {
    %c0_i32 = arith.constant 0 : i32
    %c0_i32_0 = arith.constant 0 : i32
    %c0_i32_1 = arith.constant 0 : i32
    return %c0_i32, %c0_i32_0 : i32, i32
  }
  func.func @transform_4(%arg0: i32, %arg1: i32) -> (i32, i32, i32) {
    %c0_i32 = arith.constant 0 : i32
    %c0_i32_0 = arith.constant 0 : i32
    return %arg0, %c0_i32, %arg1 : i32, i32, i32
  }
}

module attributes {stable_mosaic.version = 11 : i64} {
  func.func @_conv1d_kernel(%arg0: i32, %arg1: i32, %arg2: memref<1x8x128xf32, #tpu.memory_space<vmem>>, %arg3: memref<1x8x128xf32, #tpu.memory_space<vmem>>, %arg4: memref<8x40xbf16, #tpu.memory_space<vmem>>, %arg5: memref<8x1xf32, #tpu.memory_space<vmem>>, %arg6: memref<1x8x128xf32, #tpu.memory_space<vmem>>) attributes {dimension_semantics = [#tpu.dimension_semantics<parallel>, #tpu.dimension_semantics<parallel>], iteration_bounds = array<i64: 2, 1>, scalar_prefetch = 0 : i64, scratch_operands = 0 : i64, tpu.core_type = #tpu.core_type<tc>, window_params = [{transform_indices = @transform_0, window_bounds = array<i64: 1, 8, 128>}, {transform_indices = @transform_1, window_bounds = array<i64: 1, 8, 128>}, {pipeline_mode = #tpu.pipeline_mode<synchronous>, transform_indices = @transform_2, window_bounds = array<i64: 8, 40>}, {pipeline_mode = #tpu.pipeline_mode<synchronous>, transform_indices = @transform_3, window_bounds = array<i64: 8, 1>}, {transform_indices = @transform_4, window_bounds = array<i64: 1, 8, 128>}]} {
    %c0 = arith.constant 0 : index
    %c0_0 = arith.constant 0 : index
    %c0_1 = arith.constant 0 : index
    %0 = vector.load %arg2[%c0, %c0_0, %c0_1] : memref<1x8x128xf32, #tpu.memory_space<vmem>>, vector<1x8x128xf32>
    %1 = vector.shape_cast %0 : vector<1x8x128xf32> to vector<8x128xf32>
    %c0_2 = arith.constant 0 : index
    %c0_3 = arith.constant 0 : index
    %c0_4 = arith.constant 0 : index
    %2 = vector.load %arg3[%c0_2, %c0_3, %c0_4] : memref<1x8x128xf32, #tpu.memory_space<vmem>>, vector<1x8x128xf32>
    %3 = vector.shape_cast %2 : vector<1x8x128xf32> to vector<8x128xf32>
    %4 = tpu.concatenate %1, %3 in 1 : vector<8x128xf32>, vector<8x128xf32> -> vector<8x256xf32>
    %cst = arith.constant 0.000000e+00 : f32
    %5 = vector.broadcast %cst : f32 to vector<8x256xf32>
    %6 = arith.cmpf oge, %4, %5 : vector<8x256xf32>
    %cst_5 = arith.constant 1.000000e-01 : f32
    %7 = vector.broadcast %cst_5 : f32 to vector<8x256xf32>
    %8 = arith.mulf %7, %4 : vector<8x256xf32>
    %9 = arith.select %6, %4, %8 : vector<8x256xi1>, vector<8x256xf32>
    %10 = vector.extract_strided_slice %9 {offsets = [0, 0], sizes = [8, 128], strides = [1, 1]} : vector<8x256xf32> to vector<8x128xf32>
    %11 = vector.extract_strided_slice %9 {offsets = [0, 3], sizes = [8, 128], strides = [1, 1]} : vector<8x256xf32> to vector<8x128xf32>
    %12 = vector.extract_strided_slice %9 {offsets = [0, 6], sizes = [8, 128], strides = [1, 1]} : vector<8x256xf32> to vector<8x128xf32>
    %13 = vector.extract_strided_slice %9 {offsets = [0, 9], sizes = [8, 128], strides = [1, 1]} : vector<8x256xf32> to vector<8x128xf32>
    %14 = vector.extract_strided_slice %9 {offsets = [0, 12], sizes = [8, 128], strides = [1, 1]} : vector<8x256xf32> to vector<8x128xf32>
    %15 = tpu.concatenate %10, %11, %12, %13, %14 in 0 : vector<8x128xf32>, vector<8x128xf32>, vector<8x128xf32>, vector<8x128xf32>, vector<8x128xf32> -> vector<40x128xf32>
    %c0_6 = arith.constant 0 : index
    %c0_7 = arith.constant 0 : index
    %16 = vector.load %arg4[%c0_6, %c0_7] : memref<8x40xbf16, #tpu.memory_space<vmem>>, vector<8x40xbf16>
    %17 = arith.truncf %15 : vector<40x128xf32> to vector<40x128xbf16>
    %cst_8 = arith.constant dense<0.000000e+00> : vector<8x128xf32>
    %18 = tpu.matmul %16, %17, %cst_8 {dimension_numbers = #tpu.dot_dimension_numbers<[1], [0], [0], [1], [0, 0, 1, 1], [], []>} : vector<8x40xbf16>, vector<40x128xbf16>, vector<8x128xf32> -> vector<8x128xf32>
    %c0_9 = arith.constant 0 : index
    %c0_10 = arith.constant 0 : index
    %19 = vector.load %arg5[%c0_9, %c0_10] : memref<8x1xf32, #tpu.memory_space<vmem>>, vector<8x1xf32>
    %20 = vector.broadcast %19 : vector<8x1xf32> to vector<8x128xf32>
    %21 = arith.addf %18, %20 : vector<8x128xf32>
    %c0_11 = arith.constant 0 : index
    %c0_12 = arith.constant 0 : index
    %c0_13 = arith.constant 0 : index
    %22 = vector.load %arg6[%c0_11, %c0_12, %c0_13] : memref<1x8x128xf32, #tpu.memory_space<vmem>>, vector<1x8x128xf32>
    %23 = vector.shape_cast %22 : vector<1x8x128xf32> to vector<8x128xf32>
    %24 = vector.shape_cast %21 : vector<8x128xf32> to vector<1x8x128xf32>
    tpu.vector_store %arg6[%c0_11, %c0_12, %c0_13], %24 {strides = array<i32>} : memref<1x8x128xf32, #tpu.memory_space<vmem>>, vector<1x8x128xf32>,
    return
  }
  func.func @transform_0(%arg0: i32, %arg1: i32) -> (i32, i32, i32) {
    %c0_i32 = arith.constant 0 : i32
    %c0_i32_0 = arith.constant 0 : i32
    return %arg0, %c0_i32, %arg1 : i32, i32, i32
  }
  func.func @transform_1(%arg0: i32, %arg1: i32) -> (i32, i32, i32) {
    %c1_i32 = arith.constant 1 : i32
    %0 = arith.addi %arg1, %c1_i32 : i32
    %c1_i32_0 = arith.constant 1 : i32
    %1 = arith.muli %0, %c1_i32_0 : i32
    %c0_i32 = arith.constant 0 : i32
    %c0_i32_1 = arith.constant 0 : i32
    return %arg0, %c0_i32, %1 : i32, i32, i32
  }
  func.func @transform_2(%arg0: i32, %arg1: i32) -> (i32, i32) {
    %c0_i32 = arith.constant 0 : i32
    %c0_i32_0 = arith.constant 0 : i32
    %c0_i32_1 = arith.constant 0 : i32
    return %c0_i32, %c0_i32_0 : i32, i32
  }
  func.func @transform_3(%arg0: i32, %arg1: i32) -> (i32, i32) {
    %c0_i32 = arith.constant 0 : i32
    %c0_i32_0 = arith.constant 0 : i32
    %c0_i32_1 = arith.constant 0 : i32
    return %c0_i32, %c0_i32_0 : i32, i32
  }
  func.func @transform_4(%arg0: i32, %arg1: i32) -> (i32, i32, i32) {
    %c0_i32 = arith.constant 0 : i32
    %c0_i32_0 = arith.constant 0 : i32
    return %arg0, %c0_i32, %arg1 : i32, i32, i32
  }
}

module attributes {stable_mosaic.version = 11 : i64} {
  func.func @_conv1d_kernel(%arg0: i32, %arg1: i32, %arg2: memref<1x8x128xf32, #tpu.memory_space<vmem>>, %arg3: memref<1x8x128xf32, #tpu.memory_space<vmem>>, %arg4: memref<8x40xbf16, #tpu.memory_space<vmem>>, %arg5: memref<8x1xf32, #tpu.memory_space<vmem>>, %arg6: memref<1x8x128xf32, #tpu.memory_space<vmem>>, %arg7: memref<1x8x128xf32, #tpu.memory_space<vmem>>) attributes {dimension_semantics = [#tpu.dimension_semantics<parallel>, #tpu.dimension_semantics<parallel>], iteration_bounds = array<i64: 2, 1>, scalar_prefetch = 0 : i64, scratch_operands = 0 : i64, tpu.core_type = #tpu.core_type<tc>, window_params = [{transform_indices = @transform_0, window_bounds = array<i64: 1, 8, 128>}, {transform_indices = @transform_1, window_bounds = array<i64: 1, 8, 128>}, {pipeline_mode = #tpu.pipeline_mode<synchronous>, transform_indices = @transform_2, window_bounds = array<i64: 8, 40>}, {pipeline_mode = #tpu.pipeline_mode<synchronous>, transform_indices = @transform_3, window_bounds = array<i64: 8, 1>}, {transform_indices = @transform_4, window_bounds = array<i64: 1, 8, 128>}, {transform_indices = @transform_5, window_bounds = array<i64: 1, 8, 128>}]} {
    %c0 = arith.constant 0 : index
    %c0_0 = arith.constant 0 : index
    %c0_1 = arith.constant 0 : index
    %0 = vector.load %arg2[%c0, %c0_0, %c0_1] : memref<1x8x128xf32, #tpu.memory_space<vmem>>, vector<1x8x128xf32>
    %1 = vector.shape_cast %0 : vector<1x8x128xf32> to vector<8x128xf32>
    %c0_2 = arith.constant 0 : index
    %c0_3 = arith.constant 0 : index
    %c0_4 = arith.constant 0 : index
    %2 = vector.load %arg3[%c0_2, %c0_3, %c0_4] : memref<1x8x128xf32, #tpu.memory_space<vmem>>, vector<1x8x128xf32>
    %3 = vector.shape_cast %2 : vector<1x8x128xf32> to vector<8x128xf32>
    %4 = tpu.concatenate %1, %3 in 1 : vector<8x128xf32>, vector<8x128xf32> -> vector<8x256xf32>
    %cst = arith.constant 0.000000e+00 : f32
    %5 = vector.broadcast %cst : f32 to vector<8x256xf32>
    %6 = arith.cmpf oge, %4, %5 : vector<8x256xf32>
    %cst_5 = arith.constant 1.000000e-01 : f32
    %7 = vector.broadcast %cst_5 : f32 to vector<8x256xf32>
    %8 = arith.mulf %7, %4 : vector<8x256xf32>
    %9 = arith.select %6, %4, %8 : vector<8x256xi1>, vector<8x256xf32>
    %10 = vector.extract_strided_slice %9 {offsets = [0, 0], sizes = [8, 128], strides = [1, 1]} : vector<8x256xf32> to vector<8x128xf32>
    %11 = vector.extract_strided_slice %9 {offsets = [0, 1], sizes = [8, 128], strides = [1, 1]} : vector<8x256xf32> to vector<8x128xf32>
    %12 = vector.extract_strided_slice %9 {offsets = [0, 2], sizes = [8, 128], strides = [1, 1]} : vector<8x256xf32> to vector<8x128xf32>
    %13 = vector.extract_strided_slice %9 {offsets = [0, 3], sizes = [8, 128], strides = [1, 1]} : vector<8x256xf32> to vector<8x128xf32>
    %14 = vector.extract_strided_slice %9 {offsets = [0, 4], sizes = [8, 128], strides = [1, 1]} : vector<8x256xf32> to vector<8x128xf32>
    %15 = tpu.concatenate %10, %11, %12, %13, %14 in 0 : vector<8x128xf32>, vector<8x128xf32>, vector<8x128xf32>, vector<8x128xf32>, vector<8x128xf32> -> vector<40x128xf32>
    %c0_6 = arith.constant 0 : index
    %c0_7 = arith.constant 0 : index
    %16 = vector.load %arg4[%c0_6, %c0_7] : memref<8x40xbf16, #tpu.memory_space<vmem>>, vector<8x40xbf16>
    %17 = arith.truncf %15 : vector<40x128xf32> to vector<40x128xbf16>
    %cst_8 = arith.constant dense<0.000000e+00> : vector<8x128xf32>
    %18 = tpu.matmul %16, %17, %cst_8 {dimension_numbers = #tpu.dot_dimension_numbers<[1], [0], [0], [1], [0, 0, 1, 1], [], []>} : vector<8x40xbf16>, vector<40x128xbf16>, vector<8x128xf32> -> vector<8x128xf32>
    %c0_9 = arith.constant 0 : index
    %c0_10 = arith.constant 0 : index
    %19 = vector.load %arg5[%c0_9, %c0_10] : memref<8x1xf32, #tpu.memory_space<vmem>>, vector<8x1xf32>
    %20 = vector.broadcast %19 : vector<8x1xf32> to vector<8x128xf32>
    %21 = arith.addf %18, %20 : vector<8x128xf32>
    %c0_11 = arith.constant 0 : index
    %c0_12 = arith.constant 0 : index
    %c0_13 = arith.constant 0 : index
    %22 = vector.load %arg6[%c0_11, %c0_12, %c0_13] : memref<1x8x128xf32, #tpu.memory_space<vmem>>, vector<1x8x128xf32>
    %23 = vector.shape_cast %22 : vector<1x8x128xf32> to vector<8x128xf32>
    %24 = arith.addf %21, %23 : vector<8x128xf32>
    %c0_14 = arith.constant 0 : index
    %c0_15 = arith.constant 0 : index
    %c0_16 = arith.constant 0 : index
    %25 = vector.load %arg7[%c0_14, %c0_15, %c0_16] : memref<1x8x128xf32, #tpu.memory_space<vmem>>, vector<1x8x128xf32>
    %26 = vector.shape_cast %25 : vector<1x8x128xf32> to vector<8x128xf32>
    %27 = vector.shape_cast %24 : vector<8x128xf32> to vector<1x8x128xf32>
    tpu.vector_store %arg7[%c0_14, %c0_15, %c0_16], %27 {strides = array<i32>} : memref<1x8x128xf32, #tpu.memory_space<vmem>>, vector<1x8x128xf32>,
    return
  }
  func.func @transform_0(%arg0: i32, %arg1: i32) -> (i32, i32, i32) {
    %c0_i32 = arith.constant 0 : i32
    %c0_i32_0 = arith.constant 0 : i32
    return %arg0, %c0_i32, %arg1 : i32, i32, i32
  }
  func.func @transform_1(%arg0: i32, %arg1: i32) -> (i32, i32, i32) {
    %c1_i32 = arith.constant 1 : i32
    %0 = arith.addi %arg1, %c1_i32 : i32
    %c1_i32_0 = arith.constant 1 : i32
    %1 = arith.muli %0, %c1_i32_0 : i32
    %c0_i32 = arith.constant 0 : i32
    %c0_i32_1 = arith.constant 0 : i32
    return %arg0, %c0_i32, %1 : i32, i32, i32
  }
  func.func @transform_2(%arg0: i32, %arg1: i32) -> (i32, i32) {
    %c0_i32 = arith.constant 0 : i32
    %c0_i32_0 = arith.constant 0 : i32
    %c0_i32_1 = arith.constant 0 : i32
    return %c0_i32, %c0_i32_0 : i32, i32
  }
  func.func @transform_3(%arg0: i32, %arg1: i32) -> (i32, i32) {
    %c0_i32 = arith.constant 0 : i32
    %c0_i32_0 = arith.constant 0 : i32
    %c0_i32_1 = arith.constant 0 : i32
    return %c0_i32, %c0_i32_0 : i32, i32
  }
  func.func @transform_4(%arg0: i32, %arg1: i32) -> (i32, i32, i32) {
    %c0_i32 = arith.constant 0 : i32
    %c0_i32_0 = arith.constant 0 : i32
    return %arg0, %c0_i32, %arg1 : i32, i32, i32
  }
  func.func @transform_5(%arg0: i32, %arg1: i32) -> (i32, i32, i32) {
    %c0_i32 = arith.constant 0 : i32
    %c0_i32_0 = arith.constant 0 : i32
    return %arg0, %c0_i32, %arg1 : i32, i32, i32
  }
}

module attributes {stable_mosaic.version = 11 : i64} {
  func.func @_conv1d_kernel(%arg0: i32, %arg1: i32, %arg2: memref<1x8x128xf32, #tpu.memory_space<vmem>>, %arg3: memref<1x8x128xf32, #tpu.memory_space<vmem>>, %arg4: memref<8x40xbf16, #tpu.memory_space<vmem>>, %arg5: memref<8x1xf32, #tpu.memory_space<vmem>>, %arg6: memref<1x8x128xf32, #tpu.memory_space<vmem>>) attributes {dimension_semantics = [#tpu.dimension_semantics<parallel>, #tpu.dimension_semantics<parallel>], iteration_bounds = array<i64: 2, 1>, scalar_prefetch = 0 : i64, scratch_operands = 0 : i64, tpu.core_type = #tpu.core_type<tc>, window_params = [{transform_indices = @transform_0, window_bounds = array<i64: 1, 8, 128>}, {transform_indices = @transform_1, window_bounds = array<i64: 1, 8, 128>}, {pipeline_mode = #tpu.pipeline_mode<synchronous>, transform_indices = @transform_2, window_bounds = array<i64: 8, 40>}, {pipeline_mode = #tpu.pipeline_mode<synchronous>, transform_indices = @transform_3, window_bounds = array<i64: 8, 1>}, {transform_indices = @transform_4, window_bounds = array<i64: 1, 8, 128>}]} {
    %c0 = arith.constant 0 : index
    %c0_0 = arith.constant 0 : index
    %c0_1 = arith.constant 0 : index
    %0 = vector.load %arg2[%c0, %c0_0, %c0_1] : memref<1x8x128xf32, #tpu.memory_space<vmem>>, vector<1x8x128xf32>
    %1 = vector.shape_cast %0 : vector<1x8x128xf32> to vector<8x128xf32>
    %c0_2 = arith.constant 0 : index
    %c0_3 = arith.constant 0 : index
    %c0_4 = arith.constant 0 : index
    %2 = vector.load %arg3[%c0_2, %c0_3, %c0_4] : memref<1x8x128xf32, #tpu.memory_space<vmem>>, vector<1x8x128xf32>
    %3 = vector.shape_cast %2 : vector<1x8x128xf32> to vector<8x128xf32>
    %4 = tpu.concatenate %1, %3 in 1 : vector<8x128xf32>, vector<8x128xf32> -> vector<8x256xf32>
    %cst = arith.constant 0.000000e+00 : f32
    %5 = vector.broadcast %cst : f32 to vector<8x256xf32>
    %6 = arith.cmpf oge, %4, %5 : vector<8x256xf32>
    %cst_5 = arith.constant 1.000000e-01 : f32
    %7 = vector.broadcast %cst_5 : f32 to vector<8x256xf32>
    %8 = arith.mulf %7, %4 : vector<8x256xf32>
    %9 = arith.select %6, %4, %8 : vector<8x256xi1>, vector<8x256xf32>
    %10 = vector.extract_strided_slice %9 {offsets = [0, 0], sizes = [8, 128], strides = [1, 1]} : vector<8x256xf32> to vector<8x128xf32>
    %11 = vector.extract_strided_slice %9 {offsets = [0, 5], sizes = [8, 128], strides = [1, 1]} : vector<8x256xf32> to vector<8x128xf32>
    %12 = vector.extract_strided_slice %9 {offsets = [0, 10], sizes = [8, 128], strides = [1, 1]} : vector<8x256xf32> to vector<8x128xf32>
    %13 = vector.extract_strided_slice %9 {offsets = [0, 15], sizes = [8, 128], strides = [1, 1]} : vector<8x256xf32> to vector<8x128xf32>
    %14 = vector.extract_strided_slice %9 {offsets = [0, 20], sizes = [8, 128], strides = [1, 1]} : vector<8x256xf32> to vector<8x128xf32>
    %15 = tpu.concatenate %10, %11, %12, %13, %14 in 0 : vector<8x128xf32>, vector<8x128xf32>, vector<8x128xf32>, vector<8x128xf32>, vector<8x128xf32> -> vector<40x128xf32>
    %c0_6 = arith.constant 0 : index
    %c0_7 = arith.constant 0 : index
    %16 = vector.load %arg4[%c0_6, %c0_7] : memref<8x40xbf16, #tpu.memory_space<vmem>>, vector<8x40xbf16>
    %17 = arith.truncf %15 : vector<40x128xf32> to vector<40x128xbf16>
    %cst_8 = arith.constant dense<0.000000e+00> : vector<8x128xf32>
    %18 = tpu.matmul %16, %17, %cst_8 {dimension_numbers = #tpu.dot_dimension_numbers<[1], [0], [0], [1], [0, 0, 1, 1], [], []>} : vector<8x40xbf16>, vector<40x128xbf16>, vector<8x128xf32> -> vector<8x128xf32>
    %c0_9 = arith.constant 0 : index
    %c0_10 = arith.constant 0 : index
    %19 = vector.load %arg5[%c0_9, %c0_10] : memref<8x1xf32, #tpu.memory_space<vmem>>, vector<8x1xf32>
    %20 = vector.broadcast %19 : vector<8x1xf32> to vector<8x128xf32>
    %21 = arith.addf %18, %20 : vector<8x128xf32>
    %c0_11 = arith.constant 0 : index
    %c0_12 = arith.constant 0 : index
    %c0_13 = arith.constant 0 : index
    %22 = vector.load %arg6[%c0_11, %c0_12, %c0_13] : memref<1x8x128xf32, #tpu.memory_space<vmem>>, vector<1x8x128xf32>
    %23 = vector.shape_cast %22 : vector<1x8x128xf32> to vector<8x128xf32>
    %24 = vector.shape_cast %21 : vector<8x128xf32> to vector<1x8x128xf32>
    tpu.vector_store %arg6[%c0_11, %c0_12, %c0_13], %24 {strides = array<i32>} : memref<1x8x128xf32, #tpu.memory_space<vmem>>, vector<1x8x128xf32>,
    return
  }
  func.func @transform_0(%arg0: i32, %arg1: i32) -> (i32, i32, i32) {
    %c0_i32 = arith.constant 0 : i32
    %c0_i32_0 = arith.constant 0 : i32
    return %arg0, %c0_i32, %arg1 : i32, i32, i32
  }
  func.func @transform_1(%arg0: i32, %arg1: i32) -> (i32, i32, i32) {
    %c1_i32 = arith.constant 1 : i32
    %0 = arith.addi %arg1, %c1_i32 : i32
    %c1_i32_0 = arith.constant 1 : i32
    %1 = arith.muli %0, %c1_i32_0 : i32
    %c0_i32 = arith.constant 0 : i32
    %c0_i32_1 = arith.constant 0 : i32
    return %arg0, %c0_i32, %1 : i32, i32, i32
  }
  func.func @transform_2(%arg0: i32, %arg1: i32) -> (i32, i32) {
    %c0_i32 = arith.constant 0 : i32
    %c0_i32_0 = arith.constant 0 : i32
    %c0_i32_1 = arith.constant 0 : i32
    return %c0_i32, %c0_i32_0 : i32, i32
  }
  func.func @transform_3(%arg0: i32, %arg1: i32) -> (i32, i32) {
    %c0_i32 = arith.constant 0 : i32
    %c0_i32_0 = arith.constant 0 : i32
    %c0_i32_1 = arith.constant 0 : i32
    return %c0_i32, %c0_i32_0 : i32, i32
  }
  func.func @transform_4(%arg0: i32, %arg1: i32) -> (i32, i32, i32) {
    %c0_i32 = arith.constant 0 : i32
    %c0_i32_0 = arith.constant 0 : i32
    return %arg0, %c0_i32, %arg1 : i32, i32, i32
  }
}

module attributes {stable_mosaic.version = 11 : i64} {
  func.func @_conv1d_kernel(%arg0: i32, %arg1: i32, %arg2: memref<1x8x128xf32, #tpu.memory_space<vmem>>, %arg3: memref<1x8x128xf32, #tpu.memory_space<vmem>>, %arg4: memref<8x40xbf16, #tpu.memory_space<vmem>>, %arg5: memref<8x1xf32, #tpu.memory_space<vmem>>, %arg6: memref<1x8x128xf32, #tpu.memory_space<vmem>>, %arg7: memref<1x8x128xf32, #tpu.memory_space<vmem>>, %arg8: memref<1x8x128xf32, #tpu.memory_space<vmem>>) attributes {dimension_semantics = [#tpu.dimension_semantics<parallel>, #tpu.dimension_semantics<parallel>], iteration_bounds = array<i64: 2, 1>, scalar_prefetch = 0 : i64, scratch_operands = 0 : i64, tpu.core_type = #tpu.core_type<tc>, window_params = [{transform_indices = @transform_0, window_bounds = array<i64: 1, 8, 128>}, {transform_indices = @transform_1, window_bounds = array<i64: 1, 8, 128>}, {pipeline_mode = #tpu.pipeline_mode<synchronous>, transform_indices = @transform_2, window_bounds = array<i64: 8, 40>}, {pipeline_mode = #tpu.pipeline_mode<synchronous>, transform_indices = @transform_3, window_bounds = array<i64: 8, 1>}, {transform_indices = @transform_4, window_bounds = array<i64: 1, 8, 128>}, {transform_indices = @transform_5, window_bounds = array<i64: 1, 8, 128>}, {transform_indices = @transform_6, window_bounds = array<i64: 1, 8, 128>}]} {
    %c0 = arith.constant 0 : index
    %c0_0 = arith.constant 0 : index
    %c0_1 = arith.constant 0 : index
    %0 = vector.load %arg2[%c0, %c0_0, %c0_1] : memref<1x8x128xf32, #tpu.memory_space<vmem>>, vector<1x8x128xf32>
    %1 = vector.shape_cast %0 : vector<1x8x128xf32> to vector<8x128xf32>
    %c0_2 = arith.constant 0 : index
    %c0_3 = arith.constant 0 : index
    %c0_4 = arith.constant 0 : index
    %2 = vector.load %arg3[%c0_2, %c0_3, %c0_4] : memref<1x8x128xf32, #tpu.memory_space<vmem>>, vector<1x8x128xf32>
    %3 = vector.shape_cast %2 : vector<1x8x128xf32> to vector<8x128xf32>
    %4 = tpu.concatenate %1, %3 in 1 : vector<8x128xf32>, vector<8x128xf32> -> vector<8x256xf32>
    %cst = arith.constant 0.000000e+00 : f32
    %5 = vector.broadcast %cst : f32 to vector<8x256xf32>
    %6 = arith.cmpf oge, %4, %5 : vector<8x256xf32>
    %cst_5 = arith.constant 1.000000e-01 : f32
    %7 = vector.broadcast %cst_5 : f32 to vector<8x256xf32>
    %8 = arith.mulf %7, %4 : vector<8x256xf32>
    %9 = arith.select %6, %4, %8 : vector<8x256xi1>, vector<8x256xf32>
    %10 = vector.extract_strided_slice %9 {offsets = [0, 0], sizes = [8, 128], strides = [1, 1]} : vector<8x256xf32> to vector<8x128xf32>
    %11 = vector.extract_strided_slice %9 {offsets = [0, 1], sizes = [8, 128], strides = [1, 1]} : vector<8x256xf32> to vector<8x128xf32>
    %12 = vector.extract_strided_slice %9 {offsets = [0, 2], sizes = [8, 128], strides = [1, 1]} : vector<8x256xf32> to vector<8x128xf32>
    %13 = vector.extract_strided_slice %9 {offsets = [0, 3], sizes = [8, 128], strides = [1, 1]} : vector<8x256xf32> to vector<8x128xf32>
    %14 = vector.extract_strided_slice %9 {offsets = [0, 4], sizes = [8, 128], strides = [1, 1]} : vector<8x256xf32> to vector<8x128xf32>
    %15 = tpu.concatenate %10, %11, %12, %13, %14 in 0 : vector<8x128xf32>, vector<8x128xf32>, vector<8x128xf32>, vector<8x128xf32>, vector<8x128xf32> -> vector<40x128xf32>
    %c0_6 = arith.constant 0 : index
    %c0_7 = arith.constant 0 : index
    %16 = vector.load %arg4[%c0_6, %c0_7] : memref<8x40xbf16, #tpu.memory_space<vmem>>, vector<8x40xbf16>
    %17 = arith.truncf %15 : vector<40x128xf32> to vector<40x128xbf16>
    %cst_8 = arith.constant dense<0.000000e+00> : vector<8x128xf32>
    %18 = tpu.matmul %16, %17, %cst_8 {dimension_numbers = #tpu.dot_dimension_numbers<[1], [0], [0], [1], [0, 0, 1, 1], [], []>} : vector<8x40xbf16>, vector<40x128xbf16>, vector<8x128xf32> -> vector<8x128xf32>
    %c0_9 = arith.constant 0 : index
    %c0_10 = arith.constant 0 : index
    %19 = vector.load %arg5[%c0_9, %c0_10] : memref<8x1xf32, #tpu.memory_space<vmem>>, vector<8x1xf32>
    %20 = vector.broadcast %19 : vector<8x1xf32> to vector<8x128xf32>
    %21 = arith.addf %18, %20 : vector<8x128xf32>
    %c0_11 = arith.constant 0 : index
    %c0_12 = arith.constant 0 : index
    %c0_13 = arith.constant 0 : index
    %22 = vector.load %arg6[%c0_11, %c0_12, %c0_13] : memref<1x8x128xf32, #tpu.memory_space<vmem>>, vector<1x8x128xf32>
    %23 = vector.shape_cast %22 : vector<1x8x128xf32> to vector<8x128xf32>
    %24 = arith.addf %21, %23 : vector<8x128xf32>
    %c0_14 = arith.constant 0 : index
    %c0_15 = arith.constant 0 : index
    %c0_16 = arith.constant 0 : index
    %25 = vector.load %arg7[%c0_14, %c0_15, %c0_16] : memref<1x8x128xf32, #tpu.memory_space<vmem>>, vector<1x8x128xf32>
    %26 = vector.shape_cast %25 : vector<1x8x128xf32> to vector<8x128xf32>
    %27 = arith.addf %24, %26 : vector<8x128xf32>
    %cst_17 = arith.constant 5.000000e-01 : f32
    %28 = vector.broadcast %cst_17 : f32 to vector<8x128xf32>
    %29 = arith.mulf %27, %28 : vector<8x128xf32>
    %c0_18 = arith.constant 0 : index
    %c0_19 = arith.constant 0 : index
    %c0_20 = arith.constant 0 : index
    %30 = vector.load %arg8[%c0_18, %c0_19, %c0_20] : memref<1x8x128xf32, #tpu.memory_space<vmem>>, vector<1x8x128xf32>
    %31 = vector.shape_cast %30 : vector<1x8x128xf32> to vector<8x128xf32>
    %32 = vector.shape_cast %29 : vector<8x128xf32> to vector<1x8x128xf32>
    tpu.vector_store %arg8[%c0_18, %c0_19, %c0_20], %32 {strides = array<i32>} : memref<1x8x128xf32, #tpu.memory_space<vmem>>, vector<1x8x128xf32>,
    return
  }
  func.func @transform_0(%arg0: i32, %arg1: i32) -> (i32, i32, i32) {
    %c0_i32 = arith.constant 0 : i32
    %c0_i32_0 = arith.constant 0 : i32
    return %arg0, %c0_i32, %arg1 : i32, i32, i32
  }
  func.func @transform_1(%arg0: i32, %arg1: i32) -> (i32, i32, i32) {
    %c1_i32 = arith.constant 1 : i32
    %0 = arith.addi %arg1, %c1_i32 : i32
    %c1_i32_0 = arith.constant 1 : i32
    %1 = arith.muli %0, %c1_i32_0 : i32
    %c0_i32 = arith.constant 0 : i32
    %c0_i32_1 = arith.constant 0 : i32
    return %arg0, %c0_i32, %1 : i32, i32, i32
  }
  func.func @transform_2(%arg0: i32, %arg1: i32) -> (i32, i32) {
    %c0_i32 = arith.constant 0 : i32
    %c0_i32_0 = arith.constant 0 : i32
    %c0_i32_1 = arith.constant 0 : i32
    return %c0_i32, %c0_i32_0 : i32, i32
  }
  func.func @transform_3(%arg0: i32, %arg1: i32) -> (i32, i32) {
    %c0_i32 = arith.constant 0 : i32
    %c0_i32_0 = arith.constant 0 : i32
    %c0_i32_1 = arith.constant 0 : i32
    return %c0_i32, %c0_i32_0 : i32, i32
  }
  func.func @transform_4(%arg0: i32, %arg1: i32) -> (i32, i32, i32) {
    %c0_i32 = arith.constant 0 : i32
    %c0_i32_0 = arith.constant 0 : i32
    return %arg0, %c0_i32, %arg1 : i32, i32, i32
  }
  func.func @transform_5(%arg0: i32, %arg1: i32) -> (i32, i32, i32) {
    %c0_i32 = arith.constant 0 : i32
    %c0_i32_0 = arith.constant 0 : i32
    return %arg0, %c0_i32, %arg1 : i32, i32, i32
  }
  func.func @transform_6(%arg0: i32, %arg1: i32) -> (i32, i32, i32) {
    %c0_i32 = arith.constant 0 : i32
    %c0_i32_0 = arith.constant 0 : i32
    return %arg0, %c0_i32, %arg1 : i32, i32, i32
  }
}

module attributes {stable_mosaic.version = 11 : i64} {
  func.func @_conv1d_kernel(%arg0: i32, %arg1: i32, %arg2: memref<1x8x128xf32, #tpu.memory_space<vmem>>, %arg3: memref<1x8x128xf32, #tpu.memory_space<vmem>>, %arg4: memref<56x1xbf16, #tpu.memory_space<vmem>>, %arg5: memref<1x1xf32, #tpu.memory_space<vmem>>, %arg6: memref<1x1x128xf32, #tpu.memory_space<vmem>>) attributes {dimension_semantics = [#tpu.dimension_semantics<parallel>, #tpu.dimension_semantics<parallel>], iteration_bounds = array<i64: 2, 1>, scalar_prefetch = 0 : i64, scratch_operands = 0 : i64, tpu.core_type = #tpu.core_type<tc>, window_params = [{transform_indices = @transform_0, window_bounds = array<i64: 1, 8, 128>}, {transform_indices = @transform_1, window_bounds = array<i64: 1, 8, 128>}, {pipeline_mode = #tpu.pipeline_mode<synchronous>, transform_indices = @transform_2, window_bounds = array<i64: 56, 1>}, {pipeline_mode = #tpu.pipeline_mode<synchronous>, transform_indices = @transform_3, window_bounds = array<i64: 1, 1>}, {transform_indices = @transform_4, window_bounds = array<i64: 1, 1, 128>}]} {
    %c0 = arith.constant 0 : index
    %c0_0 = arith.constant 0 : index
    %c0_1 = arith.constant 0 : index
    %0 = vector.load %arg2[%c0, %c0_0, %c0_1] : memref<1x8x128xf32, #tpu.memory_space<vmem>>, vector<1x8x128xf32>
    %1 = vector.shape_cast %0 : vector<1x8x128xf32> to vector<8x128xf32>
    %c0_2 = arith.constant 0 : index
    %c0_3 = arith.constant 0 : index
    %c0_4 = arith.constant 0 : index
    %2 = vector.load %arg3[%c0_2, %c0_3, %c0_4] : memref<1x8x128xf32, #tpu.memory_space<vmem>>, vector<1x8x128xf32>
    %3 = vector.shape_cast %2 : vector<1x8x128xf32> to vector<8x128xf32>
    %4 = tpu.concatenate %1, %3 in 1 : vector<8x128xf32>, vector<8x128xf32> -> vector<8x256xf32>
    %cst = arith.constant 0.000000e+00 : f32
    %5 = vector.broadcast %cst : f32 to vector<8x256xf32>
    %6 = arith.cmpf oge, %4, %5 : vector<8x256xf32>
    %cst_5 = arith.constant 0.00999999977 : f32
    %7 = vector.broadcast %cst_5 : f32 to vector<8x256xf32>
    %8 = arith.mulf %7, %4 : vector<8x256xf32>
    %9 = arith.select %6, %4, %8 : vector<8x256xi1>, vector<8x256xf32>
    %10 = vector.extract_strided_slice %9 {offsets = [0, 0], sizes = [8, 128], strides = [1, 1]} : vector<8x256xf32> to vector<8x128xf32>
    %11 = vector.extract_strided_slice %9 {offsets = [0, 1], sizes = [8, 128], strides = [1, 1]} : vector<8x256xf32> to vector<8x128xf32>
    %12 = vector.extract_strided_slice %9 {offsets = [0, 2], sizes = [8, 128], strides = [1, 1]} : vector<8x256xf32> to vector<8x128xf32>
    %13 = vector.extract_strided_slice %9 {offsets = [0, 3], sizes = [8, 128], strides = [1, 1]} : vector<8x256xf32> to vector<8x128xf32>
    %14 = vector.extract_strided_slice %9 {offsets = [0, 4], sizes = [8, 128], strides = [1, 1]} : vector<8x256xf32> to vector<8x128xf32>
    %15 = vector.extract_strided_slice %9 {offsets = [0, 5], sizes = [8, 128], strides = [1, 1]} : vector<8x256xf32> to vector<8x128xf32>
    %16 = vector.extract_strided_slice %9 {offsets = [0, 6], sizes = [8, 128], strides = [1, 1]} : vector<8x256xf32> to vector<8x128xf32>
    %17 = tpu.concatenate %10, %11, %12, %13, %14, %15, %16 in 0 : vector<8x128xf32>, vector<8x128xf32>, vector<8x128xf32>, vector<8x128xf32>, vector<8x128xf32>, vector<8x128xf32>, vector<8x128xf32> -> vector<56x128xf32>
    %c0_6 = arith.constant 0 : index
    %c0_7 = arith.constant 0 : index
    %18 = vector.load %arg4[%c0_6, %c0_7] : memref<56x1xbf16, #tpu.memory_space<vmem>>, vector<56x1xbf16>
    %19 = arith.extf %18 : vector<56x1xbf16> to vector<56x1xf32>
    %20 = vector.broadcast %19 : vector<56x1xf32> to vector<56x128xf32>
    %21 = arith.mulf %20, %17 : vector<56x128xf32>
    %cst_8 = arith.constant dense<0.000000e+00> : vector<128xf32>
    %22 = vector.multi_reduction <add>, %21, %cst_8 [0] : vector<56x128xf32> to vector<128xf32>
    %23 = vector.shape_cast %22 : vector<128xf32> to vector<1x128xf32>
    %c0_9 = arith.constant 0 : index
    %c0_10 = arith.constant 0 : index
    %24 = vector.load %arg5[%c0_9, %c0_10] : memref<1x1xf32, #tpu.memory_space<vmem>>, vector<1x1xf32>
    %25 = vector.broadcast %24 : vector<1x1xf32> to vector<1x128xf32>
    %26 = arith.addf %23, %25 : vector<1x128xf32>
    %27 = math.tanh %26 : vector<1x128xf32>
    %c0_11 = arith.constant 0 : index
    %c0_12 = arith.constant 0 : index
    %c0_13 = arith.constant 0 : index
    %28 = vector.load %arg6[%c0_11, %c0_12, %c0_13] : memref<1x1x128xf32, #tpu.memory_space<vmem>>, vector<1x1x128xf32>
    %29 = vector.shape_cast %28 : vector<1x1x128xf32> to vector<1x128xf32>
    %30 = vector.shape_cast %27 : vector<1x128xf32> to vector<1x1x128xf32>
    tpu.vector_store %arg6[%c0_11, %c0_12, %c0_13], %30 {strides = array<i32>} : memref<1x1x128xf32, #tpu.memory_space<vmem>>, vector<1x1x128xf32>,
    return
  }
  func.func @transform_0(%arg0: i32, %arg1: i32) -> (i32, i32, i32) {
    %c0_i32 = arith.constant 0 : i32
    %c0_i32_0 = arith.constant 0 : i32
    return %arg0, %c0_i32, %arg1 : i32, i32, i32
  }
  func.func @transform_1(%arg0: i32, %arg1: i32) -> (i32, i32, i32) {
    %c1_i32 = arith.constant 1 : i32
    %0 = arith.addi %arg1, %c1_i32 : i32
    %c1_i32_0 = arith.constant 1 : i32
    %1 = arith.muli %0, %c1_i32_0 : i32
    %c0_i32 = arith.constant 0 : i32
    %c0_i32_1 = arith.constant 0 : i32
    return %arg0, %c0_i32, %1 : i32, i32, i32
  }
  func.func @transform_2(%arg0: i32, %arg1: i32) -> (i32, i32) {
    %c0_i32 = arith.constant 0 : i32
    %c0_i32_0 = arith.constant 0 : i32
    %c0_i32_1 = arith.constant 0 : i32
    return %c0_i32, %c0_i32_0 : i32, i32
  }
  func.func @transform_3(%arg0: i32, %arg1: i32) -> (i32, i32) {
    %c0_i32 = arith.constant 0 : i32
    %c0_i32_0 = arith.constant 0 : i32
    %c0_i32_1 = arith.constant 0 : i32
    return %c0_i32, %c0_i32_0 : i32, i32
  }
  func.func @transform_4(%arg0: i32, %arg1: i32) -> (i32, i32, i32) {
    %c0_i32 = arith.constant 0 : i32
    %c0_i32_0 = arith.constant 0 : i32
    return %arg0, %c0_i32, %arg1 : i32, i32, i32
  }
}

</mosaic_0001>

<bundles_post_ra>
// kernel: tile.13
= control target key start
LH: loop header
LB: loop body
LE: loop exit
PB: predicated region body
PF: predicated region fallthrough
CT: control target
= control target key end

     0   :  { %s22_s0 = inlined_call_operand.vmem [shape: f32[16], index: 0, kind: input, shape index: {}]   ;;  %s23_s1 = inlined_call_operand.vmem [shape: f32[2,16], index: 1, kind: output, shape index: {}]  }
   0x1   :  { %v4_v0 = vld [vmem:[%s22_s0] ss:$0 sm:$0xff] }
   0x2   :  { %5 = vst [vmem:[%s23_s1] sm:$0x3] %v4_v0 }

// kernel: tile.0
= control target key start
LH: loop header
LB: loop body
LE: loop exit
PB: predicated region body
PF: predicated region fallthrough
CT: control target
= control target key end

     0   :  { %s130_s8 = smov 127   ;;  %s131_s9 = smov 123   ;;  %vm7_vm0 = vcmask 7168   ;;  %s221_s0 = inlined_call_operand.vmem [shape: f32[2,16], index: 0, kind: input, shape index: {}]   ;;  %s222_s1 = inlined_call_operand.vmem [shape: f32[32,1], index: 1, kind: output, shape index: {}]  }
   0x1   :  { %v4_v0 = vld [vmem:[%s221_s0] sm:$0x3]  ;;  %s129_s0 = smov 125   ;;  %s132_s10 = smov 124  }
   0x2   :  { %5 = vst [vmem:[#allocation0] sm:$0x3] %v4_v0  ;;  %s133_s11 = smov 126   ;;  %s134_s12 = smov 122  }
   0x3   :  { %s135_s13 = smov 120   ;;  %s136_s14 = smov 121  }
   0x4   :  { %s137_s15 = smov 119   ;;  %s138_s16 = smov 117  }
   0x5   :  { %s139_s17 = smov 118   ;;  %s140_s18 = smov 116  }
   0x6   :  { %s141_s19 = smov 114   ;;  %s142_s20 = smov 115  }
   0x7   :  { %s143_s21 = smov 113  }
   0x9   :  { %v21_v1 = vld [vmem:[#allocation0] sm:$0x3]  }
   0xa   :  { %v9_v2 = vld [vmem:[#allocation0] sm:$0x3]   ;;  %22 = vrot.lane.b32.xlu1 %v21_v1, %s129_s0 }
   0xb   :  { %10 = vrot.lane.b32.xlu0 %v9_v2, %s130_s8  ;;  %v33_v3 = vld [vmem:[#allocation0] sm:$0x3]  }
   0xc   :  { %34 = vrot.lane.b32.xlu2 %v33_v3, %s131_s9  ;;  %v27_v4 = vld [vmem:[#allocation0] sm:$0x3]  }
   0xd   :  { %v15_v5 = vld [vmem:[#allocation0] sm:$0x3]  }
   0xe   :  { %v39_v6 = vld [vmem:[#allocation0] sm:$0x3]  }
   0xf   :  { %v51_v7 = vld [vmem:[#allocation0] sm:$0x3]  }
  0x10   :  { %v45_v8 = vld [vmem:[#allocation0] sm:$0x3]  }
  0x11   :  { %v57_v9 = vld [vmem:[#allocation0] sm:$0x3]  }
  0x12   :  { %28 = vrot.lane.b32.xlu1 %v27_v4, %s132_s10  ;;  %v69_v10 = vld [vmem:[#allocation0] sm:$0x3]  }
  0x13   :  { %16 = vrot.lane.b32.xlu0 %v15_v5, %s133_s11  ;;  %v63_v11 = vld [vmem:[#allocation0] sm:$0x3]  }
  0x14   :  { %40 = vrot.lane.b32.xlu2 %v39_v6, %s134_s12  ;;  %v75_v12 = vld [vmem:[#allocation0] sm:$0x3]  }
  0x15   :  { %v87_v13 = vld [vmem:[#allocation0] sm:$0x3]  }
  0x16   :  { %v81_v14 = vld [vmem:[#allocation0] sm:$0x3]  }
  0x17   :  { %v93_v15 = vld [vmem:[#allocation0] sm:$0x3]  }
  0x18   :  { %v6_v21 = vld [vmem:[#allocation0] sm:$0x3]  }
  0x19   :  { %8 = vst.msk [vmem:[%s222_s1] ss:$16 sm:$0x3] %vm7_vm0, %v6_v21  }
  0x1a   :  { %52 = vrot.lane.b32.xlu1 %v51_v7, %s135_s13 }
  0x1b   :  { %46 = vrot.lane.b32.xlu0 %v45_v8, %s136_s14 }
  0x1c   :  { %58 = vrot.lane.b32.xlu2 %v57_v9, %s137_s15 }
  0x22   :  { %70 = vrot.lane.b32.xlu1 %v69_v10, %s138_s16 }
  0x23   :  { %64 = vrot.lane.b32.xlu0 %v63_v11, %s139_s17 }
  0x24   :  { %76 = vrot.lane.b32.xlu2 %v75_v12, %s140_s18 }
  0x2a   :  { %88 = vrot.lane.b32.xlu1 %v87_v13, %s141_s19 }
  0x2b   :  { %82 = vrot.lane.b32.xlu0 %v81_v14, %s142_s20 }
  0x2c   :  { %94 = vrot.lane.b32.xlu2 %v93_v15, %s143_s21 }
  0x66   :  { %v35_v16 = vpop.permute.xlu2 %34  }
  0x67   :  { %103 = vst.msk [vmem:[%s222_s1 + $0x5] ss:$16 sm:$0x3] %vm7_vm0, %v35_v16  }
  0x6e   :  { %v41_v17 = vpop.permute.xlu2 %40  }
  0x6f   :  { %104 = vst.msk [vmem:[%s222_s1 + $0x6] ss:$16 sm:$0x3] %vm7_vm0, %v41_v17  }
  0x76   :  { %v59_v18 = vpop.permute.xlu2 %58  }
  0x77   :  { %107 = vst.msk [vmem:[%s222_s1 + $0x9] ss:$16 sm:$0x3] %vm7_vm0, %v59_v18  }
  0x7c   :  { %v23_v19 = vpop.permute.xlu1 %22  }
  0x7d   :  { %v11_v20 = vpop.permute.xlu0 %10   ;;  %101 = vst.msk [vmem:[%s222_s1 + $0x3] ss:$16 sm:$0x3] %vm7_vm0, %v23_v19  }
  0x7e   :  { %99 = vst.msk [vmem:[%s222_s1 + $0x1] ss:$16 sm:$0x3] %vm7_vm0, %v11_v20   ;;  %v77_v22 = vpop.permute.xlu2 %76  }
  0x7f   :  { %110 = vst.msk [vmem:[%s222_s1 + $0xc] ss:$16 sm:$0x3] %vm7_vm0, %v77_v22  }
  0x84   :  { %v29_v23 = vpop.permute.xlu1 %28  }
  0x85   :  { %v17_v24 = vpop.permute.xlu0 %16   ;;  %102 = vst.msk [vmem:[%s222_s1 + $0x4] ss:$16 sm:$0x3] %vm7_vm0, %v29_v23  }
  0x86   :  { %100 = vst.msk [vmem:[%s222_s1 + $0x2] ss:$16 sm:$0x3] %vm7_vm0, %v17_v24   ;;  %v95_v25 = vpop.permute.xlu2 %94  }
  0x87   :  { %113 = vst.msk [vmem:[%s222_s1 + $0xf] ss:$16 sm:$0x3] %vm7_vm0, %v95_v25  }
  0x8c   :  { %v53_v26 = vpop.permute.xlu1 %52  }
  0x8d   :  { %v47_v27 = vpop.permute.xlu0 %46   ;;  %106 = vst.msk [vmem:[%s222_s1 + $0x8] ss:$16 sm:$0x3] %vm7_vm0, %v53_v26  }
  0x8e   :  { %105 = vst.msk [vmem:[%s222_s1 + $0x7] ss:$16 sm:$0x3] %vm7_vm0, %v47_v27  }
  0x94   :  { %v71_v28 = vpop.permute.xlu1 %70  }
  0x95   :  { %v65_v29 = vpop.permute.xlu0 %64   ;;  %109 = vst.msk [vmem:[%s222_s1 + $0xb] ss:$16 sm:$0x3] %vm7_vm0, %v71_v28  }
  0x96   :  { %108 = vst.msk [vmem:[%s222_s1 + $0xa] ss:$16 sm:$0x3] %vm7_vm0, %v65_v29  }
  0x9c   :  { %v89_v30 = vpop.permute.xlu1 %88  }
  0x9d   :  { %v83_v31 = vpop.permute.xlu0 %82   ;;  %112 = vst.msk [vmem:[%s222_s1 + $0xe] ss:$16 sm:$0x3] %vm7_vm0, %v89_v30  }
  0x9e   :  { %111 = vst.msk [vmem:[%s222_s1 + $0xd] ss:$16 sm:$0x3] %vm7_vm0, %v83_v31  }

// kernel: generator_forward.28
= control target key start
LH: loop header
LB: loop body
LE: loop exit
PB: predicated region body
PF: predicated region fallthrough
CT: control target
= control target key end

     0   :  { %s645_s15 = smov 0   ;;  %s647_s16 = smov 0   ;;  %s707_s0 = inlined_call_operand.vmem [shape: f32[2,8,256], index: 0, kind: input, shape index: {}, may-alias: {0,1}]   ;;  %s708_s1 = inlined_call_operand.vmem [shape: f32[2,8,256], index: 1, kind: input, shape index: {}, may-alias: {0,1}]   ;;  %s709_s2 = inlined_call_operand.vmem [shape: bf16[32,56], index: 2, kind: input, shape index: {}]   ;;  %s710_s3 = inlined_call_operand.vmem [shape: f32[32,1], index: 3, kind: input, shape index: {}]   ;;  %s711_s4 = inlined_call_operand.vmem [shape: f32[2,32,128], index: 4, kind: output, shape index: {}]  }
   0x1   :  { %s649_s17 = smov 0  }
   0x2 LB: > { %s26_s18 = sadd.s32 1, %s607_s16  ;;  %p495_p0 = scmp.ge.s32.totalorder %s611_s17, 1  ;;  %s611_s17 = sphi %s649_s17, %s14_s17   ;;  %s607_s16 = sphi %s647_s16, %s713_s16   ;;  %s603_s15 = sphi %s645_s15, %s712_s15  }
   0x3   : > { %p28_p1 = scmp.ge.s32.totalorder %s26_s18, 2  ;;  %p200_p2 = scmp.lt.s32.totalorder %s611_s17, 3 }
   0x5   : > { %s715_s18 = smov (%p28_p1, %s26_s18), 0  ;;  %p201_p3 = pnand %p495_p0, %p200_p2 }
   0x6   : > { %p241_p4 = scmp.lt.s32.totalorder (!%p201_p3), %s603_s15, 1  ;;  %s613_s27 = smov (!%p201_p3), 123  }
   0x7   : > { %204 = sbr.rel (%p201_p3) target bundleno = 296 (0x128), region = 36  ;;  %s614_s28 = smov (!%p201_p3), 122  }
   0x8   : > { %s615_s29 = smov (!%p201_p3), 125   ;;  %s616_s30 = smov (!%p201_p3), 126  }
   0x9   : > { %s617_s5 = smov (!%p201_p3), 124   ;;  %s618_s6 = smov (!%p201_p3), 127  }
   0xc   : > { %s717_s15 = smov (!%p241_p4, %s603_s15), 1  ;;  %v323_v3 = vld [vmem:[%s710_s3 + $0x8] sm:$0xff]  ;;  %v322_v4 = vld [vmem:[%s710_s3] sm:$0xff]  ;;  %v619_v5 = vmov 0   ;;  %v324_v6 = vld [vmem:[%s710_s3 + $0x10] sm:$0xff]  ;;  %vm311_vm0 = vcmask 998400  }
   0xd   : > { %s514_s19 = sshll.u32 %s717_s15, 4  ;;  %587 = vset.pattern.permute.xlu1 %v619_v5  ;;  %586 = vset.pattern.permute.xlu0 %v619_v5  ;;  %v325_v10 = vld [vmem:[%s710_s3 + $0x18] sm:$0xff]  ;;  %vm363_vm1 = vcmask 1043456   ;;  %vm297_vm2 = vcmask 1014784   ;;  %vm304_vm3 = vcmask 1006592   ;;  %vm283_vm4 = vcmask 1031168  }
   0xe   : > { %s248_s22 = scalar_lea.vmem %s707_s0, %s514_s19  ;;  %s516_s23 = sadd.s32 8, %s514_s19  ;;  %588 = vset.pattern.permute.xlu2 %v619_v5  ;;  %vm290_vm5 = vcmask 1022976   ;;  %vm276_vm6 = vcmask 1039360   ;;  %v518_v37 = vld [vmem:[%s709_s2] sm:$0xff]  ;;  %v519_v38 = vld [vmem:[%s709_s2 + $0x8] sm:$0xff]  ;;  %vm356_vm7 = vcmask 457728  }
   0xf   : > { %s257_s26 = scalar_lea.vmem %s708_s1, %s516_s23  ;;  %v672_v0 = vld [vmem:[%s248_s22] sm:$0xff]  ;;  %s517_s23 = sshll.u32 %s717_s15, 5 }
  0x10   : > { %v269_v1 = vld [vmem:[%s257_s26] sm:$0xff]  ;;  %s266_s26 = scalar_lea.vmem %s711_s4, %s517_s23 }
  0x11   : > { %v566_v2 = vpack.i.bf16 %v269_v1, %v672_v0 }
  0x13   : > { %567 = vrot.lane.b32.xlu1 %v566_v2, %s613_s27  ;;  %557 = vrot.lane.b32.xlu0 %v566_v2, %s614_s28 }
  0x14   : > { %577 = vrot.lane.b32.xlu2 %v566_v2, %s615_s29 }
  0x1b   : > { %572 = vrot.lane.b32.xlu1 %v566_v2, %s616_s30  ;;  %562 = vrot.lane.b32.xlu0 %v566_v2, %s617_s5 }
  0x1c   : > { %582 = vrot.lane.b32.xlu2 %v566_v2, %s618_s6 }
  0x23   : > { %333 = vperm.xlu1 %587, %v323_v3   ;;  %328 = vperm.xlu0 %586, %v322_v4  }
  0x24   : > { %338 = vperm.xlu2 %588, %v324_v6  }
  0x2b   : > { %343 = vperm.xlu1 %587, %v325_v10  }
  0x6e   : > { %v578_v7 = vpop.permute.xlu2 %577 }
  0x6f   : > { %v580_v19 = vunpack.i.h.bf16 %v578_v7  ;;  %v579_v20 = vunpack.i.l.bf16 %v578_v7 }
  0x71   : > { %v291_v33 = vsel %vm290_vm5, %v579_v20, %v580_v19 }
  0x76   : > { %v583_v18 = vpop.permute.xlu2 %582 }
  0x77   : > { %v585_v29 = vunpack.i.h.bf16 %v583_v18  ;;  %v584_v30 = vunpack.i.l.bf16 %v583_v18 }
  0x79   : > { %v277_v34 = vsel %vm276_vm6, %v584_v30, %v585_v29 }
  0x7a   : > { %v318_v36 = vpack.c.bf16 %v277_v34, %v672_v0 }
  0x7e   : > { %v339_v40 = vpop.permute.xlu2 %338 }
  0x85   : > { %v568_v8 = vpop.permute.xlu1 %567  ;;  %v558_v9 = vpop.permute.xlu0 %557 }
  0x86   : > { %v560_v11 = vunpack.i.h.bf16 %v558_v9  ;;  %v559_v12 = vunpack.i.l.bf16 %v558_v9  ;;  %v570_v16 = vunpack.i.h.bf16 %v568_v8  ;;  %v569_v17 = vunpack.i.l.bf16 %v568_v8 }
  0x88   : > { %v312_v13 = vsel %vm311_vm0, %v559_v12, %v560_v11  ;;  %v305_v28 = vsel %vm304_vm3, %v569_v17, %v570_v16 }
  0x89   : > { %v321_v14 = vpack.c.bf16 %v312_v13, %v312_v13 }
  0x8b   : > { %v365_v15 = vsel %vm363_vm1, %v321_v14, 0 }
  0x8c   : > { %371 = vmatpush.bf16.msra.mxu0 %v365_v15  ;;  %521 = vmatpush.bf16.msra.mxu1 %v365_v15 }
  0x8d   : > { %v573_v21 = vpop.permute.xlu1 %572  ;;  %v563_v22 = vpop.permute.xlu0 %562 }
  0x8e   : > { %v575_v23 = vunpack.i.h.bf16 %v573_v21  ;;  %v574_v24 = vunpack.i.l.bf16 %v573_v21  ;;  %v565_v25 = vunpack.i.h.bf16 %v563_v22  ;;  %v564_v26 = vunpack.i.l.bf16 %v563_v22 }
  0x90   : > { %v298_v27 = vsel %vm297_vm2, %v564_v26, %v565_v25  ;;  %v284_v32 = vsel %vm283_vm4, %v574_v24, %v575_v23 }
  0x91   : > { %v320_v31 = vpack.c.bf16 %v305_v28, %v298_v27  ;;  %v319_v35 = vpack.c.bf16 %v291_v33, %v284_v32 }
  0x93   : > { %372 = vmatpush.bf16.msra.mxu0 %v320_v31  ;;  %522 = vmatpush.bf16.msra.mxu1 %v320_v31 }
  0x95   : > { %v334_v39 = vpop.permute.xlu1 %333  ;;  %v329_v41 = vpop.permute.xlu0 %328 }
  0x97   : > { %373 = vmatpush.bf16.msra.mxu0 %v319_v35  ;;  %523 = vmatpush.bf16.msra.mxu1 %v319_v35 }
  0x9b   : > { %374 = vmatpush.bf16.msra.mxu0 %v318_v36  ;;  %524 = vmatpush.bf16.msra.mxu1 %v318_v36 }
  0x9d   : > { %v344_v46 = vpop.permute.xlu1 %343 }
  0x9e   : > { %510 = vmatmul.msk.bf16.vlgmr.msra.gmra.mxu0 %vm356_vm7, %v518_v37  ;;  %511 = vmatmul.msk.bf16.vlgmr.msra.gmra.mxu1 %vm356_vm7, %v519_v38 }
 0x11b   : > { %v376_v42 = vpop.f32.mrf.mxu0  ;;  %v381_v43 = vpop.f32.mrf.mxu1 }
 0x11c   : > { %v377_v44 = vadd.f32 %v376_v42, %v329_v41  ;;  %v382_v45 = vadd.f32 %v381_v43, %v339_v40 }
 0x11e   : > { %386 = vst [vmem:[%s266_s26] sm:$0xff] %v377_v44 }
 0x11f   : > { %388 = vst [vmem:[%s266_s26 + $0x10] sm:$0xff] %v382_v45 }
 0x123   : > { %v378_v47 = vpop.f32.mrf.mxu0  ;;  %v383_v48 = vpop.f32.mrf.mxu1 }
 0x124   : > { %v379_v49 = vadd.f32 %v378_v47, %v334_v39  ;;  %v384_v50 = vadd.f32 %v383_v48, %v344_v46 }
 0x126   : > { %387 = vst [vmem:[%s266_s26 + $0x8] sm:$0xff] %v379_v49 }
 0x127   : > { %389 = vst [vmem:[%s266_s26 + $0x18] sm:$0xff] %v384_v50 }
 0x128 PF: > { %s14_s17 = sadd.s32 1, %s611_s17   ;;  %s712_s15 = smov %s607_s16 }
 0x129   : > { %p11_p5 = scmp.ge.s32.totalorder %s14_s17, 4   ;;  %s713_s16 = smov %s715_s18 }
 0x12b   :  { %13 = sbr.rel (!%p11_p5) target bundleno = 2 (0x2), region = 69 }

// kernel: generator_forward.29
= control target key start
LH: loop header
LB: loop body
LE: loop exit
PB: predicated region body
PF: predicated region fallthrough
CT: control target
= control target key end

     0   :  { %s811_s15 = smov 0   ;;  %s813_s16 = smov 0   ;;  %s932_s0 = inlined_call_operand.vmem [shape: f32[2,32,256], index: 0, kind: input, shape index: {}, may-alias: {0,1}]   ;;  %s933_s1 = inlined_call_operand.vmem [shape: f32[2,32,256], index: 1, kind: input, shape index: {}, may-alias: {0,1}]   ;;  %s934_s2 = inlined_call_operand.vmem [shape: bf16[32,96], index: 2, kind: input, shape index: {}]   ;;  %s935_s3 = inlined_call_operand.vmem [shape: f32[32,1], index: 3, kind: input, shape index: {}]   ;;  %s936_s4 = inlined_call_operand.vmem [shape: f32[2,32,128], index: 4, kind: output, shape index: {}]  }
   0x1   :  { %s815_s17 = smov 0   ;;  %s817_s18 = smov 0  }
   0x2   :  { %s819_s19 = smov 0  }
   0x3 LB: > { %s26_s20 = sadd.s32 1, %s777_s18  ;;  %p42_p1 = scmp.ne.s32.totalorder %s769_s16, %s765_s15  ;;  %s781_s19 = sphi %s819_s19, %s14_s19   ;;  %s777_s18 = sphi %s817_s18, %s941_s18   ;;  %s773_s17 = sphi %s815_s17, %s940_s17   ;;  %s769_s16 = sphi %s813_s16, %s939_s16   ;;  %s765_s15 = sphi %s811_s15, %s938_s15  }
   0x4   : > { %p28_p0 = scmp.ge.s32.totalorder %s26_s20, 2  ;;  %p43_p2 = scmp.eq.s32.totalorder %s781_s19, 0 }
   0x5   : > { %s35_s23 = sadd.s32 1, %s769_s16  ;;  %p618_p5 = scmp.ge.s32.totalorder %s781_s19, 2 }
   0x6   : > { %s943_s20 = smov (%p28_p0, %s26_s20), 0  ;;  %p842_p3 = por %p43_p2, %p42_p1 }
   0x7   : > { %s30_s22 = ssub.s32 %s777_s18, %s943_s20  ;;  %174 = sbr.rel (%p618_p5) target bundleno = 28 (0x1c), region = 24 }
   0x8   : > { %p33_p4 = scmp.eq.s32.totalorder %s30_s22, 0 }
   0xa   : > { %s850_s24 = scalar_select %p33_p4, %s769_s16, %s35_s23  }
   0xc   : > { %177 = sbr.rel (!%p842_p3) target bundleno = 20 (0x14), region = 28  ;;  %s179_s25 = sand.u32 (%p842_p3), 1, %s769_s16  }
   0xd   : > { %s646_s26 = sshll.u32 (%p842_p3), %s777_s18, 6  ;;  %s619_s27 = sshll.u32 (%p842_p3), %s179_s25, 5 }
   0xe   : > { %s185_s30 = scalar_lea.vmem (%p842_p3), %s932_s0, %s646_s26  ;;  %s181_s5 = scalar_lea.vmem (%p842_p3), [#allocation2], %s619_s27 }
   0xf   : > { %v220_v0 = vld [vmem:[%s185_s30] sm:$0xff] (%p842_p3)  ;;  %v222_v1 = vld [vmem:[%s185_s30 + $0x10] sm:$0xff] (%p842_p3) }
  0x10   : > { %v224_v2 = vld [vmem:[%s185_s30 + $0x20] sm:$0xff] (%p842_p3)  ;;  %221 = vst [vmem:[%s181_s5] sm:$0xff] (%p842_p3), %v220_v0  ;;  %v226_v3 = vld [vmem:[%s185_s30 + $0x30] sm:$0xff] (%p842_p3) }
  0x11   : > { %223 = vst [vmem:[%s181_s5 + $0x8] sm:$0xff] %v222_v1 }
  0x12   : > { %225 = vst [vmem:[%s181_s5 + $0x10] sm:$0xff] %v224_v2 }
  0x13   : > { %227 = vst [vmem:[%s181_s5 + $0x18] sm:$0xff] %v226_v3 }
  0x14 PF: > { %233 = sbr.rel (!%p842_p3) target bundleno = 28 (0x1c), region = 66  ;;  %s235_s6 = sand.u32 (%p842_p3), 1, %s769_s16  }
  0x15   : > { %s647_s7 = sshll.u32 (%p842_p3), %s777_s18, 6  ;;  %s622_s8 = sshll.u32 (%p842_p3), %s235_s6, 5 }
  0x16   : > { %s547_s11 = scalar_lea.vmem (%p842_p3), %s933_s1, %s647_s7  ;;  %s237_s12 = scalar_lea.vmem (%p842_p3), [#allocation3], %s622_s8 }
  0x17   : > { %v625_v4 = vld [vmem:[%s547_s11 + $0x8] sm:$0xff] (%p842_p3)  ;;  %v626_v5 = vld [vmem:[%s547_s11 + $0x18] sm:$0xff] (%p842_p3) }
  0x18   : > { %v627_v6 = vld [vmem:[%s547_s11 + $0x28] sm:$0xff] (%p842_p3)  ;;  %278 = vst [vmem:[%s237_s12] sm:$0xff] (%p842_p3), %v625_v4  ;;  %v628_v7 = vld [vmem:[%s547_s11 + $0x38] sm:$0xff] (%p842_p3) }
  0x19   : > { %280 = vst [vmem:[%s237_s12 + $0x8] sm:$0xff] %v626_v5 }
  0x1a   : > { %282 = vst [vmem:[%s237_s12 + $0x10] sm:$0xff] %v627_v6 }
  0x1b   : > { %284 = vst [vmem:[%s237_s12 + $0x18] sm:$0xff] %v628_v7 }
  0x1c PF: > { %p629_p6 = scmp.ge.s32.totalorder %s781_s19, 1  ;;  %p289_p7 = scmp.lt.s32.totalorder %s781_s19, 3 }
  0x1e   : > { %p290_p8 = pnand %p629_p6, %p289_p7 }
  0x1f   : > { %s296_s13 = sand.u32 (!%p290_p8), 1, %s765_s15   ;;  %s783_s15 = smov (!%p290_p8), 126  }
  0x20   : > { %293 = sbr.rel (%p290_p8) target bundleno = 333 (0x14d), region = 104  ;;  %s630_s14 = sshll.u32 (!%p290_p8), %s296_s13, 5 }
  0x21   : > { %s298_s21 = scalar_lea.vmem (!%p290_p8), [#allocation2], %s630_s14  ;;  %s305_s22 = scalar_lea.vmem (!%p290_p8), [#allocation3], %s630_s14 }
  0x22   : > { %s784_s23 = smov (!%p290_p8), 127   ;;  %p336_p9 = scmp.lt.s32.totalorder (!%p290_p8), %s773_s17, 1 }
  0x25   : > { %v347_v8 = vld [vmem:[%s298_s21 + $0x10] sm:$0xff]  ;;  %v345_v10 = vld [vmem:[%s298_s21] sm:$0xff]  ;;  %v348_v15 = vld [vmem:[%s298_s21 + $0x18] sm:$0xff]  ;;  %v785_v41 = vmov 0   ;;  %vm426_vm8 = vcmask 1031168   ;;  %vm401_vm9 = vcmask 1039360  }
  0x26   : > { %v351_v9 = vld [vmem:[%s305_s22 + $0x10] sm:$0xff]  ;;  %vm357_vm0 = vcmp.ge.f32.partialorder %v347_v8, 0.0  ;;  %v365_v11 = vmul.f32 0.1, %v347_v8  ;;  %v349_v13 = vld [vmem:[%s305_s22] sm:$0xff]  ;;  %vm353_vm2 = vcmp.ge.f32.partialorder %v345_v10, 0.0  ;;  %742 = vset.pattern.permute.xlu1 %v785_v41  ;;  %741 = vset.pattern.permute.xlu0 %v785_v41 }
  0x27   : > { %vm358_vm1 = vcmp.ge.f32.partialorder %v351_v9, 0.0  ;;  %v366_v12 = vmul.f32 0.1, %v351_v9  ;;  %v361_v14 = vmul.f32 0.1, %v345_v10  ;;  %v352_v16 = vld [vmem:[%s305_s22 + $0x18] sm:$0xff]  ;;  %740 = vset.pattern.permute.xlu2 %v785_v41 }
  0x28   : > { %v870_v17 = vsel %vm357_vm0, %v347_v8, %v365_v11  ;;  %vm354_vm3 = vcmp.ge.f32.partialorder %v349_v13, 0.0  ;;  %v362_v19 = vmul.f32 0.1, %v349_v13  ;;  %v346_v20 = vld [vmem:[%s298_s21 + $0x8] sm:$0xff]  ;;  %vm359_vm4 = vcmp.ge.f32.partialorder %v348_v15, 0.0  ;;  %v447_v39 = vld [vmem:[%s935_s3 + $0x10] sm:$0xff] }
  0x29   : > { %v374_v18 = vsel %vm358_vm1, %v351_v9, %v366_v12  ;;  %v350_v21 = vld [vmem:[%s305_s22 + $0x8] sm:$0xff]  ;;  %v873_v23 = vsel %vm353_vm2, %v345_v10, %v361_v14  ;;  %vm360_vm5 = vcmp.ge.f32.partialorder %v352_v16, 0.0  ;;  %v367_v25 = vmul.f32 0.1, %v348_v15  ;;  %v445_v42 = vld [vmem:[%s935_s3] sm:$0xff]  ;;  %v448_v62 = vld [vmem:[%s935_s3 + $0x18] sm:$0xff] }
  0x2a   : > { %v700_v22 = vpack.i.bf16 %v374_v18, %v870_v17  ;;  %v370_v24 = vsel %vm354_vm3, %v349_v13, %v362_v19  ;;  %v368_v26 = vmul.f32 0.1, %v352_v16  ;;  %vm355_vm6 = vcmp.ge.f32.partialorder %v346_v20, 0.0  ;;  %v446_v40 = vld [vmem:[%s935_s3 + $0x8] sm:$0xff]  ;;  %s945_s17 = smov (!%p336_p9, %s773_s17), 1 }
  0x2b   : > { %v710_v27 = vpack.i.bf16 %v370_v24, %v873_v23  ;;  %vm356_vm7 = vcmp.ge.f32.partialorder %v350_v21, 0.0  ;;  %v363_v28 = vmul.f32 0.1, %v346_v20  ;;  %v876_v29 = vsel %vm359_vm4, %v348_v15, %v367_v25  ;;  %v649_v15 = vld [vmem:[%s934_s2] sm:$0xff]  ;;  %s648_s11 = sshll.u32 %s945_s17, 5 }
  0x2c   : > { %701 = vrot.lane.b32.xlu0 %v700_v22, %s783_s15  ;;  %v376_v30 = vsel %vm360_vm5, %v352_v16, %v368_v26  ;;  %v364_v31 = vmul.f32 0.1, %v350_v21  ;;  %721 = vrot.lane.b32.xlu2 %v700_v22, %s784_s23  ;;  %v440_v13 = vpack.c.bf16 %v876_v29, %v870_v17  ;;  %v650_v16 = vld [vmem:[%s934_s2 + $0x8] sm:$0xff]  ;;  %vm479_vm10 = vcmask 785408   ;;  %s343_s14 = scalar_lea.vmem %s936_s4, %s648_s11 }
  0x2d   : > { %711 = vrot.lane.b32.xlu1 %v710_v27, %s783_s15  ;;  %v878_v32 = vsel %vm355_vm6, %v346_v20, %v363_v28  ;;  %v705_v34 = vpack.i.bf16 %v376_v30, %v876_v29 }
  0x2e   : > { %v372_v33 = vsel %vm356_vm7, %v350_v21, %v364_v31  ;;  %v439_v14 = vpack.c.bf16 %v878_v32, %v873_v23 }
  0x2f   : > { %v715_v35 = vpack.i.bf16 %v372_v33, %v878_v32 }
  0x34   : > { %706 = vrot.lane.b32.xlu0 %v705_v34, %s783_s15  ;;  %726 = vrot.lane.b32.xlu2 %v705_v34, %s784_s23 }
  0x35   : > { %716 = vrot.lane.b32.xlu1 %v715_v35, %s783_s15 }
  0x3c   : > { %731 = vrot.lane.b32.xlu0 %v710_v27, %s784_s23  ;;  %451 = vperm.xlu2 %740, %v445_v42  }
  0x3d   : > { %736 = vrot.lane.b32.xlu1 %v715_v35, %s784_s23 }
  0x44   : > { %456 = vperm.xlu0 %741, %v446_v40   ;;  %466 = vperm.xlu2 %740, %v448_v62  }
  0x45   : > { %461 = vperm.xlu1 %742, %v447_v39  }
  0x86   : > { %v722_v36 = vpop.permute.xlu2 %721 }
  0x87   : > { %v724_v56 = vunpack.i.h.bf16 %v722_v36  ;;  %v723_v58 = vunpack.i.l.bf16 %v722_v36 }
  0x89   : > { %v404_v4 = vsel %vm401_vm9, %v723_v58, %v724_v56 }
  0x8e   : > { %v727_v50 = vpop.permute.xlu2 %726 }
  0x8f   : > { %v729_v59 = vunpack.i.h.bf16 %v727_v50  ;;  %v728_v60 = vunpack.i.l.bf16 %v727_v50 }
  0x91   : > { %v405_v5 = vsel %vm401_vm9, %v728_v60, %v729_v59 }
  0x92   : > { %v442_v10 = vpack.c.bf16 %v405_v5, %v404_v4 }
  0x96   : > { %v452_v17 = vpop.permute.xlu2 %451 }
  0x9e   : > { %v702_v37 = vpop.permute.xlu0 %701  ;;  %v467_v24 = vpop.permute.xlu2 %466 }
  0x9f   : > { %v712_v38 = vpop.permute.xlu1 %711  ;;  %v704_v43 = vunpack.i.h.bf16 %v702_v37  ;;  %v703_v44 = vunpack.i.l.bf16 %v702_v37 }
  0xa0   : > { %v714_v48 = vunpack.i.h.bf16 %v712_v38  ;;  %v713_v49 = vunpack.i.l.bf16 %v712_v38 }
  0xa1   : > { %v429_v54 = vsel %vm426_vm8, %v703_v44, %v704_v43 }
  0xa2   : > { %v427_v63 = vsel %vm426_vm8, %v713_v49, %v714_v48 }
  0xa6   : > { %v707_v45 = vpop.permute.xlu0 %706 }
  0xa7   : > { %v709_v46 = vunpack.i.h.bf16 %v707_v45  ;;  %v708_v47 = vunpack.i.l.bf16 %v707_v45  ;;  %v717_v51 = vpop.permute.xlu1 %716 }
  0xa8   : > { %v719_v52 = vunpack.i.h.bf16 %v717_v51  ;;  %v718_v53 = vunpack.i.l.bf16 %v717_v51 }
  0xa9   : > { %v430_v55 = vsel %vm426_vm8, %v708_v47, %v709_v46 }
  0xaa   : > { %v444_v57 = vpack.c.bf16 %v430_v55, %v429_v54  ;;  %v428_v61 = vsel %vm426_vm8, %v718_v53, %v719_v52 }
  0xab   : > { %v443_v0 = vpack.c.bf16 %v428_v61, %v427_v63 }
  0xac   : > { %488 = vmatpush.bf16.msra.mxu0 %v444_v57  ;;  %651 = vmatpush.bf16.msra.mxu1 %v444_v57 }
  0xae   : > { %v732_v1 = vpop.permute.xlu0 %731 }
  0xaf   : > { %v734_v2 = vunpack.i.h.bf16 %v732_v1  ;;  %v733_v3 = vunpack.i.l.bf16 %v732_v1  ;;  %v737_v6 = vpop.permute.xlu1 %736 }
  0xb0   : > { %489 = vmatpush.bf16.msra.mxu0 %v443_v0  ;;  %652 = vmatpush.bf16.msra.mxu1 %v443_v0  ;;  %v739_v7 = vunpack.i.h.bf16 %v737_v6  ;;  %v738_v8 = vunpack.i.l.bf16 %v737_v6 }
  0xb1   : > { %v402_v9 = vsel %vm401_vm9, %v733_v3, %v734_v2 }
  0xb2   : > { %v403_v11 = vsel %vm401_vm9, %v738_v8, %v739_v7 }
  0xb3   : > { %v441_v12 = vpack.c.bf16 %v403_v11, %v402_v9 }
  0xb4   : > { %490 = vmatpush.bf16.msra.mxu0 %v442_v10  ;;  %653 = vmatpush.bf16.msra.mxu1 %v442_v10 }
  0xb6   : > { %v457_v23 = vpop.permute.xlu0 %456 }
  0xb7   : > { %v462_v18 = vpop.permute.xlu1 %461 }
  0xb8   : > { %491 = vmatpush.bf16.msra.mxu0 %v441_v12  ;;  %654 = vmatpush.bf16.msra.mxu1 %v441_v12 }
  0xbc   : > { %492 = vmatpush.bf16.msra.mxu0 %v440_v13  ;;  %655 = vmatpush.bf16.msra.mxu1 %v440_v13 }
  0xc0   : > { %493 = vmatpush.bf16.msra.mxu0 %v439_v14  ;;  %656 = vmatpush.bf16.msra.mxu1 %v439_v14 }
  0xc3   : > { %642 = vmatmul.msk.bf16.vlgmr.msra.gmra.mxu0 %vm479_vm10, %v649_v15  ;;  %643 = vmatmul.msk.bf16.vlgmr.msra.gmra.mxu1 %vm479_vm10, %v650_v16 }
 0x140   : > { %v495_v19 = vpop.f32.mrf.mxu0  ;;  %v500_v20 = vpop.f32.mrf.mxu1 }
 0x141   : > { %v496_v21 = vadd.f32 %v495_v19, %v452_v17  ;;  %v501_v22 = vadd.f32 %v500_v20, %v462_v18 }
 0x143   : > { %505 = vst [vmem:[%s343_s14] sm:$0xff] %v496_v21 }
 0x144   : > { %507 = vst [vmem:[%s343_s14 + $0x10] sm:$0xff] %v501_v22 }
 0x148   : > { %v497_v25 = vpop.f32.mrf.mxu0  ;;  %v502_v26 = vpop.f32.mrf.mxu1 }
 0x149   : > { %v498_v27 = vadd.f32 %v497_v25, %v457_v23  ;;  %v503_v28 = vadd.f32 %v502_v26, %v467_v24 }
 0x14b   : > { %506 = vst [vmem:[%s343_s14 + $0x8] sm:$0xff] %v498_v27 }
 0x14c   : > { %508 = vst [vmem:[%s343_s14 + $0x18] sm:$0xff] %v503_v28 }
 0x14d PF: > { %s14_s19 = sadd.s32 1, %s781_s19   ;;  %s938_s15 = smov %s769_s16 }
 0x14e   : > { %p11_p10 = scmp.ge.s32.totalorder %s14_s19, 4   ;;  %s939_s16 = smov %s850_s24 }
 0x14f   : > { %s940_s17 = smov %s777_s18  ;;  %s941_s18 = smov %s943_s20 }
 0x150   :  { %13 = sbr.rel (!%p11_p10) target bundleno = 3 (0x3), region = 155 }

// kernel: generator_forward.30
= control target key start
LH: loop header
LB: loop body
LE: loop exit
PB: predicated region body
PF: predicated region fallthrough
CT: control target
= control target key end

     0   :  { %s684_s15 = smov 0   ;;  %s686_s16 = smov 0   ;;  %s772_s0 = inlined_call_operand.vmem [shape: f32[2,16,256], index: 0, kind: input, shape index: {}, may-alias: {0,1}]   ;;  %s773_s1 = inlined_call_operand.vmem [shape: f32[2,16,256], index: 1, kind: input, shape index: {}, may-alias: {0,1}]   ;;  %s774_s2 = inlined_call_operand.vmem [shape: bf16[16,48], index: 2, kind: input, shape index: {}]   ;;  %s775_s3 = inlined_call_operand.vmem [shape: f32[16,1], index: 3, kind: input, shape index: {}]   ;;  %s776_s4 = inlined_call_operand.vmem [shape: f32[2,16,128], index: 4, kind: output, shape index: {}]  }
   0x1   :  { %s688_s17 = smov 0   ;;  %s690_s18 = smov 0  }
   0x2   :  { %s692_s19 = smov 0  }
   0x3 LB: > { %s26_s20 = sadd.s32 1, %s650_s18  ;;  %p42_p1 = scmp.ne.s32.totalorder %s642_s16, %s638_s15  ;;  %s654_s19 = sphi %s692_s19, %s14_s19   ;;  %s650_s18 = sphi %s690_s18, %s781_s18   ;;  %s646_s17 = sphi %s688_s17, %s780_s17   ;;  %s642_s16 = sphi %s686_s16, %s779_s16   ;;  %s638_s15 = sphi %s684_s15, %s778_s15  }
   0x4   : > { %p28_p0 = scmp.ge.s32.totalorder %s26_s20, 2  ;;  %p43_p2 = scmp.eq.s32.totalorder %s654_s19, 0 }
   0x5   : > { %s35_s23 = sadd.s32 1, %s642_s16  ;;  %p526_p5 = scmp.ge.s32.totalorder %s654_s19, 2 }
   0x6   : > { %s783_s20 = smov (%p28_p0, %s26_s20), 0  ;;  %p715_p3 = por %p43_p2, %p42_p1 }
   0x7   : > { %s30_s22 = ssub.s32 %s650_s18, %s783_s20  ;;  %174 = sbr.rel (%p526_p5) target bundleno = 24 (0x18), region = 24 }
   0x8   : > { %p33_p4 = scmp.eq.s32.totalorder %s30_s22, 0 }
   0xa   : > { %s723_s24 = scalar_select %p33_p4, %s642_s16, %s35_s23  }
   0xc   : > { %177 = sbr.rel (!%p715_p3) target bundleno = 18 (0x12), region = 28  ;;  %s179_s25 = sand.u32 (%p715_p3), 1, %s642_s16  }
   0xd   : > { %s547_s26 = sshll.u32 (%p715_p3), %s650_s18, 5  ;;  %s527_s27 = sshll.u32 (%p715_p3), %s179_s25, 4 }
   0xe   : > { %s185_s30 = scalar_lea.vmem (%p715_p3), %s772_s0, %s547_s26  ;;  %s181_s5 = scalar_lea.vmem (%p715_p3), [#allocation2], %s527_s27 }
   0xf   : > { %v216_v0 = vld [vmem:[%s185_s30] sm:$0xff] (%p715_p3)  ;;  %v218_v1 = vld [vmem:[%s185_s30 + $0x10] sm:$0xff] (%p715_p3) }
  0x10   : > { %217 = vst [vmem:[%s181_s5] sm:$0xff] (%p715_p3), %v216_v0 }
  0x11   : > { %219 = vst [vmem:[%s181_s5 + $0x8] sm:$0xff] %v218_v1 }
  0x12 PF: > { %225 = sbr.rel (!%p715_p3) target bundleno = 24 (0x18), region = 66  ;;  %s227_s6 = sand.u32 (%p715_p3), 1, %s642_s16  }
  0x13   : > { %s548_s7 = sshll.u32 (%p715_p3), %s650_s18, 5  ;;  %s530_s8 = sshll.u32 (%p715_p3), %s227_s6, 4 }
  0x14   : > { %s455_s11 = scalar_lea.vmem (%p715_p3), %s773_s1, %s548_s7  ;;  %s229_s12 = scalar_lea.vmem (%p715_p3), [#allocation3], %s530_s8 }
  0x15   : > { %v533_v2 = vld [vmem:[%s455_s11 + $0x8] sm:$0xff] (%p715_p3)  ;;  %v534_v3 = vld [vmem:[%s455_s11 + $0x18] sm:$0xff] (%p715_p3) }
  0x16   : > { %266 = vst [vmem:[%s229_s12] sm:$0xff] (%p715_p3), %v533_v2 }
  0x17   : > { %268 = vst [vmem:[%s229_s12 + $0x8] sm:$0xff] %v534_v3 }
  0x18 PF: > { %p535_p6 = scmp.ge.s32.totalorder %s654_s19, 1  ;;  %p273_p7 = scmp.lt.s32.totalorder %s654_s19, 3 }
  0x1a   : > { %p274_p8 = pnand %p535_p6, %p273_p7 }
  0x1b   : > { %s280_s13 = sand.u32 (!%p274_p8), 1, %s638_s15   ;;  %s656_s23 = smov (!%p274_p8), 127  }
  0x1c   : > { %277 = sbr.rel (%p274_p8) target bundleno = 316 (0x13c), region = 104  ;;  %s536_s14 = sshll.u32 (!%p274_p8), %s280_s13, 4 }
  0x1d   : > { %s282_s21 = scalar_lea.vmem (!%p274_p8), [#allocation2], %s536_s14  ;;  %s289_s22 = scalar_lea.vmem (!%p274_p8), [#allocation3], %s536_s14 }
  0x1e   : > { %s657_s15 = smov (!%p274_p8), 126   ;;  %p320_p9 = scmp.lt.s32.totalorder (!%p274_p8), %s646_s17, 1 }
  0x21   : > { %v329_v4 = vld [vmem:[%s282_s21] sm:$0xff]  ;;  %v330_v6 = vld [vmem:[%s282_s21 + $0x8] sm:$0xff]  ;;  %v658_v19 = vmov 0   ;;  %vm370_vm4 = vcmask 1031168   ;;  %vm357_vm5 = vcmask 1039360   ;;  %vm397_vm6 = vcmask 392192  }
  0x22   : > { %v331_v5 = vld [vmem:[%s289_s22] sm:$0xff]  ;;  %v332_v7 = vld [vmem:[%s289_s22 + $0x8] sm:$0xff]  ;;  %vm333_vm0 = vcmp.ge.f32.partialorder %v329_v4, 0.0  ;;  %v337_v8 = vmul.f32 0.1, %v329_v4  ;;  %vm335_vm2 = vcmp.ge.f32.partialorder %v330_v6, 0.0  ;;  %614 = vset.pattern.permute.xlu2 %v658_v19  ;;  %615 = vset.pattern.permute.xlu0 %v658_v19 }
  0x23   : > { %vm334_vm1 = vcmp.ge.f32.partialorder %v331_v5, 0.0  ;;  %v338_v9 = vmul.f32 0.1, %v331_v5  ;;  %v339_v11 = vmul.f32 0.1, %v330_v6  ;;  %vm336_vm3 = vcmp.ge.f32.partialorder %v332_v7, 0.0 }
  0x24   : > { %v341_v10 = vsel %vm333_vm0, %v329_v4, %v337_v8  ;;  %v340_v12 = vmul.f32 0.1, %v332_v7  ;;  %v380_v18 = vld [vmem:[%s775_s3] sm:$0xff]  ;;  %v381_v22 = vld [vmem:[%s775_s3 + $0x8] sm:$0xff]  ;;  %s785_s17 = smov (!%p320_p9, %s646_s17), 1 }
  0x25   : > { %v342_v13 = vsel %vm334_vm1, %v331_v5, %v338_v9  ;;  %v343_v15 = vsel %vm335_vm2, %v330_v6, %v339_v11  ;;  %384 = vperm.xlu2 %614, %v380_v18   ;;  %v550_v40 = vld [vmem:[%s774_s2] sm:$0xff]  ;;  %s549_s5 = sshll.u32 %s785_s17, 4 }
  0x26   : > { %v604_v14 = vpack.i.bf16 %v342_v13, %v341_v10  ;;  %v344_v16 = vsel %vm336_vm3, %v332_v7, %v340_v12  ;;  %v377_v39 = vpack.c.bf16 %v343_v15, %v341_v10  ;;  %s327_s8 = scalar_lea.vmem %s776_s4, %s549_s5 }
  0x27   : > { %v609_v17 = vpack.i.bf16 %v344_v16, %v343_v15 }
  0x28   : > { %605 = vrot.lane.b32.xlu1 %v604_v14, %s656_s23  ;;  %595 = vrot.lane.b32.xlu0 %v604_v14, %s657_s15 }
  0x2d   : > { %389 = vperm.xlu2 %614, %v381_v22  }
  0x30   : > { %610 = vrot.lane.b32.xlu1 %v609_v17, %s656_s23  ;;  %600 = vrot.lane.b32.xlu0 %v609_v17, %s657_s15 }
  0x7f   : > { %v385_v41 = vpop.permute.xlu2 %384 }
  0x87   : > { %v390_v44 = vpop.permute.xlu2 %389 }
  0x9a   : > { %v606_v20 = vpop.permute.xlu1 %605  ;;  %v596_v21 = vpop.permute.xlu0 %595 }
  0x9b   : > { %v598_v23 = vunpack.i.h.bf16 %v596_v21  ;;  %v597_v24 = vunpack.i.l.bf16 %v596_v21  ;;  %v608_v31 = vunpack.i.h.bf16 %v606_v20  ;;  %v607_v32 = vunpack.i.l.bf16 %v606_v20 }
  0x9d   : > { %v371_v33 = vsel %vm370_vm4, %v597_v24, %v598_v23  ;;  %v358_v37 = vsel %vm357_vm5, %v607_v32, %v608_v31 }
  0xa2   : > { %v611_v25 = vpop.permute.xlu1 %610  ;;  %v601_v26 = vpop.permute.xlu0 %600 }
  0xa3   : > { %v613_v27 = vunpack.i.h.bf16 %v611_v25  ;;  %v612_v28 = vunpack.i.l.bf16 %v611_v25  ;;  %v603_v29 = vunpack.i.h.bf16 %v601_v26  ;;  %v602_v30 = vunpack.i.l.bf16 %v601_v26 }
  0xa5   : > { %v372_v34 = vsel %vm370_vm4, %v602_v30, %v603_v29  ;;  %v359_v36 = vsel %vm357_vm5, %v612_v28, %v613_v27 }
  0xa6   : > { %v379_v35 = vpack.c.bf16 %v372_v34, %v371_v33  ;;  %v378_v38 = vpack.c.bf16 %v359_v36, %v358_v37 }
  0xa8   : > { %406 = vmatpush.bf16.msra.mxu0 %v379_v35 }
  0xac   : > { %407 = vmatpush.bf16.msra.mxu0 %v378_v38 }
  0xb0   : > { %408 = vmatpush.bf16.msra.mxu0 %v377_v39 }
  0xb3   : > { %544 = vmatmul.msk.bf16.vlgmr.msra.gmra.mxu0 %vm397_vm6, %v550_v40 }
 0x130   : > { %v410_v42 = vpop.f32.mrf.mxu0 }
 0x131   : > { %v411_v43 = vadd.f32 %v410_v42, %v385_v41 }
 0x133   : > { %415 = vst [vmem:[%s327_s8] sm:$0xff] %v411_v43 }
 0x138   : > { %v412_v45 = vpop.f32.mrf.mxu0 }
 0x139   : > { %v413_v46 = vadd.f32 %v412_v45, %v390_v44 }
 0x13b   : > { %416 = vst [vmem:[%s327_s8 + $0x8] sm:$0xff] %v413_v46 }
 0x13c PF: > { %s14_s19 = sadd.s32 1, %s654_s19   ;;  %s778_s15 = smov %s642_s16 }
 0x13d   : > { %p11_p10 = scmp.ge.s32.totalorder %s14_s19, 4   ;;  %s779_s16 = smov %s723_s24 }
 0x13e   : > { %s780_s17 = smov %s650_s18  ;;  %s781_s18 = smov %s783_s20 }
 0x13f   :  { %13 = sbr.rel (!%p11_p10) target bundleno = 3 (0x3), region = 155 }

// kernel: generator_forward.31
= control target key start
LH: loop header
LB: loop body
LE: loop exit
PB: predicated region body
PF: predicated region fallthrough
CT: control target
= control target key end

     0   :  { %s772_s18 = smov 0   ;;  %s774_s19 = smov 0   ;;  %s863_s0 = inlined_call_operand.vmem [shape: f32[2,16,256], index: 0, kind: input, shape index: {}, may-alias: {0,1}]   ;;  %s864_s1 = inlined_call_operand.vmem [shape: f32[2,16,256], index: 1, kind: input, shape index: {}, may-alias: {0,1}]   ;;  %s865_s2 = inlined_call_operand.vmem [shape: bf16[16,48], index: 2, kind: input, shape index: {}]   ;;  %s866_s3 = inlined_call_operand.vmem [shape: f32[16,1], index: 3, kind: input, shape index: {}]   ;;  %s867_s4 = inlined_call_operand.vmem [shape: f32[2,16,128], index: 4, kind: input, shape index: {}]   ;;  %s868_s5 = inlined_call_operand.vmem [shape: f32[2,16,128], index: 5, kind: output, shape index: {}]  }
   0x1   :  { %s776_s20 = smov 0   ;;  %s778_s21 = smov 0  }
   0x2   :  { %s780_s22 = smov 0  }
   0x3 LB: > { %s27_s23 = sadd.s32 1, %s733_s21  ;;  %p43_p1 = scmp.ne.s32.totalorder %s725_s19, %s721_s18  ;;  %s737_s22 = sphi %s780_s22, %s15_s22   ;;  %s733_s21 = sphi %s778_s21, %s873_s21   ;;  %s729_s20 = sphi %s776_s20, %s872_s20   ;;  %s725_s19 = sphi %s774_s19, %s871_s19   ;;  %s721_s18 = sphi %s772_s18, %s870_s18  }
   0x4   : > { %p29_p0 = scmp.ge.s32.totalorder %s27_s23, 2  ;;  %p44_p2 = scmp.eq.s32.totalorder %s737_s22, 0 }
   0x5   : > { %s36_s26 = sadd.s32 1, %s725_s19  ;;  %p606_p5 = scmp.ge.s32.totalorder %s737_s22, 2 }
   0x6   : > { %s875_s23 = smov (%p29_p0, %s27_s23), 0  ;;  %p803_p3 = por %p44_p2, %p43_p1 }
   0x7   : > { %s31_s25 = ssub.s32 %s733_s21, %s875_s23  ;;  %203 = sbr.rel (%p606_p5) target bundleno = 24 (0x18), region = 24 }
   0x8   : > { %p34_p4 = scmp.eq.s32.totalorder %s31_s25, 0 }
   0xa   : > { %s811_s27 = scalar_select %p34_p4, %s725_s19, %s36_s26  }
   0xc   : > { %206 = sbr.rel (!%p803_p3) target bundleno = 18 (0x12), region = 28  ;;  %s208_s28 = sand.u32 (%p803_p3), 1, %s725_s19  }
   0xd   : > { %s629_s29 = sshll.u32 (%p803_p3), %s733_s21, 5  ;;  %s607_s30 = sshll.u32 (%p803_p3), %s208_s28, 4 }
   0xe   : > { %s214_s8 = scalar_lea.vmem (%p803_p3), %s863_s0, %s629_s29  ;;  %s210_s9 = scalar_lea.vmem (%p803_p3), [#allocation2], %s607_s30 }
   0xf   : > { %v245_v0 = vld [vmem:[%s214_s8] sm:$0xff] (%p803_p3)  ;;  %v247_v1 = vld [vmem:[%s214_s8 + $0x10] sm:$0xff] (%p803_p3) }
  0x10   : > { %246 = vst [vmem:[%s210_s9] sm:$0xff] (%p803_p3), %v245_v0 }
  0x11   : > { %248 = vst [vmem:[%s210_s9 + $0x8] sm:$0xff] %v247_v1 }
  0x12 PF: > { %254 = sbr.rel (!%p803_p3) target bundleno = 24 (0x18), region = 66  ;;  %s256_s10 = sand.u32 (%p803_p3), 1, %s725_s19  }
  0x13   : > { %s630_s11 = sshll.u32 (%p803_p3), %s733_s21, 5  ;;  %s610_s12 = sshll.u32 (%p803_p3), %s256_s10, 4 }
  0x14   : > { %s517_s15 = scalar_lea.vmem (%p803_p3), %s864_s1, %s630_s11  ;;  %s258_s16 = scalar_lea.vmem (%p803_p3), [#allocation3], %s610_s12 }
  0x15   : > { %v613_v2 = vld [vmem:[%s517_s15 + $0x8] sm:$0xff] (%p803_p3)  ;;  %v614_v3 = vld [vmem:[%s517_s15 + $0x18] sm:$0xff] (%p803_p3) }
  0x16   : > { %295 = vst [vmem:[%s258_s16] sm:$0xff] (%p803_p3), %v613_v2 }
  0x17   : > { %297 = vst [vmem:[%s258_s16 + $0x8] sm:$0xff] %v614_v3 }
  0x18 PF: > { %p615_p6 = scmp.ge.s32.totalorder %s737_s22, 1  ;;  %p313_p7 = scmp.lt.s32.totalorder %s737_s22, 3 }
  0x1a   : > { %p314_p8 = pnand %p615_p6, %p313_p7 }
  0x1b   : > { %s320_s17 = sand.u32 (!%p314_p8), 1, %s721_s18   ;;  %s739_s28 = smov (!%p314_p8), 127  }
  0x1c   : > { %317 = sbr.rel (%p314_p8) target bundleno = 318 (0x13e), region = 108  ;;  %s616_s24 = sshll.u32 (!%p314_p8), %s320_s17, 4 }
  0x1d   : > { %s322_s25 = scalar_lea.vmem (!%p314_p8), [#allocation2], %s616_s24  ;;  %s329_s26 = scalar_lea.vmem (!%p314_p8), [#allocation3], %s616_s24 }
  0x1e   : > { %s740_s18 = smov (!%p314_p8), 126   ;;  %p370_p9 = scmp.lt.s32.totalorder (!%p314_p8), %s729_s20, 1 }
  0x21   : > { %v387_v4 = vld [vmem:[%s322_s25] sm:$0xff]  ;;  %v388_v6 = vld [vmem:[%s322_s25 + $0x8] sm:$0xff]  ;;  %v741_v19 = vmov 0   ;;  %vm428_vm4 = vcmask 1031168   ;;  %vm415_vm5 = vcmask 1039360   ;;  %vm455_vm6 = vcmask 392192  }
  0x22   : > { %v389_v5 = vld [vmem:[%s329_s26] sm:$0xff]  ;;  %v390_v7 = vld [vmem:[%s329_s26 + $0x8] sm:$0xff]  ;;  %vm391_vm0 = vcmp.ge.f32.partialorder %v387_v4, 0.0  ;;  %v395_v8 = vmul.f32 0.1, %v387_v4  ;;  %vm393_vm2 = vcmp.ge.f32.partialorder %v388_v6, 0.0  ;;  %697 = vset.pattern.permute.xlu2 %v741_v19  ;;  %698 = vset.pattern.permute.xlu0 %v741_v19 }
  0x23   : > { %vm392_vm1 = vcmp.ge.f32.partialorder %v389_v5, 0.0  ;;  %v396_v9 = vmul.f32 0.1, %v389_v5  ;;  %v397_v11 = vmul.f32 0.1, %v388_v6  ;;  %vm394_vm3 = vcmp.ge.f32.partialorder %v390_v7, 0.0 }
  0x24   : > { %v399_v10 = vsel %vm391_vm0, %v387_v4, %v395_v8  ;;  %v398_v12 = vmul.f32 0.1, %v390_v7  ;;  %v438_v18 = vld [vmem:[%s866_s3] sm:$0xff]  ;;  %v439_v22 = vld [vmem:[%s866_s3 + $0x8] sm:$0xff]  ;;  %s877_s20 = smov (!%p370_p9, %s729_s20), 1 }
  0x25   : > { %v400_v13 = vsel %vm392_vm1, %v389_v5, %v396_v9  ;;  %v401_v15 = vsel %vm393_vm2, %v388_v6, %v397_v11  ;;  %442 = vperm.xlu2 %697, %v438_v18   ;;  %v633_v40 = vld [vmem:[%s865_s2] sm:$0xff]  ;;  %s631_s10 = sshll.u32 %s877_s20, 4 }
  0x26   : > { %v687_v14 = vpack.i.bf16 %v400_v13, %v399_v10  ;;  %v402_v16 = vsel %vm394_vm3, %v390_v7, %v398_v12  ;;  %v435_v39 = vpack.c.bf16 %v401_v15, %v399_v10  ;;  %s377_s13 = scalar_lea.vmem %s867_s4, %s631_s10  ;;  %s385_s16 = scalar_lea.vmem %s868_s5, %s631_s10 }
  0x27   : > { %v692_v17 = vpack.i.bf16 %v402_v16, %v401_v15  ;;  %v473_v43 = vld [vmem:[%s377_s13] sm:$0xff]  ;;  %v474_v48 = vld [vmem:[%s377_s13 + $0x8] sm:$0xff] }
  0x28   : > { %688 = vrot.lane.b32.xlu1 %v687_v14, %s739_s28  ;;  %678 = vrot.lane.b32.xlu0 %v687_v14, %s740_s18 }
  0x2d   : > { %447 = vperm.xlu2 %697, %v439_v22  }
  0x30   : > { %693 = vrot.lane.b32.xlu1 %v692_v17, %s739_s28  ;;  %683 = vrot.lane.b32.xlu0 %v692_v17, %s740_s18 }
  0x7f   : > { %v443_v41 = vpop.permute.xlu2 %442 }
  0x87   : > { %v448_v46 = vpop.permute.xlu2 %447 }
  0x9a   : > { %v689_v20 = vpop.permute.xlu1 %688  ;;  %v679_v21 = vpop.permute.xlu0 %678 }
  0x9b   : > { %v681_v23 = vunpack.i.h.bf16 %v679_v21  ;;  %v680_v24 = vunpack.i.l.bf16 %v679_v21  ;;  %v691_v31 = vunpack.i.h.bf16 %v689_v20  ;;  %v690_v32 = vunpack.i.l.bf16 %v689_v20 }
  0x9d   : > { %v429_v33 = vsel %vm428_vm4, %v680_v24, %v681_v23  ;;  %v416_v37 = vsel %vm415_vm5, %v690_v32, %v691_v31 }
  0xa2   : > { %v694_v25 = vpop.permute.xlu1 %693  ;;  %v684_v26 = vpop.permute.xlu0 %683 }
  0xa3   : > { %v696_v27 = vunpack.i.h.bf16 %v694_v25  ;;  %v695_v28 = vunpack.i.l.bf16 %v694_v25  ;;  %v686_v29 = vunpack.i.h.bf16 %v684_v26  ;;  %v685_v30 = vunpack.i.l.bf16 %v684_v26 }
  0xa5   : > { %v430_v34 = vsel %vm428_vm4, %v685_v30, %v686_v29  ;;  %v417_v36 = vsel %vm415_vm5, %v695_v28, %v696_v27 }
  0xa6   : > { %v437_v35 = vpack.c.bf16 %v430_v34, %v429_v33  ;;  %v436_v38 = vpack.c.bf16 %v417_v36, %v416_v37 }
  0xa8   : > { %464 = vmatpush.bf16.msra.mxu0 %v437_v35 }
  0xac   : > { %465 = vmatpush.bf16.msra.mxu0 %v436_v38 }
  0xb0   : > { %466 = vmatpush.bf16.msra.mxu0 %v435_v39 }
  0xb3   : > { %626 = vmatmul.msk.bf16.vlgmr.msra.gmra.mxu0 %vm455_vm6, %v633_v40 }
 0x130   : > { %v468_v42 = vpop.f32.mrf.mxu0 }
 0x131   : > { %v469_v44 = vadd.f32 %v468_v42, %v443_v41 }
 0x133   : > { %v475_v45 = vadd.f32 %v473_v43, %v469_v44 }
 0x135   : > { %477 = vst [vmem:[%s385_s16] sm:$0xff] %v475_v45 }
 0x138   : > { %v470_v47 = vpop.f32.mrf.mxu0 }
 0x139   : > { %v471_v49 = vadd.f32 %v470_v47, %v448_v46 }
 0x13b   : > { %v476_v50 = vadd.f32 %v474_v48, %v471_v49 }
 0x13d   : > { %478 = vst [vmem:[%s385_s16 + $0x8] sm:$0xff] %v476_v50 }
 0x13e PF: > { %s15_s22 = sadd.s32 1, %s737_s22   ;;  %s870_s18 = smov %s725_s19 }
 0x13f   : > { %p12_p10 = scmp.ge.s32.totalorder %s15_s22, 4   ;;  %s871_s19 = smov %s811_s27 }
 0x140   : > { %s872_s20 = smov %s733_s21  ;;  %s873_s21 = smov %s875_s23 }
 0x141   :  { %14 = sbr.rel (!%p12_p10) target bundleno = 3 (0x3), region = 162 }

// kernel: generator_forward.32
= control target key start
LH: loop header
LB: loop body
LE: loop exit
PB: predicated region body
PF: predicated region fallthrough
CT: control target
= control target key end

     0   :  { %s684_s15 = smov 0   ;;  %s686_s16 = smov 0   ;;  %s772_s0 = inlined_call_operand.vmem [shape: f32[2,16,256], index: 0, kind: input, shape index: {}, may-alias: {0,1}]   ;;  %s773_s1 = inlined_call_operand.vmem [shape: f32[2,16,256], index: 1, kind: input, shape index: {}, may-alias: {0,1}]   ;;  %s774_s2 = inlined_call_operand.vmem [shape: bf16[16,48], index: 2, kind: input, shape index: {}]   ;;  %s775_s3 = inlined_call_operand.vmem [shape: f32[16,1], index: 3, kind: input, shape index: {}]   ;;  %s776_s4 = inlined_call_operand.vmem [shape: f32[2,16,128], index: 4, kind: output, shape index: {}]  }
   0x1   :  { %s688_s17 = smov 0   ;;  %s690_s18 = smov 0  }
   0x2   :  { %s692_s19 = smov 0  }
   0x3 LB: > { %s26_s20 = sadd.s32 1, %s650_s18  ;;  %p42_p1 = scmp.ne.s32.totalorder %s642_s16, %s638_s15  ;;  %s654_s19 = sphi %s692_s19, %s14_s19   ;;  %s650_s18 = sphi %s690_s18, %s781_s18   ;;  %s646_s17 = sphi %s688_s17, %s780_s17   ;;  %s642_s16 = sphi %s686_s16, %s779_s16   ;;  %s638_s15 = sphi %s684_s15, %s778_s15  }
   0x4   : > { %p28_p0 = scmp.ge.s32.totalorder %s26_s20, 2  ;;  %p43_p2 = scmp.eq.s32.totalorder %s654_s19, 0 }
   0x5   : > { %s35_s23 = sadd.s32 1, %s642_s16  ;;  %p526_p5 = scmp.ge.s32.totalorder %s654_s19, 2 }
   0x6   : > { %s783_s20 = smov (%p28_p0, %s26_s20), 0  ;;  %p715_p3 = por %p43_p2, %p42_p1 }
   0x7   : > { %s30_s22 = ssub.s32 %s650_s18, %s783_s20  ;;  %174 = sbr.rel (%p526_p5) target bundleno = 24 (0x18), region = 24 }
   0x8   : > { %p33_p4 = scmp.eq.s32.totalorder %s30_s22, 0 }
   0xa   : > { %s723_s24 = scalar_select %p33_p4, %s642_s16, %s35_s23  }
   0xc   : > { %177 = sbr.rel (!%p715_p3) target bundleno = 18 (0x12), region = 28  ;;  %s179_s25 = sand.u32 (%p715_p3), 1, %s642_s16  }
   0xd   : > { %s547_s26 = sshll.u32 (%p715_p3), %s650_s18, 5  ;;  %s527_s27 = sshll.u32 (%p715_p3), %s179_s25, 4 }
   0xe   : > { %s185_s30 = scalar_lea.vmem (%p715_p3), %s772_s0, %s547_s26  ;;  %s181_s5 = scalar_lea.vmem (%p715_p3), [#allocation2], %s527_s27 }
   0xf   : > { %v216_v0 = vld [vmem:[%s185_s30] sm:$0xff] (%p715_p3)  ;;  %v218_v1 = vld [vmem:[%s185_s30 + $0x10] sm:$0xff] (%p715_p3) }
  0x10   : > { %217 = vst [vmem:[%s181_s5] sm:$0xff] (%p715_p3), %v216_v0 }
  0x11   : > { %219 = vst [vmem:[%s181_s5 + $0x8] sm:$0xff] %v218_v1 }
  0x12 PF: > { %225 = sbr.rel (!%p715_p3) target bundleno = 24 (0x18), region = 66  ;;  %s227_s6 = sand.u32 (%p715_p3), 1, %s642_s16  }
  0x13   : > { %s548_s7 = sshll.u32 (%p715_p3), %s650_s18, 5  ;;  %s530_s8 = sshll.u32 (%p715_p3), %s227_s6, 4 }
  0x14   : > { %s455_s11 = scalar_lea.vmem (%p715_p3), %s773_s1, %s548_s7  ;;  %s229_s12 = scalar_lea.vmem (%p715_p3), [#allocation3], %s530_s8 }
  0x15   : > { %v533_v2 = vld [vmem:[%s455_s11 + $0x8] sm:$0xff] (%p715_p3)  ;;  %v534_v3 = vld [vmem:[%s455_s11 + $0x18] sm:$0xff] (%p715_p3) }
  0x16   : > { %266 = vst [vmem:[%s229_s12] sm:$0xff] (%p715_p3), %v533_v2 }
  0x17   : > { %268 = vst [vmem:[%s229_s12 + $0x8] sm:$0xff] %v534_v3 }
  0x18 PF: > { %p535_p6 = scmp.ge.s32.totalorder %s654_s19, 1  ;;  %p273_p7 = scmp.lt.s32.totalorder %s654_s19, 3 }
  0x1a   : > { %p274_p8 = pnand %p535_p6, %p273_p7 }
  0x1b   : > { %s280_s13 = sand.u32 (!%p274_p8), 1, %s638_s15   ;;  %s656_s23 = smov (!%p274_p8), 125  }
  0x1c   : > { %277 = sbr.rel (%p274_p8) target bundleno = 316 (0x13c), region = 104  ;;  %s536_s14 = sshll.u32 (!%p274_p8), %s280_s13, 4 }
  0x1d   : > { %s282_s21 = scalar_lea.vmem (!%p274_p8), [#allocation2], %s536_s14  ;;  %s289_s22 = scalar_lea.vmem (!%p274_p8), [#allocation3], %s536_s14 }
  0x1e   : > { %s657_s15 = smov (!%p274_p8), 122   ;;  %p320_p9 = scmp.lt.s32.totalorder (!%p274_p8), %s646_s17, 1 }
  0x21   : > { %v329_v4 = vld [vmem:[%s282_s21] sm:$0xff]  ;;  %v330_v6 = vld [vmem:[%s282_s21 + $0x8] sm:$0xff]  ;;  %v658_v19 = vmov 0   ;;  %vm370_vm4 = vcmask 998400   ;;  %vm357_vm5 = vcmask 1022976   ;;  %vm397_vm6 = vcmask 392192  }
  0x22   : > { %v331_v5 = vld [vmem:[%s289_s22] sm:$0xff]  ;;  %v332_v7 = vld [vmem:[%s289_s22 + $0x8] sm:$0xff]  ;;  %vm333_vm0 = vcmp.ge.f32.partialorder %v329_v4, 0.0  ;;  %v337_v8 = vmul.f32 0.1, %v329_v4  ;;  %vm335_vm2 = vcmp.ge.f32.partialorder %v330_v6, 0.0  ;;  %614 = vset.pattern.permute.xlu2 %v658_v19  ;;  %615 = vset.pattern.permute.xlu0 %v658_v19 }
  0x23   : > { %vm334_vm1 = vcmp.ge.f32.partialorder %v331_v5, 0.0  ;;  %v338_v9 = vmul.f32 0.1, %v331_v5  ;;  %v339_v11 = vmul.f32 0.1, %v330_v6  ;;  %vm336_vm3 = vcmp.ge.f32.partialorder %v332_v7, 0.0 }
  0x24   : > { %v341_v10 = vsel %vm333_vm0, %v329_v4, %v337_v8  ;;  %v340_v12 = vmul.f32 0.1, %v332_v7  ;;  %v380_v18 = vld [vmem:[%s775_s3] sm:$0xff]  ;;  %v381_v22 = vld [vmem:[%s775_s3 + $0x8] sm:$0xff]  ;;  %s785_s17 = smov (!%p320_p9, %s646_s17), 1 }
  0x25   : > { %v342_v13 = vsel %vm334_vm1, %v331_v5, %v338_v9  ;;  %v343_v15 = vsel %vm335_vm2, %v330_v6, %v339_v11  ;;  %384 = vperm.xlu2 %614, %v380_v18   ;;  %v550_v40 = vld [vmem:[%s774_s2] sm:$0xff]  ;;  %s549_s5 = sshll.u32 %s785_s17, 4 }
  0x26   : > { %v604_v14 = vpack.i.bf16 %v342_v13, %v341_v10  ;;  %v344_v16 = vsel %vm336_vm3, %v332_v7, %v340_v12  ;;  %v377_v39 = vpack.c.bf16 %v343_v15, %v341_v10  ;;  %s327_s8 = scalar_lea.vmem %s776_s4, %s549_s5 }
  0x27   : > { %v609_v17 = vpack.i.bf16 %v344_v16, %v343_v15 }
  0x28   : > { %605 = vrot.lane.b32.xlu1 %v604_v14, %s656_s23  ;;  %595 = vrot.lane.b32.xlu0 %v604_v14, %s657_s15 }
  0x2d   : > { %389 = vperm.xlu2 %614, %v381_v22  }
  0x30   : > { %610 = vrot.lane.b32.xlu1 %v609_v17, %s656_s23  ;;  %600 = vrot.lane.b32.xlu0 %v609_v17, %s657_s15 }
  0x7f   : > { %v385_v41 = vpop.permute.xlu2 %384 }
  0x87   : > { %v390_v44 = vpop.permute.xlu2 %389 }
  0x9a   : > { %v606_v20 = vpop.permute.xlu1 %605  ;;  %v596_v21 = vpop.permute.xlu0 %595 }
  0x9b   : > { %v598_v23 = vunpack.i.h.bf16 %v596_v21  ;;  %v597_v24 = vunpack.i.l.bf16 %v596_v21  ;;  %v608_v31 = vunpack.i.h.bf16 %v606_v20  ;;  %v607_v32 = vunpack.i.l.bf16 %v606_v20 }
  0x9d   : > { %v371_v33 = vsel %vm370_vm4, %v597_v24, %v598_v23  ;;  %v358_v37 = vsel %vm357_vm5, %v607_v32, %v608_v31 }
  0xa2   : > { %v611_v25 = vpop.permute.xlu1 %610  ;;  %v601_v26 = vpop.permute.xlu0 %600 }
  0xa3   : > { %v613_v27 = vunpack.i.h.bf16 %v611_v25  ;;  %v612_v28 = vunpack.i.l.bf16 %v611_v25  ;;  %v603_v29 = vunpack.i.h.bf16 %v601_v26  ;;  %v602_v30 = vunpack.i.l.bf16 %v601_v26 }
  0xa5   : > { %v372_v34 = vsel %vm370_vm4, %v602_v30, %v603_v29  ;;  %v359_v36 = vsel %vm357_vm5, %v612_v28, %v613_v27 }
  0xa6   : > { %v379_v35 = vpack.c.bf16 %v372_v34, %v371_v33  ;;  %v378_v38 = vpack.c.bf16 %v359_v36, %v358_v37 }
  0xa8   : > { %406 = vmatpush.bf16.msra.mxu0 %v379_v35 }
  0xac   : > { %407 = vmatpush.bf16.msra.mxu0 %v378_v38 }
  0xb0   : > { %408 = vmatpush.bf16.msra.mxu0 %v377_v39 }
  0xb3   : > { %544 = vmatmul.msk.bf16.vlgmr.msra.gmra.mxu0 %vm397_vm6, %v550_v40 }
 0x130   : > { %v410_v42 = vpop.f32.mrf.mxu0 }
 0x131   : > { %v411_v43 = vadd.f32 %v410_v42, %v385_v41 }
 0x133   : > { %415 = vst [vmem:[%s327_s8] sm:$0xff] %v411_v43 }
 0x138   : > { %v412_v45 = vpop.f32.mrf.mxu0 }
 0x139   : > { %v413_v46 = vadd.f32 %v412_v45, %v390_v44 }
 0x13b   : > { %416 = vst [vmem:[%s327_s8 + $0x8] sm:$0xff] %v413_v46 }
 0x13c PF: > { %s14_s19 = sadd.s32 1, %s654_s19   ;;  %s778_s15 = smov %s642_s16 }
 0x13d   : > { %p11_p10 = scmp.ge.s32.totalorder %s14_s19, 4   ;;  %s779_s16 = smov %s723_s24 }
 0x13e   : > { %s780_s17 = smov %s650_s18  ;;  %s781_s18 = smov %s783_s20 }
 0x13f   :  { %13 = sbr.rel (!%p11_p10) target bundleno = 3 (0x3), region = 155 }

// kernel: generator_forward.34
= control target key start
LH: loop header
LB: loop body
LE: loop exit
PB: predicated region body
PF: predicated region fallthrough
CT: control target
= control target key end

     0   :  { %s684_s15 = smov 0   ;;  %s686_s16 = smov 0   ;;  %s772_s0 = inlined_call_operand.vmem [shape: f32[2,16,256], index: 0, kind: input, shape index: {}, may-alias: {0,1}]   ;;  %s773_s1 = inlined_call_operand.vmem [shape: f32[2,16,256], index: 1, kind: input, shape index: {}, may-alias: {0,1}]   ;;  %s774_s2 = inlined_call_operand.vmem [shape: bf16[16,48], index: 2, kind: input, shape index: {}]   ;;  %s775_s3 = inlined_call_operand.vmem [shape: f32[16,1], index: 3, kind: input, shape index: {}]   ;;  %s776_s4 = inlined_call_operand.vmem [shape: f32[2,16,128], index: 4, kind: output, shape index: {}]  }
   0x1   :  { %s688_s17 = smov 0   ;;  %s690_s18 = smov 0  }
   0x2   :  { %s692_s19 = smov 0  }
   0x3 LB: > { %s26_s20 = sadd.s32 1, %s650_s18  ;;  %p42_p1 = scmp.ne.s32.totalorder %s642_s16, %s638_s15  ;;  %s654_s19 = sphi %s692_s19, %s14_s19   ;;  %s650_s18 = sphi %s690_s18, %s781_s18   ;;  %s646_s17 = sphi %s688_s17, %s780_s17   ;;  %s642_s16 = sphi %s686_s16, %s779_s16   ;;  %s638_s15 = sphi %s684_s15, %s778_s15  }
   0x4   : > { %p28_p0 = scmp.ge.s32.totalorder %s26_s20, 2  ;;  %p43_p2 = scmp.eq.s32.totalorder %s654_s19, 0 }
   0x5   : > { %s35_s23 = sadd.s32 1, %s642_s16  ;;  %p526_p5 = scmp.ge.s32.totalorder %s654_s19, 2 }
   0x6   : > { %s783_s20 = smov (%p28_p0, %s26_s20), 0  ;;  %p715_p3 = por %p43_p2, %p42_p1 }
   0x7   : > { %s30_s22 = ssub.s32 %s650_s18, %s783_s20  ;;  %174 = sbr.rel (%p526_p5) target bundleno = 24 (0x18), region = 24 }
   0x8   : > { %p33_p4 = scmp.eq.s32.totalorder %s30_s22, 0 }
   0xa   : > { %s723_s24 = scalar_select %p33_p4, %s642_s16, %s35_s23  }
   0xc   : > { %177 = sbr.rel (!%p715_p3) target bundleno = 18 (0x12), region = 28  ;;  %s179_s25 = sand.u32 (%p715_p3), 1, %s642_s16  }
   0xd   : > { %s547_s26 = sshll.u32 (%p715_p3), %s650_s18, 5  ;;  %s527_s27 = sshll.u32 (%p715_p3), %s179_s25, 4 }
   0xe   : > { %s185_s30 = scalar_lea.vmem (%p715_p3), %s772_s0, %s547_s26  ;;  %s181_s5 = scalar_lea.vmem (%p715_p3), [#allocation2], %s527_s27 }
   0xf   : > { %v216_v0 = vld [vmem:[%s185_s30] sm:$0xff] (%p715_p3)  ;;  %v218_v1 = vld [vmem:[%s185_s30 + $0x10] sm:$0xff] (%p715_p3) }
  0x10   : > { %217 = vst [vmem:[%s181_s5] sm:$0xff] (%p715_p3), %v216_v0 }
  0x11   : > { %219 = vst [vmem:[%s181_s5 + $0x8] sm:$0xff] %v218_v1 }
  0x12 PF: > { %225 = sbr.rel (!%p715_p3) target bundleno = 24 (0x18), region = 66  ;;  %s227_s6 = sand.u32 (%p715_p3), 1, %s642_s16  }
  0x13   : > { %s548_s7 = sshll.u32 (%p715_p3), %s650_s18, 5  ;;  %s530_s8 = sshll.u32 (%p715_p3), %s227_s6, 4 }
  0x14   : > { %s455_s11 = scalar_lea.vmem (%p715_p3), %s773_s1, %s548_s7  ;;  %s229_s12 = scalar_lea.vmem (%p715_p3), [#allocation3], %s530_s8 }
  0x15   : > { %v533_v2 = vld [vmem:[%s455_s11 + $0x8] sm:$0xff] (%p715_p3)  ;;  %v534_v3 = vld [vmem:[%s455_s11 + $0x18] sm:$0xff] (%p715_p3) }
  0x16   : > { %266 = vst [vmem:[%s229_s12] sm:$0xff] (%p715_p3), %v533_v2 }
  0x17   : > { %268 = vst [vmem:[%s229_s12 + $0x8] sm:$0xff] %v534_v3 }
  0x18 PF: > { %p535_p6 = scmp.ge.s32.totalorder %s654_s19, 1  ;;  %p273_p7 = scmp.lt.s32.totalorder %s654_s19, 3 }
  0x1a   : > { %p274_p8 = pnand %p535_p6, %p273_p7 }
  0x1b   : > { %s280_s13 = sand.u32 (!%p274_p8), 1, %s638_s15   ;;  %s656_s23 = smov (!%p274_p8), 123  }
  0x1c   : > { %277 = sbr.rel (%p274_p8) target bundleno = 316 (0x13c), region = 104  ;;  %s536_s14 = sshll.u32 (!%p274_p8), %s280_s13, 4 }
  0x1d   : > { %s282_s21 = scalar_lea.vmem (!%p274_p8), [#allocation2], %s536_s14  ;;  %s289_s22 = scalar_lea.vmem (!%p274_p8), [#allocation3], %s536_s14 }
  0x1e   : > { %s657_s15 = smov (!%p274_p8), 118   ;;  %p320_p9 = scmp.lt.s32.totalorder (!%p274_p8), %s646_s17, 1 }
  0x21   : > { %v329_v4 = vld [vmem:[%s282_s21] sm:$0xff]  ;;  %v330_v6 = vld [vmem:[%s282_s21 + $0x8] sm:$0xff]  ;;  %v658_v19 = vmov 0   ;;  %vm370_vm4 = vcmask 965632   ;;  %vm357_vm5 = vcmask 1006592   ;;  %vm397_vm6 = vcmask 392192  }
  0x22   : > { %v331_v5 = vld [vmem:[%s289_s22] sm:$0xff]  ;;  %v332_v7 = vld [vmem:[%s289_s22 + $0x8] sm:$0xff]  ;;  %vm333_vm0 = vcmp.ge.f32.partialorder %v329_v4, 0.0  ;;  %v337_v8 = vmul.f32 0.1, %v329_v4  ;;  %vm335_vm2 = vcmp.ge.f32.partialorder %v330_v6, 0.0  ;;  %614 = vset.pattern.permute.xlu2 %v658_v19  ;;  %615 = vset.pattern.permute.xlu0 %v658_v19 }
  0x23   : > { %vm334_vm1 = vcmp.ge.f32.partialorder %v331_v5, 0.0  ;;  %v338_v9 = vmul.f32 0.1, %v331_v5  ;;  %v339_v11 = vmul.f32 0.1, %v330_v6  ;;  %vm336_vm3 = vcmp.ge.f32.partialorder %v332_v7, 0.0 }
  0x24   : > { %v341_v10 = vsel %vm333_vm0, %v329_v4, %v337_v8  ;;  %v340_v12 = vmul.f32 0.1, %v332_v7  ;;  %v380_v18 = vld [vmem:[%s775_s3] sm:$0xff]  ;;  %v381_v22 = vld [vmem:[%s775_s3 + $0x8] sm:$0xff]  ;;  %s785_s17 = smov (!%p320_p9, %s646_s17), 1 }
  0x25   : > { %v342_v13 = vsel %vm334_vm1, %v331_v5, %v338_v9  ;;  %v343_v15 = vsel %vm335_vm2, %v330_v6, %v339_v11  ;;  %384 = vperm.xlu2 %614, %v380_v18   ;;  %v550_v40 = vld [vmem:[%s774_s2] sm:$0xff]  ;;  %s549_s5 = sshll.u32 %s785_s17, 4 }
  0x26   : > { %v604_v14 = vpack.i.bf16 %v342_v13, %v341_v10  ;;  %v344_v16 = vsel %vm336_vm3, %v332_v7, %v340_v12  ;;  %v377_v39 = vpack.c.bf16 %v343_v15, %v341_v10  ;;  %s327_s8 = scalar_lea.vmem %s776_s4, %s549_s5 }
  0x27   : > { %v609_v17 = vpack.i.bf16 %v344_v16, %v343_v15 }
  0x28   : > { %605 = vrot.lane.b32.xlu1 %v604_v14, %s656_s23  ;;  %595 = vrot.lane.b32.xlu0 %v604_v14, %s657_s15 }
  0x2d   : > { %389 = vperm.xlu2 %614, %v381_v22  }
  0x30   : > { %610 = vrot.lane.b32.xlu1 %v609_v17, %s656_s23  ;;  %600 = vrot.lane.b32.xlu0 %v609_v17, %s657_s15 }
  0x7f   : > { %v385_v41 = vpop.permute.xlu2 %384 }
  0x87   : > { %v390_v44 = vpop.permute.xlu2 %389 }
  0x9a   : > { %v606_v20 = vpop.permute.xlu1 %605  ;;  %v596_v21 = vpop.permute.xlu0 %595 }
  0x9b   : > { %v598_v23 = vunpack.i.h.bf16 %v596_v21  ;;  %v597_v24 = vunpack.i.l.bf16 %v596_v21  ;;  %v608_v31 = vunpack.i.h.bf16 %v606_v20  ;;  %v607_v32 = vunpack.i.l.bf16 %v606_v20 }
  0x9d   : > { %v371_v33 = vsel %vm370_vm4, %v597_v24, %v598_v23  ;;  %v358_v37 = vsel %vm357_vm5, %v607_v32, %v608_v31 }
  0xa2   : > { %v611_v25 = vpop.permute.xlu1 %610  ;;  %v601_v26 = vpop.permute.xlu0 %600 }
  0xa3   : > { %v613_v27 = vunpack.i.h.bf16 %v611_v25  ;;  %v612_v28 = vunpack.i.l.bf16 %v611_v25  ;;  %v603_v29 = vunpack.i.h.bf16 %v601_v26  ;;  %v602_v30 = vunpack.i.l.bf16 %v601_v26 }
  0xa5   : > { %v372_v34 = vsel %vm370_vm4, %v602_v30, %v603_v29  ;;  %v359_v36 = vsel %vm357_vm5, %v612_v28, %v613_v27 }
  0xa6   : > { %v379_v35 = vpack.c.bf16 %v372_v34, %v371_v33  ;;  %v378_v38 = vpack.c.bf16 %v359_v36, %v358_v37 }
  0xa8   : > { %406 = vmatpush.bf16.msra.mxu0 %v379_v35 }
  0xac   : > { %407 = vmatpush.bf16.msra.mxu0 %v378_v38 }
  0xb0   : > { %408 = vmatpush.bf16.msra.mxu0 %v377_v39 }
  0xb3   : > { %544 = vmatmul.msk.bf16.vlgmr.msra.gmra.mxu0 %vm397_vm6, %v550_v40 }
 0x130   : > { %v410_v42 = vpop.f32.mrf.mxu0 }
 0x131   : > { %v411_v43 = vadd.f32 %v410_v42, %v385_v41 }
 0x133   : > { %415 = vst [vmem:[%s327_s8] sm:$0xff] %v411_v43 }
 0x138   : > { %v412_v45 = vpop.f32.mrf.mxu0 }
 0x139   : > { %v413_v46 = vadd.f32 %v412_v45, %v390_v44 }
 0x13b   : > { %416 = vst [vmem:[%s327_s8 + $0x8] sm:$0xff] %v413_v46 }
 0x13c PF: > { %s14_s19 = sadd.s32 1, %s654_s19   ;;  %s778_s15 = smov %s642_s16 }
 0x13d   : > { %p11_p10 = scmp.ge.s32.totalorder %s14_s19, 4   ;;  %s779_s16 = smov %s723_s24 }
 0x13e   : > { %s780_s17 = smov %s650_s18  ;;  %s781_s18 = smov %s783_s20 }
 0x13f   :  { %13 = sbr.rel (!%p11_p10) target bundleno = 3 (0x3), region = 155 }

// kernel: generator_forward.36
= control target key start
LH: loop header
LB: loop body
LE: loop exit
PB: predicated region body
PF: predicated region fallthrough
CT: control target
= control target key end

     0   :  { %s736_s15 = smov 0   ;;  %s738_s16 = smov 0   ;;  %s832_s0 = inlined_call_operand.vmem [shape: f32[2,16,256], index: 0, kind: input, shape index: {}, may-alias: {0,1}]   ;;  %s833_s1 = inlined_call_operand.vmem [shape: f32[2,16,256], index: 1, kind: input, shape index: {}, may-alias: {0,1}]   ;;  %s834_s2 = inlined_call_operand.vmem [shape: bf16[16,80], index: 2, kind: input, shape index: {}]   ;;  %s835_s3 = inlined_call_operand.vmem [shape: f32[16,1], index: 3, kind: input, shape index: {}]   ;;  %s836_s4 = inlined_call_operand.vmem [shape: f32[2,16,128], index: 4, kind: output, shape index: {}]  }
   0x1   :  { %s740_s17 = smov 0   ;;  %s742_s18 = smov 0  }
   0x2   :  { %s744_s19 = smov 0  }
   0x3 LB: > { %s26_s20 = sadd.s32 1, %s700_s18  ;;  %p42_p1 = scmp.ne.s32.totalorder %s692_s16, %s688_s15  ;;  %s704_s19 = sphi %s744_s19, %s14_s19   ;;  %s700_s18 = sphi %s742_s18, %s841_s18   ;;  %s696_s17 = sphi %s740_s17, %s840_s17   ;;  %s692_s16 = sphi %s738_s16, %s839_s16   ;;  %s688_s15 = sphi %s736_s15, %s838_s15  }
   0x4   : > { %p28_p0 = scmp.ge.s32.totalorder %s26_s20, 2  ;;  %p43_p2 = scmp.eq.s32.totalorder %s704_s19, 0 }
   0x5   : > { %s35_s23 = sadd.s32 1, %s692_s16  ;;  %p554_p5 = scmp.ge.s32.totalorder %s704_s19, 2 }
   0x6   : > { %s843_s20 = smov (%p28_p0, %s26_s20), 0  ;;  %p767_p3 = por %p43_p2, %p42_p1 }
   0x7   : > { %s30_s22 = ssub.s32 %s700_s18, %s843_s20  ;;  %174 = sbr.rel (%p554_p5) target bundleno = 24 (0x18), region = 24 }
   0x8   : > { %p33_p4 = scmp.eq.s32.totalorder %s30_s22, 0 }
   0xa   : > { %s775_s24 = scalar_select %p33_p4, %s692_s16, %s35_s23  }
   0xc   : > { %177 = sbr.rel (!%p767_p3) target bundleno = 18 (0x12), region = 28  ;;  %s179_s25 = sand.u32 (%p767_p3), 1, %s692_s16  }
   0xd   : > { %s575_s26 = sshll.u32 (%p767_p3), %s700_s18, 5  ;;  %s555_s27 = sshll.u32 (%p767_p3), %s179_s25, 4 }
   0xe   : > { %s185_s30 = scalar_lea.vmem (%p767_p3), %s832_s0, %s575_s26  ;;  %s181_s5 = scalar_lea.vmem (%p767_p3), [#allocation2], %s555_s27 }
   0xf   : > { %v216_v0 = vld [vmem:[%s185_s30] sm:$0xff] (%p767_p3)  ;;  %v218_v1 = vld [vmem:[%s185_s30 + $0x10] sm:$0xff] (%p767_p3) }
  0x10   : > { %217 = vst [vmem:[%s181_s5] sm:$0xff] (%p767_p3), %v216_v0 }
  0x11   : > { %219 = vst [vmem:[%s181_s5 + $0x8] sm:$0xff] %v218_v1 }
  0x12 PF: > { %225 = sbr.rel (!%p767_p3) target bundleno = 24 (0x18), region = 66  ;;  %s227_s6 = sand.u32 (%p767_p3), 1, %s692_s16  }
  0x13   : > { %s576_s7 = sshll.u32 (%p767_p3), %s700_s18, 5  ;;  %s558_s8 = sshll.u32 (%p767_p3), %s227_s6, 4 }
  0x14   : > { %s483_s11 = scalar_lea.vmem (%p767_p3), %s833_s1, %s576_s7  ;;  %s229_s12 = scalar_lea.vmem (%p767_p3), [#allocation3], %s558_s8 }
  0x15   : > { %v561_v2 = vld [vmem:[%s483_s11 + $0x8] sm:$0xff] (%p767_p3)  ;;  %v562_v3 = vld [vmem:[%s483_s11 + $0x18] sm:$0xff] (%p767_p3) }
  0x16   : > { %266 = vst [vmem:[%s229_s12] sm:$0xff] (%p767_p3), %v561_v2 }
  0x17   : > { %268 = vst [vmem:[%s229_s12 + $0x8] sm:$0xff] %v562_v3 }
  0x18 PF: > { %p563_p6 = scmp.ge.s32.totalorder %s704_s19, 1  ;;  %p273_p7 = scmp.lt.s32.totalorder %s704_s19, 3 }
  0x1a   : > { %p274_p8 = pnand %p563_p6, %p273_p7 }
  0x1b   : > { %s280_s13 = sand.u32 (!%p274_p8), 1, %s688_s15   ;;  %s706_s15 = smov (!%p274_p8), 125  }
  0x1c   : > { %277 = sbr.rel (%p274_p8) target bundleno = 324 (0x144), region = 104  ;;  %s564_s14 = sshll.u32 (!%p274_p8), %s280_s13, 4 }
  0x1d   : > { %s282_s21 = scalar_lea.vmem (!%p274_p8), [#allocation2], %s564_s14  ;;  %s289_s22 = scalar_lea.vmem (!%p274_p8), [#allocation3], %s564_s14 }
  0x1e   : > { %s707_s23 = smov (!%p274_p8), 124   ;;  %s708_s25 = smov (!%p274_p8), 126  }
  0x1f   : > { %s709_s26 = smov (!%p274_p8), 127   ;;  %p320_p9 = scmp.lt.s32.totalorder (!%p274_p8), %s696_s17, 1 }
  0x21   : > { %v329_v4 = vld [vmem:[%s282_s21] sm:$0xff]  ;;  %v330_v6 = vld [vmem:[%s282_s21 + $0x8] sm:$0xff]  ;;  %v710_v23 = vmov 0   ;;  %vm396_vm4 = vcmask 1014784   ;;  %vm383_vm5 = vcmask 1022976   ;;  %vm370_vm6 = vcmask 1031168  }
  0x22   : > { %v331_v5 = vld [vmem:[%s289_s22] sm:$0xff]  ;;  %v332_v7 = vld [vmem:[%s289_s22 + $0x8] sm:$0xff]  ;;  %vm333_vm0 = vcmp.ge.f32.partialorder %v329_v4, 0.0  ;;  %v337_v8 = vmul.f32 0.1, %v329_v4  ;;  %vm335_vm2 = vcmp.ge.f32.partialorder %v330_v6, 0.0  ;;  %665 = vset.pattern.permute.xlu0 %v710_v23  ;;  %664 = vset.pattern.permute.xlu2 %v710_v23 }
  0x23   : > { %vm334_vm1 = vcmp.ge.f32.partialorder %v331_v5, 0.0  ;;  %v338_v9 = vmul.f32 0.1, %v331_v5  ;;  %v339_v11 = vmul.f32 0.1, %v330_v6  ;;  %vm336_vm3 = vcmp.ge.f32.partialorder %v332_v7, 0.0 }
  0x24   : > { %v795_v10 = vsel %vm333_vm0, %v329_v4, %v337_v8  ;;  %v340_v12 = vmul.f32 0.1, %v332_v7  ;;  %v409_v21 = vld [vmem:[%s835_s3 + $0x8] sm:$0xff]  ;;  %v408_v22 = vld [vmem:[%s835_s3] sm:$0xff]  ;;  %vm357_vm7 = vcmask 1039360   ;;  %vm425_vm8 = vcmask 654336  }
  0x25   : > { %v342_v13 = vsel %vm334_vm1, %v331_v5, %v338_v9  ;;  %v798_v15 = vsel %vm335_vm2, %v330_v6, %v339_v11  ;;  %v578_v58 = vld [vmem:[%s834_s2] sm:$0xff]  ;;  %s845_s17 = smov (!%p320_p9, %s696_s17), 1 }
  0x26   : > { %v634_v14 = vpack.i.bf16 %v342_v13, %v795_v10  ;;  %v344_v16 = vsel %vm336_vm3, %v332_v7, %v340_v12  ;;  %v403_v57 = vpack.c.bf16 %v798_v15, %v795_v10  ;;  %s577_s7 = sshll.u32 %s845_s17, 4 }
  0x27   : > { %v639_v17 = vpack.i.bf16 %v344_v16, %v798_v15  ;;  %s327_s10 = scalar_lea.vmem %s836_s4, %s577_s7 }
  0x28   : > { %635 = vrot.lane.b32.xlu1 %v634_v14, %s706_s15  ;;  %625 = vrot.lane.b32.xlu0 %v634_v14, %s707_s23 }
  0x29   : > { %645 = vrot.lane.b32.xlu2 %v634_v14, %s708_s25 }
  0x30   : > { %640 = vrot.lane.b32.xlu1 %v639_v17, %s706_s15  ;;  %630 = vrot.lane.b32.xlu0 %v639_v17, %s707_s23 }
  0x31   : > { %650 = vrot.lane.b32.xlu2 %v639_v17, %s708_s25 }
  0x38   : > { %660 = vrot.lane.b32.xlu1 %v639_v17, %s709_s26  ;;  %655 = vrot.lane.b32.xlu0 %v634_v14, %s709_s26 }
  0x39   : > { %412 = vperm.xlu2 %664, %v408_v22  }
  0x40   : > { %417 = vperm.xlu0 %665, %v409_v21  }
  0x83   : > { %v646_v18 = vpop.permute.xlu2 %645 }
  0x84   : > { %v648_v33 = vunpack.i.h.bf16 %v646_v18  ;;  %v647_v38 = vunpack.i.l.bf16 %v646_v18 }
  0x86   : > { %v371_v47 = vsel %vm370_vm6, %v647_v38, %v648_v33 }
  0x8b   : > { %v651_v28 = vpop.permute.xlu2 %650 }
  0x8c   : > { %v653_v39 = vunpack.i.h.bf16 %v651_v28  ;;  %v652_v40 = vunpack.i.l.bf16 %v651_v28 }
  0x8e   : > { %v372_v48 = vsel %vm370_vm6, %v652_v40, %v653_v39 }
  0x8f   : > { %v405_v55 = vpack.c.bf16 %v372_v48, %v371_v47 }
  0x93   : > { %v413_v59 = vpop.permute.xlu2 %412 }
  0x9a   : > { %v636_v19 = vpop.permute.xlu1 %635  ;;  %v626_v20 = vpop.permute.xlu0 %625 }
  0x9b   : > { %v628_v24 = vunpack.i.h.bf16 %v626_v20  ;;  %v627_v25 = vunpack.i.l.bf16 %v626_v20  ;;  %v638_v34 = vunpack.i.h.bf16 %v636_v19  ;;  %v637_v35 = vunpack.i.l.bf16 %v636_v19 }
  0x9d   : > { %v397_v36 = vsel %vm396_vm4, %v627_v25, %v628_v24  ;;  %v384_v43 = vsel %vm383_vm5, %v637_v35, %v638_v34 }
  0xa2   : > { %v641_v26 = vpop.permute.xlu1 %640  ;;  %v631_v27 = vpop.permute.xlu0 %630 }
  0xa3   : > { %v643_v29 = vunpack.i.h.bf16 %v641_v26  ;;  %v642_v30 = vunpack.i.l.bf16 %v641_v26  ;;  %v633_v31 = vunpack.i.h.bf16 %v631_v27  ;;  %v632_v32 = vunpack.i.l.bf16 %v631_v27 }
  0xa5   : > { %v398_v37 = vsel %vm396_vm4, %v632_v32, %v633_v31  ;;  %v385_v42 = vsel %vm383_vm5, %v642_v30, %v643_v29 }
  0xa6   : > { %v407_v41 = vpack.c.bf16 %v398_v37, %v397_v36  ;;  %v406_v44 = vpack.c.bf16 %v385_v42, %v384_v43 }
  0xa8   : > { %432 = vmatpush.bf16.msra.mxu0 %v407_v41 }
  0xaa   : > { %v661_v45 = vpop.permute.xlu1 %660  ;;  %v656_v46 = vpop.permute.xlu0 %655 }
  0xab   : > { %v663_v49 = vunpack.i.h.bf16 %v661_v45  ;;  %v662_v50 = vunpack.i.l.bf16 %v661_v45  ;;  %v658_v51 = vunpack.i.h.bf16 %v656_v46  ;;  %v657_v52 = vunpack.i.l.bf16 %v656_v46 }
  0xac   : > { %433 = vmatpush.bf16.msra.mxu0 %v406_v44 }
  0xad   : > { %v358_v53 = vsel %vm357_vm7, %v657_v52, %v658_v51  ;;  %v359_v54 = vsel %vm357_vm7, %v662_v50, %v663_v49 }
  0xae   : > { %v404_v56 = vpack.c.bf16 %v359_v54, %v358_v53 }
  0xb0   : > { %434 = vmatpush.bf16.msra.mxu0 %v405_v55 }
  0xb2   : > { %v418_v62 = vpop.permute.xlu0 %417 }
  0xb4   : > { %435 = vmatpush.bf16.msra.mxu0 %v404_v56 }
  0xb8   : > { %436 = vmatpush.bf16.msra.mxu0 %v403_v57 }
  0xbb   : > { %572 = vmatmul.msk.bf16.vlgmr.msra.gmra.mxu0 %vm425_vm8, %v578_v58 }
 0x138   : > { %v438_v60 = vpop.f32.mrf.mxu0 }
 0x139   : > { %v439_v61 = vadd.f32 %v438_v60, %v413_v59 }
 0x13b   : > { %443 = vst [vmem:[%s327_s10] sm:$0xff] %v439_v61 }
 0x140   : > { %v440_v63 = vpop.f32.mrf.mxu0 }
 0x141   : > { %v441_v0 = vadd.f32 %v440_v63, %v418_v62 }
 0x143   : > { %444 = vst [vmem:[%s327_s10 + $0x8] sm:$0xff] %v441_v0 }
 0x144 PF: > { %s14_s19 = sadd.s32 1, %s704_s19   ;;  %s838_s15 = smov %s692_s16 }
 0x145   : > { %p11_p10 = scmp.ge.s32.totalorder %s14_s19, 4   ;;  %s839_s16 = smov %s775_s24 }
 0x146   : > { %s840_s17 = smov %s700_s18  ;;  %s841_s18 = smov %s843_s20 }
 0x147   :  { %13 = sbr.rel (!%p11_p10) target bundleno = 3 (0x3), region = 155 }

// kernel: generator_forward.38
= control target key start
LH: loop header
LB: loop body
LE: loop exit
PB: predicated region body
PF: predicated region fallthrough
CT: control target
= control target key end

     0   :  { %s736_s15 = smov 0   ;;  %s738_s16 = smov 0   ;;  %s832_s0 = inlined_call_operand.vmem [shape: f32[2,16,256], index: 0, kind: input, shape index: {}, may-alias: {0,1}]   ;;  %s833_s1 = inlined_call_operand.vmem [shape: f32[2,16,256], index: 1, kind: input, shape index: {}, may-alias: {0,1}]   ;;  %s834_s2 = inlined_call_operand.vmem [shape: bf16[16,80], index: 2, kind: input, shape index: {}]   ;;  %s835_s3 = inlined_call_operand.vmem [shape: f32[16,1], index: 3, kind: input, shape index: {}]   ;;  %s836_s4 = inlined_call_operand.vmem [shape: f32[2,16,128], index: 4, kind: output, shape index: {}]  }
   0x1   :  { %s740_s17 = smov 0   ;;  %s742_s18 = smov 0  }
   0x2   :  { %s744_s19 = smov 0  }
   0x3 LB: > { %s26_s20 = sadd.s32 1, %s700_s18  ;;  %p42_p1 = scmp.ne.s32.totalorder %s692_s16, %s688_s15  ;;  %s704_s19 = sphi %s744_s19, %s14_s19   ;;  %s700_s18 = sphi %s742_s18, %s841_s18   ;;  %s696_s17 = sphi %s740_s17, %s840_s17   ;;  %s692_s16 = sphi %s738_s16, %s839_s16   ;;  %s688_s15 = sphi %s736_s15, %s838_s15  }
   0x4   : > { %p28_p0 = scmp.ge.s32.totalorder %s26_s20, 2  ;;  %p43_p2 = scmp.eq.s32.totalorder %s704_s19, 0 }
   0x5   : > { %s35_s23 = sadd.s32 1, %s692_s16  ;;  %p554_p5 = scmp.ge.s32.totalorder %s704_s19, 2 }
   0x6   : > { %s843_s20 = smov (%p28_p0, %s26_s20), 0  ;;  %p767_p3 = por %p43_p2, %p42_p1 }
   0x7   : > { %s30_s22 = ssub.s32 %s700_s18, %s843_s20  ;;  %174 = sbr.rel (%p554_p5) target bundleno = 24 (0x18), region = 24 }
   0x8   : > { %p33_p4 = scmp.eq.s32.totalorder %s30_s22, 0 }
   0xa   : > { %s775_s24 = scalar_select %p33_p4, %s692_s16, %s35_s23  }
   0xc   : > { %177 = sbr.rel (!%p767_p3) target bundleno = 18 (0x12), region = 28  ;;  %s179_s25 = sand.u32 (%p767_p3), 1, %s692_s16  }
   0xd   : > { %s575_s26 = sshll.u32 (%p767_p3), %s700_s18, 5  ;;  %s555_s27 = sshll.u32 (%p767_p3), %s179_s25, 4 }
   0xe   : > { %s185_s30 = scalar_lea.vmem (%p767_p3), %s832_s0, %s575_s26  ;;  %s181_s5 = scalar_lea.vmem (%p767_p3), [#allocation2], %s555_s27 }
   0xf   : > { %v216_v0 = vld [vmem:[%s185_s30] sm:$0xff] (%p767_p3)  ;;  %v218_v1 = vld [vmem:[%s185_s30 + $0x10] sm:$0xff] (%p767_p3) }
  0x10   : > { %217 = vst [vmem:[%s181_s5] sm:$0xff] (%p767_p3), %v216_v0 }
  0x11   : > { %219 = vst [vmem:[%s181_s5 + $0x8] sm:$0xff] %v218_v1 }
  0x12 PF: > { %225 = sbr.rel (!%p767_p3) target bundleno = 24 (0x18), region = 66  ;;  %s227_s6 = sand.u32 (%p767_p3), 1, %s692_s16  }
  0x13   : > { %s576_s7 = sshll.u32 (%p767_p3), %s700_s18, 5  ;;  %s558_s8 = sshll.u32 (%p767_p3), %s227_s6, 4 }
  0x14   : > { %s483_s11 = scalar_lea.vmem (%p767_p3), %s833_s1, %s576_s7  ;;  %s229_s12 = scalar_lea.vmem (%p767_p3), [#allocation3], %s558_s8 }
  0x15   : > { %v561_v2 = vld [vmem:[%s483_s11 + $0x8] sm:$0xff] (%p767_p3)  ;;  %v562_v3 = vld [vmem:[%s483_s11 + $0x18] sm:$0xff] (%p767_p3) }
  0x16   : > { %266 = vst [vmem:[%s229_s12] sm:$0xff] (%p767_p3), %v561_v2 }
  0x17   : > { %268 = vst [vmem:[%s229_s12 + $0x8] sm:$0xff] %v562_v3 }
  0x18 PF: > { %p563_p6 = scmp.ge.s32.totalorder %s704_s19, 1  ;;  %p273_p7 = scmp.lt.s32.totalorder %s704_s19, 3 }
  0x1a   : > { %p274_p8 = pnand %p563_p6, %p273_p7 }
  0x1b   : > { %s280_s13 = sand.u32 (!%p274_p8), 1, %s688_s15   ;;  %s706_s15 = smov (!%p274_p8), 119  }
  0x1c   : > { %277 = sbr.rel (%p274_p8) target bundleno = 324 (0x144), region = 104  ;;  %s564_s14 = sshll.u32 (!%p274_p8), %s280_s13, 4 }
  0x1d   : > { %s282_s21 = scalar_lea.vmem (!%p274_p8), [#allocation2], %s564_s14  ;;  %s289_s22 = scalar_lea.vmem (!%p274_p8), [#allocation3], %s564_s14 }
  0x1e   : > { %s707_s23 = smov (!%p274_p8), 116   ;;  %s708_s25 = smov (!%p274_p8), 122  }
  0x1f   : > { %s709_s26 = smov (!%p274_p8), 125   ;;  %p320_p9 = scmp.lt.s32.totalorder (!%p274_p8), %s696_s17, 1 }
  0x21   : > { %v329_v4 = vld [vmem:[%s282_s21] sm:$0xff]  ;;  %v330_v6 = vld [vmem:[%s282_s21 + $0x8] sm:$0xff]  ;;  %v710_v23 = vmov 0   ;;  %vm396_vm4 = vcmask 949248   ;;  %vm383_vm5 = vcmask 973824   ;;  %vm370_vm6 = vcmask 998400  }
  0x22   : > { %v331_v5 = vld [vmem:[%s289_s22] sm:$0xff]  ;;  %v332_v7 = vld [vmem:[%s289_s22 + $0x8] sm:$0xff]  ;;  %vm333_vm0 = vcmp.ge.f32.partialorder %v329_v4, 0.0  ;;  %v337_v8 = vmul.f32 0.1, %v329_v4  ;;  %vm335_vm2 = vcmp.ge.f32.partialorder %v330_v6, 0.0  ;;  %665 = vset.pattern.permute.xlu0 %v710_v23  ;;  %664 = vset.pattern.permute.xlu2 %v710_v23 }
  0x23   : > { %vm334_vm1 = vcmp.ge.f32.partialorder %v331_v5, 0.0  ;;  %v338_v9 = vmul.f32 0.1, %v331_v5  ;;  %v339_v11 = vmul.f32 0.1, %v330_v6  ;;  %vm336_vm3 = vcmp.ge.f32.partialorder %v332_v7, 0.0 }
  0x24   : > { %v795_v10 = vsel %vm333_vm0, %v329_v4, %v337_v8  ;;  %v340_v12 = vmul.f32 0.1, %v332_v7  ;;  %v409_v21 = vld [vmem:[%s835_s3 + $0x8] sm:$0xff]  ;;  %v408_v22 = vld [vmem:[%s835_s3] sm:$0xff]  ;;  %vm357_vm7 = vcmask 1022976   ;;  %vm425_vm8 = vcmask 654336  }
  0x25   : > { %v342_v13 = vsel %vm334_vm1, %v331_v5, %v338_v9  ;;  %v798_v15 = vsel %vm335_vm2, %v330_v6, %v339_v11  ;;  %v578_v58 = vld [vmem:[%s834_s2] sm:$0xff]  ;;  %s845_s17 = smov (!%p320_p9, %s696_s17), 1 }
  0x26   : > { %v634_v14 = vpack.i.bf16 %v342_v13, %v795_v10  ;;  %v344_v16 = vsel %vm336_vm3, %v332_v7, %v340_v12  ;;  %v403_v57 = vpack.c.bf16 %v798_v15, %v795_v10  ;;  %s577_s7 = sshll.u32 %s845_s17, 4 }
  0x27   : > { %v639_v17 = vpack.i.bf16 %v344_v16, %v798_v15  ;;  %s327_s10 = scalar_lea.vmem %s836_s4, %s577_s7 }
  0x28   : > { %635 = vrot.lane.b32.xlu1 %v634_v14, %s706_s15  ;;  %625 = vrot.lane.b32.xlu0 %v634_v14, %s707_s23 }
  0x29   : > { %645 = vrot.lane.b32.xlu2 %v634_v14, %s708_s25 }
  0x30   : > { %640 = vrot.lane.b32.xlu1 %v639_v17, %s706_s15  ;;  %630 = vrot.lane.b32.xlu0 %v639_v17, %s707_s23 }
  0x31   : > { %650 = vrot.lane.b32.xlu2 %v639_v17, %s708_s25 }
  0x38   : > { %660 = vrot.lane.b32.xlu1 %v639_v17, %s709_s26  ;;  %655 = vrot.lane.b32.xlu0 %v634_v14, %s709_s26 }
  0x39   : > { %412 = vperm.xlu2 %664, %v408_v22  }
  0x40   : > { %417 = vperm.xlu0 %665, %v409_v21  }
  0x83   : > { %v646_v18 = vpop.permute.xlu2 %645 }
  0x84   : > { %v648_v33 = vunpack.i.h.bf16 %v646_v18  ;;  %v647_v38 = vunpack.i.l.bf16 %v646_v18 }
  0x86   : > { %v371_v47 = vsel %vm370_vm6, %v647_v38, %v648_v33 }
  0x8b   : > { %v651_v28 = vpop.permute.xlu2 %650 }
  0x8c   : > { %v653_v39 = vunpack.i.h.bf16 %v651_v28  ;;  %v652_v40 = vunpack.i.l.bf16 %v651_v28 }
  0x8e   : > { %v372_v48 = vsel %vm370_vm6, %v652_v40, %v653_v39 }
  0x8f   : > { %v405_v55 = vpack.c.bf16 %v372_v48, %v371_v47 }
  0x93   : > { %v413_v59 = vpop.permute.xlu2 %412 }
  0x9a   : > { %v636_v19 = vpop.permute.xlu1 %635  ;;  %v626_v20 = vpop.permute.xlu0 %625 }
  0x9b   : > { %v628_v24 = vunpack.i.h.bf16 %v626_v20  ;;  %v627_v25 = vunpack.i.l.bf16 %v626_v20  ;;  %v638_v34 = vunpack.i.h.bf16 %v636_v19  ;;  %v637_v35 = vunpack.i.l.bf16 %v636_v19 }
  0x9d   : > { %v397_v36 = vsel %vm396_vm4, %v627_v25, %v628_v24  ;;  %v384_v43 = vsel %vm383_vm5, %v637_v35, %v638_v34 }
  0xa2   : > { %v641_v26 = vpop.permute.xlu1 %640  ;;  %v631_v27 = vpop.permute.xlu0 %630 }
  0xa3   : > { %v643_v29 = vunpack.i.h.bf16 %v641_v26  ;;  %v642_v30 = vunpack.i.l.bf16 %v641_v26  ;;  %v633_v31 = vunpack.i.h.bf16 %v631_v27  ;;  %v632_v32 = vunpack.i.l.bf16 %v631_v27 }
  0xa5   : > { %v398_v37 = vsel %vm396_vm4, %v632_v32, %v633_v31  ;;  %v385_v42 = vsel %vm383_vm5, %v642_v30, %v643_v29 }
  0xa6   : > { %v407_v41 = vpack.c.bf16 %v398_v37, %v397_v36  ;;  %v406_v44 = vpack.c.bf16 %v385_v42, %v384_v43 }
  0xa8   : > { %432 = vmatpush.bf16.msra.mxu0 %v407_v41 }
  0xaa   : > { %v661_v45 = vpop.permute.xlu1 %660  ;;  %v656_v46 = vpop.permute.xlu0 %655 }
  0xab   : > { %v663_v49 = vunpack.i.h.bf16 %v661_v45  ;;  %v662_v50 = vunpack.i.l.bf16 %v661_v45  ;;  %v658_v51 = vunpack.i.h.bf16 %v656_v46  ;;  %v657_v52 = vunpack.i.l.bf16 %v656_v46 }
  0xac   : > { %433 = vmatpush.bf16.msra.mxu0 %v406_v44 }
  0xad   : > { %v358_v53 = vsel %vm357_vm7, %v657_v52, %v658_v51  ;;  %v359_v54 = vsel %vm357_vm7, %v662_v50, %v663_v49 }
  0xae   : > { %v404_v56 = vpack.c.bf16 %v359_v54, %v358_v53 }
  0xb0   : > { %434 = vmatpush.bf16.msra.mxu0 %v405_v55 }
  0xb2   : > { %v418_v62 = vpop.permute.xlu0 %417 }
  0xb4   : > { %435 = vmatpush.bf16.msra.mxu0 %v404_v56 }
  0xb8   : > { %436 = vmatpush.bf16.msra.mxu0 %v403_v57 }
  0xbb   : > { %572 = vmatmul.msk.bf16.vlgmr.msra.gmra.mxu0 %vm425_vm8, %v578_v58 }
 0x138   : > { %v438_v60 = vpop.f32.mrf.mxu0 }
 0x139   : > { %v439_v61 = vadd.f32 %v438_v60, %v413_v59 }
 0x13b   : > { %443 = vst [vmem:[%s327_s10] sm:$0xff] %v439_v61 }
 0x140   : > { %v440_v63 = vpop.f32.mrf.mxu0 }
 0x141   : > { %v441_v0 = vadd.f32 %v440_v63, %v418_v62 }
 0x143   : > { %444 = vst [vmem:[%s327_s10 + $0x8] sm:$0xff] %v441_v0 }
 0x144 PF: > { %s14_s19 = sadd.s32 1, %s704_s19   ;;  %s838_s15 = smov %s692_s16 }
 0x145   : > { %p11_p10 = scmp.ge.s32.totalorder %s14_s19, 4   ;;  %s839_s16 = smov %s775_s24 }
 0x146   : > { %s840_s17 = smov %s700_s18  ;;  %s841_s18 = smov %s843_s20 }
 0x147   :  { %13 = sbr.rel (!%p11_p10) target bundleno = 3 (0x3), region = 155 }

// kernel: generator_forward.37
= control target key start
LH: loop header
LB: loop body
LE: loop exit
PB: predicated region body
PF: predicated region fallthrough
CT: control target
= control target key end

     0   :  { %s824_s18 = smov 0   ;;  %s826_s19 = smov 0   ;;  %s923_s0 = inlined_call_operand.vmem [shape: f32[2,16,256], index: 0, kind: input, shape index: {}, may-alias: {0,1}]   ;;  %s924_s1 = inlined_call_operand.vmem [shape: f32[2,16,256], index: 1, kind: input, shape index: {}, may-alias: {0,1}]   ;;  %s925_s2 = inlined_call_operand.vmem [shape: bf16[16,80], index: 2, kind: input, shape index: {}]   ;;  %s926_s3 = inlined_call_operand.vmem [shape: f32[16,1], index: 3, kind: input, shape index: {}]   ;;  %s927_s4 = inlined_call_operand.vmem [shape: f32[2,16,128], index: 4, kind: input, shape index: {}]   ;;  %s928_s5 = inlined_call_operand.vmem [shape: f32[2,16,128], index: 5, kind: output, shape index: {}]  }
   0x1   :  { %s828_s20 = smov 0   ;;  %s830_s21 = smov 0  }
   0x2   :  { %s832_s22 = smov 0  }
   0x3 LB: > { %s27_s23 = sadd.s32 1, %s783_s21  ;;  %p43_p1 = scmp.ne.s32.totalorder %s775_s19, %s771_s18  ;;  %s787_s22 = sphi %s832_s22, %s15_s22   ;;  %s783_s21 = sphi %s830_s21, %s933_s21   ;;  %s779_s20 = sphi %s828_s20, %s932_s20   ;;  %s775_s19 = sphi %s826_s19, %s931_s19   ;;  %s771_s18 = sphi %s824_s18, %s930_s18  }
   0x4   : > { %p29_p0 = scmp.ge.s32.totalorder %s27_s23, 2  ;;  %p44_p2 = scmp.eq.s32.totalorder %s787_s22, 0 }
   0x5   : > { %s36_s26 = sadd.s32 1, %s775_s19  ;;  %p634_p5 = scmp.ge.s32.totalorder %s787_s22, 2 }
   0x6   : > { %s935_s23 = smov (%p29_p0, %s27_s23), 0  ;;  %p855_p3 = por %p44_p2, %p43_p1 }
   0x7   : > { %s31_s25 = ssub.s32 %s783_s21, %s935_s23  ;;  %203 = sbr.rel (%p634_p5) target bundleno = 24 (0x18), region = 24 }
   0x8   : > { %p34_p4 = scmp.eq.s32.totalorder %s31_s25, 0 }
   0xa   : > { %s863_s27 = scalar_select %p34_p4, %s775_s19, %s36_s26  }
   0xc   : > { %206 = sbr.rel (!%p855_p3) target bundleno = 18 (0x12), region = 28  ;;  %s208_s28 = sand.u32 (%p855_p3), 1, %s775_s19  }
   0xd   : > { %s657_s29 = sshll.u32 (%p855_p3), %s783_s21, 5  ;;  %s635_s30 = sshll.u32 (%p855_p3), %s208_s28, 4 }
   0xe   : > { %s214_s8 = scalar_lea.vmem (%p855_p3), %s923_s0, %s657_s29  ;;  %s210_s9 = scalar_lea.vmem (%p855_p3), [#allocation2], %s635_s30 }
   0xf   : > { %v245_v0 = vld [vmem:[%s214_s8] sm:$0xff] (%p855_p3)  ;;  %v247_v1 = vld [vmem:[%s214_s8 + $0x10] sm:$0xff] (%p855_p3) }
  0x10   : > { %246 = vst [vmem:[%s210_s9] sm:$0xff] (%p855_p3), %v245_v0 }
  0x11   : > { %248 = vst [vmem:[%s210_s9 + $0x8] sm:$0xff] %v247_v1 }
  0x12 PF: > { %254 = sbr.rel (!%p855_p3) target bundleno = 24 (0x18), region = 66  ;;  %s256_s10 = sand.u32 (%p855_p3), 1, %s775_s19  }
  0x13   : > { %s658_s11 = sshll.u32 (%p855_p3), %s783_s21, 5  ;;  %s638_s12 = sshll.u32 (%p855_p3), %s256_s10, 4 }
  0x14   : > { %s545_s15 = scalar_lea.vmem (%p855_p3), %s924_s1, %s658_s11  ;;  %s258_s16 = scalar_lea.vmem (%p855_p3), [#allocation3], %s638_s12 }
  0x15   : > { %v641_v2 = vld [vmem:[%s545_s15 + $0x8] sm:$0xff] (%p855_p3)  ;;  %v642_v3 = vld [vmem:[%s545_s15 + $0x18] sm:$0xff] (%p855_p3) }
  0x16   : > { %295 = vst [vmem:[%s258_s16] sm:$0xff] (%p855_p3), %v641_v2 }
  0x17   : > { %297 = vst [vmem:[%s258_s16 + $0x8] sm:$0xff] %v642_v3 }
  0x18 PF: > { %p643_p6 = scmp.ge.s32.totalorder %s787_s22, 1  ;;  %p313_p7 = scmp.lt.s32.totalorder %s787_s22, 3 }
  0x1a   : > { %p314_p8 = pnand %p643_p6, %p313_p7 }
  0x1b   : > { %s320_s17 = sand.u32 (!%p314_p8), 1, %s771_s18   ;;  %s789_s18 = smov (!%p314_p8), 125  }
  0x1c   : > { %317 = sbr.rel (%p314_p8) target bundleno = 326 (0x146), region = 108  ;;  %s644_s24 = sshll.u32 (!%p314_p8), %s320_s17, 4 }
  0x1d   : > { %s322_s25 = scalar_lea.vmem (!%p314_p8), [#allocation2], %s644_s24  ;;  %s329_s26 = scalar_lea.vmem (!%p314_p8), [#allocation3], %s644_s24 }
  0x1e   : > { %s790_s28 = smov (!%p314_p8), 124   ;;  %s791_s29 = smov (!%p314_p8), 126  }
  0x1f   : > { %s792_s30 = smov (!%p314_p8), 127   ;;  %p370_p9 = scmp.lt.s32.totalorder (!%p314_p8), %s779_s20, 1 }
  0x21   : > { %v387_v4 = vld [vmem:[%s322_s25] sm:$0xff]  ;;  %v388_v6 = vld [vmem:[%s322_s25 + $0x8] sm:$0xff]  ;;  %v793_v23 = vmov 0   ;;  %vm454_vm4 = vcmask 1014784   ;;  %vm441_vm5 = vcmask 1022976   ;;  %vm428_vm6 = vcmask 1031168  }
  0x22   : > { %v389_v5 = vld [vmem:[%s329_s26] sm:$0xff]  ;;  %v390_v7 = vld [vmem:[%s329_s26 + $0x8] sm:$0xff]  ;;  %vm391_vm0 = vcmp.ge.f32.partialorder %v387_v4, 0.0  ;;  %v395_v8 = vmul.f32 0.1, %v387_v4  ;;  %vm393_vm2 = vcmp.ge.f32.partialorder %v388_v6, 0.0  ;;  %748 = vset.pattern.permute.xlu0 %v793_v23  ;;  %747 = vset.pattern.permute.xlu2 %v793_v23 }
  0x23   : > { %vm392_vm1 = vcmp.ge.f32.partialorder %v389_v5, 0.0  ;;  %v396_v9 = vmul.f32 0.1, %v389_v5  ;;  %v397_v11 = vmul.f32 0.1, %v388_v6  ;;  %vm394_vm3 = vcmp.ge.f32.partialorder %v390_v7, 0.0 }
  0x24   : > { %v883_v10 = vsel %vm391_vm0, %v387_v4, %v395_v8  ;;  %v398_v12 = vmul.f32 0.1, %v390_v7  ;;  %v467_v21 = vld [vmem:[%s926_s3 + $0x8] sm:$0xff]  ;;  %v466_v22 = vld [vmem:[%s926_s3] sm:$0xff]  ;;  %vm415_vm7 = vcmask 1039360   ;;  %vm483_vm8 = vcmask 654336  }
  0x25   : > { %v400_v13 = vsel %vm392_vm1, %v389_v5, %v396_v9  ;;  %v886_v15 = vsel %vm393_vm2, %v388_v6, %v397_v11  ;;  %v661_v58 = vld [vmem:[%s925_s2] sm:$0xff]  ;;  %s937_s20 = smov (!%p370_p9, %s779_s20), 1 }
  0x26   : > { %v717_v14 = vpack.i.bf16 %v400_v13, %v883_v10  ;;  %v402_v16 = vsel %vm394_vm3, %v390_v7, %v398_v12  ;;  %v461_v57 = vpack.c.bf16 %v886_v15, %v883_v10  ;;  %s659_s12 = sshll.u32 %s937_s20, 4 }
  0x27   : > { %v722_v17 = vpack.i.bf16 %v402_v16, %v886_v15  ;;  %s377_s15 = scalar_lea.vmem %s927_s4, %s659_s12  ;;  %s385_s24 = scalar_lea.vmem %s928_s5, %s659_s12 }
  0x28   : > { %718 = vrot.lane.b32.xlu1 %v717_v14, %s789_s18  ;;  %708 = vrot.lane.b32.xlu0 %v717_v14, %s790_s28  ;;  %v501_v61 = vld [vmem:[%s377_s15] sm:$0xff]  ;;  %v502_v2 = vld [vmem:[%s377_s15 + $0x8] sm:$0xff] }
  0x29   : > { %728 = vrot.lane.b32.xlu2 %v717_v14, %s791_s29 }
  0x30   : > { %723 = vrot.lane.b32.xlu1 %v722_v17, %s789_s18  ;;  %713 = vrot.lane.b32.xlu0 %v722_v17, %s790_s28 }
  0x31   : > { %733 = vrot.lane.b32.xlu2 %v722_v17, %s791_s29 }
  0x38   : > { %743 = vrot.lane.b32.xlu1 %v722_v17, %s792_s30  ;;  %738 = vrot.lane.b32.xlu0 %v717_v14, %s792_s30 }
  0x39   : > { %470 = vperm.xlu2 %747, %v466_v22  }
  0x40   : > { %475 = vperm.xlu0 %748, %v467_v21  }
  0x83   : > { %v729_v18 = vpop.permute.xlu2 %728 }
  0x84   : > { %v731_v33 = vunpack.i.h.bf16 %v729_v18  ;;  %v730_v38 = vunpack.i.l.bf16 %v729_v18 }
  0x86   : > { %v429_v47 = vsel %vm428_vm6, %v730_v38, %v731_v33 }
  0x8b   : > { %v734_v28 = vpop.permute.xlu2 %733 }
  0x8c   : > { %v736_v39 = vunpack.i.h.bf16 %v734_v28  ;;  %v735_v40 = vunpack.i.l.bf16 %v734_v28 }
  0x8e   : > { %v430_v48 = vsel %vm428_vm6, %v735_v40, %v736_v39 }
  0x8f   : > { %v463_v55 = vpack.c.bf16 %v430_v48, %v429_v47 }
  0x93   : > { %v471_v59 = vpop.permute.xlu2 %470 }
  0x9a   : > { %v719_v19 = vpop.permute.xlu1 %718  ;;  %v709_v20 = vpop.permute.xlu0 %708 }
  0x9b   : > { %v711_v24 = vunpack.i.h.bf16 %v709_v20  ;;  %v710_v25 = vunpack.i.l.bf16 %v709_v20  ;;  %v721_v34 = vunpack.i.h.bf16 %v719_v19  ;;  %v720_v35 = vunpack.i.l.bf16 %v719_v19 }
  0x9d   : > { %v455_v36 = vsel %vm454_vm4, %v710_v25, %v711_v24  ;;  %v442_v43 = vsel %vm441_vm5, %v720_v35, %v721_v34 }
  0xa2   : > { %v724_v26 = vpop.permute.xlu1 %723  ;;  %v714_v27 = vpop.permute.xlu0 %713 }
  0xa3   : > { %v726_v29 = vunpack.i.h.bf16 %v724_v26  ;;  %v725_v30 = vunpack.i.l.bf16 %v724_v26  ;;  %v716_v31 = vunpack.i.h.bf16 %v714_v27  ;;  %v715_v32 = vunpack.i.l.bf16 %v714_v27 }
  0xa5   : > { %v456_v37 = vsel %vm454_vm4, %v715_v32, %v716_v31  ;;  %v443_v42 = vsel %vm441_vm5, %v725_v30, %v726_v29 }
  0xa6   : > { %v465_v41 = vpack.c.bf16 %v456_v37, %v455_v36  ;;  %v464_v44 = vpack.c.bf16 %v443_v42, %v442_v43 }
  0xa8   : > { %490 = vmatpush.bf16.msra.mxu0 %v465_v41 }
  0xaa   : > { %v744_v45 = vpop.permute.xlu1 %743  ;;  %v739_v46 = vpop.permute.xlu0 %738 }
  0xab   : > { %v746_v49 = vunpack.i.h.bf16 %v744_v45  ;;  %v745_v50 = vunpack.i.l.bf16 %v744_v45  ;;  %v741_v51 = vunpack.i.h.bf16 %v739_v46  ;;  %v740_v52 = vunpack.i.l.bf16 %v739_v46 }
  0xac   : > { %491 = vmatpush.bf16.msra.mxu0 %v464_v44 }
  0xad   : > { %v416_v53 = vsel %vm415_vm7, %v740_v52, %v741_v51  ;;  %v417_v54 = vsel %vm415_vm7, %v745_v50, %v746_v49 }
  0xae   : > { %v462_v56 = vpack.c.bf16 %v417_v54, %v416_v53 }
  0xb0   : > { %492 = vmatpush.bf16.msra.mxu0 %v463_v55 }
  0xb2   : > { %v476_v0 = vpop.permute.xlu0 %475 }
  0xb4   : > { %493 = vmatpush.bf16.msra.mxu0 %v462_v56 }
  0xb8   : > { %494 = vmatpush.bf16.msra.mxu0 %v461_v57 }
  0xbb   : > { %654 = vmatmul.msk.bf16.vlgmr.msra.gmra.mxu0 %vm483_vm8, %v661_v58 }
 0x138   : > { %v496_v60 = vpop.f32.mrf.mxu0 }
 0x139   : > { %v497_v62 = vadd.f32 %v496_v60, %v471_v59 }
 0x13b   : > { %v503_v63 = vadd.f32 %v501_v61, %v497_v62 }
 0x13d   : > { %505 = vst [vmem:[%s385_s24] sm:$0xff] %v503_v63 }
 0x140   : > { %v498_v1 = vpop.f32.mrf.mxu0 }
 0x141   : > { %v499_v3 = vadd.f32 %v498_v1, %v476_v0 }
 0x143   : > { %v504_v4 = vadd.f32 %v502_v2, %v499_v3 }
 0x145   : > { %506 = vst [vmem:[%s385_s24 + $0x8] sm:$0xff] %v504_v4 }
 0x146 PF: > { %s15_s22 = sadd.s32 1, %s787_s22   ;;  %s930_s18 = smov %s775_s19 }
 0x147   : > { %p12_p10 = scmp.ge.s32.totalorder %s15_s22, 4   ;;  %s931_s19 = smov %s863_s27 }
 0x148   : > { %s932_s20 = smov %s783_s21  ;;  %s933_s21 = smov %s935_s23 }
 0x149   :  { %14 = sbr.rel (!%p12_p10) target bundleno = 3 (0x3), region = 162 }

// kernel: generator_forward.40
= control target key start
LH: loop header
LB: loop body
LE: loop exit
PB: predicated region body
PF: predicated region fallthrough
CT: control target
= control target key end

     0   :  { %s736_s15 = smov 0   ;;  %s738_s16 = smov 0   ;;  %s832_s0 = inlined_call_operand.vmem [shape: f32[2,16,256], index: 0, kind: input, shape index: {}, may-alias: {0,1}]   ;;  %s833_s1 = inlined_call_operand.vmem [shape: f32[2,16,256], index: 1, kind: input, shape index: {}, may-alias: {0,1}]   ;;  %s834_s2 = inlined_call_operand.vmem [shape: bf16[16,80], index: 2, kind: input, shape index: {}]   ;;  %s835_s3 = inlined_call_operand.vmem [shape: f32[16,1], index: 3, kind: input, shape index: {}]   ;;  %s836_s4 = inlined_call_operand.vmem [shape: f32[2,16,128], index: 4, kind: output, shape index: {}]  }
   0x1   :  { %s740_s17 = smov 0   ;;  %s742_s18 = smov 0  }
   0x2   :  { %s744_s19 = smov 0  }
   0x3 LB: > { %s26_s20 = sadd.s32 1, %s700_s18  ;;  %p42_p1 = scmp.ne.s32.totalorder %s692_s16, %s688_s15  ;;  %s704_s19 = sphi %s744_s19, %s14_s19   ;;  %s700_s18 = sphi %s742_s18, %s841_s18   ;;  %s696_s17 = sphi %s740_s17, %s840_s17   ;;  %s692_s16 = sphi %s738_s16, %s839_s16   ;;  %s688_s15 = sphi %s736_s15, %s838_s15  }
   0x4   : > { %p28_p0 = scmp.ge.s32.totalorder %s26_s20, 2  ;;  %p43_p2 = scmp.eq.s32.totalorder %s704_s19, 0 }
   0x5   : > { %s35_s23 = sadd.s32 1, %s692_s16  ;;  %p554_p5 = scmp.ge.s32.totalorder %s704_s19, 2 }
   0x6   : > { %s843_s20 = smov (%p28_p0, %s26_s20), 0  ;;  %p767_p3 = por %p43_p2, %p42_p1 }
   0x7   : > { %s30_s22 = ssub.s32 %s700_s18, %s843_s20  ;;  %174 = sbr.rel (%p554_p5) target bundleno = 24 (0x18), region = 24 }
   0x8   : > { %p33_p4 = scmp.eq.s32.totalorder %s30_s22, 0 }
   0xa   : > { %s775_s24 = scalar_select %p33_p4, %s692_s16, %s35_s23  }
   0xc   : > { %177 = sbr.rel (!%p767_p3) target bundleno = 18 (0x12), region = 28  ;;  %s179_s25 = sand.u32 (%p767_p3), 1, %s692_s16  }
   0xd   : > { %s575_s26 = sshll.u32 (%p767_p3), %s700_s18, 5  ;;  %s555_s27 = sshll.u32 (%p767_p3), %s179_s25, 4 }
   0xe   : > { %s185_s30 = scalar_lea.vmem (%p767_p3), %s832_s0, %s575_s26  ;;  %s181_s5 = scalar_lea.vmem (%p767_p3), [#allocation2], %s555_s27 }
   0xf   : > { %v216_v0 = vld [vmem:[%s185_s30] sm:$0xff] (%p767_p3)  ;;  %v218_v1 = vld [vmem:[%s185_s30 + $0x10] sm:$0xff] (%p767_p3) }
  0x10   : > { %217 = vst [vmem:[%s181_s5] sm:$0xff] (%p767_p3), %v216_v0 }
  0x11   : > { %219 = vst [vmem:[%s181_s5 + $0x8] sm:$0xff] %v218_v1 }
  0x12 PF: > { %225 = sbr.rel (!%p767_p3) target bundleno = 24 (0x18), region = 66  ;;  %s227_s6 = sand.u32 (%p767_p3), 1, %s692_s16  }
  0x13   : > { %s576_s7 = sshll.u32 (%p767_p3), %s700_s18, 5  ;;  %s558_s8 = sshll.u32 (%p767_p3), %s227_s6, 4 }
  0x14   : > { %s483_s11 = scalar_lea.vmem (%p767_p3), %s833_s1, %s576_s7  ;;  %s229_s12 = scalar_lea.vmem (%p767_p3), [#allocation3], %s558_s8 }
  0x15   : > { %v561_v2 = vld [vmem:[%s483_s11 + $0x8] sm:$0xff] (%p767_p3)  ;;  %v562_v3 = vld [vmem:[%s483_s11 + $0x18] sm:$0xff] (%p767_p3) }
  0x16   : > { %266 = vst [vmem:[%s229_s12] sm:$0xff] (%p767_p3), %v561_v2 }
  0x17   : > { %268 = vst [vmem:[%s229_s12 + $0x8] sm:$0xff] %v562_v3 }
  0x18 PF: > { %p563_p6 = scmp.ge.s32.totalorder %s704_s19, 1  ;;  %p273_p7 = scmp.lt.s32.totalorder %s704_s19, 3 }
  0x1a   : > { %p274_p8 = pnand %p563_p6, %p273_p7 }
  0x1b   : > { %s280_s13 = sand.u32 (!%p274_p8), 1, %s688_s15   ;;  %s706_s15 = smov (!%p274_p8), 113  }
  0x1c   : > { %277 = sbr.rel (%p274_p8) target bundleno = 324 (0x144), region = 104  ;;  %s564_s14 = sshll.u32 (!%p274_p8), %s280_s13, 4 }
  0x1d   : > { %s282_s21 = scalar_lea.vmem (!%p274_p8), [#allocation2], %s564_s14  ;;  %s289_s22 = scalar_lea.vmem (!%p274_p8), [#allocation3], %s564_s14 }
  0x1e   : > { %s707_s23 = smov (!%p274_p8), 108   ;;  %s708_s25 = smov (!%p274_p8), 118  }
  0x1f   : > { %s709_s26 = smov (!%p274_p8), 123   ;;  %p320_p9 = scmp.lt.s32.totalorder (!%p274_p8), %s696_s17, 1 }
  0x21   : > { %v329_v4 = vld [vmem:[%s282_s21] sm:$0xff]  ;;  %v330_v6 = vld [vmem:[%s282_s21 + $0x8] sm:$0xff]  ;;  %v710_v23 = vmov 0   ;;  %vm396_vm4 = vcmask 883712   ;;  %vm383_vm5 = vcmask 924672   ;;  %vm370_vm6 = vcmask 965632  }
  0x22   : > { %v331_v5 = vld [vmem:[%s289_s22] sm:$0xff]  ;;  %v332_v7 = vld [vmem:[%s289_s22 + $0x8] sm:$0xff]  ;;  %vm333_vm0 = vcmp.ge.f32.partialorder %v329_v4, 0.0  ;;  %v337_v8 = vmul.f32 0.1, %v329_v4  ;;  %vm335_vm2 = vcmp.ge.f32.partialorder %v330_v6, 0.0  ;;  %665 = vset.pattern.permute.xlu0 %v710_v23  ;;  %664 = vset.pattern.permute.xlu2 %v710_v23 }
  0x23   : > { %vm334_vm1 = vcmp.ge.f32.partialorder %v331_v5, 0.0  ;;  %v338_v9 = vmul.f32 0.1, %v331_v5  ;;  %v339_v11 = vmul.f32 0.1, %v330_v6  ;;  %vm336_vm3 = vcmp.ge.f32.partialorder %v332_v7, 0.0 }
  0x24   : > { %v795_v10 = vsel %vm333_vm0, %v329_v4, %v337_v8  ;;  %v340_v12 = vmul.f32 0.1, %v332_v7  ;;  %v409_v21 = vld [vmem:[%s835_s3 + $0x8] sm:$0xff]  ;;  %v408_v22 = vld [vmem:[%s835_s3] sm:$0xff]  ;;  %vm357_vm7 = vcmask 1006592   ;;  %vm425_vm8 = vcmask 654336  }
  0x25   : > { %v342_v13 = vsel %vm334_vm1, %v331_v5, %v338_v9  ;;  %v798_v15 = vsel %vm335_vm2, %v330_v6, %v339_v11  ;;  %v578_v58 = vld [vmem:[%s834_s2] sm:$0xff]  ;;  %s845_s17 = smov (!%p320_p9, %s696_s17), 1 }
  0x26   : > { %v634_v14 = vpack.i.bf16 %v342_v13, %v795_v10  ;;  %v344_v16 = vsel %vm336_vm3, %v332_v7, %v340_v12  ;;  %v403_v57 = vpack.c.bf16 %v798_v15, %v795_v10  ;;  %s577_s7 = sshll.u32 %s845_s17, 4 }
  0x27   : > { %v639_v17 = vpack.i.bf16 %v344_v16, %v798_v15  ;;  %s327_s10 = scalar_lea.vmem %s836_s4, %s577_s7 }
  0x28   : > { %635 = vrot.lane.b32.xlu1 %v634_v14, %s706_s15  ;;  %625 = vrot.lane.b32.xlu0 %v634_v14, %s707_s23 }
  0x29   : > { %645 = vrot.lane.b32.xlu2 %v634_v14, %s708_s25 }
  0x30   : > { %640 = vrot.lane.b32.xlu1 %v639_v17, %s706_s15  ;;  %630 = vrot.lane.b32.xlu0 %v639_v17, %s707_s23 }
  0x31   : > { %650 = vrot.lane.b32.xlu2 %v639_v17, %s708_s25 }
  0x38   : > { %660 = vrot.lane.b32.xlu1 %v639_v17, %s709_s26  ;;  %655 = vrot.lane.b32.xlu0 %v634_v14, %s709_s26 }
  0x39   : > { %412 = vperm.xlu2 %664, %v408_v22  }
  0x40   : > { %417 = vperm.xlu0 %665, %v409_v21  }
  0x83   : > { %v646_v18 = vpop.permute.xlu2 %645 }
  0x84   : > { %v648_v33 = vunpack.i.h.bf16 %v646_v18  ;;  %v647_v38 = vunpack.i.l.bf16 %v646_v18 }
  0x86   : > { %v371_v47 = vsel %vm370_vm6, %v647_v38, %v648_v33 }
  0x8b   : > { %v651_v28 = vpop.permute.xlu2 %650 }
  0x8c   : > { %v653_v39 = vunpack.i.h.bf16 %v651_v28  ;;  %v652_v40 = vunpack.i.l.bf16 %v651_v28 }
  0x8e   : > { %v372_v48 = vsel %vm370_vm6, %v652_v40, %v653_v39 }
  0x8f   : > { %v405_v55 = vpack.c.bf16 %v372_v48, %v371_v47 }
  0x93   : > { %v413_v59 = vpop.permute.xlu2 %412 }
  0x9a   : > { %v636_v19 = vpop.permute.xlu1 %635  ;;  %v626_v20 = vpop.permute.xlu0 %625 }
  0x9b   : > { %v628_v24 = vunpack.i.h.bf16 %v626_v20  ;;  %v627_v25 = vunpack.i.l.bf16 %v626_v20  ;;  %v638_v34 = vunpack.i.h.bf16 %v636_v19  ;;  %v637_v35 = vunpack.i.l.bf16 %v636_v19 }
  0x9d   : > { %v397_v36 = vsel %vm396_vm4, %v627_v25, %v628_v24  ;;  %v384_v43 = vsel %vm383_vm5, %v637_v35, %v638_v34 }
  0xa2   : > { %v641_v26 = vpop.permute.xlu1 %640  ;;  %v631_v27 = vpop.permute.xlu0 %630 }
  0xa3   : > { %v643_v29 = vunpack.i.h.bf16 %v641_v26  ;;  %v642_v30 = vunpack.i.l.bf16 %v641_v26  ;;  %v633_v31 = vunpack.i.h.bf16 %v631_v27  ;;  %v632_v32 = vunpack.i.l.bf16 %v631_v27 }
  0xa5   : > { %v398_v37 = vsel %vm396_vm4, %v632_v32, %v633_v31  ;;  %v385_v42 = vsel %vm383_vm5, %v642_v30, %v643_v29 }
  0xa6   : > { %v407_v41 = vpack.c.bf16 %v398_v37, %v397_v36  ;;  %v406_v44 = vpack.c.bf16 %v385_v42, %v384_v43 }
  0xa8   : > { %432 = vmatpush.bf16.msra.mxu0 %v407_v41 }
  0xaa   : > { %v661_v45 = vpop.permute.xlu1 %660  ;;  %v656_v46 = vpop.permute.xlu0 %655 }
  0xab   : > { %v663_v49 = vunpack.i.h.bf16 %v661_v45  ;;  %v662_v50 = vunpack.i.l.bf16 %v661_v45  ;;  %v658_v51 = vunpack.i.h.bf16 %v656_v46  ;;  %v657_v52 = vunpack.i.l.bf16 %v656_v46 }
  0xac   : > { %433 = vmatpush.bf16.msra.mxu0 %v406_v44 }
  0xad   : > { %v358_v53 = vsel %vm357_vm7, %v657_v52, %v658_v51  ;;  %v359_v54 = vsel %vm357_vm7, %v662_v50, %v663_v49 }
  0xae   : > { %v404_v56 = vpack.c.bf16 %v359_v54, %v358_v53 }
  0xb0   : > { %434 = vmatpush.bf16.msra.mxu0 %v405_v55 }
  0xb2   : > { %v418_v62 = vpop.permute.xlu0 %417 }
  0xb4   : > { %435 = vmatpush.bf16.msra.mxu0 %v404_v56 }
  0xb8   : > { %436 = vmatpush.bf16.msra.mxu0 %v403_v57 }
  0xbb   : > { %572 = vmatmul.msk.bf16.vlgmr.msra.gmra.mxu0 %vm425_vm8, %v578_v58 }
 0x138   : > { %v438_v60 = vpop.f32.mrf.mxu0 }
 0x139   : > { %v439_v61 = vadd.f32 %v438_v60, %v413_v59 }
 0x13b   : > { %443 = vst [vmem:[%s327_s10] sm:$0xff] %v439_v61 }
 0x140   : > { %v440_v63 = vpop.f32.mrf.mxu0 }
 0x141   : > { %v441_v0 = vadd.f32 %v440_v63, %v418_v62 }
 0x143   : > { %444 = vst [vmem:[%s327_s10 + $0x8] sm:$0xff] %v441_v0 }
 0x144 PF: > { %s14_s19 = sadd.s32 1, %s704_s19   ;;  %s838_s15 = smov %s692_s16 }
 0x145   : > { %p11_p10 = scmp.ge.s32.totalorder %s14_s19, 4   ;;  %s839_s16 = smov %s775_s24 }
 0x146   : > { %s840_s17 = smov %s700_s18  ;;  %s841_s18 = smov %s843_s20 }
 0x147   :  { %13 = sbr.rel (!%p11_p10) target bundleno = 3 (0x3), region = 155 }

// kernel: tile.18
= control target key start
LH: loop header
LB: loop body
LE: loop exit
PB: predicated region body
PF: predicated region fallthrough
CT: control target
= control target key end

     0   :  { %s22_s0 = inlined_call_operand.vmem [shape: f32[8], index: 0, kind: input, shape index: {}]   ;;  %s23_s1 = inlined_call_operand.vmem [shape: f32[2,8], index: 1, kind: output, shape index: {}]  }
   0x1   :  { %v4_v0 = vld [vmem:[%s22_s0] ss:$0 sm:$0xff] }
   0x2   :  { %5 = vst [vmem:[%s23_s1] sm:$0x3] %v4_v0 }

// kernel: tile.1
= control target key start
LH: loop header
LB: loop body
LE: loop exit
PB: predicated region body
PF: predicated region fallthrough
CT: control target
= control target key end

     0   :  { %s66_s8 = smov 125   ;;  %s67_s9 = smov 123   ;;  %vm7_vm0 = vcmask 7168   ;;  %s117_s0 = inlined_call_operand.vmem [shape: f32[2,8], index: 0, kind: input, shape index: {}]   ;;  %s118_s1 = inlined_call_operand.vmem [shape: f32[16,1], index: 1, kind: output, shape index: {}]  }
   0x1   :  { %v4_v0 = vld [vmem:[%s117_s0] sm:$0x3]  ;;  %s65_s0 = smov 127   ;;  %s68_s10 = smov 126  }
   0x2   :  { %5 = vst [vmem:[#allocation0] sm:$0x3] %v4_v0  ;;  %s69_s11 = smov 124   ;;  %s70_s12 = smov 122  }
   0x3   :  { %s71_s13 = smov 121  }
   0x9   :  { %v9_v1 = vld [vmem:[#allocation0] sm:$0x3]  }
   0xa   :  { %v21_v2 = vld [vmem:[#allocation0] sm:$0x3]   ;;  %10 = vrot.lane.b32.xlu0 %v9_v1, %s65_s0 }
   0xb   :  { %22 = vrot.lane.b32.xlu1 %v21_v2, %s66_s8  ;;  %v33_v3 = vld [vmem:[#allocation0] sm:$0x3]  }
   0xc   :  { %34 = vrot.lane.b32.xlu2 %v33_v3, %s67_s9  ;;  %v15_v4 = vld [vmem:[#allocation0] sm:$0x3]  }
   0xd   :  { %v27_v5 = vld [vmem:[#allocation0] sm:$0x3]  }
   0xe   :  { %v39_v6 = vld [vmem:[#allocation0] sm:$0x3]  }
   0xf   :  { %v45_v7 = vld [vmem:[#allocation0] sm:$0x3]  }
  0x10   :  { %v6_v8 = vld [vmem:[#allocation0] sm:$0x3]  }
  0x11   :  { %8 = vst.msk [vmem:[%s118_s1] ss:$8 sm:$0x3] %vm7_vm0, %v6_v8  }
  0x12   :  { %16 = vrot.lane.b32.xlu0 %v15_v4, %s68_s10 }
  0x13   :  { %28 = vrot.lane.b32.xlu1 %v27_v5, %s69_s11 }
  0x14   :  { %40 = vrot.lane.b32.xlu2 %v39_v6, %s70_s12 }
  0x1a   :  { %46 = vrot.lane.b32.xlu0 %v45_v7, %s71_s13 }
  0x66   :  { %v35_v9 = vpop.permute.xlu2 %34  }
  0x67   :  { %55 = vst.msk [vmem:[%s118_s1 + $0x5] ss:$8 sm:$0x3] %vm7_vm0, %v35_v9  }
  0x6e   :  { %v41_v10 = vpop.permute.xlu2 %40  }
  0x6f   :  { %56 = vst.msk [vmem:[%s118_s1 + $0x6] ss:$8 sm:$0x3] %vm7_vm0, %v41_v10  }
  0x7c   :  { %v11_v11 = vpop.permute.xlu0 %10  }
  0x7d   :  { %v23_v12 = vpop.permute.xlu1 %22   ;;  %51 = vst.msk [vmem:[%s118_s1 + $0x1] ss:$8 sm:$0x3] %vm7_vm0, %v11_v11  }
  0x7e   :  { %53 = vst.msk [vmem:[%s118_s1 + $0x3] ss:$8 sm:$0x3] %vm7_vm0, %v23_v12  }
  0x84   :  { %v17_v13 = vpop.permute.xlu0 %16  }
  0x85   :  { %v29_v14 = vpop.permute.xlu1 %28   ;;  %52 = vst.msk [vmem:[%s118_s1 + $0x2] ss:$8 sm:$0x3] %vm7_vm0, %v17_v13  }
  0x86   :  { %54 = vst.msk [vmem:[%s118_s1 + $0x4] ss:$8 sm:$0x3] %vm7_vm0, %v29_v14  }
  0x8c   :  { %v47_v15 = vpop.permute.xlu0 %46  }
  0x8d   :  { %57 = vst.msk [vmem:[%s118_s1 + $0x7] ss:$8 sm:$0x3] %vm7_vm0, %v47_v15  }

// kernel: generator_forward.41
= control target key start
LH: loop header
LB: loop body
LE: loop exit
PB: predicated region body
PF: predicated region fallthrough
CT: control target
= control target key end

     0   :  { %s914_s21 = smov 0   ;;  %s916_s22 = smov 0   ;;  %s1016_s0 = inlined_call_operand.vmem [shape: f32[2,16,256], index: 0, kind: input, shape index: {}, may-alias: {0,1}]   ;;  %s1017_s1 = inlined_call_operand.vmem [shape: f32[2,16,256], index: 1, kind: input, shape index: {}, may-alias: {0,1}]   ;;  %s1018_s2 = inlined_call_operand.vmem [shape: bf16[16,80], index: 2, kind: input, shape index: {}]   ;;  %s1019_s3 = inlined_call_operand.vmem [shape: f32[16,1], index: 3, kind: input, shape index: {}]   ;;  %s1020_s4 = inlined_call_operand.vmem [shape: f32[2,16,128], index: 4, kind: input, shape index: {}]   ;;  %s1021_s5 = inlined_call_operand.vmem [shape: f32[2,16,128], index: 5, kind: input, shape index: {}]   ;;  %s1022_s6 = inlined_call_operand.vmem [shape: f32[2,16,128], index: 6, kind: output, shape index: {}]  }
   0x1   :  { %s918_s23 = smov 0   ;;  %s920_s24 = smov 0  }
   0x2   :  { %s922_s25 = smov 0  }
   0x3 LB: > { %s28_s26 = sadd.s32 1, %s868_s24  ;;  %p44_p1 = scmp.ne.s32.totalorder %s860_s22, %s856_s21  ;;  %s872_s25 = sphi %s922_s25, %s16_s25   ;;  %s868_s24 = sphi %s920_s24, %s1027_s24   ;;  %s864_s23 = sphi %s918_s23, %s1026_s23   ;;  %s860_s22 = sphi %s916_s22, %s1025_s22   ;;  %s856_s21 = sphi %s914_s21, %s1024_s21  }
   0x4   : > { %p30_p0 = scmp.ge.s32.totalorder %s28_s26, 2  ;;  %p45_p2 = scmp.eq.s32.totalorder %s872_s25, 0 }
   0x5   : > { %s37_s29 = sadd.s32 1, %s860_s22  ;;  %p716_p5 = scmp.ge.s32.totalorder %s872_s25, 2 }
   0x6   : > { %s1029_s26 = smov (%p30_p0, %s28_s26), 0  ;;  %p945_p3 = por %p45_p2, %p44_p1 }
   0x7   : > { %s32_s28 = ssub.s32 %s868_s24, %s1029_s26  ;;  %232 = sbr.rel (%p716_p5) target bundleno = 24 (0x18), region = 24 }
   0x8   : > { %p35_p4 = scmp.eq.s32.totalorder %s32_s28, 0 }
   0xa   : > { %s953_s30 = scalar_select %p35_p4, %s860_s22, %s37_s29  }
   0xc   : > { %235 = sbr.rel (!%p945_p3) target bundleno = 18 (0x12), region = 28  ;;  %s237_s7 = sand.u32 (%p945_p3), 1, %s860_s22  }
   0xd   : > { %s741_s8 = sshll.u32 (%p945_p3), %s868_s24, 5  ;;  %s717_s9 = sshll.u32 (%p945_p3), %s237_s7, 4 }
   0xe   : > { %s243_s12 = scalar_lea.vmem (%p945_p3), %s1016_s0, %s741_s8  ;;  %s239_s13 = scalar_lea.vmem (%p945_p3), [#allocation2], %s717_s9 }
   0xf   : > { %v274_v0 = vld [vmem:[%s243_s12] sm:$0xff] (%p945_p3)  ;;  %v276_v1 = vld [vmem:[%s243_s12 + $0x10] sm:$0xff] (%p945_p3) }
  0x10   : > { %275 = vst [vmem:[%s239_s13] sm:$0xff] (%p945_p3), %v274_v0 }
  0x11   : > { %277 = vst [vmem:[%s239_s13 + $0x8] sm:$0xff] %v276_v1 }
  0x12 PF: > { %283 = sbr.rel (!%p945_p3) target bundleno = 24 (0x18), region = 66  ;;  %s285_s14 = sand.u32 (%p945_p3), 1, %s860_s22  }
  0x13   : > { %s742_s15 = sshll.u32 (%p945_p3), %s868_s24, 5  ;;  %s720_s16 = sshll.u32 (%p945_p3), %s285_s14, 4 }
  0x14   : > { %s609_s19 = scalar_lea.vmem (%p945_p3), %s1017_s1, %s742_s15  ;;  %s287_s20 = scalar_lea.vmem (%p945_p3), [#allocation3], %s720_s16 }
  0x15   : > { %v723_v2 = vld [vmem:[%s609_s19 + $0x8] sm:$0xff] (%p945_p3)  ;;  %v724_v3 = vld [vmem:[%s609_s19 + $0x18] sm:$0xff] (%p945_p3) }
  0x16   : > { %324 = vst [vmem:[%s287_s20] sm:$0xff] (%p945_p3), %v723_v2 }
  0x17   : > { %326 = vst [vmem:[%s287_s20 + $0x8] sm:$0xff] %v724_v3 }
  0x18 PF: > { %p725_p6 = scmp.ge.s32.totalorder %s872_s25, 1  ;;  %p353_p7 = scmp.lt.s32.totalorder %s872_s25, 3 }
  0x1a   : > { %p354_p8 = pnand %p725_p6, %p353_p7 }
  0x1b   : > { %s360_s27 = sand.u32 (!%p354_p8), 1, %s856_s21   ;;  %s874_s21 = smov (!%p354_p8), 125  }
  0x1c   : > { %357 = sbr.rel (%p354_p8) target bundleno = 330 (0x14a), region = 112  ;;  %s726_s28 = sshll.u32 (!%p354_p8), %s360_s27, 4 }
  0x1d   : > { %s362_s29 = scalar_lea.vmem (!%p354_p8), [#allocation2], %s726_s28  ;;  %s369_s7 = scalar_lea.vmem (!%p354_p8), [#allocation3], %s726_s28 }
  0x1e   : > { %s875_s8 = smov (!%p354_p8), 124   ;;  %s876_s9 = smov (!%p354_p8), 126  }
  0x1f   : > { %s877_s10 = smov (!%p354_p8), 127   ;;  %p420_p9 = scmp.lt.s32.totalorder (!%p354_p8), %s864_s23, 1 }
  0x21   : > { %v445_v4 = vld [vmem:[%s362_s29] sm:$0xff]  ;;  %v446_v6 = vld [vmem:[%s362_s29 + $0x8] sm:$0xff]  ;;  %v878_v23 = vmov 0   ;;  %vm512_vm4 = vcmask 1014784   ;;  %vm499_vm5 = vcmask 1022976   ;;  %vm486_vm6 = vcmask 1031168  }
  0x22   : > { %v447_v5 = vld [vmem:[%s369_s7] sm:$0xff]  ;;  %v448_v7 = vld [vmem:[%s369_s7 + $0x8] sm:$0xff]  ;;  %vm449_vm0 = vcmp.ge.f32.partialorder %v445_v4, 0.0  ;;  %v453_v8 = vmul.f32 0.1, %v445_v4  ;;  %vm451_vm2 = vcmp.ge.f32.partialorder %v446_v6, 0.0  ;;  %833 = vset.pattern.permute.xlu0 %v878_v23  ;;  %832 = vset.pattern.permute.xlu2 %v878_v23 }
  0x23   : > { %vm450_vm1 = vcmp.ge.f32.partialorder %v447_v5, 0.0  ;;  %v454_v9 = vmul.f32 0.1, %v447_v5  ;;  %v455_v11 = vmul.f32 0.1, %v446_v6  ;;  %vm452_vm3 = vcmp.ge.f32.partialorder %v448_v7, 0.0 }
  0x24   : > { %v973_v10 = vsel %vm449_vm0, %v445_v4, %v453_v8  ;;  %v456_v12 = vmul.f32 0.1, %v448_v7  ;;  %v525_v21 = vld [vmem:[%s1019_s3 + $0x8] sm:$0xff]  ;;  %v524_v22 = vld [vmem:[%s1019_s3] sm:$0xff]  ;;  %vm473_vm7 = vcmask 1039360   ;;  %vm541_vm8 = vcmask 654336  }
  0x25   : > { %v458_v13 = vsel %vm450_vm1, %v447_v5, %v454_v9  ;;  %v976_v15 = vsel %vm451_vm2, %v446_v6, %v455_v11  ;;  %v746_v58 = vld [vmem:[%s1018_s2] sm:$0xff]  ;;  %s1031_s23 = smov (!%p420_p9, %s864_s23), 1 }
  0x26   : > { %v802_v14 = vpack.i.bf16 %v458_v13, %v973_v10  ;;  %v460_v16 = vsel %vm452_vm3, %v448_v7, %v456_v12  ;;  %v519_v57 = vpack.c.bf16 %v976_v15, %v973_v10  ;;  %s743_s17 = sshll.u32 %s1031_s23, 4 }
  0x27   : > { %v807_v17 = vpack.i.bf16 %v460_v16, %v976_v15  ;;  %s427_s20 = scalar_lea.vmem %s1020_s4, %s743_s17  ;;  %s435_s29 = scalar_lea.vmem %s1021_s5, %s743_s17 }
  0x28   : > { %803 = vrot.lane.b32.xlu1 %v802_v14, %s874_s21  ;;  %793 = vrot.lane.b32.xlu0 %v802_v14, %s875_s8  ;;  %v559_v61 = vld [vmem:[%s427_s20] sm:$0xff]  ;;  %v560_v5 = vld [vmem:[%s427_s20 + $0x8] sm:$0xff] }
  0x29   : > { %813 = vrot.lane.b32.xlu2 %v802_v14, %s876_s9  ;;  %v563_v63 = vld [vmem:[%s435_s29] sm:$0xff]  ;;  %v564_v7 = vld [vmem:[%s435_s29 + $0x8] sm:$0xff] }
  0x30   : > { %808 = vrot.lane.b32.xlu1 %v807_v17, %s874_s21  ;;  %798 = vrot.lane.b32.xlu0 %v807_v17, %s875_s8  ;;  %s443_s8 = scalar_lea.vmem %s1022_s6, %s743_s17 }
  0x31   : > { %818 = vrot.lane.b32.xlu2 %v807_v17, %s876_s9 }
  0x38   : > { %828 = vrot.lane.b32.xlu1 %v807_v17, %s877_s10  ;;  %823 = vrot.lane.b32.xlu0 %v802_v14, %s877_s10 }
  0x39   : > { %528 = vperm.xlu2 %832, %v524_v22  }
  0x40   : > { %533 = vperm.xlu0 %833, %v525_v21  }
  0x83   : > { %v814_v18 = vpop.permute.xlu2 %813 }
  0x84   : > { %v816_v33 = vunpack.i.h.bf16 %v814_v18  ;;  %v815_v38 = vunpack.i.l.bf16 %v814_v18 }
  0x86   : > { %v487_v47 = vsel %vm486_vm6, %v815_v38, %v816_v33 }
  0x8b   : > { %v819_v28 = vpop.permute.xlu2 %818 }
  0x8c   : > { %v821_v39 = vunpack.i.h.bf16 %v819_v28  ;;  %v820_v40 = vunpack.i.l.bf16 %v819_v28 }
  0x8e   : > { %v488_v48 = vsel %vm486_vm6, %v820_v40, %v821_v39 }
  0x8f   : > { %v521_v55 = vpack.c.bf16 %v488_v48, %v487_v47 }
  0x93   : > { %v529_v59 = vpop.permute.xlu2 %528 }
  0x9a   : > { %v804_v19 = vpop.permute.xlu1 %803  ;;  %v794_v20 = vpop.permute.xlu0 %793 }
  0x9b   : > { %v796_v24 = vunpack.i.h.bf16 %v794_v20  ;;  %v795_v25 = vunpack.i.l.bf16 %v794_v20  ;;  %v806_v34 = vunpack.i.h.bf16 %v804_v19  ;;  %v805_v35 = vunpack.i.l.bf16 %v804_v19 }
  0x9d   : > { %v513_v36 = vsel %vm512_vm4, %v795_v25, %v796_v24  ;;  %v500_v43 = vsel %vm499_vm5, %v805_v35, %v806_v34 }
  0xa2   : > { %v809_v26 = vpop.permute.xlu1 %808  ;;  %v799_v27 = vpop.permute.xlu0 %798 }
  0xa3   : > { %v811_v29 = vunpack.i.h.bf16 %v809_v26  ;;  %v810_v30 = vunpack.i.l.bf16 %v809_v26  ;;  %v801_v31 = vunpack.i.h.bf16 %v799_v27  ;;  %v800_v32 = vunpack.i.l.bf16 %v799_v27 }
  0xa5   : > { %v514_v37 = vsel %vm512_vm4, %v800_v32, %v801_v31  ;;  %v501_v42 = vsel %vm499_vm5, %v810_v30, %v811_v29 }
  0xa6   : > { %v523_v41 = vpack.c.bf16 %v514_v37, %v513_v36  ;;  %v522_v44 = vpack.c.bf16 %v501_v42, %v500_v43 }
  0xa8   : > { %548 = vmatpush.bf16.msra.mxu0 %v523_v41 }
  0xaa   : > { %v829_v45 = vpop.permute.xlu1 %828  ;;  %v824_v46 = vpop.permute.xlu0 %823 }
  0xab   : > { %v831_v49 = vunpack.i.h.bf16 %v829_v45  ;;  %v830_v50 = vunpack.i.l.bf16 %v829_v45  ;;  %v826_v51 = vunpack.i.h.bf16 %v824_v46  ;;  %v825_v52 = vunpack.i.l.bf16 %v824_v46 }
  0xac   : > { %549 = vmatpush.bf16.msra.mxu0 %v522_v44 }
  0xad   : > { %v474_v53 = vsel %vm473_vm7, %v825_v52, %v826_v51  ;;  %v475_v54 = vsel %vm473_vm7, %v830_v50, %v831_v49 }
  0xae   : > { %v520_v56 = vpack.c.bf16 %v475_v54, %v474_v53 }
  0xb0   : > { %550 = vmatpush.bf16.msra.mxu0 %v521_v55 }
  0xb2   : > { %v534_v2 = vpop.permute.xlu0 %533 }
  0xb4   : > { %551 = vmatpush.bf16.msra.mxu0 %v520_v56 }
  0xb8   : > { %552 = vmatpush.bf16.msra.mxu0 %v519_v57 }
  0xbb   : > { %738 = vmatmul.msk.bf16.vlgmr.msra.gmra.mxu0 %vm541_vm8, %v746_v58 }
 0x138   : > { %v554_v60 = vpop.f32.mrf.mxu0 }
 0x139   : > { %v555_v62 = vadd.f32 %v554_v60, %v529_v59 }
 0x13b   : > { %v561_v0 = vadd.f32 %v559_v61, %v555_v62 }
 0x13d   : > { %v565_v1 = vadd.f32 %v563_v63, %v561_v0 }
 0x13f   : > { %v567_v3 = vmul.f32 0.5, %v565_v1 }
 0x140   : > { %v556_v4 = vpop.f32.mrf.mxu0 }
 0x141   : > { %569 = vst [vmem:[%s443_s8] sm:$0xff] %v567_v3  ;;  %v557_v6 = vadd.f32 %v556_v4, %v534_v2 }
 0x143   : > { %v562_v8 = vadd.f32 %v560_v5, %v557_v6 }
 0x145   : > { %v566_v9 = vadd.f32 %v564_v7, %v562_v8 }
 0x147   : > { %v568_v10 = vmul.f32 0.5, %v566_v9 }
 0x149   : > { %570 = vst [vmem:[%s443_s8 + $0x8] sm:$0xff] %v568_v10 }
 0x14a PF: > { %s16_s25 = sadd.s32 1, %s872_s25   ;;  %s1024_s21 = smov %s860_s22 }
 0x14b   : > { %p13_p10 = scmp.ge.s32.totalorder %s16_s25, 4   ;;  %s1025_s22 = smov %s953_s30 }
 0x14c   : > { %s1026_s23 = smov %s868_s24  ;;  %s1027_s24 = smov %s1029_s26 }
 0x14d   :  { %15 = sbr.rel (!%p13_p10) target bundleno = 3 (0x3), region = 169 }

// kernel: generator_forward.45
= control target key start
LH: loop header
LB: loop body
LE: loop exit
PB: predicated region body
PF: predicated region fallthrough
CT: control target
= control target key end

     0   :  { %s524_s15 = smov 0   ;;  %s526_s16 = smov 0   ;;  %s570_s0 = inlined_call_operand.vmem [shape: f32[2,8,256], index: 0, kind: input, shape index: {}, may-alias: {0,1}]   ;;  %s571_s1 = inlined_call_operand.vmem [shape: f32[2,8,256], index: 1, kind: input, shape index: {}, may-alias: {0,1}]   ;;  %s572_s2 = inlined_call_operand.vmem [shape: bf16[8,24], index: 2, kind: input, shape index: {}]   ;;  %s573_s3 = inlined_call_operand.vmem [shape: f32[8,1], index: 3, kind: input, shape index: {}]   ;;  %s574_s4 = inlined_call_operand.vmem [shape: f32[2,8,128], index: 4, kind: output, shape index: {}]  }
   0x1   :  { %s528_s17 = smov 0  }
   0x2 LB: > { %s26_s18 = sadd.s32 1, %s490_s16  ;;  %p420_p0 = scmp.ge.s32.totalorder %s494_s17, 1  ;;  %s494_s17 = sphi %s528_s17, %s14_s17   ;;  %s490_s16 = sphi %s526_s16, %s576_s16   ;;  %s486_s15 = sphi %s524_s15, %s575_s15  }
   0x3   : > { %p28_p1 = scmp.ge.s32.totalorder %s26_s18, 2  ;;  %p200_p2 = scmp.lt.s32.totalorder %s494_s17, 3 }
   0x5   : > { %s578_s18 = smov (%p28_p1, %s26_s18), 0  ;;  %p201_p3 = pnand %p420_p0, %p200_p2 }
   0x6   : > { %p240_p4 = scmp.lt.s32.totalorder (!%p201_p3), %s486_s15, 1  ;;  %s496_s27 = smov (!%p201_p3), 122  }
   0x7   : > { %204 = sbr.rel (%p201_p3) target bundleno = 287 (0x11f), region = 36  ;;  %s497_s28 = smov (!%p201_p3), 125  }
   0xc   : > { %s580_s15 = smov (!%p240_p4, %s486_s15), 1  ;;  %v293_v7 = vld [vmem:[%s573_s3] sm:$0xff]  ;;  %v498_v8 = vmov 0   ;;  %vm287_vm2 = vcmask 998400   ;;  %vm303_vm3 = vcmask 1043456   ;;  %vm280_vm4 = vcmask 1022976  }
   0xd   : > { %s429_s19 = sshll.u32 %s580_s15, 4  ;;  %470 = vset.pattern.permute.xlu1 %v498_v8  ;;  %471 = vset.pattern.permute.xlu0 %v498_v8  ;;  %v290_v20 = vld [vmem:[%s572_s2] sm:$0xf]  ;;  %vm299_vm5 = vcmask 195584   ;;  %s425_s7 = sshll.u32 %s580_s15, 3 }
   0xe   : > { %s247_s22 = scalar_lea.vmem %s570_s0, %s429_s19  ;;  %s431_s23 = sadd.s32 8, %s429_s19  ;;  %296 = vperm.xlu1 %470, %v293_v7  }
   0xf   : > { %s256_s26 = scalar_lea.vmem %s571_s1, %s431_s23  ;;  %v266_v0 = vld [vmem:[%s247_s22] sm:$0xff]  ;;  %s264_s10 = scalar_lea.vmem %s574_s4, %s425_s7 }
  0x10   : > { %v267_v1 = vld [vmem:[%s256_s26] sm:$0xff]  ;;  %vm268_vm0 = vcmp.ge.f32.partialorder %v266_v0, 0.0  ;;  %v270_v2 = vmul.f32 0.1, %v266_v0 }
  0x11   : > { %vm269_vm1 = vcmp.ge.f32.partialorder %v267_v1, 0.0  ;;  %v271_v3 = vmul.f32 0.1, %v267_v1 }
  0x12   : > { %v272_v4 = vsel %vm268_vm0, %v266_v0, %v270_v2 }
  0x13   : > { %v273_v5 = vsel %vm269_vm1, %v267_v1, %v271_v3 }
  0x14   : > { %v460_v6 = vpack.i.bf16 %v273_v5, %v272_v4 }
  0x16   : > { %461 = vrot.lane.b32.xlu0 %v460_v6, %s496_s27 }
  0x1e   : > { %466 = vrot.lane.b32.xlu0 %v460_v6, %s497_s28 }
  0x80   : > { %v297_v21 = vpop.permute.xlu1 %296 }
  0x88   : > { %v462_v9 = vpop.permute.xlu0 %461 }
  0x89   : > { %v464_v10 = vunpack.i.h.bf16 %v462_v9  ;;  %v463_v11 = vunpack.i.l.bf16 %v462_v9 }
  0x8b   : > { %v288_v12 = vsel %vm287_vm2, %v463_v11, %v464_v10 }
  0x8c   : > { %v292_v13 = vpack.c.bf16 %v288_v12, %v288_v12 }
  0x8e   : > { %v305_v14 = vsel %vm303_vm3, %v292_v13, 0 }
  0x8f   : > { %313 = vmatpush.bf16.msra.mxu0 %v305_v14 }
  0x90   : > { %v467_v15 = vpop.permute.xlu0 %466 }
  0x91   : > { %v469_v16 = vunpack.i.h.bf16 %v467_v15  ;;  %v468_v17 = vunpack.i.l.bf16 %v467_v15 }
  0x93   : > { %v281_v18 = vsel %vm280_vm4, %v468_v17, %v469_v16 }
  0x94   : > { %v291_v19 = vpack.c.bf16 %v281_v18, %v272_v4 }
  0x96   : > { %314 = vmatpush.bf16.msra.mxu0 %v291_v19 }
  0x99   : > { %426 = vmatmul.msk.bf16.vlgmr.msra.gmra.mxu0 %vm299_vm5, %v290_v20 }
 0x116   : > { %v316_v22 = vpop.f32.mrf.mxu0 }
 0x117   : > { %v317_v23 = vadd.f32 %v316_v22, %v297_v21 }
 0x119   : > { %320 = vst [vmem:[%s264_s10] sm:$0xff] %v317_v23 }
 0x11e   : > { %v318_v24 = vpop.f32.mrf.mxu0 }
 0x11f PF: > { %s14_s17 = sadd.s32 1, %s494_s17   ;;  %s575_s15 = smov %s490_s16 }
 0x120   : > { %p11_p5 = scmp.ge.s32.totalorder %s14_s17, 4   ;;  %s576_s16 = smov %s578_s18 }
 0x122   :  { %13 = sbr.rel (!%p11_p5) target bundleno = 2 (0x2), region = 69 }

// kernel: generator_forward.43
= control target key start
LH: loop header
LB: loop body
LE: loop exit
PB: predicated region body
PF: predicated region fallthrough
CT: control target
= control target key end

     0   :  { %s524_s15 = smov 0   ;;  %s526_s16 = smov 0   ;;  %s570_s0 = inlined_call_operand.vmem [shape: f32[2,8,256], index: 0, kind: input, shape index: {}, may-alias: {0,1}]   ;;  %s571_s1 = inlined_call_operand.vmem [shape: f32[2,8,256], index: 1, kind: input, shape index: {}, may-alias: {0,1}]   ;;  %s572_s2 = inlined_call_operand.vmem [shape: bf16[8,24], index: 2, kind: input, shape index: {}]   ;;  %s573_s3 = inlined_call_operand.vmem [shape: f32[8,1], index: 3, kind: input, shape index: {}]   ;;  %s574_s4 = inlined_call_operand.vmem [shape: f32[2,8,128], index: 4, kind: output, shape index: {}]  }
   0x1   :  { %s528_s17 = smov 0  }
   0x2 LB: > { %s26_s18 = sadd.s32 1, %s490_s16  ;;  %p420_p0 = scmp.ge.s32.totalorder %s494_s17, 1  ;;  %s494_s17 = sphi %s528_s17, %s14_s17   ;;  %s490_s16 = sphi %s526_s16, %s576_s16   ;;  %s486_s15 = sphi %s524_s15, %s575_s15  }
   0x3   : > { %p28_p1 = scmp.ge.s32.totalorder %s26_s18, 2  ;;  %p200_p2 = scmp.lt.s32.totalorder %s494_s17, 3 }
   0x5   : > { %s578_s18 = smov (%p28_p1, %s26_s18), 0  ;;  %p201_p3 = pnand %p420_p0, %p200_p2 }
   0x6   : > { %p240_p4 = scmp.lt.s32.totalorder (!%p201_p3), %s486_s15, 1  ;;  %s496_s27 = smov (!%p201_p3), 126  }
   0x7   : > { %204 = sbr.rel (%p201_p3) target bundleno = 287 (0x11f), region = 36  ;;  %s497_s28 = smov (!%p201_p3), 127  }
   0xc   : > { %s580_s15 = smov (!%p240_p4, %s486_s15), 1  ;;  %v293_v7 = vld [vmem:[%s573_s3] sm:$0xff]  ;;  %v498_v8 = vmov 0   ;;  %vm287_vm2 = vcmask 1031168   ;;  %vm303_vm3 = vcmask 1043456   ;;  %vm280_vm4 = vcmask 1039360  }
   0xd   : > { %s429_s19 = sshll.u32 %s580_s15, 4  ;;  %470 = vset.pattern.permute.xlu1 %v498_v8  ;;  %471 = vset.pattern.permute.xlu0 %v498_v8  ;;  %v290_v20 = vld [vmem:[%s572_s2] sm:$0xf]  ;;  %vm299_vm5 = vcmask 195584   ;;  %s425_s7 = sshll.u32 %s580_s15, 3 }
   0xe   : > { %s247_s22 = scalar_lea.vmem %s570_s0, %s429_s19  ;;  %s431_s23 = sadd.s32 8, %s429_s19  ;;  %296 = vperm.xlu1 %470, %v293_v7  }
   0xf   : > { %s256_s26 = scalar_lea.vmem %s571_s1, %s431_s23  ;;  %v266_v0 = vld [vmem:[%s247_s22] sm:$0xff]  ;;  %s264_s10 = scalar_lea.vmem %s574_s4, %s425_s7 }
  0x10   : > { %v267_v1 = vld [vmem:[%s256_s26] sm:$0xff]  ;;  %vm268_vm0 = vcmp.ge.f32.partialorder %v266_v0, 0.0  ;;  %v270_v2 = vmul.f32 0.1, %v266_v0 }
  0x11   : > { %vm269_vm1 = vcmp.ge.f32.partialorder %v267_v1, 0.0  ;;  %v271_v3 = vmul.f32 0.1, %v267_v1 }
  0x12   : > { %v272_v4 = vsel %vm268_vm0, %v266_v0, %v270_v2 }
  0x13   : > { %v273_v5 = vsel %vm269_vm1, %v267_v1, %v271_v3 }
  0x14   : > { %v460_v6 = vpack.i.bf16 %v273_v5, %v272_v4 }
  0x16   : > { %461 = vrot.lane.b32.xlu0 %v460_v6, %s496_s27 }
  0x1e   : > { %466 = vrot.lane.b32.xlu0 %v460_v6, %s497_s28 }
  0x80   : > { %v297_v21 = vpop.permute.xlu1 %296 }
  0x88   : > { %v462_v9 = vpop.permute.xlu0 %461 }
  0x89   : > { %v464_v10 = vunpack.i.h.bf16 %v462_v9  ;;  %v463_v11 = vunpack.i.l.bf16 %v462_v9 }
  0x8b   : > { %v288_v12 = vsel %vm287_vm2, %v463_v11, %v464_v10 }
  0x8c   : > { %v292_v13 = vpack.c.bf16 %v288_v12, %v288_v12 }
  0x8e   : > { %v305_v14 = vsel %vm303_vm3, %v292_v13, 0 }
  0x8f   : > { %313 = vmatpush.bf16.msra.mxu0 %v305_v14 }
  0x90   : > { %v467_v15 = vpop.permute.xlu0 %466 }
  0x91   : > { %v469_v16 = vunpack.i.h.bf16 %v467_v15  ;;  %v468_v17 = vunpack.i.l.bf16 %v467_v15 }
  0x93   : > { %v281_v18 = vsel %vm280_vm4, %v468_v17, %v469_v16 }
  0x94   : > { %v291_v19 = vpack.c.bf16 %v281_v18, %v272_v4 }
  0x96   : > { %314 = vmatpush.bf16.msra.mxu0 %v291_v19 }
  0x99   : > { %426 = vmatmul.msk.bf16.vlgmr.msra.gmra.mxu0 %vm299_vm5, %v290_v20 }
 0x116   : > { %v316_v22 = vpop.f32.mrf.mxu0 }
 0x117   : > { %v317_v23 = vadd.f32 %v316_v22, %v297_v21 }
 0x119   : > { %320 = vst [vmem:[%s264_s10] sm:$0xff] %v317_v23 }
 0x11e   : > { %v318_v24 = vpop.f32.mrf.mxu0 }
 0x11f PF: > { %s14_s17 = sadd.s32 1, %s494_s17   ;;  %s575_s15 = smov %s490_s16 }
 0x120   : > { %p11_p5 = scmp.ge.s32.totalorder %s14_s17, 4   ;;  %s576_s16 = smov %s578_s18 }
 0x122   :  { %13 = sbr.rel (!%p11_p5) target bundleno = 2 (0x2), region = 69 }

// kernel: generator_forward.44
= control target key start
LH: loop header
LB: loop body
LE: loop exit
PB: predicated region body
PF: predicated region fallthrough
CT: control target
= control target key end

     0   :  { %s602_s18 = smov 0   ;;  %s604_s19 = smov 0   ;;  %s651_s0 = inlined_call_operand.vmem [shape: f32[2,8,256], index: 0, kind: input, shape index: {}, may-alias: {0,1}]   ;;  %s652_s1 = inlined_call_operand.vmem [shape: f32[2,8,256], index: 1, kind: input, shape index: {}, may-alias: {0,1}]   ;;  %s653_s2 = inlined_call_operand.vmem [shape: bf16[8,24], index: 2, kind: input, shape index: {}]   ;;  %s654_s3 = inlined_call_operand.vmem [shape: f32[8,1], index: 3, kind: input, shape index: {}]   ;;  %s655_s4 = inlined_call_operand.vmem [shape: f32[2,8,128], index: 4, kind: input, shape index: {}]   ;;  %s656_s5 = inlined_call_operand.vmem [shape: f32[2,8,128], index: 5, kind: output, shape index: {}]  }
   0x1   :  { %s606_s20 = smov 0  }
   0x2 LB: > { %s27_s21 = sadd.s32 1, %s563_s19  ;;  %p492_p0 = scmp.ge.s32.totalorder %s567_s20, 1  ;;  %s567_s20 = sphi %s606_s20, %s15_s20   ;;  %s563_s19 = sphi %s604_s19, %s658_s19   ;;  %s559_s18 = sphi %s602_s18, %s657_s18  }
   0x3   : > { %p29_p1 = scmp.ge.s32.totalorder %s27_s21, 2  ;;  %p239_p2 = scmp.lt.s32.totalorder %s567_s20, 3 }
   0x5   : > { %s660_s21 = smov (%p29_p1, %s27_s21), 0  ;;  %p240_p3 = pnand %p492_p0, %p239_p2 }
   0x6   : > { %p288_p4 = scmp.lt.s32.totalorder (!%p240_p3), %s559_s18, 1  ;;  %s569_s30 = smov (!%p240_p3), 126  }
   0x7   : > { %243 = sbr.rel (%p240_p3) target bundleno = 287 (0x11f), region = 40  ;;  %s570_s6 = smov (!%p240_p3), 127  }
   0xc   : > { %s662_s18 = smov (!%p288_p4, %s559_s18), 1  ;;  %v348_v7 = vld [vmem:[%s654_s3] sm:$0xff]  ;;  %v571_v8 = vmov 0   ;;  %vm342_vm2 = vcmask 1031168   ;;  %vm358_vm3 = vcmask 1043456   ;;  %vm335_vm4 = vcmask 1039360  }
   0xd   : > { %s502_s22 = sshll.u32 %s662_s18, 4  ;;  %543 = vset.pattern.permute.xlu1 %v571_v8  ;;  %544 = vset.pattern.permute.xlu0 %v571_v8  ;;  %v345_v20 = vld [vmem:[%s653_s2] sm:$0xf]  ;;  %vm354_vm5 = vcmask 195584   ;;  %s497_s11 = sshll.u32 %s662_s18, 3 }
   0xe   : > { %s295_s25 = scalar_lea.vmem %s651_s0, %s502_s22  ;;  %s504_s26 = sadd.s32 8, %s502_s22  ;;  %351 = vperm.xlu1 %543, %v348_v7  }
   0xf   : > { %s304_s29 = scalar_lea.vmem %s652_s1, %s504_s26  ;;  %v321_v0 = vld [vmem:[%s295_s25] sm:$0xff]  ;;  %s312_s14 = scalar_lea.vmem %s655_s4, %s497_s11 }
  0x10   : > { %v322_v1 = vld [vmem:[%s304_s29] sm:$0xff]  ;;  %vm323_vm0 = vcmp.ge.f32.partialorder %v321_v0, 0.0  ;;  %v325_v2 = vmul.f32 0.1, %v321_v0  ;;  %s319_s17 = scalar_lea.vmem %s656_s5, %s497_s11 }
  0x11   : > { %vm324_vm1 = vcmp.ge.f32.partialorder %v322_v1, 0.0  ;;  %v326_v3 = vmul.f32 0.1, %v322_v1  ;;  %v375_v23 = vld [vmem:[%s312_s14] sm:$0xff] }
  0x12   : > { %v327_v4 = vsel %vm323_vm0, %v321_v0, %v325_v2 }
  0x13   : > { %v328_v5 = vsel %vm324_vm1, %v322_v1, %v326_v3 }
  0x14   : > { %v533_v6 = vpack.i.bf16 %v328_v5, %v327_v4 }
  0x16   : > { %534 = vrot.lane.b32.xlu0 %v533_v6, %s569_s30 }
  0x1e   : > { %539 = vrot.lane.b32.xlu0 %v533_v6, %s570_s6 }
  0x80   : > { %v352_v21 = vpop.permute.xlu1 %351 }
  0x88   : > { %v535_v9 = vpop.permute.xlu0 %534 }
  0x89   : > { %v537_v10 = vunpack.i.h.bf16 %v535_v9  ;;  %v536_v11 = vunpack.i.l.bf16 %v535_v9 }
  0x8b   : > { %v343_v12 = vsel %vm342_vm2, %v536_v11, %v537_v10 }
  0x8c   : > { %v347_v13 = vpack.c.bf16 %v343_v12, %v343_v12 }
  0x8e   : > { %v360_v14 = vsel %vm358_vm3, %v347_v13, 0 }
  0x8f   : > { %368 = vmatpush.bf16.msra.mxu0 %v360_v14 }
  0x90   : > { %v540_v15 = vpop.permute.xlu0 %539 }
  0x91   : > { %v542_v16 = vunpack.i.h.bf16 %v540_v15  ;;  %v541_v17 = vunpack.i.l.bf16 %v540_v15 }
  0x93   : > { %v336_v18 = vsel %vm335_vm4, %v541_v17, %v542_v16 }
  0x94   : > { %v346_v19 = vpack.c.bf16 %v336_v18, %v327_v4 }
  0x96   : > { %369 = vmatpush.bf16.msra.mxu0 %v346_v19 }
  0x99   : > { %499 = vmatmul.msk.bf16.vlgmr.msra.gmra.mxu0 %vm354_vm5, %v345_v20 }
 0x116   : > { %v371_v22 = vpop.f32.mrf.mxu0 }
 0x117   : > { %v372_v24 = vadd.f32 %v371_v22, %v352_v21 }
 0x119   : > { %v376_v25 = vadd.f32 %v375_v23, %v372_v24 }
 0x11b   : > { %377 = vst [vmem:[%s319_s17] sm:$0xff] %v376_v25 }
 0x11e   : > { %v373_v26 = vpop.f32.mrf.mxu0 }
 0x11f PF: > { %s15_s20 = sadd.s32 1, %s567_s20   ;;  %s657_s18 = smov %s563_s19 }
 0x120   : > { %p12_p5 = scmp.ge.s32.totalorder %s15_s20, 4   ;;  %s658_s19 = smov %s660_s21 }
 0x122   :  { %14 = sbr.rel (!%p12_p5) target bundleno = 2 (0x2), region = 76 }

// kernel: generator_forward.47
= control target key start
LH: loop header
LB: loop body
LE: loop exit
PB: predicated region body
PF: predicated region fallthrough
CT: control target
= control target key end

     0   :  { %s524_s15 = smov 0   ;;  %s526_s16 = smov 0   ;;  %s570_s0 = inlined_call_operand.vmem [shape: f32[2,8,256], index: 0, kind: input, shape index: {}, may-alias: {0,1}]   ;;  %s571_s1 = inlined_call_operand.vmem [shape: f32[2,8,256], index: 1, kind: input, shape index: {}, may-alias: {0,1}]   ;;  %s572_s2 = inlined_call_operand.vmem [shape: bf16[8,24], index: 2, kind: input, shape index: {}]   ;;  %s573_s3 = inlined_call_operand.vmem [shape: f32[8,1], index: 3, kind: input, shape index: {}]   ;;  %s574_s4 = inlined_call_operand.vmem [shape: f32[2,8,128], index: 4, kind: output, shape index: {}]  }
   0x1   :  { %s528_s17 = smov 0  }
   0x2 LB: > { %s26_s18 = sadd.s32 1, %s490_s16  ;;  %p420_p0 = scmp.ge.s32.totalorder %s494_s17, 1  ;;  %s494_s17 = sphi %s528_s17, %s14_s17   ;;  %s490_s16 = sphi %s526_s16, %s576_s16   ;;  %s486_s15 = sphi %s524_s15, %s575_s15  }
   0x3   : > { %p28_p1 = scmp.ge.s32.totalorder %s26_s18, 2  ;;  %p200_p2 = scmp.lt.s32.totalorder %s494_s17, 3 }
   0x5   : > { %s578_s18 = smov (%p28_p1, %s26_s18), 0  ;;  %p201_p3 = pnand %p420_p0, %p200_p2 }
   0x6   : > { %p240_p4 = scmp.lt.s32.totalorder (!%p201_p3), %s486_s15, 1  ;;  %s496_s27 = smov (!%p201_p3), 118  }
   0x7   : > { %204 = sbr.rel (%p201_p3) target bundleno = 287 (0x11f), region = 36  ;;  %s497_s28 = smov (!%p201_p3), 123  }
   0xc   : > { %s580_s15 = smov (!%p240_p4, %s486_s15), 1  ;;  %v293_v7 = vld [vmem:[%s573_s3] sm:$0xff]  ;;  %v498_v8 = vmov 0   ;;  %vm287_vm2 = vcmask 965632   ;;  %vm303_vm3 = vcmask 1043456   ;;  %vm280_vm4 = vcmask 1006592  }
   0xd   : > { %s429_s19 = sshll.u32 %s580_s15, 4  ;;  %470 = vset.pattern.permute.xlu1 %v498_v8  ;;  %471 = vset.pattern.permute.xlu0 %v498_v8  ;;  %v290_v20 = vld [vmem:[%s572_s2] sm:$0xf]  ;;  %vm299_vm5 = vcmask 195584   ;;  %s425_s7 = sshll.u32 %s580_s15, 3 }
   0xe   : > { %s247_s22 = scalar_lea.vmem %s570_s0, %s429_s19  ;;  %s431_s23 = sadd.s32 8, %s429_s19  ;;  %296 = vperm.xlu1 %470, %v293_v7  }
   0xf   : > { %s256_s26 = scalar_lea.vmem %s571_s1, %s431_s23  ;;  %v266_v0 = vld [vmem:[%s247_s22] sm:$0xff]  ;;  %s264_s10 = scalar_lea.vmem %s574_s4, %s425_s7 }
  0x10   : > { %v267_v1 = vld [vmem:[%s256_s26] sm:$0xff]  ;;  %vm268_vm0 = vcmp.ge.f32.partialorder %v266_v0, 0.0  ;;  %v270_v2 = vmul.f32 0.1, %v266_v0 }
  0x11   : > { %vm269_vm1 = vcmp.ge.f32.partialorder %v267_v1, 0.0  ;;  %v271_v3 = vmul.f32 0.1, %v267_v1 }
  0x12   : > { %v272_v4 = vsel %vm268_vm0, %v266_v0, %v270_v2 }
  0x13   : > { %v273_v5 = vsel %vm269_vm1, %v267_v1, %v271_v3 }
  0x14   : > { %v460_v6 = vpack.i.bf16 %v273_v5, %v272_v4 }
  0x16   : > { %461 = vrot.lane.b32.xlu0 %v460_v6, %s496_s27 }
  0x1e   : > { %466 = vrot.lane.b32.xlu0 %v460_v6, %s497_s28 }
  0x80   : > { %v297_v21 = vpop.permute.xlu1 %296 }
  0x88   : > { %v462_v9 = vpop.permute.xlu0 %461 }
  0x89   : > { %v464_v10 = vunpack.i.h.bf16 %v462_v9  ;;  %v463_v11 = vunpack.i.l.bf16 %v462_v9 }
  0x8b   : > { %v288_v12 = vsel %vm287_vm2, %v463_v11, %v464_v10 }
  0x8c   : > { %v292_v13 = vpack.c.bf16 %v288_v12, %v288_v12 }
  0x8e   : > { %v305_v14 = vsel %vm303_vm3, %v292_v13, 0 }
  0x8f   : > { %313 = vmatpush.bf16.msra.mxu0 %v305_v14 }
  0x90   : > { %v467_v15 = vpop.permute.xlu0 %466 }
  0x91   : > { %v469_v16 = vunpack.i.h.bf16 %v467_v15  ;;  %v468_v17 = vunpack.i.l.bf16 %v467_v15 }
  0x93   : > { %v281_v18 = vsel %vm280_vm4, %v468_v17, %v469_v16 }
  0x94   : > { %v291_v19 = vpack.c.bf16 %v281_v18, %v272_v4 }
  0x96   : > { %314 = vmatpush.bf16.msra.mxu0 %v291_v19 }
  0x99   : > { %426 = vmatmul.msk.bf16.vlgmr.msra.gmra.mxu0 %vm299_vm5, %v290_v20 }
 0x116   : > { %v316_v22 = vpop.f32.mrf.mxu0 }
 0x117   : > { %v317_v23 = vadd.f32 %v316_v22, %v297_v21 }
 0x119   : > { %320 = vst [vmem:[%s264_s10] sm:$0xff] %v317_v23 }
 0x11e   : > { %v318_v24 = vpop.f32.mrf.mxu0 }
 0x11f PF: > { %s14_s17 = sadd.s32 1, %s494_s17   ;;  %s575_s15 = smov %s490_s16 }
 0x120   : > { %p11_p5 = scmp.ge.s32.totalorder %s14_s17, 4   ;;  %s576_s16 = smov %s578_s18 }
 0x122   :  { %13 = sbr.rel (!%p11_p5) target bundleno = 2 (0x2), region = 69 }

// kernel: generator_forward.49
= control target key start
LH: loop header
LB: loop body
LE: loop exit
PB: predicated region body
PF: predicated region fallthrough
CT: control target
= control target key end

     0   :  { %s553_s15 = smov 0   ;;  %s555_s16 = smov 0   ;;  %s599_s0 = inlined_call_operand.vmem [shape: f32[2,8,256], index: 0, kind: input, shape index: {}, may-alias: {0,1}]   ;;  %s600_s1 = inlined_call_operand.vmem [shape: f32[2,8,256], index: 1, kind: input, shape index: {}, may-alias: {0,1}]   ;;  %s601_s2 = inlined_call_operand.vmem [shape: bf16[8,40], index: 2, kind: input, shape index: {}]   ;;  %s602_s3 = inlined_call_operand.vmem [shape: f32[8,1], index: 3, kind: input, shape index: {}]   ;;  %s603_s4 = inlined_call_operand.vmem [shape: f32[2,8,128], index: 4, kind: output, shape index: {}]  }
   0x1   :  { %s557_s17 = smov 0  }
   0x2 LB: > { %s26_s18 = sadd.s32 1, %s517_s16  ;;  %p435_p0 = scmp.ge.s32.totalorder %s521_s17, 1  ;;  %s521_s17 = sphi %s557_s17, %s14_s17   ;;  %s517_s16 = sphi %s555_s16, %s605_s16   ;;  %s513_s15 = sphi %s553_s15, %s604_s15  }
   0x3   : > { %p28_p1 = scmp.ge.s32.totalorder %s26_s18, 2  ;;  %p200_p2 = scmp.lt.s32.totalorder %s521_s17, 3 }
   0x5   : > { %s607_s18 = smov (%p28_p1, %s26_s18), 0  ;;  %p201_p3 = pnand %p435_p0, %p200_p2 }
   0x6   : > { %p240_p4 = scmp.lt.s32.totalorder (!%p201_p3), %s513_s15, 1  ;;  %s523_s27 = smov (!%p201_p3), 124  }
   0x7   : > { %204 = sbr.rel (%p201_p3) target bundleno = 291 (0x123), region = 36  ;;  %s524_s28 = smov (!%p201_p3), 125  }
   0x8   : > { %s525_s29 = smov (!%p201_p3), 126   ;;  %s526_s30 = smov (!%p201_p3), 127  }
   0xc   : > { %s609_s15 = smov (!%p240_p4, %s513_s15), 1  ;;  %v308_v7 = vld [vmem:[%s602_s3] sm:$0xff]  ;;  %v527_v8 = vmov 0   ;;  %vm301_vm2 = vcmask 1014784   ;;  %vm318_vm3 = vcmask 1043456   ;;  %vm287_vm4 = vcmask 1031168  }
   0xd   : > { %s444_s19 = sshll.u32 %s609_s15, 4  ;;  %497 = vset.pattern.permute.xlu2 %v527_v8  ;;  %498 = vset.pattern.permute.xlu0 %v527_v8  ;;  %vm294_vm5 = vcmask 1022976   ;;  %vm280_vm6 = vcmask 1039360   ;;  %v304_v29 = vld [vmem:[%s601_s2] sm:$0xf]  ;;  %vm314_vm7 = vcmask 326656  }
   0xe   : > { %s247_s22 = scalar_lea.vmem %s599_s0, %s444_s19  ;;  %s446_s23 = sadd.s32 8, %s444_s19  ;;  %311 = vperm.xlu2 %497, %v308_v7  }
   0xf   : > { %s256_s26 = scalar_lea.vmem %s600_s1, %s446_s23  ;;  %v266_v0 = vld [vmem:[%s247_s22] sm:$0xff]  ;;  %s440_s9 = sshll.u32 %s609_s15, 3 }
  0x10   : > { %v267_v1 = vld [vmem:[%s256_s26] sm:$0xff]  ;;  %vm268_vm0 = vcmp.ge.f32.partialorder %v266_v0, 0.0  ;;  %v270_v2 = vmul.f32 0.1, %v266_v0  ;;  %s264_s12 = scalar_lea.vmem %s603_s4, %s440_s9 }
  0x11   : > { %vm269_vm1 = vcmp.ge.f32.partialorder %v267_v1, 0.0  ;;  %v271_v3 = vmul.f32 0.1, %v267_v1 }
  0x12   : > { %v272_v4 = vsel %vm268_vm0, %v266_v0, %v270_v2 }
  0x13   : > { %v273_v5 = vsel %vm269_vm1, %v267_v1, %v271_v3 }
  0x14   : > { %v477_v6 = vpack.i.bf16 %v273_v5, %v272_v4 }
  0x16   : > { %478 = vrot.lane.b32.xlu0 %v477_v6, %s523_s27  ;;  %488 = vrot.lane.b32.xlu1 %v477_v6, %s524_s28 }
  0x1e   : > { %483 = vrot.lane.b32.xlu0 %v477_v6, %s525_s29  ;;  %493 = vrot.lane.b32.xlu1 %v477_v6, %s526_s30 }
  0x68   : > { %v312_v30 = vpop.permute.xlu2 %311 }
  0x88   : > { %v479_v9 = vpop.permute.xlu0 %478  ;;  %v489_v10 = vpop.permute.xlu1 %488 }
  0x89   : > { %v481_v11 = vunpack.i.h.bf16 %v479_v9  ;;  %v480_v12 = vunpack.i.l.bf16 %v479_v9  ;;  %v491_v16 = vunpack.i.h.bf16 %v489_v10  ;;  %v490_v17 = vunpack.i.l.bf16 %v489_v10 }
  0x8b   : > { %v302_v13 = vsel %vm301_vm2, %v480_v12, %v481_v11  ;;  %v295_v25 = vsel %vm294_vm5, %v490_v17, %v491_v16 }
  0x8c   : > { %v307_v14 = vpack.c.bf16 %v302_v13, %v302_v13 }
  0x8e   : > { %v320_v15 = vsel %vm318_vm3, %v307_v14, 0 }
  0x8f   : > { %327 = vmatpush.bf16.msra.mxu0 %v320_v15 }
  0x90   : > { %v484_v18 = vpop.permute.xlu0 %483  ;;  %v494_v19 = vpop.permute.xlu1 %493 }
  0x91   : > { %v486_v20 = vunpack.i.h.bf16 %v484_v18  ;;  %v485_v21 = vunpack.i.l.bf16 %v484_v18  ;;  %v496_v22 = vunpack.i.h.bf16 %v494_v19  ;;  %v495_v23 = vunpack.i.l.bf16 %v494_v19 }
  0x93   : > { %v288_v24 = vsel %vm287_vm4, %v485_v21, %v486_v20  ;;  %v281_v26 = vsel %vm280_vm6, %v495_v23, %v496_v22 }
  0x94   : > { %v306_v27 = vpack.c.bf16 %v295_v25, %v288_v24  ;;  %v305_v28 = vpack.c.bf16 %v281_v26, %v272_v4 }
  0x96   : > { %328 = vmatpush.bf16.msra.mxu0 %v306_v27 }
  0x9a   : > { %329 = vmatpush.bf16.msra.mxu0 %v305_v28 }
  0x9d   : > { %441 = vmatmul.msk.bf16.vlgmr.msra.gmra.mxu0 %vm314_vm7, %v304_v29 }
 0x11a   : > { %v331_v31 = vpop.f32.mrf.mxu0 }
 0x11b   : > { %v332_v32 = vadd.f32 %v331_v31, %v312_v30 }
 0x11d   : > { %335 = vst [vmem:[%s264_s12] sm:$0xff] %v332_v32 }
 0x122   : > { %v333_v33 = vpop.f32.mrf.mxu0 }
 0x123 PF: > { %s14_s17 = sadd.s32 1, %s521_s17   ;;  %s604_s15 = smov %s517_s16 }
 0x124   : > { %p11_p5 = scmp.ge.s32.totalorder %s14_s17, 4   ;;  %s605_s16 = smov %s607_s18 }
 0x126   :  { %13 = sbr.rel (!%p11_p5) target bundleno = 2 (0x2), region = 69 }

// kernel: generator_forward.50
= control target key start
LH: loop header
LB: loop body
LE: loop exit
PB: predicated region body
PF: predicated region fallthrough
CT: control target
= control target key end

     0   :  { %s631_s18 = smov 0   ;;  %s633_s19 = smov 0   ;;  %s680_s0 = inlined_call_operand.vmem [shape: f32[2,8,256], index: 0, kind: input, shape index: {}, may-alias: {0,1}]   ;;  %s681_s1 = inlined_call_operand.vmem [shape: f32[2,8,256], index: 1, kind: input, shape index: {}, may-alias: {0,1}]   ;;  %s682_s2 = inlined_call_operand.vmem [shape: bf16[8,40], index: 2, kind: input, shape index: {}]   ;;  %s683_s3 = inlined_call_operand.vmem [shape: f32[8,1], index: 3, kind: input, shape index: {}]   ;;  %s684_s4 = inlined_call_operand.vmem [shape: f32[2,8,128], index: 4, kind: input, shape index: {}]   ;;  %s685_s5 = inlined_call_operand.vmem [shape: f32[2,8,128], index: 5, kind: output, shape index: {}]  }
   0x1   :  { %s635_s20 = smov 0  }
   0x2 LB: > { %s27_s21 = sadd.s32 1, %s590_s19  ;;  %p507_p0 = scmp.ge.s32.totalorder %s594_s20, 1  ;;  %s594_s20 = sphi %s635_s20, %s15_s20   ;;  %s590_s19 = sphi %s633_s19, %s687_s19   ;;  %s586_s18 = sphi %s631_s18, %s686_s18  }
   0x3   : > { %p29_p1 = scmp.ge.s32.totalorder %s27_s21, 2  ;;  %p239_p2 = scmp.lt.s32.totalorder %s594_s20, 3 }
   0x5   : > { %s689_s21 = smov (%p29_p1, %s27_s21), 0  ;;  %p240_p3 = pnand %p507_p0, %p239_p2 }
   0x6   : > { %p288_p4 = scmp.lt.s32.totalorder (!%p240_p3), %s586_s18, 1  ;;  %s596_s30 = smov (!%p240_p3), 124  }
   0x7   : > { %243 = sbr.rel (%p240_p3) target bundleno = 291 (0x123), region = 40  ;;  %s597_s6 = smov (!%p240_p3), 125  }
   0x8   : > { %s598_s7 = smov (!%p240_p3), 126   ;;  %s599_s8 = smov (!%p240_p3), 127  }
   0xc   : > { %s691_s18 = smov (!%p288_p4, %s586_s18), 1  ;;  %v363_v7 = vld [vmem:[%s683_s3] sm:$0xff]  ;;  %v600_v8 = vmov 0   ;;  %vm356_vm2 = vcmask 1014784   ;;  %vm373_vm3 = vcmask 1043456   ;;  %vm342_vm4 = vcmask 1031168  }
   0xd   : > { %s517_s22 = sshll.u32 %s691_s18, 4  ;;  %570 = vset.pattern.permute.xlu2 %v600_v8  ;;  %571 = vset.pattern.permute.xlu0 %v600_v8  ;;  %vm349_vm5 = vcmask 1022976   ;;  %vm335_vm6 = vcmask 1039360   ;;  %v359_v29 = vld [vmem:[%s682_s2] sm:$0xf]  ;;  %vm369_vm7 = vcmask 326656  }
   0xe   : > { %s295_s25 = scalar_lea.vmem %s680_s0, %s517_s22  ;;  %s519_s26 = sadd.s32 8, %s517_s22  ;;  %366 = vperm.xlu2 %570, %v363_v7  }
   0xf   : > { %s304_s29 = scalar_lea.vmem %s681_s1, %s519_s26  ;;  %v321_v0 = vld [vmem:[%s295_s25] sm:$0xff]  ;;  %s512_s13 = sshll.u32 %s691_s18, 3 }
  0x10   : > { %v322_v1 = vld [vmem:[%s304_s29] sm:$0xff]  ;;  %vm323_vm0 = vcmp.ge.f32.partialorder %v321_v0, 0.0  ;;  %v325_v2 = vmul.f32 0.1, %v321_v0  ;;  %s312_s16 = scalar_lea.vmem %s684_s4, %s512_s13  ;;  %s319_s23 = scalar_lea.vmem %s685_s5, %s512_s13 }
  0x11   : > { %vm324_vm1 = vcmp.ge.f32.partialorder %v322_v1, 0.0  ;;  %v326_v3 = vmul.f32 0.1, %v322_v1  ;;  %v390_v32 = vld [vmem:[%s312_s16] sm:$0xff] }
  0x12   : > { %v327_v4 = vsel %vm323_vm0, %v321_v0, %v325_v2 }
  0x13   : > { %v328_v5 = vsel %vm324_vm1, %v322_v1, %v326_v3 }
  0x14   : > { %v550_v6 = vpack.i.bf16 %v328_v5, %v327_v4 }
  0x16   : > { %551 = vrot.lane.b32.xlu0 %v550_v6, %s596_s30  ;;  %561 = vrot.lane.b32.xlu1 %v550_v6, %s597_s6 }
  0x1e   : > { %556 = vrot.lane.b32.xlu0 %v550_v6, %s598_s7  ;;  %566 = vrot.lane.b32.xlu1 %v550_v6, %s599_s8 }
  0x68   : > { %v367_v30 = vpop.permute.xlu2 %366 }
  0x88   : > { %v552_v9 = vpop.permute.xlu0 %551  ;;  %v562_v10 = vpop.permute.xlu1 %561 }
  0x89   : > { %v554_v11 = vunpack.i.h.bf16 %v552_v9  ;;  %v553_v12 = vunpack.i.l.bf16 %v552_v9  ;;  %v564_v16 = vunpack.i.h.bf16 %v562_v10  ;;  %v563_v17 = vunpack.i.l.bf16 %v562_v10 }
  0x8b   : > { %v357_v13 = vsel %vm356_vm2, %v553_v12, %v554_v11  ;;  %v350_v25 = vsel %vm349_vm5, %v563_v17, %v564_v16 }
  0x8c   : > { %v362_v14 = vpack.c.bf16 %v357_v13, %v357_v13 }
  0x8e   : > { %v375_v15 = vsel %vm373_vm3, %v362_v14, 0 }
  0x8f   : > { %382 = vmatpush.bf16.msra.mxu0 %v375_v15 }
  0x90   : > { %v557_v18 = vpop.permute.xlu0 %556  ;;  %v567_v19 = vpop.permute.xlu1 %566 }
  0x91   : > { %v559_v20 = vunpack.i.h.bf16 %v557_v18  ;;  %v558_v21 = vunpack.i.l.bf16 %v557_v18  ;;  %v569_v22 = vunpack.i.h.bf16 %v567_v19  ;;  %v568_v23 = vunpack.i.l.bf16 %v567_v19 }
  0x93   : > { %v343_v24 = vsel %vm342_vm4, %v558_v21, %v559_v20  ;;  %v336_v26 = vsel %vm335_vm6, %v568_v23, %v569_v22 }
  0x94   : > { %v361_v27 = vpack.c.bf16 %v350_v25, %v343_v24  ;;  %v360_v28 = vpack.c.bf16 %v336_v26, %v327_v4 }
  0x96   : > { %383 = vmatpush.bf16.msra.mxu0 %v361_v27 }
  0x9a   : > { %384 = vmatpush.bf16.msra.mxu0 %v360_v28 }
  0x9d   : > { %514 = vmatmul.msk.bf16.vlgmr.msra.gmra.mxu0 %vm369_vm7, %v359_v29 }
 0x11a   : > { %v386_v31 = vpop.f32.mrf.mxu0 }
 0x11b   : > { %v387_v33 = vadd.f32 %v386_v31, %v367_v30 }
 0x11d   : > { %v391_v34 = vadd.f32 %v390_v32, %v387_v33 }
 0x11f   : > { %392 = vst [vmem:[%s319_s23] sm:$0xff] %v391_v34 }
 0x122   : > { %v388_v35 = vpop.f32.mrf.mxu0 }
 0x123 PF: > { %s15_s20 = sadd.s32 1, %s594_s20   ;;  %s686_s18 = smov %s590_s19 }
 0x124   : > { %p12_p5 = scmp.ge.s32.totalorder %s15_s20, 4   ;;  %s687_s19 = smov %s689_s21 }
 0x126   :  { %14 = sbr.rel (!%p12_p5) target bundleno = 2 (0x2), region = 76 }

// kernel: generator_forward.51
= control target key start
LH: loop header
LB: loop body
LE: loop exit
PB: predicated region body
PF: predicated region fallthrough
CT: control target
= control target key end

     0   :  { %s553_s15 = smov 0   ;;  %s555_s16 = smov 0   ;;  %s599_s0 = inlined_call_operand.vmem [shape: f32[2,8,256], index: 0, kind: input, shape index: {}, may-alias: {0,1}]   ;;  %s600_s1 = inlined_call_operand.vmem [shape: f32[2,8,256], index: 1, kind: input, shape index: {}, may-alias: {0,1}]   ;;  %s601_s2 = inlined_call_operand.vmem [shape: bf16[8,40], index: 2, kind: input, shape index: {}]   ;;  %s602_s3 = inlined_call_operand.vmem [shape: f32[8,1], index: 3, kind: input, shape index: {}]   ;;  %s603_s4 = inlined_call_operand.vmem [shape: f32[2,8,128], index: 4, kind: output, shape index: {}]  }
   0x1   :  { %s557_s17 = smov 0  }
   0x2 LB: > { %s26_s18 = sadd.s32 1, %s517_s16  ;;  %p435_p0 = scmp.ge.s32.totalorder %s521_s17, 1  ;;  %s521_s17 = sphi %s557_s17, %s14_s17   ;;  %s517_s16 = sphi %s555_s16, %s605_s16   ;;  %s513_s15 = sphi %s553_s15, %s604_s15  }
   0x3   : > { %p28_p1 = scmp.ge.s32.totalorder %s26_s18, 2  ;;  %p200_p2 = scmp.lt.s32.totalorder %s521_s17, 3 }
   0x5   : > { %s607_s18 = smov (%p28_p1, %s26_s18), 0  ;;  %p201_p3 = pnand %p435_p0, %p200_p2 }
   0x6   : > { %p240_p4 = scmp.lt.s32.totalorder (!%p201_p3), %s513_s15, 1  ;;  %s523_s27 = smov (!%p201_p3), 116  }
   0x7   : > { %204 = sbr.rel (%p201_p3) target bundleno = 291 (0x123), region = 36  ;;  %s524_s28 = smov (!%p201_p3), 119  }
   0x8   : > { %s525_s29 = smov (!%p201_p3), 122   ;;  %s526_s30 = smov (!%p201_p3), 125  }
   0xc   : > { %s609_s15 = smov (!%p240_p4, %s513_s15), 1  ;;  %v308_v7 = vld [vmem:[%s602_s3] sm:$0xff]  ;;  %v527_v8 = vmov 0   ;;  %vm301_vm2 = vcmask 949248   ;;  %vm318_vm3 = vcmask 1043456   ;;  %vm287_vm4 = vcmask 998400  }
   0xd   : > { %s444_s19 = sshll.u32 %s609_s15, 4  ;;  %497 = vset.pattern.permute.xlu2 %v527_v8  ;;  %498 = vset.pattern.permute.xlu0 %v527_v8  ;;  %vm294_vm5 = vcmask 973824   ;;  %vm280_vm6 = vcmask 1022976   ;;  %v304_v29 = vld [vmem:[%s601_s2] sm:$0xf]  ;;  %vm314_vm7 = vcmask 326656  }
   0xe   : > { %s247_s22 = scalar_lea.vmem %s599_s0, %s444_s19  ;;  %s446_s23 = sadd.s32 8, %s444_s19  ;;  %311 = vperm.xlu2 %497, %v308_v7  }
   0xf   : > { %s256_s26 = scalar_lea.vmem %s600_s1, %s446_s23  ;;  %v266_v0 = vld [vmem:[%s247_s22] sm:$0xff]  ;;  %s440_s9 = sshll.u32 %s609_s15, 3 }
  0x10   : > { %v267_v1 = vld [vmem:[%s256_s26] sm:$0xff]  ;;  %vm268_vm0 = vcmp.ge.f32.partialorder %v266_v0, 0.0  ;;  %v270_v2 = vmul.f32 0.1, %v266_v0  ;;  %s264_s12 = scalar_lea.vmem %s603_s4, %s440_s9 }
  0x11   : > { %vm269_vm1 = vcmp.ge.f32.partialorder %v267_v1, 0.0  ;;  %v271_v3 = vmul.f32 0.1, %v267_v1 }
  0x12   : > { %v272_v4 = vsel %vm268_vm0, %v266_v0, %v270_v2 }
  0x13   : > { %v273_v5 = vsel %vm269_vm1, %v267_v1, %v271_v3 }
  0x14   : > { %v477_v6 = vpack.i.bf16 %v273_v5, %v272_v4 }
  0x16   : > { %478 = vrot.lane.b32.xlu0 %v477_v6, %s523_s27  ;;  %488 = vrot.lane.b32.xlu1 %v477_v6, %s524_s28 }
  0x1e   : > { %483 = vrot.lane.b32.xlu0 %v477_v6, %s525_s29  ;;  %493 = vrot.lane.b32.xlu1 %v477_v6, %s526_s30 }
  0x68   : > { %v312_v30 = vpop.permute.xlu2 %311 }
  0x88   : > { %v479_v9 = vpop.permute.xlu0 %478  ;;  %v489_v10 = vpop.permute.xlu1 %488 }
  0x89   : > { %v481_v11 = vunpack.i.h.bf16 %v479_v9  ;;  %v480_v12 = vunpack.i.l.bf16 %v479_v9  ;;  %v491_v16 = vunpack.i.h.bf16 %v489_v10  ;;  %v490_v17 = vunpack.i.l.bf16 %v489_v10 }
  0x8b   : > { %v302_v13 = vsel %vm301_vm2, %v480_v12, %v481_v11  ;;  %v295_v25 = vsel %vm294_vm5, %v490_v17, %v491_v16 }
  0x8c   : > { %v307_v14 = vpack.c.bf16 %v302_v13, %v302_v13 }
  0x8e   : > { %v320_v15 = vsel %vm318_vm3, %v307_v14, 0 }
  0x8f   : > { %327 = vmatpush.bf16.msra.mxu0 %v320_v15 }
  0x90   : > { %v484_v18 = vpop.permute.xlu0 %483  ;;  %v494_v19 = vpop.permute.xlu1 %493 }
  0x91   : > { %v486_v20 = vunpack.i.h.bf16 %v484_v18  ;;  %v485_v21 = vunpack.i.l.bf16 %v484_v18  ;;  %v496_v22 = vunpack.i.h.bf16 %v494_v19  ;;  %v495_v23 = vunpack.i.l.bf16 %v494_v19 }
  0x93   : > { %v288_v24 = vsel %vm287_vm4, %v485_v21, %v486_v20  ;;  %v281_v26 = vsel %vm280_vm6, %v495_v23, %v496_v22 }
  0x94   : > { %v306_v27 = vpack.c.bf16 %v295_v25, %v288_v24  ;;  %v305_v28 = vpack.c.bf16 %v281_v26, %v272_v4 }
  0x96   : > { %328 = vmatpush.bf16.msra.mxu0 %v306_v27 }
  0x9a   : > { %329 = vmatpush.bf16.msra.mxu0 %v305_v28 }
  0x9d   : > { %441 = vmatmul.msk.bf16.vlgmr.msra.gmra.mxu0 %vm314_vm7, %v304_v29 }
 0x11a   : > { %v331_v31 = vpop.f32.mrf.mxu0 }
 0x11b   : > { %v332_v32 = vadd.f32 %v331_v31, %v312_v30 }
 0x11d   : > { %335 = vst [vmem:[%s264_s12] sm:$0xff] %v332_v32 }
 0x122   : > { %v333_v33 = vpop.f32.mrf.mxu0 }
 0x123 PF: > { %s14_s17 = sadd.s32 1, %s521_s17   ;;  %s604_s15 = smov %s517_s16 }
 0x124   : > { %p11_p5 = scmp.ge.s32.totalorder %s14_s17, 4   ;;  %s605_s16 = smov %s607_s18 }
 0x126   :  { %13 = sbr.rel (!%p11_p5) target bundleno = 2 (0x2), region = 69 }

// kernel: generator_forward.53
= control target key start
LH: loop header
LB: loop body
LE: loop exit
PB: predicated region body
PF: predicated region fallthrough
CT: control target
= control target key end

     0   :  { %s553_s15 = smov 0   ;;  %s555_s16 = smov 0   ;;  %s599_s0 = inlined_call_operand.vmem [shape: f32[2,8,256], index: 0, kind: input, shape index: {}, may-alias: {0,1}]   ;;  %s600_s1 = inlined_call_operand.vmem [shape: f32[2,8,256], index: 1, kind: input, shape index: {}, may-alias: {0,1}]   ;;  %s601_s2 = inlined_call_operand.vmem [shape: bf16[8,40], index: 2, kind: input, shape index: {}]   ;;  %s602_s3 = inlined_call_operand.vmem [shape: f32[8,1], index: 3, kind: input, shape index: {}]   ;;  %s603_s4 = inlined_call_operand.vmem [shape: f32[2,8,128], index: 4, kind: output, shape index: {}]  }
   0x1   :  { %s557_s17 = smov 0  }
   0x2 LB: > { %s26_s18 = sadd.s32 1, %s517_s16  ;;  %p435_p0 = scmp.ge.s32.totalorder %s521_s17, 1  ;;  %s521_s17 = sphi %s557_s17, %s14_s17   ;;  %s517_s16 = sphi %s555_s16, %s605_s16   ;;  %s513_s15 = sphi %s553_s15, %s604_s15  }
   0x3   : > { %p28_p1 = scmp.ge.s32.totalorder %s26_s18, 2  ;;  %p200_p2 = scmp.lt.s32.totalorder %s521_s17, 3 }
   0x5   : > { %s607_s18 = smov (%p28_p1, %s26_s18), 0  ;;  %p201_p3 = pnand %p435_p0, %p200_p2 }
   0x6   : > { %p240_p4 = scmp.lt.s32.totalorder (!%p201_p3), %s513_s15, 1  ;;  %s523_s27 = smov (!%p201_p3), 108  }
   0x7   : > { %204 = sbr.rel (%p201_p3) target bundleno = 291 (0x123), region = 36  ;;  %s524_s28 = smov (!%p201_p3), 113  }
   0x8   : > { %s525_s29 = smov (!%p201_p3), 118   ;;  %s526_s30 = smov (!%p201_p3), 123  }
   0xc   : > { %s609_s15 = smov (!%p240_p4, %s513_s15), 1  ;;  %v308_v7 = vld [vmem:[%s602_s3] sm:$0xff]  ;;  %v527_v8 = vmov 0   ;;  %vm301_vm2 = vcmask 883712   ;;  %vm318_vm3 = vcmask 1043456   ;;  %vm287_vm4 = vcmask 965632  }
   0xd   : > { %s444_s19 = sshll.u32 %s609_s15, 4  ;;  %497 = vset.pattern.permute.xlu2 %v527_v8  ;;  %498 = vset.pattern.permute.xlu0 %v527_v8  ;;  %vm294_vm5 = vcmask 924672   ;;  %vm280_vm6 = vcmask 1006592   ;;  %v304_v29 = vld [vmem:[%s601_s2] sm:$0xf]  ;;  %vm314_vm7 = vcmask 326656  }
   0xe   : > { %s247_s22 = scalar_lea.vmem %s599_s0, %s444_s19  ;;  %s446_s23 = sadd.s32 8, %s444_s19  ;;  %311 = vperm.xlu2 %497, %v308_v7  }
   0xf   : > { %s256_s26 = scalar_lea.vmem %s600_s1, %s446_s23  ;;  %v266_v0 = vld [vmem:[%s247_s22] sm:$0xff]  ;;  %s440_s9 = sshll.u32 %s609_s15, 3 }
  0x10   : > { %v267_v1 = vld [vmem:[%s256_s26] sm:$0xff]  ;;  %vm268_vm0 = vcmp.ge.f32.partialorder %v266_v0, 0.0  ;;  %v270_v2 = vmul.f32 0.1, %v266_v0  ;;  %s264_s12 = scalar_lea.vmem %s603_s4, %s440_s9 }
  0x11   : > { %vm269_vm1 = vcmp.ge.f32.partialorder %v267_v1, 0.0  ;;  %v271_v3 = vmul.f32 0.1, %v267_v1 }
  0x12   : > { %v272_v4 = vsel %vm268_vm0, %v266_v0, %v270_v2 }
  0x13   : > { %v273_v5 = vsel %vm269_vm1, %v267_v1, %v271_v3 }
  0x14   : > { %v477_v6 = vpack.i.bf16 %v273_v5, %v272_v4 }
  0x16   : > { %478 = vrot.lane.b32.xlu0 %v477_v6, %s523_s27  ;;  %488 = vrot.lane.b32.xlu1 %v477_v6, %s524_s28 }
  0x1e   : > { %483 = vrot.lane.b32.xlu0 %v477_v6, %s525_s29  ;;  %493 = vrot.lane.b32.xlu1 %v477_v6, %s526_s30 }
  0x68   : > { %v312_v30 = vpop.permute.xlu2 %311 }
  0x88   : > { %v479_v9 = vpop.permute.xlu0 %478  ;;  %v489_v10 = vpop.permute.xlu1 %488 }
  0x89   : > { %v481_v11 = vunpack.i.h.bf16 %v479_v9  ;;  %v480_v12 = vunpack.i.l.bf16 %v479_v9  ;;  %v491_v16 = vunpack.i.h.bf16 %v489_v10  ;;  %v490_v17 = vunpack.i.l.bf16 %v489_v10 }
  0x8b   : > { %v302_v13 = vsel %vm301_vm2, %v480_v12, %v481_v11  ;;  %v295_v25 = vsel %vm294_vm5, %v490_v17, %v491_v16 }
  0x8c   : > { %v307_v14 = vpack.c.bf16 %v302_v13, %v302_v13 }
  0x8e   : > { %v320_v15 = vsel %vm318_vm3, %v307_v14, 0 }
  0x8f   : > { %327 = vmatpush.bf16.msra.mxu0 %v320_v15 }
  0x90   : > { %v484_v18 = vpop.permute.xlu0 %483  ;;  %v494_v19 = vpop.permute.xlu1 %493 }
  0x91   : > { %v486_v20 = vunpack.i.h.bf16 %v484_v18  ;;  %v485_v21 = vunpack.i.l.bf16 %v484_v18  ;;  %v496_v22 = vunpack.i.h.bf16 %v494_v19  ;;  %v495_v23 = vunpack.i.l.bf16 %v494_v19 }
  0x93   : > { %v288_v24 = vsel %vm287_vm4, %v485_v21, %v486_v20  ;;  %v281_v26 = vsel %vm280_vm6, %v495_v23, %v496_v22 }
  0x94   : > { %v306_v27 = vpack.c.bf16 %v295_v25, %v288_v24  ;;  %v305_v28 = vpack.c.bf16 %v281_v26, %v272_v4 }
  0x96   : > { %328 = vmatpush.bf16.msra.mxu0 %v306_v27 }
  0x9a   : > { %329 = vmatpush.bf16.msra.mxu0 %v305_v28 }
  0x9d   : > { %441 = vmatmul.msk.bf16.vlgmr.msra.gmra.mxu0 %vm314_vm7, %v304_v29 }
 0x11a   : > { %v331_v31 = vpop.f32.mrf.mxu0 }
 0x11b   : > { %v332_v32 = vadd.f32 %v331_v31, %v312_v30 }
 0x11d   : > { %335 = vst [vmem:[%s264_s12] sm:$0xff] %v332_v32 }
 0x122   : > { %v333_v33 = vpop.f32.mrf.mxu0 }
 0x123 PF: > { %s14_s17 = sadd.s32 1, %s521_s17   ;;  %s604_s15 = smov %s517_s16 }
 0x124   : > { %p11_p5 = scmp.ge.s32.totalorder %s14_s17, 4   ;;  %s605_s16 = smov %s607_s18 }
 0x126   :  { %13 = sbr.rel (!%p11_p5) target bundleno = 2 (0x2), region = 69 }

// kernel: generator_forward.54
= control target key start
LH: loop header
LB: loop body
LE: loop exit
PB: predicated region body
PF: predicated region fallthrough
CT: control target
= control target key end

     0   :  { %s710_s21 = smov 0   ;;  %s712_s22 = smov 0   ;;  %s762_s0 = inlined_call_operand.vmem [shape: f32[2,8,256], index: 0, kind: input, shape index: {}, may-alias: {0,1}]   ;;  %s763_s1 = inlined_call_operand.vmem [shape: f32[2,8,256], index: 1, kind: input, shape index: {}, may-alias: {0,1}]   ;;  %s764_s2 = inlined_call_operand.vmem [shape: bf16[8,40], index: 2, kind: input, shape index: {}]   ;;  %s765_s3 = inlined_call_operand.vmem [shape: f32[8,1], index: 3, kind: input, shape index: {}]   ;;  %s766_s4 = inlined_call_operand.vmem [shape: f32[2,8,128], index: 4, kind: input, shape index: {}]   ;;  %s767_s5 = inlined_call_operand.vmem [shape: f32[2,8,128], index: 5, kind: input, shape index: {}]   ;;  %s768_s6 = inlined_call_operand.vmem [shape: f32[2,8,128], index: 6, kind: output, shape index: {}]  }
   0x1   :  { %s714_s23 = smov 0  }
   0x2 LB: > { %s28_s24 = sadd.s32 1, %s664_s22  ;;  %p580_p0 = scmp.ge.s32.totalorder %s668_s23, 1  ;;  %s668_s23 = sphi %s714_s23, %s16_s23   ;;  %s664_s22 = sphi %s712_s22, %s770_s22   ;;  %s660_s21 = sphi %s710_s21, %s769_s21  }
   0x3   : > { %p30_p1 = scmp.ge.s32.totalorder %s28_s24, 2  ;;  %p278_p2 = scmp.lt.s32.totalorder %s668_s23, 3 }
   0x5   : > { %s772_s24 = smov (%p30_p1, %s28_s24), 0  ;;  %p279_p3 = pnand %p580_p0, %p278_p2 }
   0x6   : > { %p336_p4 = scmp.lt.s32.totalorder (!%p279_p3), %s660_s21, 1  ;;  %s670_s9 = smov (!%p279_p3), 124  }
   0x7   : > { %282 = sbr.rel (%p279_p3) target bundleno = 292 (0x124), region = 44  ;;  %s671_s10 = smov (!%p279_p3), 125  }
   0x8   : > { %s672_s11 = smov (!%p279_p3), 126   ;;  %s673_s12 = smov (!%p279_p3), 127  }
   0xc   : > { %s774_s21 = smov (!%p336_p4, %s660_s21), 1  ;;  %v418_v7 = vld [vmem:[%s765_s3] sm:$0xff]  ;;  %v674_v8 = vmov 0   ;;  %vm411_vm2 = vcmask 1014784   ;;  %vm428_vm3 = vcmask 1043456   ;;  %vm397_vm4 = vcmask 1031168  }
   0xd   : > { %s591_s25 = sshll.u32 %s774_s21, 4  ;;  %644 = vset.pattern.permute.xlu2 %v674_v8  ;;  %645 = vset.pattern.permute.xlu0 %v674_v8  ;;  %vm404_vm5 = vcmask 1022976   ;;  %vm390_vm6 = vcmask 1039360   ;;  %v414_v29 = vld [vmem:[%s764_s2] sm:$0xf]  ;;  %vm424_vm7 = vcmask 326656  }
   0xe   : > { %s343_s28 = scalar_lea.vmem %s762_s0, %s591_s25  ;;  %s593_s29 = sadd.s32 8, %s591_s25  ;;  %421 = vperm.xlu2 %644, %v418_v7  }
   0xf   : > { %s352_s8 = scalar_lea.vmem %s763_s1, %s593_s29  ;;  %v376_v0 = vld [vmem:[%s343_s28] sm:$0xff]  ;;  %s585_s17 = sshll.u32 %s774_s21, 3 }
  0x10   : > { %v377_v1 = vld [vmem:[%s352_s8] sm:$0xff]  ;;  %vm378_vm0 = vcmp.ge.f32.partialorder %v376_v0, 0.0  ;;  %v380_v2 = vmul.f32 0.1, %v376_v0  ;;  %s360_s20 = scalar_lea.vmem %s766_s4, %s585_s17  ;;  %s367_s27 = scalar_lea.vmem %s767_s5, %s585_s17 }
  0x11   : > { %vm379_vm1 = vcmp.ge.f32.partialorder %v377_v1, 0.0  ;;  %v381_v3 = vmul.f32 0.1, %v377_v1  ;;  %v445_v32 = vld [vmem:[%s360_s20] sm:$0xff]  ;;  %s374_s30 = scalar_lea.vmem %s768_s6, %s585_s17 }
  0x12   : > { %v382_v4 = vsel %vm378_vm0, %v376_v0, %v380_v2  ;;  %v447_v34 = vld [vmem:[%s367_s27] sm:$0xff] }
  0x13   : > { %v383_v5 = vsel %vm379_vm1, %v377_v1, %v381_v3 }
  0x14   : > { %v624_v6 = vpack.i.bf16 %v383_v5, %v382_v4 }
  0x16   : > { %625 = vrot.lane.b32.xlu0 %v624_v6, %s670_s9  ;;  %635 = vrot.lane.b32.xlu1 %v624_v6, %s671_s10 }
  0x1e   : > { %630 = vrot.lane.b32.xlu0 %v624_v6, %s672_s11  ;;  %640 = vrot.lane.b32.xlu1 %v624_v6, %s673_s12 }
  0x68   : > { %v422_v30 = vpop.permute.xlu2 %421 }
  0x88   : > { %v626_v9 = vpop.permute.xlu0 %625  ;;  %v636_v10 = vpop.permute.xlu1 %635 }
  0x89   : > { %v628_v11 = vunpack.i.h.bf16 %v626_v9  ;;  %v627_v12 = vunpack.i.l.bf16 %v626_v9  ;;  %v638_v16 = vunpack.i.h.bf16 %v636_v10  ;;  %v637_v17 = vunpack.i.l.bf16 %v636_v10 }
  0x8b   : > { %v412_v13 = vsel %vm411_vm2, %v627_v12, %v628_v11  ;;  %v405_v25 = vsel %vm404_vm5, %v637_v17, %v638_v16 }
  0x8c   : > { %v417_v14 = vpack.c.bf16 %v412_v13, %v412_v13 }
  0x8e   : > { %v430_v15 = vsel %vm428_vm3, %v417_v14, 0 }
  0x8f   : > { %437 = vmatpush.bf16.msra.mxu0 %v430_v15 }
  0x90   : > { %v631_v18 = vpop.permute.xlu0 %630  ;;  %v641_v19 = vpop.permute.xlu1 %640 }
  0x91   : > { %v633_v20 = vunpack.i.h.bf16 %v631_v18  ;;  %v632_v21 = vunpack.i.l.bf16 %v631_v18  ;;  %v643_v22 = vunpack.i.h.bf16 %v641_v19  ;;  %v642_v23 = vunpack.i.l.bf16 %v641_v19 }
  0x93   : > { %v398_v24 = vsel %vm397_vm4, %v632_v21, %v633_v20  ;;  %v391_v26 = vsel %vm390_vm6, %v642_v23, %v643_v22 }
  0x94   : > { %v416_v27 = vpack.c.bf16 %v405_v25, %v398_v24  ;;  %v415_v28 = vpack.c.bf16 %v391_v26, %v382_v4 }
  0x96   : > { %438 = vmatpush.bf16.msra.mxu0 %v416_v27 }
  0x9a   : > { %439 = vmatpush.bf16.msra.mxu0 %v415_v28 }
  0x9d   : > { %588 = vmatmul.msk.bf16.vlgmr.msra.gmra.mxu0 %vm424_vm7, %v414_v29 }
 0x11a   : > { %v441_v31 = vpop.f32.mrf.mxu0 }
 0x11b   : > { %v442_v33 = vadd.f32 %v441_v31, %v422_v30 }
 0x11d   : > { %v446_v35 = vadd.f32 %v445_v32, %v442_v33 }
 0x11f   : > { %v448_v36 = vadd.f32 %v447_v34, %v446_v35 }
 0x121   : > { %v449_v37 = vmul.f32 0.5, %v448_v36 }
 0x122   : > { %v443_v38 = vpop.f32.mrf.mxu0 }
 0x123   : > { %450 = vst [vmem:[%s374_s30] sm:$0xff] %v449_v37 }
 0x124 PF: > { %s16_s23 = sadd.s32 1, %s668_s23   ;;  %s769_s21 = smov %s664_s22 }
 0x125   : > { %p13_p5 = scmp.ge.s32.totalorder %s16_s23, 4   ;;  %s770_s22 = smov %s772_s24 }
 0x127   :  { %15 = sbr.rel (!%p13_p5) target bundleno = 2 (0x2), region = 83 }

// kernel: generator_forward.55
= control target key start
LH: loop header
LB: loop body
LE: loop exit
PB: predicated region body
PF: predicated region fallthrough
CT: control target
= control target key end

     0   :  { %s830_s0 = inlined_call_operand.vmem [shape: f32[2,8,256], index: 0, kind: input, shape index: {}, may-alias: {0,1}]   ;;  %s831_s1 = inlined_call_operand.vmem [shape: f32[2,8,256], index: 1, kind: input, shape index: {}, may-alias: {0,1}]   ;;  %s832_s2 = inlined_call_operand.vmem [shape: bf16[56,1], index: 2, kind: input, shape index: {}]   ;;  %s833_s3 = inlined_call_operand.<no memory space> [shape: f32[1,1], index: 3, kind: input, shape index: {}]   ;;  %s834_s4 = inlined_call_operand.hbm [shape: f32[2,1,128], index: 4, kind: output, shape index: {}]  }
   0x1   :  { %v9_v0 = vstv %s833_s3 }
   0x2   :  { %10 = vst [vmem:[#allocation2] sm:$0x1] %v9_v0 }
   0x3   :  { %11 = vsyncpa [#allocation4], 0 }
   0x4   :  { %13 = vsyncpa [#allocation4 + $0x1], 0  ;;  %s718_s17 = smov 0   ;;  %s720_s18 = smov 0  }
   0x5   :  { %s722_s19 = smov 0   ;;  %s724_s20 = smov 0  }
   0x6   :  { %s726_s21 = smov 0   ;;  %s728_s22 = smov 0  }
   0x7 LB: > { %s492_s3 = sadd.s32 4294967295, %s681_s22   ;;  %s493_s23 = sadd.s32 4294967294, %s681_s22   ;;  %s681_s22 = sphi %s728_s22, %s19_s22   ;;  %s677_s21 = sphi %s726_s21, %s841_s21   ;;  %s673_s20 = sphi %s724_s20, %s840_s20   ;;  %s669_s19 = sphi %s722_s19, %s839_s19   ;;  %s665_s18 = sphi %s720_s18, %s838_s18   ;;  %s661_s17 = sphi %s718_s17, %s837_s17  }
   0x8   : > { %s31_s24 = sadd.s32 1, %s677_s21  ;;  %s140_s25 = sadd.s32 1, %s669_s19 }
   0x9   : > { %p33_p0 = scmp.ge.s32.totalorder %s31_s24, 2  ;;  %p150_p1 = scmp.ne.s32.totalorder %s669_s19, %s665_s18 }
   0xa   : > { %p151_p2 = scmp.eq.s32.totalorder %s492_s3, 1  ;;  %p156_p3 = scmp.ne.s32.totalorder %s665_s18, %s661_s17 }
   0xb   : > { %s843_s24 = smov (%p33_p0, %s31_s24), 0  ;;  %p157_p5 = scmp.eq.s32.totalorder %s493_s23, 1 }
   0xc   : > { %p758_p4 = por %p151_p2, %p150_p1  ;;  %s135_s27 = ssub.s32 %s677_s21, %s843_s24 }
   0xd   : > { %p496_p6 = scmp.ge.s32.totalorder %s681_s22, 1  ;;  %p138_p7 = scmp.eq.s32.totalorder %s135_s27, 0 }
   0xe   : > { %p765_p8 = por %p157_p5, %p156_p3  ;;  %p205_p9 = scmp.lt.s32.totalorder %s681_s22, 3 }
   0xf   : > { %s771_s29 = scalar_select %p138_p7, %s669_s19, %s140_s25  }
  0x10   : > { %p206_p10 = pnand %p496_p6, %p205_p9 }
  0x11   : > { %p242_p11 = scmp.lt.s32.totalorder (!%p206_p10), %s673_s20, 1  ;;  %s684_s3 = smov (!%p206_p10), 127  }
  0x12   : > { %209 = sbr.rel (%p206_p10) target bundleno = 214 (0xd6), region = 36  ;;  %s685_s23 = smov (!%p206_p10), 126  }
  0x13   : > { %s686_s30 = smov (!%p206_p10), 125   ;;  %s687_s5 = smov (!%p206_p10), 124  }
  0x14   : > { %s688_s6 = smov (!%p206_p10), 123   ;;  %s689_s7 = smov (!%p206_p10), 122  }
  0x15   : > { %s240_s10 = sand.u32 (!%p206_p10), 1, %s665_s18  }
  0x16   : > { %s241_s14 = scalar_lea.vmem (!%p206_p10), [#allocation3], %s240_s10 }
  0x17   : > { %v507_v1 = vld [vmem:[%s832_s2] sm:$0xff]   ;;  %v519_v2 = vld [vmem:[%s832_s2 + $0x8] sm:$0xff]   ;;  %v683_v3 = vmov 0   ;;  %s243_s8 = scalar_select %p242_p11, %s673_s20, 1  ;;  %v520_v16 = vld [vmem:[%s832_s2 + $0x10] sm:$0xff]   ;;  %vm274_vm2 = vcmask 1039360  }
  0x18   : > { %583 = vset.pattern.permute.xlu1 %v683_v3  ;;  %v508_v4 = vunpack.c.l.bf16 %v507_v1  ;;  %v509_v5 = vunpack.c.h.bf16 %v507_v1  ;;  %589 = vset.pattern.permute.xlu2 %v683_v3  ;;  %v512_v6 = vunpack.c.l.bf16 %v519_v2  ;;  %v513_v7 = vunpack.c.h.bf16 %v519_v2  ;;  %v380_v20 = vld [vmem:[#allocation2] sm:$0x1]  ;;  %v318_v21 = vld [vmem:[%s832_s2 + $0x18] sm:$0xf]  ;;  %s402_s15 = sshll.u32 %s241_s14, 4  ;;  %s403_s15 = int_to_ptr.vmem [resolvable:$true] %s402_s15 }
  0x19   : > { %600 = vset.pattern.permute.xlu0 %v683_v3  ;;  %s503_s9 = sshll.u32 %s243_s8, 4  ;;  %v516_v17 = vunpack.c.l.bf16 %v520_v16  ;;  %v517_v18 = vunpack.c.h.bf16 %v520_v16  ;;  %v325_v22 = vunpack.c.l.bf16 %v318_v21  ;;  %vm281_vm3 = vcmask 1031168  }
  0x1a   : > { %v584_v8 = vpack.i.bf16 %v509_v5, %v508_v4  ;;  %v590_v9 = vpack.i.bf16 %v513_v7, %v512_v6  ;;  %s249_s12 = scalar_lea.vmem %s830_s0, %s503_s9  ;;  %s505_s13 = sadd.s32 8, %s503_s9  ;;  %vm288_vm4 = vcmask 1022976   ;;  %vm295_vm5 = vcmask 1014784  }
  0x1b   : > { %v260_v10 = vld [vmem:[%s249_s12] sm:$0xff]  ;;  %s258_s16 = scalar_lea.vmem %s831_s1, %s505_s13  ;;  %v595_v19 = vpack.i.bf16 %v517_v18, %v516_v17  ;;  %vm302_vm6 = vcmask 1006592   ;;  %vm309_vm7 = vcmask 998400   ;;  %s400_s13 = scalar_lea.hbm %s834_s4, %s673_s20 }
  0x1c   : > { %585 = vperm.xlu1 %583, %v584_v8   ;;  %591 = vperm.xlu2 %589, %v590_v9   ;;  %vm262_vm0 = vcmp.ge.f32.partialorder %v260_v10, 0.0  ;;  %v264_v11 = vmul.f32 0.01, %v260_v10  ;;  %v261_v12 = vld [vmem:[%s258_s16] sm:$0xff]  ;;  %s404_s16 = sshll.u32 %s400_s13, 4  ;;  %s623_s20 = scalar_lea.hbm %s834_s4, 2  ;;  %s405_s16 = int_to_ptr.hbm [resolvable:$true] %s404_s16 }
  0x1d   : > { %v265_v14 = vmul.f32 0.01, %v261_v12  ;;  %vm263_vm1 = vcmp.ge.f32.partialorder %v261_v12, 0.0 }
  0x1e   : > { %v266_v13 = vsel %vm262_vm0, %v260_v10, %v264_v11 }
  0x1f   : > { %270 = vrot.lane.b32.xlu0 %v266_v13, %s684_s3  ;;  %v267_v15 = vsel %vm263_vm1, %v261_v12, %v265_v14 }
  0x24   : > { %277 = vrot.lane.b32.xlu1 %v266_v13, %s685_s23  ;;  %279 = vrot.lane.b32.xlu2 %v267_v15, %s685_s23  ;;  %s617_s23 = sshra.s32 %s405_s16, 4  ;;  %s618_s23 = int_to_ptr.hbm [resolvable:$true] %s617_s23 }
  0x25   : > { %s619_s25 = scalar_lea.hbm %s618_s23, 1  ;;  %p624_p1 = scmp.lt.s32.totalorder %s618_s23, %s834_s4 }
  0x26   : > { %p620_p12 = scmp.ne.s32.totalorder %s618_s23, %s619_s25  ;;  %p625_p2 = scmp.lt.s32.totalorder %s623_s20, %s619_s25 }
  0x27   : > { %272 = vrot.lane.b32.xlu0 %v267_v15, %s684_s3  ;;  %s391_s3 = scalar_lea.sflag [#allocation4], %s240_s10 }
  0x28   : > { %p621_p13 = pnand %p620_p12, %p758_p4  ;;  %p626_p3 = por %p625_p2, %p624_p1 }
  0x2a   : > { %p622_p0 = pneg %p621_p13 }
  0x2c   : > { %286 = vrot.lane.b32.xlu1 %v267_v15, %s686_s30  ;;  %291 = vrot.lane.b32.xlu2 %v266_v13, %s687_s5  ;;  %p627_p5 = pnand %p626_p3, %p622_p0 }
  0x2f   : > { %284 = vrot.lane.b32.xlu0 %v266_v13, %s686_s30 }
  0x34   : > { %596 = vperm.xlu1 %583, %v595_v19   ;;  %298 = vrot.lane.b32.xlu2 %v266_v13, %s688_s6 }
  0x37   : > { %293 = vrot.lane.b32.xlu0 %v267_v15, %s687_s5 }
  0x3c   : > { %305 = vrot.lane.b32.xlu1 %v266_v13, %s689_s7  ;;  %307 = vrot.lane.b32.xlu2 %v267_v15, %s689_s7 }
  0x3f   : > { %300 = vrot.lane.b32.xlu0 %v267_v15, %s688_s6 }
  0x44   : > { %383 = vperm.xlu1 %583, %v380_v20  }
  0x47   : > { %358 = vperm.xlu0 %600, %v325_v22  }
  0x76   : > { %v592_v24 = vpop.permute.xlu2 %591 }
  0x77   : > { %v593_v40 = vunpack.i.l.bf16 %v592_v24  ;;  %v594_v43 = vunpack.i.h.bf16 %v592_v24 }
  0x7e   : > { %v280_v27 = vpop.permute.xlu2 %279 }
  0x86   : > { %v292_v29 = vpop.permute.xlu2 %291 }
  0x8e   : > { %v586_v23 = vpop.permute.xlu1 %585  ;;  %v299_v36 = vpop.permute.xlu2 %298 }
  0x8f   : > { %v588_v32 = vunpack.i.h.bf16 %v586_v23  ;;  %v587_v33 = vunpack.i.l.bf16 %v586_v23 }
  0x91   : > { %v271_v25 = vpop.permute.xlu0 %270  ;;  %v361_v37 = vmul.f32 %v587_v33, %v266_v13 }
  0x96   : > { %v278_v26 = vpop.permute.xlu1 %277  ;;  %v308_v54 = vpop.permute.xlu2 %307 }
  0x97   : > { %v282_v41 = vsel %vm281_vm3, %v278_v26, %v280_v27 }
  0x98   : > { %v363_v47 = vmul.f32 %v593_v40, %v282_v41 }
  0x99   : > { %v273_v28 = vpop.permute.xlu0 %272 }
  0x9a   : > { %v275_v34 = vsel %vm274_vm2, %v271_v25, %v273_v28 }
  0x9b   : > { %v362_v38 = vmul.f32 %v588_v32, %v275_v34 }
  0x9d   : > { %v368_v44 = vadd.f32 %v362_v38, %v361_v37 }
  0x9e   : > { %v287_v31 = vpop.permute.xlu1 %286 }
  0x9f   : > { %v369_v51 = vadd.f32 %v368_v44, %v363_v47 }
  0xa1   : > { %v285_v30 = vpop.permute.xlu0 %284 }
  0xa2   : > { %v289_v42 = vsel %vm288_vm4, %v285_v30, %v287_v31 }
  0xa3   : > { %v364_v48 = vmul.f32 %v594_v43, %v289_v42 }
  0xa5   : > { %v370_v55 = vadd.f32 %v369_v51, %v364_v48 }
  0xa6   : > { %v597_v39 = vpop.permute.xlu1 %596 }
  0xa7   : > { %v598_v49 = vunpack.i.l.bf16 %v597_v39  ;;  %v599_v52 = vunpack.i.h.bf16 %v597_v39 }
  0xa9   : > { %v294_v35 = vpop.permute.xlu0 %293 }
  0xaa   : > { %v296_v45 = vsel %vm295_vm5, %v292_v29, %v294_v35 }
  0xab   : > { %v365_v53 = vmul.f32 %v598_v49, %v296_v45 }
  0xad   : > { %v371_v59 = vadd.f32 %v370_v55, %v365_v53 }
  0xae   : > { %v306_v56 = vpop.permute.xlu1 %305 }
  0xaf   : > { %v310_v58 = vsel %vm309_vm7, %v306_v56, %v308_v54 }
  0xb1   : > { %v301_v46 = vpop.permute.xlu0 %300 }
  0xb2   : > { %v303_v50 = vsel %vm302_vm6, %v299_v36, %v301_v46 }
  0xb3   : > { %v366_v57 = vmul.f32 %v599_v52, %v303_v50 }
  0xb5   : > { %v372_v62 = vadd.f32 %v371_v59, %v366_v57 }
  0xb6   : > { %v384_v4 = vpop.permute.xlu1 %383 }
  0xb7   : > { %v386_v6 = vperm.slane %v384_v4, 0 }
  0xb9   : > { %v359_v60 = vpop.permute.xlu0 %358 }
  0xba   : > { %v367_v61 = vmul.f32 %v359_v60, %v310_v58 }
  0xbc   : > { %v373_v63 = vadd.f32 %v372_v62, %v367_v61 }
  0xbe   : > { %v374_v0 = vrot.slane %v373_v63, 4 }
  0xc0   : > { %v375_v1 = vadd.f32 %v374_v0, %v373_v63 }
  0xc2   : > { %v376_v2 = vrot.slane %v375_v1, 2 }
  0xc4   : > { %v377_v3 = vadd.f32 %v376_v2, %v375_v1 }
  0xc6   : > { %v378_v5 = vrot.slane %v377_v3, 1 }
  0xc8   : > { %v379_v7 = vadd.f32 %v378_v5, %v377_v3 }
  0xca   : > { %v387_v8 = vadd.f32 %v386_v6, %v379_v7 }
  0xcc   : > { %601 = vtanh.f32 %v387_v8 }
  0xd2   : > { %v602_v9 = vpop.eup %601 }
  0xd3   : > { %389 = vst [vmem:[%s241_s14] sm:$0x1] %v602_v9 }
  0xd4   : > { %630 = shalt.err (!%p627_p5)
}
  0xd5   : > { %521 = dma.vmem_to_hbm [thread:$0]  (%p758_p4), %s403_s15, 16, %s405_s16, %s391_s3  }
  0xd6 PF: > { %p527_p6 = scmp.ge.s32.totalorder %s681_s22, 2  ;;  %s416_s7 = sand.u32 1, %s661_s17  }
  0xd7   : > { %s417_s8 = scalar_lea.sflag [#allocation4], %s416_s7 }
  0xd8   : > { %p524_p7 = pnand %p527_p6, %p765_p8 }
  0xda   : > { %p525_p9 = pneg %p524_p7 }
  0xdc   : > { %656 = dma.done.wait (%p525_p9), %s417_s8, 16  }
  0xdd   : > { %658 = vsyncadd (%p525_p9), %s417_s8, 4294967280  ;;  %s19_s22 = sadd.s32 1, %s681_s22   ;;  %s837_s17 = smov %s665_s18 }
  0xde   : > { %p16_p10 = scmp.ge.s32.totalorder %s19_s22, 4   ;;  %s838_s18 = smov %s669_s19 }
  0xdf   : > { %s839_s19 = smov %s771_s29  ;;  %s840_s20 = smov %s677_s21 }
  0xe0   : > { %s841_s21 = smov %s843_s24  ;;  %18 = sbr.rel (!%p16_p10) target bundleno = 7 (0x7), region = 74 }
  0xe5   :  { %422 = vsyncpa [#allocation4], 1 }
  0xe6   :  { %424 = vsyncpa [#allocation4 + $0x1], 1 }

</bundles_post_ra>
